<compile_context>
chip_gen: v6e
topology: v6e:2x2x1
jax: 0.10.0
libtpu: 0.0.40
codegen_flags: <defaults>
</compile_context>

<pallas_src>
import functools

import jax
import jax.numpy as jnp
from jax.experimental import pallas as pl
from jax.experimental.pallas import tpu as pltpu


# Above every default scoped VMEM limit (16/32 MiB), safely under v7x's 64 MiB physical.
_VMEM_LIMIT_BYTES = 48 * 1024 * 1024


def _round_up(x, m):
    return (x + m - 1) // m * m


def _pick_divisor(dim, candidates):
    for c in candidates:
        if c <= dim and dim % c == 0:
            return c
    return dim


def _fast_sigmoid(x):
    # sigmoid(x) == 0.5*tanh(0.5*x) + 0.5 : one EUP op instead of exp + reciprocal.
    # The recurrence is latency/EUP-bound at small B, so this shortens the critical path.
    return 0.5 * jnp.tanh(0.5 * x) + 0.5


# ----------------------- Tiled matmul + bias kernel (MXU) ----------------------
def _matmul_bias_kernel(x_ref, w_ref, b_ref, o_ref, acc_ref):
    k = pl.program_id(2)

    @pl.when(k == 0)
    def _():
        acc_ref[...] = jnp.zeros_like(acc_ref)

    acc_ref[...] += jnp.dot(x_ref[...], w_ref[...],
                            preferred_element_type=jnp.float32)

    @pl.when(k == pl.num_programs(2) - 1)
    def _():
        o_ref[...] = (acc_ref[...] + b_ref[...].astype(jnp.float32)).astype(o_ref.dtype)


def matmul_bias(x, w, b, *, out_dtype, tm=None, tn=None, tk=None):
    """x: (M, K) @ w: (K, N) + b: (1, N); f32 accumulation, output in out_dtype.

    Weights arrive pre-cast (prepare_params); x is cast to the weight dtype (no-op
    when the activation dtype already matches). Shapes are padded to (8,128)-aligned
    sizes so _pick_divisor never falls back to a full unaligned dimension (which would
    create masked partial stores and a huge accumulator scratch -> VMEM OOM on v7x).
    """
    M, K = x.shape
    N = w.shape[1]
    x = x.astype(w.dtype)
    Mp, Kp, Np = _round_up(M, 8), _round_up(K, 128), _round_up(N, 128)
    if (Mp, Kp) != (M, K):
        x = jnp.pad(x, ((0, Mp - M), (0, Kp - K)))
    if (Kp, Np) != (K, N):
        w = jnp.pad(w, ((0, Kp - K), (0, Np - N)))
    if Np != N:
        b = jnp.pad(b, ((0, 0), (0, Np - N)))
    tm = tm or _pick_divisor(Mp, (256, 128, 64, 32, 16, 8))
    tn = tn or _pick_divisor(Np, (512, 256, 128))
    tk = tk or _pick_divisor(Kp, (512, 256, 128))
    out = pl.pallas_call(
        _matmul_bias_kernel,
        out_shape=jax.ShapeDtypeStruct((Mp, Np), out_dtype),
        grid_spec=pltpu.PrefetchScalarGridSpec(
            num_scalar_prefetch=0,
            grid=(Mp // tm, Np // tn, Kp // tk),
            in_specs=[
                pl.BlockSpec((tm, tk), lambda i, j, k: (i, k)),
                pl.BlockSpec((tk, tn), lambda i, j, k: (k, j)),
                pl.BlockSpec((1, tn), lambda i, j, k: (0, j)),
            ],
            out_specs=pl.BlockSpec((tm, tn), lambda i, j, k: (i, j)),
            scratch_shapes=[pltpu.VMEM((tm, tn), jnp.float32)],
        ),
        compiler_params=pltpu.CompilerParams(
            dimension_semantics=("parallel", "parallel", "arbitrary"),
            vmem_limit_bytes=_VMEM_LIMIT_BYTES),
    )(x, w, b)
    if (Mp, Np) != (M, N):
        out = out[:M, :N]
    return out


# ----------------------- LSTM recurrence kernel --------------------------------
# Each grid step processes t_block timesteps of one batch block. Only h_prev @ W_hh is
# on the serial critical path; x @ W_ih + bias was hoisted into g_in by one big matmul.
# h/c live in VMEM scratch across the time axis; W_hh is single-buffered in VMEM.
def _lstm_rec_kernel(gin_ref, whh_hbm, out_ref, whh_vmem, h_scr, c_scr, *, unroll):
    H = h_scr.shape[-1]
    Tt = gin_ref.shape[0]

    @pl.when(pl.program_id(1) == 0)   # first time block of this batch block
    def _():
        # Single-buffered, time-invariant recurrent weights: one explicit DMA into
        # persistent VMEM scratch (vs. 2x footprint from BlockSpec double-buffering).
        pltpu.sync_copy(whh_hbm, whh_vmem)
        h_scr[...] = jnp.zeros_like(h_scr)
        c_scr[...] = jnp.zeros_like(c_scr)

    def step(t, carry):
        h_prev, c_prev = carry
        # TODO(synk): keep W_hh stationary in the MXU across timesteps via
        # pltpu.matmul_push_rhs / matmul_acc_lhs / matmul_pop (chip-specific RHS
        # chunking); kept as jnp.dot here for portability / lowering safety.
        gates = gin_ref[t].astype(jnp.float32) + jnp.dot(
            h_prev.astype(whh_vmem.dtype), whh_vmem[...],
            preferred_element_type=jnp.float32)        # (B, 4H); PyTorch order i,f,g,o
        i = _fast_sigmoid(gates[:, 0 * H:1 * H])       # gate math kept in f32 (v5e VPU/EUP)
        f = _fast_sigmoid(gates[:, 1 * H:2 * H])
        g = jnp.tanh(gates[:, 2 * H:3 * H])
        o = _fast_sigmoid(gates[:, 3 * H:4 * H])
        c = f * c_prev + i * g
        h = o * jnp.tanh(c)
        out_ref[t] = h.astype(out_ref.dtype)
        return (h, c)

    h_last, c_last = jax.lax.fori_loop(0, Tt, step, (h_scr[...], c_scr[...]),
                                       unroll=unroll)
    h_scr[...] = h_last
    c_scr[...] = c_last


def lstm_recurrence(g_in, w_hh, *, out_dtype, t_block=None):
    """g_in: (T, B, 4H) = x @ W_ih + b precomputed; w_hh: (H, 4H) -> h: (T, B, H)."""
    T, B, H4 = g_in.shape
    H = w_hh.shape[0]
    assert H4 == 4 * H
    if t_block is None:
        t_block = _pick_divisor(T, (32, 16, 8, 4, 2, 1))
    assert T % t_block == 0, (T, t_block)
    # Full unroll for short time blocks (LLO visibility); partial unroll above ~16 to
    # keep compile time / register pressure bounded.
    unroll = True if t_block <= 16 else 8
    # Batch-parallel leading grid axis (megacore / v7x 2nd TC); only split when both
    # halves keep >= 8 sublanes so per-step tiles stay (8,128) aligned.
    b_blocks = 2 if (B % 16 == 0) else 1
    # TODO(synk): at B < 16 on v7x the 2nd TensorCore idles during the recurrence; an
    # explicit pl.core_map / CORE_PARALLEL split (or layer pipelining) would be needed.
    Bblk = B // b_blocks
    kernel = functools.partial(_lstm_rec_kernel, unroll=unroll)
    return pl.pallas_call(
        kernel,
        out_shape=jax.ShapeDtypeStruct((T, B, H), out_dtype),
        grid_spec=pltpu.PrefetchScalarGridSpec(
            num_scalar_prefetch=0,
            grid=(b_blocks, T // t_block),
            in_specs=[
                pl.BlockSpec((t_block, Bblk, 4 * H), lambda b, t: (t, b, 0)),
                # time-invariant recurrent weights stay in HBM; copied manually once
                pl.BlockSpec(memory_space=pl.ANY),
            ],
            out_specs=pl.BlockSpec((t_block, Bblk, H), lambda b, t: (t, b, 0)),
            scratch_shapes=[
                pltpu.VMEM((H, 4 * H), w_hh.dtype),   # single-buffered W_hh
                pltpu.VMEM((Bblk, H), jnp.float32),   # h state (f32)
                pltpu.VMEM((Bblk, H), jnp.float32),   # c state (f32)
            ],
        ),
        compiler_params=pltpu.CompilerParams(
            dimension_semantics=("parallel", "arbitrary"),   # time axis carries state
            vmem_limit_bytes=_VMEM_LIMIT_BYTES),
    )(g_in, w_hh)


# ----------------------------- Parameters ---------------------------------------
def init_params(key, vocab_size, embed_size, hidden_size):
    """Canonical f32 parameters matching the PyTorch module's structure."""
    sizes = [(embed_size, hidden_size),
             (hidden_size, hidden_size),
             (hidden_size, embed_size)]
    keys = jax.random.split(key, 2 + 4 * len(sizes) + 2)
    ki = iter(keys)
    params = {}
    params["embed"] = jax.random.normal(next(ki), (vocab_size, embed_size),
                                        jnp.float32) * 0.1
    params["lstm"] = []
    for (in_sz, h_sz) in sizes:
        s = 1.0 / jnp.sqrt(jnp.float32(h_sz))
        w_ih = jax.random.uniform(next(ki), (in_sz, 4 * h_sz), jnp.float32, -s, s)
        w_hh = jax.random.uniform(next(ki), (h_sz, 4 * h_sz), jnp.float32, -s, s)
        b_ih = jax.random.uniform(next(ki), (1, 4 * h_sz), jnp.float32, -s, s)
        b_hh = jax.random.uniform(next(ki), (1, 4 * h_sz), jnp.float32, -s, s)
        params["lstm"].append((w_ih, w_hh, b_ih + b_hh))   # bias folded once
    s = 1.0 / jnp.sqrt(jnp.float32(embed_size))
    params["dec_w"] = jax.random.uniform(next(ki), (embed_size, vocab_size),
                                         jnp.float32, -s, s)
    params["dec_b"] = jax.random.uniform(next(ki), (1, vocab_size),
                                         jnp.float32, -s, s)
    return params


def prepare_params(params, compute_dtype=jnp.bfloat16):
    """One-time cast of weights to the MXU compute dtype (no per-forward astype copies).

    Biases stay f32 (added after f32 accumulation); gate math / h / c stay f32 in-kernel.
    """
    return {
        "embed": params["embed"].astype(compute_dtype),
        "lstm": [(w_ih.astype(compute_dtype), w_hh.astype(compute_dtype),
                  b.astype(jnp.float32))
                 for (w_ih, w_hh, b) in params["lstm"]],
        "dec_w": params["dec_w"].astype(compute_dtype),
        "dec_b": params["dec_b"].astype(jnp.float32),
    }


# ----------------------------- RLSTM forward (forward=0 path) -------------------
def rlstm_forward(params, tokens, *, t_block=None):
    T, B = tokens.shape
    act_dtype = params["embed"].dtype      # bf16 activations halve inter-layer HBM traffic
    h = jnp.take(params["embed"], tokens, axis=0)            # (T, B, E)
    # TODO(synk): fuse the embedding gather into the first projection via scalar-
    # prefetched token ids + pl.Element row gather; kept as XLA glue (minor at small T*B).
    for (w_ih, w_hh, b) in params["lstm"]:
        In = h.shape[-1]
        H = w_hh.shape[0]
        # Hoisted, time-independent input projection (+ folded bias): one large MXU
        # matmul over all T*B rows instead of T tiny per-step dots.
        g_in = matmul_bias(h.reshape(T * B, In), w_ih, b,
                           out_dtype=act_dtype).reshape(T, B, 4 * H)
        # TODO(synk): for long T, overlap this projection / its DMA with the serial
        # recurrence (emit_pipeline / manual double-buffer) instead of a full g_in
        # HBM round trip per layer.
        h = lstm_recurrence(g_in, w_hh, out_dtype=act_dtype, t_block=t_block)
    E = h.shape[-1]
    V = params["dec_w"].shape[1]
    logits = matmul_bias(h.reshape(T * B, E), params["dec_w"], params["dec_b"],
                         out_dtype=jnp.float32)
    return logits.reshape(T, B, V)
    # TODO(synk): the `forward > 0` autoregressive branch of the original module
    # references undefined attributes (self.embedding / self.projection) and is not
    # exercised by the default call; only forward=0 is implemented.


# ----------------------------- Pure-JAX reference -------------------------------
def rlstm_reference(params, tokens):
    h = jnp.take(params["embed"], tokens, axis=0)
    for (w_ih, w_hh, b) in params["lstm"]:
        H = w_hh.shape[0]
        B = h.shape[1]

        def step(carry, x_t):
            h_prev, c_prev = carry
            gates = x_t @ w_ih + h_prev @ w_hh + b
            i = jax.nn.sigmoid(gates[:, 0 * H:1 * H])
            f = jax.nn.sigmoid(gates[:, 1 * H:2 * H])
            g = jnp.tanh(gates[:, 2 * H:3 * H])
            o = jax.nn.sigmoid(gates[:, 3 * H:4 * H])
            c = f * c_prev + i * g
            hn = o * jnp.tanh(c)
            return (hn, c), hn

        init = (jnp.zeros((B, H), jnp.float32), jnp.zeros((B, H), jnp.float32))
        _, h = jax.lax.scan(step, init, h)
    return h @ params["dec_w"] + params["dec_b"]


if __name__ == "__main__":
    # Small but lane/sublane-aligned shapes: B=16 exercises the batch split (Bblk=8),
    # E=H=128 and V=256 keep gate slices and stores lane-tile aligned.
    vocab_size, embed_size, hidden_size = 256, 128, 128
    T, B = 16, 16

    key = jax.random.PRNGKey(0)
    pkey, tkey = jax.random.split(key)
    params = init_params(pkey, vocab_size, embed_size, hidden_size)
    tokens = jax.random.randint(tkey, (T, B), 0, vocab_size, jnp.int32)

    ref = jax.block_until_ready(rlstm_reference(params, tokens))

    fwd = jax.jit(rlstm_forward, static_argnames=("t_block",))

    # f32 compute path: tolerance covers TPU default-precision matmuls compounding over
    # T recurrent steps x 3 layers; a semantic bug would be O(0.3+) on these logits.
    p_f32 = prepare_params(params, jnp.float32)
    out_f32 = jax.block_until_ready(fwd(p_f32, tokens))
    assert out_f32.shape == (T, B, vocab_size)
    err_f32 = float(jnp.max(jnp.abs(out_f32 - ref)))
    assert err_f32 < 3e-2, err_f32

    # Smaller time blocks: exercises h/c carry + single-buffered W_hh reload across
    # grid steps; numerics must be unchanged w.r.t. the single-block run.
    out_f32_tb = jax.block_until_ready(fwd(p_f32, tokens, t_block=4))
    err_tb = float(jnp.max(jnp.abs(out_f32_tb - out_f32)))
    assert err_tb < 1e-5, err_tb

    # Default bf16 MXU-input path (f32 accumulation + f32 gate/state math on every
    # TPU generation): loose check — bf16 g_in/activations compound across timesteps.
    p_bf16 = prepare_params(params, jnp.bfloat16)
    out_bf16 = jax.block_until_ready(fwd(p_bf16, tokens))
    assert out_bf16.shape == (T, B, vocab_size)
    err_bf16 = float(jnp.max(jnp.abs(out_bf16 - ref)))
    assert err_bf16 < 0.25, err_bf16

    print("KERNEL_OK")
</pallas_src>

<mosaic_0001>
module attributes {stable_mosaic.version = 11 : i64} {
  func.func @_matmul_bias_kernel(%arg0: i32, %arg1: i32, %arg2: i32, %arg3: memref<256x128xf32, #tpu.memory_space<vmem>>, %arg4: memref<128x256xf32, #tpu.memory_space<vmem>>, %arg5: memref<1x256xf32, #tpu.memory_space<vmem>>, %arg6: memref<256x256xf32, #tpu.memory_space<vmem>>, %arg7: memref<256x256xf32, #tpu.memory_space<vmem>>) attributes {dimension_semantics = [#tpu.dimension_semantics<parallel>, #tpu.dimension_semantics<parallel>, #tpu.dimension_semantics<arbitrary>], iteration_bounds = array<i64: 1, 1, 1>, scalar_prefetch = 0 : i64, scratch_operands = 1 : i64, tpu.core_type = #tpu.core_type<tc>, window_params = [{transform_indices = @transform_0, window_bounds = array<i64: 256, 128>}, {transform_indices = @transform_1, window_bounds = array<i64: 128, 256>}, {transform_indices = @transform_2, window_bounds = array<i64: 1, 256>}, {transform_indices = @transform_3, window_bounds = array<i64: 256, 256>}]} {
    %c0_i32 = arith.constant 0 : i32
    %0 = arith.cmpi eq, %arg2, %c0_i32 : i32
    %1 = arith.extui %0 : i1 to i32
    %c0_i32_0 = arith.constant 0 : i32
    %2 = arith.cmpi ne, %1, %c0_i32_0 : i32
    scf.if %2 {
      %cst_10 = arith.constant 0.000000e+00 : f32
      %12 = vector.broadcast %cst_10 : f32 to vector<256x256xf32>
      %c0_11 = arith.constant 0 : index
      %c0_12 = arith.constant 0 : index
      %13 = vector.load %arg7[%c0_11, %c0_12] : memref<256x256xf32, #tpu.memory_space<vmem>>, vector<256x256xf32>
      tpu.vector_store %arg7[%c0_11, %c0_12], %12 {strides = array<i32>} : memref<256x256xf32, #tpu.memory_space<vmem>>, vector<256x256xf32>,
    } else {
    }
    %c0 = arith.constant 0 : index
    %c0_1 = arith.constant 0 : index
    %3 = vector.load %arg7[%c0, %c0_1] : memref<256x256xf32, #tpu.memory_space<vmem>>, vector<256x256xf32>
    %c0_2 = arith.constant 0 : index
    %c0_3 = arith.constant 0 : index
    %4 = vector.load %arg3[%c0_2, %c0_3] : memref<256x128xf32, #tpu.memory_space<vmem>>, vector<256x128xf32>
    %c0_4 = arith.constant 0 : index
    %c0_5 = arith.constant 0 : index
    %5 = vector.load %arg4[%c0_4, %c0_5] : memref<128x256xf32, #tpu.memory_space<vmem>>, vector<128x256xf32>
    %cst = arith.constant dense<0.000000e+00> : vector<256x256xf32>
    %6 = tpu.matmul %4, %5, %cst {dimension_numbers = #tpu.dot_dimension_numbers<[1], [0], [0], [1], [0, 0, 1, 1], [], []>} : vector<256x128xf32>, vector<128x256xf32>, vector<256x256xf32> -> vector<256x256xf32>
    %7 = arith.addf %3, %6 : vector<256x256xf32>
    %c0_6 = arith.constant 0 : index
    %c0_7 = arith.constant 0 : index
    %8 = vector.load %arg7[%c0_6, %c0_7] : memref<256x256xf32, #tpu.memory_space<vmem>>, vector<256x256xf32>
    tpu.vector_store %arg7[%c0_6, %c0_7], %7 {strides = array<i32>} : memref<256x256xf32, #tpu.memory_space<vmem>>, vector<256x256xf32>,
    %c0_i32_8 = arith.constant 0 : i32
    %9 = arith.cmpi eq, %arg2, %c0_i32_8 : i32
    %10 = arith.extui %9 : i1 to i32
    %c0_i32_9 = arith.constant 0 : i32
    %11 = arith.cmpi ne, %10, %c0_i32_9 : i32
    scf.if %11 {
      %c0_10 = arith.constant 0 : index
      %c0_11 = arith.constant 0 : index
      %12 = vector.load %arg7[%c0_10, %c0_11] : memref<256x256xf32, #tpu.memory_space<vmem>>, vector<256x256xf32>
      %c0_12 = arith.constant 0 : index
      %c0_13 = arith.constant 0 : index
      %13 = vector.load %arg5[%c0_12, %c0_13] : memref<1x256xf32, #tpu.memory_space<vmem>>, vector<1x256xf32>
      %14 = vector.broadcast %13 : vector<1x256xf32> to vector<256x256xf32>
      %15 = arith.addf %12, %14 : vector<256x256xf32>
      %c0_14 = arith.constant 0 : index
      %c0_15 = arith.constant 0 : index
      %16 = vector.load %arg6[%c0_14, %c0_15] : memref<256x256xf32, #tpu.memory_space<vmem>>, vector<256x256xf32>
      tpu.vector_store %arg6[%c0_14, %c0_15], %15 {strides = array<i32>} : memref<256x256xf32, #tpu.memory_space<vmem>>, vector<256x256xf32>,
    } else {
    }
    return
  }
  func.func @transform_0(%arg0: i32, %arg1: i32, %arg2: i32) -> (i32, i32) {
    %c0_i32 = arith.constant 0 : i32
    return %arg0, %arg2 : i32, i32
  }
  func.func @transform_1(%arg0: i32, %arg1: i32, %arg2: i32) -> (i32, i32) {
    %c0_i32 = arith.constant 0 : i32
    return %arg2, %arg1 : i32, i32
  }
  func.func @transform_2(%arg0: i32, %arg1: i32, %arg2: i32) -> (i32, i32) {
    %c0_i32 = arith.constant 0 : i32
    %c0_i32_0 = arith.constant 0 : i32
    return %c0_i32, %arg1 : i32, i32
  }
  func.func @transform_3(%arg0: i32, %arg1: i32, %arg2: i32) -> (i32, i32) {
    %c0_i32 = arith.constant 0 : i32
    return %arg0, %arg1 : i32, i32
  }
}

module attributes {stable_mosaic.version = 11 : i64} {
  func.func @_matmul_bias_kernel(%arg0: i32, %arg1: i32, %arg2: i32, %arg3: memref<256x128xf32, #tpu.memory_space<vmem>>, %arg4: memref<128x512xf32, #tpu.memory_space<vmem>>, %arg5: memref<1x512xf32, #tpu.memory_space<vmem>>, %arg6: memref<256x512xf32, #tpu.memory_space<vmem>>, %arg7: memref<256x512xf32, #tpu.memory_space<vmem>>) attributes {dimension_semantics = [#tpu.dimension_semantics<parallel>, #tpu.dimension_semantics<parallel>, #tpu.dimension_semantics<arbitrary>], iteration_bounds = array<i64: 1, 1, 1>, scalar_prefetch = 0 : i64, scratch_operands = 1 : i64, tpu.core_type = #tpu.core_type<tc>, window_params = [{transform_indices = @transform_0, window_bounds = array<i64: 256, 128>}, {transform_indices = @transform_1, window_bounds = array<i64: 128, 512>}, {transform_indices = @transform_2, window_bounds = array<i64: 1, 512>}, {transform_indices = @transform_3, window_bounds = array<i64: 256, 512>}]} {
    %c0_i32 = arith.constant 0 : i32
    %0 = arith.cmpi eq, %arg2, %c0_i32 : i32
    %1 = arith.extui %0 : i1 to i32
    %c0_i32_0 = arith.constant 0 : i32
    %2 = arith.cmpi ne, %1, %c0_i32_0 : i32
    scf.if %2 {
      %cst_10 = arith.constant 0.000000e+00 : f32
      %12 = vector.broadcast %cst_10 : f32 to vector<256x512xf32>
      %c0_11 = arith.constant 0 : index
      %c0_12 = arith.constant 0 : index
      %13 = vector.load %arg7[%c0_11, %c0_12] : memref<256x512xf32, #tpu.memory_space<vmem>>, vector<256x512xf32>
      tpu.vector_store %arg7[%c0_11, %c0_12], %12 {strides = array<i32>} : memref<256x512xf32, #tpu.memory_space<vmem>>, vector<256x512xf32>,
    } else {
    }
    %c0 = arith.constant 0 : index
    %c0_1 = arith.constant 0 : index
    %3 = vector.load %arg7[%c0, %c0_1] : memref<256x512xf32, #tpu.memory_space<vmem>>, vector<256x512xf32>
    %c0_2 = arith.constant 0 : index
    %c0_3 = arith.constant 0 : index
    %4 = vector.load %arg3[%c0_2, %c0_3] : memref<256x128xf32, #tpu.memory_space<vmem>>, vector<256x128xf32>
    %c0_4 = arith.constant 0 : index
    %c0_5 = arith.constant 0 : index
    %5 = vector.load %arg4[%c0_4, %c0_5] : memref<128x512xf32, #tpu.memory_space<vmem>>, vector<128x512xf32>
    %cst = arith.constant dense<0.000000e+00> : vector<256x512xf32>
    %6 = tpu.matmul %4, %5, %cst {dimension_numbers = #tpu.dot_dimension_numbers<[1], [0], [0], [1], [0, 0, 1, 1], [], []>} : vector<256x128xf32>, vector<128x512xf32>, vector<256x512xf32> -> vector<256x512xf32>
    %7 = arith.addf %3, %6 : vector<256x512xf32>
    %c0_6 = arith.constant 0 : index
    %c0_7 = arith.constant 0 : index
    %8 = vector.load %arg7[%c0_6, %c0_7] : memref<256x512xf32, #tpu.memory_space<vmem>>, vector<256x512xf32>
    tpu.vector_store %arg7[%c0_6, %c0_7], %7 {strides = array<i32>} : memref<256x512xf32, #tpu.memory_space<vmem>>, vector<256x512xf32>,
    %c0_i32_8 = arith.constant 0 : i32
    %9 = arith.cmpi eq, %arg2, %c0_i32_8 : i32
    %10 = arith.extui %9 : i1 to i32
    %c0_i32_9 = arith.constant 0 : i32
    %11 = arith.cmpi ne, %10, %c0_i32_9 : i32
    scf.if %11 {
      %c0_10 = arith.constant 0 : index
      %c0_11 = arith.constant 0 : index
      %12 = vector.load %arg7[%c0_10, %c0_11] : memref<256x512xf32, #tpu.memory_space<vmem>>, vector<256x512xf32>
      %c0_12 = arith.constant 0 : index
      %c0_13 = arith.constant 0 : index
      %13 = vector.load %arg5[%c0_12, %c0_13] : memref<1x512xf32, #tpu.memory_space<vmem>>, vector<1x512xf32>
      %14 = vector.broadcast %13 : vector<1x512xf32> to vector<256x512xf32>
      %15 = arith.addf %12, %14 : vector<256x512xf32>
      %c0_14 = arith.constant 0 : index
      %c0_15 = arith.constant 0 : index
      %16 = vector.load %arg6[%c0_14, %c0_15] : memref<256x512xf32, #tpu.memory_space<vmem>>, vector<256x512xf32>
      tpu.vector_store %arg6[%c0_14, %c0_15], %15 {strides = array<i32>} : memref<256x512xf32, #tpu.memory_space<vmem>>, vector<256x512xf32>,
    } else {
    }
    return
  }
  func.func @transform_0(%arg0: i32, %arg1: i32, %arg2: i32) -> (i32, i32) {
    %c0_i32 = arith.constant 0 : i32
    return %arg0, %arg2 : i32, i32
  }
  func.func @transform_1(%arg0: i32, %arg1: i32, %arg2: i32) -> (i32, i32) {
    %c0_i32 = arith.constant 0 : i32
    return %arg2, %arg1 : i32, i32
  }
  func.func @transform_2(%arg0: i32, %arg1: i32, %arg2: i32) -> (i32, i32) {
    %c0_i32 = arith.constant 0 : i32
    %c0_i32_0 = arith.constant 0 : i32
    return %c0_i32, %arg1 : i32, i32
  }
  func.func @transform_3(%arg0: i32, %arg1: i32, %arg2: i32) -> (i32, i32) {
    %c0_i32 = arith.constant 0 : i32
    return %arg0, %arg1 : i32, i32
  }
}

module attributes {stable_mosaic.version = 11 : i64} {
  func.func @_lstm_rec_kernel(%arg0: i32, %arg1: i32, %arg2: memref<16x8x512xf32, #tpu.memory_space<vmem>>, %arg3: memref<128x512xf32, #tpu.memory_space<any>>, %arg4: memref<16x8x128xf32, #tpu.memory_space<vmem>>, %arg5: memref<128x512xf32, #tpu.memory_space<vmem>>, %arg6: memref<8x128xf32, #tpu.memory_space<vmem>>, %arg7: memref<8x128xf32, #tpu.memory_space<vmem>>) attributes {dimension_semantics = [#tpu.dimension_semantics<parallel>, #tpu.dimension_semantics<arbitrary>], iteration_bounds = array<i64: 2, 1>, scalar_prefetch = 0 : i64, scratch_operands = 3 : i64, tpu.core_type = #tpu.core_type<tc>, window_params = [{transform_indices = @transform_0, window_bounds = array<i64: 16, 8, 512>}, {}, {transform_indices = @transform_2, window_bounds = array<i64: 16, 8, 128>}]} {
    %c0_i32 = arith.constant 0 : i32
    %0 = arith.cmpi eq, %arg1, %c0_i32 : i32
    %1 = arith.extui %0 : i1 to i32
    %c0_i32_0 = arith.constant 0 : i32
    %2 = arith.cmpi ne, %1, %c0_i32_0 : i32
    scf.if %2 {
      "tpu.region"() ({
        %667 = tpu.sem_alloc : memref<!tpu.dma_semaphore, #tpu.memory_space<semaphore_mem>>
        tpu.enqueue_dma source(%arg3 : memref<128x512xf32, #tpu.memory_space<any>>) target(%arg5 : memref<128x512xf32, #tpu.memory_space<vmem>>) target_semaphore(%667 : memref<!tpu.dma_semaphore, #tpu.memory_space<semaphore_mem>>)
        tpu.wait_dma2 semaphore(%667 : memref<!tpu.dma_semaphore, #tpu.memory_space<semaphore_mem>>) src(%arg3 : memref<128x512xf32, #tpu.memory_space<any>>) dst(%arg5 : memref<128x512xf32, #tpu.memory_space<vmem>>)
        tpu.yield
      }) : () -> ()
      %cst_264 = arith.constant 0.000000e+00 : f32
      %663 = vector.broadcast %cst_264 : f32 to vector<8x128xf32>
      %c0_265 = arith.constant 0 : index
      %c0_266 = arith.constant 0 : index
      %664 = vector.load %arg6[%c0_265, %c0_266] : memref<8x128xf32, #tpu.memory_space<vmem>>, vector<8x128xf32>
      tpu.vector_store %arg6[%c0_265, %c0_266], %663 {strides = array<i32>} : memref<8x128xf32, #tpu.memory_space<vmem>>, vector<8x128xf32>,
      %cst_267 = arith.constant 0.000000e+00 : f32
      %665 = vector.broadcast %cst_267 : f32 to vector<8x128xf32>
      %c0_268 = arith.constant 0 : index
      %c0_269 = arith.constant 0 : index
      %666 = vector.load %arg7[%c0_268, %c0_269] : memref<8x128xf32, #tpu.memory_space<vmem>>, vector<8x128xf32>
      tpu.vector_store %arg7[%c0_268, %c0_269], %665 {strides = array<i32>} : memref<8x128xf32, #tpu.memory_space<vmem>>, vector<8x128xf32>,
    } else {
    }
    %c0 = arith.constant 0 : index
    %c0_1 = arith.constant 0 : index
    %3 = vector.load %arg6[%c0, %c0_1] : memref<8x128xf32, #tpu.memory_space<vmem>>, vector<8x128xf32>
    %c0_2 = arith.constant 0 : index
    %c0_3 = arith.constant 0 : index
    %4 = vector.load %arg7[%c0_2, %c0_3] : memref<8x128xf32, #tpu.memory_space<vmem>>, vector<8x128xf32>
    %c0_i32_4 = arith.constant 0 : i32
    %5 = arith.index_cast %c0_i32_4 : i32 to index
    %c0_5 = arith.constant 0 : index
    %c0_6 = arith.constant 0 : index
    %6 = vector.load %arg2[%5, %c0_5, %c0_6] : memref<16x8x512xf32, #tpu.memory_space<vmem>>, vector<1x8x512xf32>
    %7 = vector.shape_cast %6 : vector<1x8x512xf32> to vector<8x512xf32>
    %c0_7 = arith.constant 0 : index
    %c0_8 = arith.constant 0 : index
    %8 = vector.load %arg5[%c0_7, %c0_8] : memref<128x512xf32, #tpu.memory_space<vmem>>, vector<128x512xf32>
    %cst = arith.constant dense<0.000000e+00> : vector<8x512xf32>
    %9 = tpu.matmul %3, %8, %cst {dimension_numbers = #tpu.dot_dimension_numbers<[1], [0], [0], [1], [0, 0, 1, 1], [], []>} : vector<8x128xf32>, vector<128x512xf32>, vector<8x512xf32> -> vector<8x512xf32>
    %10 = arith.addf %7, %9 : vector<8x512xf32>
    %11 = vector.extract_strided_slice %10 {offsets = [0, 0], sizes = [8, 128], strides = [1, 1]} : vector<8x512xf32> to vector<8x128xf32>
    %cst_9 = arith.constant 5.000000e-01 : f32
    %12 = vector.broadcast %cst_9 : f32 to vector<8x128xf32>
    %13 = arith.mulf %12, %11 : vector<8x128xf32>
    %14 = math.tanh %13 : vector<8x128xf32>
    %cst_10 = arith.constant 5.000000e-01 : f32
    %15 = vector.broadcast %cst_10 : f32 to vector<8x128xf32>
    %16 = arith.mulf %15, %14 : vector<8x128xf32>
    %cst_11 = arith.constant 5.000000e-01 : f32
    %17 = vector.broadcast %cst_11 : f32 to vector<8x128xf32>
    %18 = arith.addf %16, %17 : vector<8x128xf32>
    %19 = vector.extract_strided_slice %10 {offsets = [0, 128], sizes = [8, 128], strides = [1, 1]} : vector<8x512xf32> to vector<8x128xf32>
    %cst_12 = arith.constant 5.000000e-01 : f32
    %20 = vector.broadcast %cst_12 : f32 to vector<8x128xf32>
    %21 = arith.mulf %20, %19 : vector<8x128xf32>
    %22 = math.tanh %21 : vector<8x128xf32>
    %cst_13 = arith.constant 5.000000e-01 : f32
    %23 = vector.broadcast %cst_13 : f32 to vector<8x128xf32>
    %24 = arith.mulf %23, %22 : vector<8x128xf32>
    %cst_14 = arith.constant 5.000000e-01 : f32
    %25 = vector.broadcast %cst_14 : f32 to vector<8x128xf32>
    %26 = arith.addf %24, %25 : vector<8x128xf32>
    %27 = vector.extract_strided_slice %10 {offsets = [0, 256], sizes = [8, 128], strides = [1, 1]} : vector<8x512xf32> to vector<8x128xf32>
    %28 = math.tanh %27 : vector<8x128xf32>
    %29 = vector.extract_strided_slice %10 {offsets = [0, 384], sizes = [8, 128], strides = [1, 1]} : vector<8x512xf32> to vector<8x128xf32>
    %cst_15 = arith.constant 5.000000e-01 : f32
    %30 = vector.broadcast %cst_15 : f32 to vector<8x128xf32>
    %31 = arith.mulf %30, %29 : vector<8x128xf32>
    %32 = math.tanh %31 : vector<8x128xf32>
    %cst_16 = arith.constant 5.000000e-01 : f32
    %33 = vector.broadcast %cst_16 : f32 to vector<8x128xf32>
    %34 = arith.mulf %33, %32 : vector<8x128xf32>
    %cst_17 = arith.constant 5.000000e-01 : f32
    %35 = vector.broadcast %cst_17 : f32 to vector<8x128xf32>
    %36 = arith.addf %34, %35 : vector<8x128xf32>
    %37 = arith.mulf %26, %4 : vector<8x128xf32>
    %38 = arith.mulf %18, %28 : vector<8x128xf32>
    %39 = arith.addf %37, %38 : vector<8x128xf32>
    %40 = math.tanh %39 : vector<8x128xf32>
    %41 = arith.mulf %36, %40 : vector<8x128xf32>
    %42 = arith.index_cast %c0_i32_4 : i32 to index
    %c0_18 = arith.constant 0 : index
    %c0_19 = arith.constant 0 : index
    %43 = vector.load %arg4[%42, %c0_18, %c0_19] : memref<16x8x128xf32, #tpu.memory_space<vmem>>, vector<1x8x128xf32>
    %44 = vector.shape_cast %43 : vector<1x8x128xf32> to vector<8x128xf32>
    %45 = vector.shape_cast %41 : vector<8x128xf32> to vector<1x8x128xf32>
    tpu.vector_store %arg4[%42, %c0_18, %c0_19], %45 {strides = array<i32>} : memref<16x8x128xf32, #tpu.memory_space<vmem>>, vector<1x8x128xf32>,
    %c1_i32 = arith.constant 1 : i32
    %46 = arith.index_cast %c1_i32 : i32 to index
    %c0_20 = arith.constant 0 : index
    %c0_21 = arith.constant 0 : index
    %47 = vector.load %arg2[%46, %c0_20, %c0_21] : memref<16x8x512xf32, #tpu.memory_space<vmem>>, vector<1x8x512xf32>
    %48 = vector.shape_cast %47 : vector<1x8x512xf32> to vector<8x512xf32>
    %c0_22 = arith.constant 0 : index
    %c0_23 = arith.constant 0 : index
    %49 = vector.load %arg5[%c0_22, %c0_23] : memref<128x512xf32, #tpu.memory_space<vmem>>, vector<128x512xf32>
    %cst_24 = arith.constant dense<0.000000e+00> : vector<8x512xf32>
    %50 = tpu.matmul %41, %49, %cst_24 {dimension_numbers = #tpu.dot_dimension_numbers<[1], [0], [0], [1], [0, 0, 1, 1], [], []>} : vector<8x128xf32>, vector<128x512xf32>, vector<8x512xf32> -> vector<8x512xf32>
    %51 = arith.addf %48, %50 : vector<8x512xf32>
    %52 = vector.extract_strided_slice %51 {offsets = [0, 0], sizes = [8, 128], strides = [1, 1]} : vector<8x512xf32> to vector<8x128xf32>
    %cst_25 = arith.constant 5.000000e-01 : f32
    %53 = vector.broadcast %cst_25 : f32 to vector<8x128xf32>
    %54 = arith.mulf %53, %52 : vector<8x128xf32>
    %55 = math.tanh %54 : vector<8x128xf32>
    %cst_26 = arith.constant 5.000000e-01 : f32
    %56 = vector.broadcast %cst_26 : f32 to vector<8x128xf32>
    %57 = arith.mulf %56, %55 : vector<8x128xf32>
    %cst_27 = arith.constant 5.000000e-01 : f32
    %58 = vector.broadcast %cst_27 : f32 to vector<8x128xf32>
    %59 = arith.addf %57, %58 : vector<8x128xf32>
    %60 = vector.extract_strided_slice %51 {offsets = [0, 128], sizes = [8, 128], strides = [1, 1]} : vector<8x512xf32> to vector<8x128xf32>
    %cst_28 = arith.constant 5.000000e-01 : f32
    %61 = vector.broadcast %cst_28 : f32 to vector<8x128xf32>
    %62 = arith.mulf %61, %60 : vector<8x128xf32>
    %63 = math.tanh %62 : vector<8x128xf32>
    %cst_29 = arith.constant 5.000000e-01 : f32
    %64 = vector.broadcast %cst_29 : f32 to vector<8x128xf32>
    %65 = arith.mulf %64, %63 : vector<8x128xf32>
    %cst_30 = arith.constant 5.000000e-01 : f32
    %66 = vector.broadcast %cst_30 : f32 to vector<8x128xf32>
    %67 = arith.addf %65, %66 : vector<8x128xf32>
    %68 = vector.extract_strided_slice %51 {offsets = [0, 256], sizes = [8, 128], strides = [1, 1]} : vector<8x512xf32> to vector<8x128xf32>
    %69 = math.tanh %68 : vector<8x128xf32>
    %70 = vector.extract_strided_slice %51 {offsets = [0, 384], sizes = [8, 128], strides = [1, 1]} : vector<8x512xf32> to vector<8x128xf32>
    %cst_31 = arith.constant 5.000000e-01 : f32
    %71 = vector.broadcast %cst_31 : f32 to vector<8x128xf32>
    %72 = arith.mulf %71, %70 : vector<8x128xf32>
    %73 = math.tanh %72 : vector<8x128xf32>
    %cst_32 = arith.constant 5.000000e-01 : f32
    %74 = vector.broadcast %cst_32 : f32 to vector<8x128xf32>
    %75 = arith.mulf %74, %73 : vector<8x128xf32>
    %cst_33 = arith.constant 5.000000e-01 : f32
    %76 = vector.broadcast %cst_33 : f32 to vector<8x128xf32>
    %77 = arith.addf %75, %76 : vector<8x128xf32>
    %78 = arith.mulf %67, %39 : vector<8x128xf32>
    %79 = arith.mulf %59, %69 : vector<8x128xf32>
    %80 = arith.addf %78, %79 : vector<8x128xf32>
    %81 = math.tanh %80 : vector<8x128xf32>
    %82 = arith.mulf %77, %81 : vector<8x128xf32>
    %83 = arith.index_cast %c1_i32 : i32 to index
    %c0_34 = arith.constant 0 : index
    %c0_35 = arith.constant 0 : index
    %84 = vector.load %arg4[%83, %c0_34, %c0_35] : memref<16x8x128xf32, #tpu.memory_space<vmem>>, vector<1x8x128xf32>
    %85 = vector.shape_cast %84 : vector<1x8x128xf32> to vector<8x128xf32>
    %86 = vector.shape_cast %82 : vector<8x128xf32> to vector<1x8x128xf32>
    tpu.vector_store %arg4[%83, %c0_34, %c0_35], %86 {strides = array<i32>} : memref<16x8x128xf32, #tpu.memory_space<vmem>>, vector<1x8x128xf32>,
    %c2_i32 = arith.constant 2 : i32
    %87 = arith.index_cast %c2_i32 : i32 to index
    %c0_36 = arith.constant 0 : index
    %c0_37 = arith.constant 0 : index
    %88 = vector.load %arg2[%87, %c0_36, %c0_37] : memref<16x8x512xf32, #tpu.memory_space<vmem>>, vector<1x8x512xf32>
    %89 = vector.shape_cast %88 : vector<1x8x512xf32> to vector<8x512xf32>
    %c0_38 = arith.constant 0 : index
    %c0_39 = arith.constant 0 : index
    %90 = vector.load %arg5[%c0_38, %c0_39] : memref<128x512xf32, #tpu.memory_space<vmem>>, vector<128x512xf32>
    %cst_40 = arith.constant dense<0.000000e+00> : vector<8x512xf32>
    %91 = tpu.matmul %82, %90, %cst_40 {dimension_numbers = #tpu.dot_dimension_numbers<[1], [0], [0], [1], [0, 0, 1, 1], [], []>} : vector<8x128xf32>, vector<128x512xf32>, vector<8x512xf32> -> vector<8x512xf32>
    %92 = arith.addf %89, %91 : vector<8x512xf32>
    %93 = vector.extract_strided_slice %92 {offsets = [0, 0], sizes = [8, 128], strides = [1, 1]} : vector<8x512xf32> to vector<8x128xf32>
    %cst_41 = arith.constant 5.000000e-01 : f32
    %94 = vector.broadcast %cst_41 : f32 to vector<8x128xf32>
    %95 = arith.mulf %94, %93 : vector<8x128xf32>
    %96 = math.tanh %95 : vector<8x128xf32>
    %cst_42 = arith.constant 5.000000e-01 : f32
    %97 = vector.broadcast %cst_42 : f32 to vector<8x128xf32>
    %98 = arith.mulf %97, %96 : vector<8x128xf32>
    %cst_43 = arith.constant 5.000000e-01 : f32
    %99 = vector.broadcast %cst_43 : f32 to vector<8x128xf32>
    %100 = arith.addf %98, %99 : vector<8x128xf32>
    %101 = vector.extract_strided_slice %92 {offsets = [0, 128], sizes = [8, 128], strides = [1, 1]} : vector<8x512xf32> to vector<8x128xf32>
    %cst_44 = arith.constant 5.000000e-01 : f32
    %102 = vector.broadcast %cst_44 : f32 to vector<8x128xf32>
    %103 = arith.mulf %102, %101 : vector<8x128xf32>
    %104 = math.tanh %103 : vector<8x128xf32>
    %cst_45 = arith.constant 5.000000e-01 : f32
    %105 = vector.broadcast %cst_45 : f32 to vector<8x128xf32>
    %106 = arith.mulf %105, %104 : vector<8x128xf32>
    %cst_46 = arith.constant 5.000000e-01 : f32
    %107 = vector.broadcast %cst_46 : f32 to vector<8x128xf32>
    %108 = arith.addf %106, %107 : vector<8x128xf32>
    %109 = vector.extract_strided_slice %92 {offsets = [0, 256], sizes = [8, 128], strides = [1, 1]} : vector<8x512xf32> to vector<8x128xf32>
    %110 = math.tanh %109 : vector<8x128xf32>
    %111 = vector.extract_strided_slice %92 {offsets = [0, 384], sizes = [8, 128], strides = [1, 1]} : vector<8x512xf32> to vector<8x128xf32>
    %cst_47 = arith.constant 5.000000e-01 : f32
    %112 = vector.broadcast %cst_47 : f32 to vector<8x128xf32>
    %113 = arith.mulf %112, %111 : vector<8x128xf32>
    %114 = math.tanh %113 : vector<8x128xf32>
    %cst_48 = arith.constant 5.000000e-01 : f32
    %115 = vector.broadcast %cst_48 : f32 to vector<8x128xf32>
    %116 = arith.mulf %115, %114 : vector<8x128xf32>
    %cst_49 = arith.constant 5.000000e-01 : f32
    %117 = vector.broadcast %cst_49 : f32 to vector<8x128xf32>
    %118 = arith.addf %116, %117 : vector<8x128xf32>
    %119 = arith.mulf %108, %80 : vector<8x128xf32>
    %120 = arith.mulf %100, %110 : vector<8x128xf32>
    %121 = arith.addf %119, %120 : vector<8x128xf32>
    %122 = math.tanh %121 : vector<8x128xf32>
    %123 = arith.mulf %118, %122 : vector<8x128xf32>
    %124 = arith.index_cast %c2_i32 : i32 to index
    %c0_50 = arith.constant 0 : index
    %c0_51 = arith.constant 0 : index
    %125 = vector.load %arg4[%124, %c0_50, %c0_51] : memref<16x8x128xf32, #tpu.memory_space<vmem>>, vector<1x8x128xf32>
    %126 = vector.shape_cast %125 : vector<1x8x128xf32> to vector<8x128xf32>
    %127 = vector.shape_cast %123 : vector<8x128xf32> to vector<1x8x128xf32>
    tpu.vector_store %arg4[%124, %c0_50, %c0_51], %127 {strides = array<i32>} : memref<16x8x128xf32, #tpu.memory_space<vmem>>, vector<1x8x128xf32>,
    %c3_i32 = arith.constant 3 : i32
    %128 = arith.index_cast %c3_i32 : i32 to index
    %c0_52 = arith.constant 0 : index
    %c0_53 = arith.constant 0 : index
    %129 = vector.load %arg2[%128, %c0_52, %c0_53] : memref<16x8x512xf32, #tpu.memory_space<vmem>>, vector<1x8x512xf32>
    %130 = vector.shape_cast %129 : vector<1x8x512xf32> to vector<8x512xf32>
    %c0_54 = arith.constant 0 : index
    %c0_55 = arith.constant 0 : index
    %131 = vector.load %arg5[%c0_54, %c0_55] : memref<128x512xf32, #tpu.memory_space<vmem>>, vector<128x512xf32>
    %cst_56 = arith.constant dense<0.000000e+00> : vector<8x512xf32>
    %132 = tpu.matmul %123, %131, %cst_56 {dimension_numbers = #tpu.dot_dimension_numbers<[1], [0], [0], [1], [0, 0, 1, 1], [], []>} : vector<8x128xf32>, vector<128x512xf32>, vector<8x512xf32> -> vector<8x512xf32>
    %133 = arith.addf %130, %132 : vector<8x512xf32>
    %134 = vector.extract_strided_slice %133 {offsets = [0, 0], sizes = [8, 128], strides = [1, 1]} : vector<8x512xf32> to vector<8x128xf32>
    %cst_57 = arith.constant 5.000000e-01 : f32
    %135 = vector.broadcast %cst_57 : f32 to vector<8x128xf32>
    %136 = arith.mulf %135, %134 : vector<8x128xf32>
    %137 = math.tanh %136 : vector<8x128xf32>
    %cst_58 = arith.constant 5.000000e-01 : f32
    %138 = vector.broadcast %cst_58 : f32 to vector<8x128xf32>
    %139 = arith.mulf %138, %137 : vector<8x128xf32>
    %cst_59 = arith.constant 5.000000e-01 : f32
    %140 = vector.broadcast %cst_59 : f32 to vector<8x128xf32>
    %141 = arith.addf %139, %140 : vector<8x128xf32>
    %142 = vector.extract_strided_slice %133 {offsets = [0, 128], sizes = [8, 128], strides = [1, 1]} : vector<8x512xf32> to vector<8x128xf32>
    %cst_60 = arith.constant 5.000000e-01 : f32
    %143 = vector.broadcast %cst_60 : f32 to vector<8x128xf32>
    %144 = arith.mulf %143, %142 : vector<8x128xf32>
    %145 = math.tanh %144 : vector<8x128xf32>
    %cst_61 = arith.constant 5.000000e-01 : f32
    %146 = vector.broadcast %cst_61 : f32 to vector<8x128xf32>
    %147 = arith.mulf %146, %145 : vector<8x128xf32>
    %cst_62 = arith.constant 5.000000e-01 : f32
    %148 = vector.broadcast %cst_62 : f32 to vector<8x128xf32>
    %149 = arith.addf %147, %148 : vector<8x128xf32>
    %150 = vector.extract_strided_slice %133 {offsets = [0, 256], sizes = [8, 128], strides = [1, 1]} : vector<8x512xf32> to vector<8x128xf32>
    %151 = math.tanh %150 : vector<8x128xf32>
    %152 = vector.extract_strided_slice %133 {offsets = [0, 384], sizes = [8, 128], strides = [1, 1]} : vector<8x512xf32> to vector<8x128xf32>
    %cst_63 = arith.constant 5.000000e-01 : f32
    %153 = vector.broadcast %cst_63 : f32 to vector<8x128xf32>
    %154 = arith.mulf %153, %152 : vector<8x128xf32>
    %155 = math.tanh %154 : vector<8x128xf32>
    %cst_64 = arith.constant 5.000000e-01 : f32
    %156 = vector.broadcast %cst_64 : f32 to vector<8x128xf32>
    %157 = arith.mulf %156, %155 : vector<8x128xf32>
    %cst_65 = arith.constant 5.000000e-01 : f32
    %158 = vector.broadcast %cst_65 : f32 to vector<8x128xf32>
    %159 = arith.addf %157, %158 : vector<8x128xf32>
    %160 = arith.mulf %149, %121 : vector<8x128xf32>
    %161 = arith.mulf %141, %151 : vector<8x128xf32>
    %162 = arith.addf %160, %161 : vector<8x128xf32>
    %163 = math.tanh %162 : vector<8x128xf32>
    %164 = arith.mulf %159, %163 : vector<8x128xf32>
    %165 = arith.index_cast %c3_i32 : i32 to index
    %c0_66 = arith.constant 0 : index
    %c0_67 = arith.constant 0 : index
    %166 = vector.load %arg4[%165, %c0_66, %c0_67] : memref<16x8x128xf32, #tpu.memory_space<vmem>>, vector<1x8x128xf32>
    %167 = vector.shape_cast %166 : vector<1x8x128xf32> to vector<8x128xf32>
    %168 = vector.shape_cast %164 : vector<8x128xf32> to vector<1x8x128xf32>
    tpu.vector_store %arg4[%165, %c0_66, %c0_67], %168 {strides = array<i32>} : memref<16x8x128xf32, #tpu.memory_space<vmem>>, vector<1x8x128xf32>,
    %c4_i32 = arith.constant 4 : i32
    %169 = arith.index_cast %c4_i32 : i32 to index
    %c0_68 = arith.constant 0 : index
    %c0_69 = arith.constant 0 : index
    %170 = vector.load %arg2[%169, %c0_68, %c0_69] : memref<16x8x512xf32, #tpu.memory_space<vmem>>, vector<1x8x512xf32>
    %171 = vector.shape_cast %170 : vector<1x8x512xf32> to vector<8x512xf32>
    %c0_70 = arith.constant 0 : index
    %c0_71 = arith.constant 0 : index
    %172 = vector.load %arg5[%c0_70, %c0_71] : memref<128x512xf32, #tpu.memory_space<vmem>>, vector<128x512xf32>
    %cst_72 = arith.constant dense<0.000000e+00> : vector<8x512xf32>
    %173 = tpu.matmul %164, %172, %cst_72 {dimension_numbers = #tpu.dot_dimension_numbers<[1], [0], [0], [1], [0, 0, 1, 1], [], []>} : vector<8x128xf32>, vector<128x512xf32>, vector<8x512xf32> -> vector<8x512xf32>
    %174 = arith.addf %171, %173 : vector<8x512xf32>
    %175 = vector.extract_strided_slice %174 {offsets = [0, 0], sizes = [8, 128], strides = [1, 1]} : vector<8x512xf32> to vector<8x128xf32>
    %cst_73 = arith.constant 5.000000e-01 : f32
    %176 = vector.broadcast %cst_73 : f32 to vector<8x128xf32>
    %177 = arith.mulf %176, %175 : vector<8x128xf32>
    %178 = math.tanh %177 : vector<8x128xf32>
    %cst_74 = arith.constant 5.000000e-01 : f32
    %179 = vector.broadcast %cst_74 : f32 to vector<8x128xf32>
    %180 = arith.mulf %179, %178 : vector<8x128xf32>
    %cst_75 = arith.constant 5.000000e-01 : f32
    %181 = vector.broadcast %cst_75 : f32 to vector<8x128xf32>
    %182 = arith.addf %180, %181 : vector<8x128xf32>
    %183 = vector.extract_strided_slice %174 {offsets = [0, 128], sizes = [8, 128], strides = [1, 1]} : vector<8x512xf32> to vector<8x128xf32>
    %cst_76 = arith.constant 5.000000e-01 : f32
    %184 = vector.broadcast %cst_76 : f32 to vector<8x128xf32>
    %185 = arith.mulf %184, %183 : vector<8x128xf32>
    %186 = math.tanh %185 : vector<8x128xf32>
    %cst_77 = arith.constant 5.000000e-01 : f32
    %187 = vector.broadcast %cst_77 : f32 to vector<8x128xf32>
    %188 = arith.mulf %187, %186 : vector<8x128xf32>
    %cst_78 = arith.constant 5.000000e-01 : f32
    %189 = vector.broadcast %cst_78 : f32 to vector<8x128xf32>
    %190 = arith.addf %188, %189 : vector<8x128xf32>
    %191 = vector.extract_strided_slice %174 {offsets = [0, 256], sizes = [8, 128], strides = [1, 1]} : vector<8x512xf32> to vector<8x128xf32>
    %192 = math.tanh %191 : vector<8x128xf32>
    %193 = vector.extract_strided_slice %174 {offsets = [0, 384], sizes = [8, 128], strides = [1, 1]} : vector<8x512xf32> to vector<8x128xf32>
    %cst_79 = arith.constant 5.000000e-01 : f32
    %194 = vector.broadcast %cst_79 : f32 to vector<8x128xf32>
    %195 = arith.mulf %194, %193 : vector<8x128xf32>
    %196 = math.tanh %195 : vector<8x128xf32>
    %cst_80 = arith.constant 5.000000e-01 : f32
    %197 = vector.broadcast %cst_80 : f32 to vector<8x128xf32>
    %198 = arith.mulf %197, %196 : vector<8x128xf32>
    %cst_81 = arith.constant 5.000000e-01 : f32
    %199 = vector.broadcast %cst_81 : f32 to vector<8x128xf32>
    %200 = arith.addf %198, %199 : vector<8x128xf32>
    %201 = arith.mulf %190, %162 : vector<8x128xf32>
    %202 = arith.mulf %182, %192 : vector<8x128xf32>
    %203 = arith.addf %201, %202 : vector<8x128xf32>
    %204 = math.tanh %203 : vector<8x128xf32>
    %205 = arith.mulf %200, %204 : vector<8x128xf32>
    %206 = arith.index_cast %c4_i32 : i32 to index
    %c0_82 = arith.constant 0 : index
    %c0_83 = arith.constant 0 : index
    %207 = vector.load %arg4[%206, %c0_82, %c0_83] : memref<16x8x128xf32, #tpu.memory_space<vmem>>, vector<1x8x128xf32>
    %208 = vector.shape_cast %207 : vector<1x8x128xf32> to vector<8x128xf32>
    %209 = vector.shape_cast %205 : vector<8x128xf32> to vector<1x8x128xf32>
    tpu.vector_store %arg4[%206, %c0_82, %c0_83], %209 {strides = array<i32>} : memref<16x8x128xf32, #tpu.memory_space<vmem>>, vector<1x8x128xf32>,
    %c5_i32 = arith.constant 5 : i32
    %210 = arith.index_cast %c5_i32 : i32 to index
    %c0_84 = arith.constant 0 : index
    %c0_85 = arith.constant 0 : index
    %211 = vector.load %arg2[%210, %c0_84, %c0_85] : memref<16x8x512xf32, #tpu.memory_space<vmem>>, vector<1x8x512xf32>
    %212 = vector.shape_cast %211 : vector<1x8x512xf32> to vector<8x512xf32>
    %c0_86 = arith.constant 0 : index
    %c0_87 = arith.constant 0 : index
    %213 = vector.load %arg5[%c0_86, %c0_87] : memref<128x512xf32, #tpu.memory_space<vmem>>, vector<128x512xf32>
    %cst_88 = arith.constant dense<0.000000e+00> : vector<8x512xf32>
    %214 = tpu.matmul %205, %213, %cst_88 {dimension_numbers = #tpu.dot_dimension_numbers<[1], [0], [0], [1], [0, 0, 1, 1], [], []>} : vector<8x128xf32>, vector<128x512xf32>, vector<8x512xf32> -> vector<8x512xf32>
    %215 = arith.addf %212, %214 : vector<8x512xf32>
    %216 = vector.extract_strided_slice %215 {offsets = [0, 0], sizes = [8, 128], strides = [1, 1]} : vector<8x512xf32> to vector<8x128xf32>
    %cst_89 = arith.constant 5.000000e-01 : f32
    %217 = vector.broadcast %cst_89 : f32 to vector<8x128xf32>
    %218 = arith.mulf %217, %216 : vector<8x128xf32>
    %219 = math.tanh %218 : vector<8x128xf32>
    %cst_90 = arith.constant 5.000000e-01 : f32
    %220 = vector.broadcast %cst_90 : f32 to vector<8x128xf32>
    %221 = arith.mulf %220, %219 : vector<8x128xf32>
    %cst_91 = arith.constant 5.000000e-01 : f32
    %222 = vector.broadcast %cst_91 : f32 to vector<8x128xf32>
    %223 = arith.addf %221, %222 : vector<8x128xf32>
    %224 = vector.extract_strided_slice %215 {offsets = [0, 128], sizes = [8, 128], strides = [1, 1]} : vector<8x512xf32> to vector<8x128xf32>
    %cst_92 = arith.constant 5.000000e-01 : f32
    %225 = vector.broadcast %cst_92 : f32 to vector<8x128xf32>
    %226 = arith.mulf %225, %224 : vector<8x128xf32>
    %227 = math.tanh %226 : vector<8x128xf32>
    %cst_93 = arith.constant 5.000000e-01 : f32
    %228 = vector.broadcast %cst_93 : f32 to vector<8x128xf32>
    %229 = arith.mulf %228, %227 : vector<8x128xf32>
    %cst_94 = arith.constant 5.000000e-01 : f32
    %230 = vector.broadcast %cst_94 : f32 to vector<8x128xf32>
    %231 = arith.addf %229, %230 : vector<8x128xf32>
    %232 = vector.extract_strided_slice %215 {offsets = [0, 256], sizes = [8, 128], strides = [1, 1]} : vector<8x512xf32> to vector<8x128xf32>
    %233 = math.tanh %232 : vector<8x128xf32>
    %234 = vector.extract_strided_slice %215 {offsets = [0, 384], sizes = [8, 128], strides = [1, 1]} : vector<8x512xf32> to vector<8x128xf32>
    %cst_95 = arith.constant 5.000000e-01 : f32
    %235 = vector.broadcast %cst_95 : f32 to vector<8x128xf32>
    %236 = arith.mulf %235, %234 : vector<8x128xf32>
    %237 = math.tanh %236 : vector<8x128xf32>
    %cst_96 = arith.constant 5.000000e-01 : f32
    %238 = vector.broadcast %cst_96 : f32 to vector<8x128xf32>
    %239 = arith.mulf %238, %237 : vector<8x128xf32>
    %cst_97 = arith.constant 5.000000e-01 : f32
    %240 = vector.broadcast %cst_97 : f32 to vector<8x128xf32>
    %241 = arith.addf %239, %240 : vector<8x128xf32>
    %242 = arith.mulf %231, %203 : vector<8x128xf32>
    %243 = arith.mulf %223, %233 : vector<8x128xf32>
    %244 = arith.addf %242, %243 : vector<8x128xf32>
    %245 = math.tanh %244 : vector<8x128xf32>
    %246 = arith.mulf %241, %245 : vector<8x128xf32>
    %247 = arith.index_cast %c5_i32 : i32 to index
    %c0_98 = arith.constant 0 : index
    %c0_99 = arith.constant 0 : index
    %248 = vector.load %arg4[%247, %c0_98, %c0_99] : memref<16x8x128xf32, #tpu.memory_space<vmem>>, vector<1x8x128xf32>
    %249 = vector.shape_cast %248 : vector<1x8x128xf32> to vector<8x128xf32>
    %250 = vector.shape_cast %246 : vector<8x128xf32> to vector<1x8x128xf32>
    tpu.vector_store %arg4[%247, %c0_98, %c0_99], %250 {strides = array<i32>} : memref<16x8x128xf32, #tpu.memory_space<vmem>>, vector<1x8x128xf32>,
    %c6_i32 = arith.constant 6 : i32
    %251 = arith.index_cast %c6_i32 : i32 to index
    %c0_100 = arith.constant 0 : index
    %c0_101 = arith.constant 0 : index
    %252 = vector.load %arg2[%251, %c0_100, %c0_101] : memref<16x8x512xf32, #tpu.memory_space<vmem>>, vector<1x8x512xf32>
    %253 = vector.shape_cast %252 : vector<1x8x512xf32> to vector<8x512xf32>
    %c0_102 = arith.constant 0 : index
    %c0_103 = arith.constant 0 : index
    %254 = vector.load %arg5[%c0_102, %c0_103] : memref<128x512xf32, #tpu.memory_space<vmem>>, vector<128x512xf32>
    %cst_104 = arith.constant dense<0.000000e+00> : vector<8x512xf32>
    %255 = tpu.matmul %246, %254, %cst_104 {dimension_numbers = #tpu.dot_dimension_numbers<[1], [0], [0], [1], [0, 0, 1, 1], [], []>} : vector<8x128xf32>, vector<128x512xf32>, vector<8x512xf32> -> vector<8x512xf32>
    %256 = arith.addf %253, %255 : vector<8x512xf32>
    %257 = vector.extract_strided_slice %256 {offsets = [0, 0], sizes = [8, 128], strides = [1, 1]} : vector<8x512xf32> to vector<8x128xf32>
    %cst_105 = arith.constant 5.000000e-01 : f32
    %258 = vector.broadcast %cst_105 : f32 to vector<8x128xf32>
    %259 = arith.mulf %258, %257 : vector<8x128xf32>
    %260 = math.tanh %259 : vector<8x128xf32>
    %cst_106 = arith.constant 5.000000e-01 : f32
    %261 = vector.broadcast %cst_106 : f32 to vector<8x128xf32>
    %262 = arith.mulf %261, %260 : vector<8x128xf32>
    %cst_107 = arith.constant 5.000000e-01 : f32
    %263 = vector.broadcast %cst_107 : f32 to vector<8x128xf32>
    %264 = arith.addf %262, %263 : vector<8x128xf32>
    %265 = vector.extract_strided_slice %256 {offsets = [0, 128], sizes = [8, 128], strides = [1, 1]} : vector<8x512xf32> to vector<8x128xf32>
    %cst_108 = arith.constant 5.000000e-01 : f32
    %266 = vector.broadcast %cst_108 : f32 to vector<8x128xf32>
    %267 = arith.mulf %266, %265 : vector<8x128xf32>
    %268 = math.tanh %267 : vector<8x128xf32>
    %cst_109 = arith.constant 5.000000e-01 : f32
    %269 = vector.broadcast %cst_109 : f32 to vector<8x128xf32>
    %270 = arith.mulf %269, %268 : vector<8x128xf32>
    %cst_110 = arith.constant 5.000000e-01 : f32
    %271 = vector.broadcast %cst_110 : f32 to vector<8x128xf32>
    %272 = arith.addf %270, %271 : vector<8x128xf32>
    %273 = vector.extract_strided_slice %256 {offsets = [0, 256], sizes = [8, 128], strides = [1, 1]} : vector<8x512xf32> to vector<8x128xf32>
    %274 = math.tanh %273 : vector<8x128xf32>
    %275 = vector.extract_strided_slice %256 {offsets = [0, 384], sizes = [8, 128], strides = [1, 1]} : vector<8x512xf32> to vector<8x128xf32>
    %cst_111 = arith.constant 5.000000e-01 : f32
    %276 = vector.broadcast %cst_111 : f32 to vector<8x128xf32>
    %277 = arith.mulf %276, %275 : vector<8x128xf32>
    %278 = math.tanh %277 : vector<8x128xf32>
    %cst_112 = arith.constant 5.000000e-01 : f32
    %279 = vector.broadcast %cst_112 : f32 to vector<8x128xf32>
    %280 = arith.mulf %279, %278 : vector<8x128xf32>
    %cst_113 = arith.constant 5.000000e-01 : f32
    %281 = vector.broadcast %cst_113 : f32 to vector<8x128xf32>
    %282 = arith.addf %280, %281 : vector<8x128xf32>
    %283 = arith.mulf %272, %244 : vector<8x128xf32>
    %284 = arith.mulf %264, %274 : vector<8x128xf32>
    %285 = arith.addf %283, %284 : vector<8x128xf32>
    %286 = math.tanh %285 : vector<8x128xf32>
    %287 = arith.mulf %282, %286 : vector<8x128xf32>
    %288 = arith.index_cast %c6_i32 : i32 to index
    %c0_114 = arith.constant 0 : index
    %c0_115 = arith.constant 0 : index
    %289 = vector.load %arg4[%288, %c0_114, %c0_115] : memref<16x8x128xf32, #tpu.memory_space<vmem>>, vector<1x8x128xf32>
    %290 = vector.shape_cast %289 : vector<1x8x128xf32> to vector<8x128xf32>
    %291 = vector.shape_cast %287 : vector<8x128xf32> to vector<1x8x128xf32>
    tpu.vector_store %arg4[%288, %c0_114, %c0_115], %291 {strides = array<i32>} : memref<16x8x128xf32, #tpu.memory_space<vmem>>, vector<1x8x128xf32>,
    %c7_i32 = arith.constant 7 : i32
    %292 = arith.index_cast %c7_i32 : i32 to index
    %c0_116 = arith.constant 0 : index
    %c0_117 = arith.constant 0 : index
    %293 = vector.load %arg2[%292, %c0_116, %c0_117] : memref<16x8x512xf32, #tpu.memory_space<vmem>>, vector<1x8x512xf32>
    %294 = vector.shape_cast %293 : vector<1x8x512xf32> to vector<8x512xf32>
    %c0_118 = arith.constant 0 : index
    %c0_119 = arith.constant 0 : index
    %295 = vector.load %arg5[%c0_118, %c0_119] : memref<128x512xf32, #tpu.memory_space<vmem>>, vector<128x512xf32>
    %cst_120 = arith.constant dense<0.000000e+00> : vector<8x512xf32>
    %296 = tpu.matmul %287, %295, %cst_120 {dimension_numbers = #tpu.dot_dimension_numbers<[1], [0], [0], [1], [0, 0, 1, 1], [], []>} : vector<8x128xf32>, vector<128x512xf32>, vector<8x512xf32> -> vector<8x512xf32>
    %297 = arith.addf %294, %296 : vector<8x512xf32>
    %298 = vector.extract_strided_slice %297 {offsets = [0, 0], sizes = [8, 128], strides = [1, 1]} : vector<8x512xf32> to vector<8x128xf32>
    %cst_121 = arith.constant 5.000000e-01 : f32
    %299 = vector.broadcast %cst_121 : f32 to vector<8x128xf32>
    %300 = arith.mulf %299, %298 : vector<8x128xf32>
    %301 = math.tanh %300 : vector<8x128xf32>
    %cst_122 = arith.constant 5.000000e-01 : f32
    %302 = vector.broadcast %cst_122 : f32 to vector<8x128xf32>
    %303 = arith.mulf %302, %301 : vector<8x128xf32>
    %cst_123 = arith.constant 5.000000e-01 : f32
    %304 = vector.broadcast %cst_123 : f32 to vector<8x128xf32>
    %305 = arith.addf %303, %304 : vector<8x128xf32>
    %306 = vector.extract_strided_slice %297 {offsets = [0, 128], sizes = [8, 128], strides = [1, 1]} : vector<8x512xf32> to vector<8x128xf32>
    %cst_124 = arith.constant 5.000000e-01 : f32
    %307 = vector.broadcast %cst_124 : f32 to vector<8x128xf32>
    %308 = arith.mulf %307, %306 : vector<8x128xf32>
    %309 = math.tanh %308 : vector<8x128xf32>
    %cst_125 = arith.constant 5.000000e-01 : f32
    %310 = vector.broadcast %cst_125 : f32 to vector<8x128xf32>
    %311 = arith.mulf %310, %309 : vector<8x128xf32>
    %cst_126 = arith.constant 5.000000e-01 : f32
    %312 = vector.broadcast %cst_126 : f32 to vector<8x128xf32>
    %313 = arith.addf %311, %312 : vector<8x128xf32>
    %314 = vector.extract_strided_slice %297 {offsets = [0, 256], sizes = [8, 128], strides = [1, 1]} : vector<8x512xf32> to vector<8x128xf32>
    %315 = math.tanh %314 : vector<8x128xf32>
    %316 = vector.extract_strided_slice %297 {offsets = [0, 384], sizes = [8, 128], strides = [1, 1]} : vector<8x512xf32> to vector<8x128xf32>
    %cst_127 = arith.constant 5.000000e-01 : f32
    %317 = vector.broadcast %cst_127 : f32 to vector<8x128xf32>
    %318 = arith.mulf %317, %316 : vector<8x128xf32>
    %319 = math.tanh %318 : vector<8x128xf32>
    %cst_128 = arith.constant 5.000000e-01 : f32
    %320 = vector.broadcast %cst_128 : f32 to vector<8x128xf32>
    %321 = arith.mulf %320, %319 : vector<8x128xf32>
    %cst_129 = arith.constant 5.000000e-01 : f32
    %322 = vector.broadcast %cst_129 : f32 to vector<8x128xf32>
    %323 = arith.addf %321, %322 : vector<8x128xf32>
    %324 = arith.mulf %313, %285 : vector<8x128xf32>
    %325 = arith.mulf %305, %315 : vector<8x128xf32>
    %326 = arith.addf %324, %325 : vector<8x128xf32>
    %327 = math.tanh %326 : vector<8x128xf32>
    %328 = arith.mulf %323, %327 : vector<8x128xf32>
    %329 = arith.index_cast %c7_i32 : i32 to index
    %c0_130 = arith.constant 0 : index
    %c0_131 = arith.constant 0 : index
    %330 = vector.load %arg4[%329, %c0_130, %c0_131] : memref<16x8x128xf32, #tpu.memory_space<vmem>>, vector<1x8x128xf32>
    %331 = vector.shape_cast %330 : vector<1x8x128xf32> to vector<8x128xf32>
    %332 = vector.shape_cast %328 : vector<8x128xf32> to vector<1x8x128xf32>
    tpu.vector_store %arg4[%329, %c0_130, %c0_131], %332 {strides = array<i32>} : memref<16x8x128xf32, #tpu.memory_space<vmem>>, vector<1x8x128xf32>,
    %c8_i32 = arith.constant 8 : i32
    %333 = arith.index_cast %c8_i32 : i32 to index
    %c0_132 = arith.constant 0 : index
    %c0_133 = arith.constant 0 : index
    %334 = vector.load %arg2[%333, %c0_132, %c0_133] : memref<16x8x512xf32, #tpu.memory_space<vmem>>, vector<1x8x512xf32>
    %335 = vector.shape_cast %334 : vector<1x8x512xf32> to vector<8x512xf32>
    %c0_134 = arith.constant 0 : index
    %c0_135 = arith.constant 0 : index
    %336 = vector.load %arg5[%c0_134, %c0_135] : memref<128x512xf32, #tpu.memory_space<vmem>>, vector<128x512xf32>
    %cst_136 = arith.constant dense<0.000000e+00> : vector<8x512xf32>
    %337 = tpu.matmul %328, %336, %cst_136 {dimension_numbers = #tpu.dot_dimension_numbers<[1], [0], [0], [1], [0, 0, 1, 1], [], []>} : vector<8x128xf32>, vector<128x512xf32>, vector<8x512xf32> -> vector<8x512xf32>
    %338 = arith.addf %335, %337 : vector<8x512xf32>
    %339 = vector.extract_strided_slice %338 {offsets = [0, 0], sizes = [8, 128], strides = [1, 1]} : vector<8x512xf32> to vector<8x128xf32>
    %cst_137 = arith.constant 5.000000e-01 : f32
    %340 = vector.broadcast %cst_137 : f32 to vector<8x128xf32>
    %341 = arith.mulf %340, %339 : vector<8x128xf32>
    %342 = math.tanh %341 : vector<8x128xf32>
    %cst_138 = arith.constant 5.000000e-01 : f32
    %343 = vector.broadcast %cst_138 : f32 to vector<8x128xf32>
    %344 = arith.mulf %343, %342 : vector<8x128xf32>
    %cst_139 = arith.constant 5.000000e-01 : f32
    %345 = vector.broadcast %cst_139 : f32 to vector<8x128xf32>
    %346 = arith.addf %344, %345 : vector<8x128xf32>
    %347 = vector.extract_strided_slice %338 {offsets = [0, 128], sizes = [8, 128], strides = [1, 1]} : vector<8x512xf32> to vector<8x128xf32>
    %cst_140 = arith.constant 5.000000e-01 : f32
    %348 = vector.broadcast %cst_140 : f32 to vector<8x128xf32>
    %349 = arith.mulf %348, %347 : vector<8x128xf32>
    %350 = math.tanh %349 : vector<8x128xf32>
    %cst_141 = arith.constant 5.000000e-01 : f32
    %351 = vector.broadcast %cst_141 : f32 to vector<8x128xf32>
    %352 = arith.mulf %351, %350 : vector<8x128xf32>
    %cst_142 = arith.constant 5.000000e-01 : f32
    %353 = vector.broadcast %cst_142 : f32 to vector<8x128xf32>
    %354 = arith.addf %352, %353 : vector<8x128xf32>
    %355 = vector.extract_strided_slice %338 {offsets = [0, 256], sizes = [8, 128], strides = [1, 1]} : vector<8x512xf32> to vector<8x128xf32>
    %356 = math.tanh %355 : vector<8x128xf32>
    %357 = vector.extract_strided_slice %338 {offsets = [0, 384], sizes = [8, 128], strides = [1, 1]} : vector<8x512xf32> to vector<8x128xf32>
    %cst_143 = arith.constant 5.000000e-01 : f32
    %358 = vector.broadcast %cst_143 : f32 to vector<8x128xf32>
    %359 = arith.mulf %358, %357 : vector<8x128xf32>
    %360 = math.tanh %359 : vector<8x128xf32>
    %cst_144 = arith.constant 5.000000e-01 : f32
    %361 = vector.broadcast %cst_144 : f32 to vector<8x128xf32>
    %362 = arith.mulf %361, %360 : vector<8x128xf32>
    %cst_145 = arith.constant 5.000000e-01 : f32
    %363 = vector.broadcast %cst_145 : f32 to vector<8x128xf32>
    %364 = arith.addf %362, %363 : vector<8x128xf32>
    %365 = arith.mulf %354, %326 : vector<8x128xf32>
    %366 = arith.mulf %346, %356 : vector<8x128xf32>
    %367 = arith.addf %365, %366 : vector<8x128xf32>
    %368 = math.tanh %367 : vector<8x128xf32>
    %369 = arith.mulf %364, %368 : vector<8x128xf32>
    %370 = arith.index_cast %c8_i32 : i32 to index
    %c0_146 = arith.constant 0 : index
    %c0_147 = arith.constant 0 : index
    %371 = vector.load %arg4[%370, %c0_146, %c0_147] : memref<16x8x128xf32, #tpu.memory_space<vmem>>, vector<1x8x128xf32>
    %372 = vector.shape_cast %371 : vector<1x8x128xf32> to vector<8x128xf32>
    %373 = vector.shape_cast %369 : vector<8x128xf32> to vector<1x8x128xf32>
    tpu.vector_store %arg4[%370, %c0_146, %c0_147], %373 {strides = array<i32>} : memref<16x8x128xf32, #tpu.memory_space<vmem>>, vector<1x8x128xf32>,
    %c9_i32 = arith.constant 9 : i32
    %374 = arith.index_cast %c9_i32 : i32 to index
    %c0_148 = arith.constant 0 : index
    %c0_149 = arith.constant 0 : index
    %375 = vector.load %arg2[%374, %c0_148, %c0_149] : memref<16x8x512xf32, #tpu.memory_space<vmem>>, vector<1x8x512xf32>
    %376 = vector.shape_cast %375 : vector<1x8x512xf32> to vector<8x512xf32>
    %c0_150 = arith.constant 0 : index
    %c0_151 = arith.constant 0 : index
    %377 = vector.load %arg5[%c0_150, %c0_151] : memref<128x512xf32, #tpu.memory_space<vmem>>, vector<128x512xf32>
    %cst_152 = arith.constant dense<0.000000e+00> : vector<8x512xf32>
    %378 = tpu.matmul %369, %377, %cst_152 {dimension_numbers = #tpu.dot_dimension_numbers<[1], [0], [0], [1], [0, 0, 1, 1], [], []>} : vector<8x128xf32>, vector<128x512xf32>, vector<8x512xf32> -> vector<8x512xf32>
    %379 = arith.addf %376, %378 : vector<8x512xf32>
    %380 = vector.extract_strided_slice %379 {offsets = [0, 0], sizes = [8, 128], strides = [1, 1]} : vector<8x512xf32> to vector<8x128xf32>
    %cst_153 = arith.constant 5.000000e-01 : f32
    %381 = vector.broadcast %cst_153 : f32 to vector<8x128xf32>
    %382 = arith.mulf %381, %380 : vector<8x128xf32>
    %383 = math.tanh %382 : vector<8x128xf32>
    %cst_154 = arith.constant 5.000000e-01 : f32
    %384 = vector.broadcast %cst_154 : f32 to vector<8x128xf32>
    %385 = arith.mulf %384, %383 : vector<8x128xf32>
    %cst_155 = arith.constant 5.000000e-01 : f32
    %386 = vector.broadcast %cst_155 : f32 to vector<8x128xf32>
    %387 = arith.addf %385, %386 : vector<8x128xf32>
    %388 = vector.extract_strided_slice %379 {offsets = [0, 128], sizes = [8, 128], strides = [1, 1]} : vector<8x512xf32> to vector<8x128xf32>
    %cst_156 = arith.constant 5.000000e-01 : f32
    %389 = vector.broadcast %cst_156 : f32 to vector<8x128xf32>
    %390 = arith.mulf %389, %388 : vector<8x128xf32>
    %391 = math.tanh %390 : vector<8x128xf32>
    %cst_157 = arith.constant 5.000000e-01 : f32
    %392 = vector.broadcast %cst_157 : f32 to vector<8x128xf32>
    %393 = arith.mulf %392, %391 : vector<8x128xf32>
    %cst_158 = arith.constant 5.000000e-01 : f32
    %394 = vector.broadcast %cst_158 : f32 to vector<8x128xf32>
    %395 = arith.addf %393, %394 : vector<8x128xf32>
    %396 = vector.extract_strided_slice %379 {offsets = [0, 256], sizes = [8, 128], strides = [1, 1]} : vector<8x512xf32> to vector<8x128xf32>
    %397 = math.tanh %396 : vector<8x128xf32>
    %398 = vector.extract_strided_slice %379 {offsets = [0, 384], sizes = [8, 128], strides = [1, 1]} : vector<8x512xf32> to vector<8x128xf32>
    %cst_159 = arith.constant 5.000000e-01 : f32
    %399 = vector.broadcast %cst_159 : f32 to vector<8x128xf32>
    %400 = arith.mulf %399, %398 : vector<8x128xf32>
    %401 = math.tanh %400 : vector<8x128xf32>
    %cst_160 = arith.constant 5.000000e-01 : f32
    %402 = vector.broadcast %cst_160 : f32 to vector<8x128xf32>
    %403 = arith.mulf %402, %401 : vector<8x128xf32>
    %cst_161 = arith.constant 5.000000e-01 : f32
    %404 = vector.broadcast %cst_161 : f32 to vector<8x128xf32>
    %405 = arith.addf %403, %404 : vector<8x128xf32>
    %406 = arith.mulf %395, %367 : vector<8x128xf32>
    %407 = arith.mulf %387, %397 : vector<8x128xf32>
    %408 = arith.addf %406, %407 : vector<8x128xf32>
    %409 = math.tanh %408 : vector<8x128xf32>
    %410 = arith.mulf %405, %409 : vector<8x128xf32>
    %411 = arith.index_cast %c9_i32 : i32 to index
    %c0_162 = arith.constant 0 : index
    %c0_163 = arith.constant 0 : index
    %412 = vector.load %arg4[%411, %c0_162, %c0_163] : memref<16x8x128xf32, #tpu.memory_space<vmem>>, vector<1x8x128xf32>
    %413 = vector.shape_cast %412 : vector<1x8x128xf32> to vector<8x128xf32>
    %414 = vector.shape_cast %410 : vector<8x128xf32> to vector<1x8x128xf32>
    tpu.vector_store %arg4[%411, %c0_162, %c0_163], %414 {strides = array<i32>} : memref<16x8x128xf32, #tpu.memory_space<vmem>>, vector<1x8x128xf32>,
    %c10_i32 = arith.constant 10 : i32
    %415 = arith.index_cast %c10_i32 : i32 to index
    %c0_164 = arith.constant 0 : index
    %c0_165 = arith.constant 0 : index
    %416 = vector.load %arg2[%415, %c0_164, %c0_165] : memref<16x8x512xf32, #tpu.memory_space<vmem>>, vector<1x8x512xf32>
    %417 = vector.shape_cast %416 : vector<1x8x512xf32> to vector<8x512xf32>
    %c0_166 = arith.constant 0 : index
    %c0_167 = arith.constant 0 : index
    %418 = vector.load %arg5[%c0_166, %c0_167] : memref<128x512xf32, #tpu.memory_space<vmem>>, vector<128x512xf32>
    %cst_168 = arith.constant dense<0.000000e+00> : vector<8x512xf32>
    %419 = tpu.matmul %410, %418, %cst_168 {dimension_numbers = #tpu.dot_dimension_numbers<[1], [0], [0], [1], [0, 0, 1, 1], [], []>} : vector<8x128xf32>, vector<128x512xf32>, vector<8x512xf32> -> vector<8x512xf32>
    %420 = arith.addf %417, %419 : vector<8x512xf32>
    %421 = vector.extract_strided_slice %420 {offsets = [0, 0], sizes = [8, 128], strides = [1, 1]} : vector<8x512xf32> to vector<8x128xf32>
    %cst_169 = arith.constant 5.000000e-01 : f32
    %422 = vector.broadcast %cst_169 : f32 to vector<8x128xf32>
    %423 = arith.mulf %422, %421 : vector<8x128xf32>
    %424 = math.tanh %423 : vector<8x128xf32>
    %cst_170 = arith.constant 5.000000e-01 : f32
    %425 = vector.broadcast %cst_170 : f32 to vector<8x128xf32>
    %426 = arith.mulf %425, %424 : vector<8x128xf32>
    %cst_171 = arith.constant 5.000000e-01 : f32
    %427 = vector.broadcast %cst_171 : f32 to vector<8x128xf32>
    %428 = arith.addf %426, %427 : vector<8x128xf32>
    %429 = vector.extract_strided_slice %420 {offsets = [0, 128], sizes = [8, 128], strides = [1, 1]} : vector<8x512xf32> to vector<8x128xf32>
    %cst_172 = arith.constant 5.000000e-01 : f32
    %430 = vector.broadcast %cst_172 : f32 to vector<8x128xf32>
    %431 = arith.mulf %430, %429 : vector<8x128xf32>
    %432 = math.tanh %431 : vector<8x128xf32>
    %cst_173 = arith.constant 5.000000e-01 : f32
    %433 = vector.broadcast %cst_173 : f32 to vector<8x128xf32>
    %434 = arith.mulf %433, %432 : vector<8x128xf32>
    %cst_174 = arith.constant 5.000000e-01 : f32
    %435 = vector.broadcast %cst_174 : f32 to vector<8x128xf32>
    %436 = arith.addf %434, %435 : vector<8x128xf32>
    %437 = vector.extract_strided_slice %420 {offsets = [0, 256], sizes = [8, 128], strides = [1, 1]} : vector<8x512xf32> to vector<8x128xf32>
    %438 = math.tanh %437 : vector<8x128xf32>
    %439 = vector.extract_strided_slice %420 {offsets = [0, 384], sizes = [8, 128], strides = [1, 1]} : vector<8x512xf32> to vector<8x128xf32>
    %cst_175 = arith.constant 5.000000e-01 : f32
    %440 = vector.broadcast %cst_175 : f32 to vector<8x128xf32>
    %441 = arith.mulf %440, %439 : vector<8x128xf32>
    %442 = math.tanh %441 : vector<8x128xf32>
    %cst_176 = arith.constant 5.000000e-01 : f32
    %443 = vector.broadcast %cst_176 : f32 to vector<8x128xf32>
    %444 = arith.mulf %443, %442 : vector<8x128xf32>
    %cst_177 = arith.constant 5.000000e-01 : f32
    %445 = vector.broadcast %cst_177 : f32 to vector<8x128xf32>
    %446 = arith.addf %444, %445 : vector<8x128xf32>
    %447 = arith.mulf %436, %408 : vector<8x128xf32>
    %448 = arith.mulf %428, %438 : vector<8x128xf32>
    %449 = arith.addf %447, %448 : vector<8x128xf32>
    %450 = math.tanh %449 : vector<8x128xf32>
    %451 = arith.mulf %446, %450 : vector<8x128xf32>
    %452 = arith.index_cast %c10_i32 : i32 to index
    %c0_178 = arith.constant 0 : index
    %c0_179 = arith.constant 0 : index
    %453 = vector.load %arg4[%452, %c0_178, %c0_179] : memref<16x8x128xf32, #tpu.memory_space<vmem>>, vector<1x8x128xf32>
    %454 = vector.shape_cast %453 : vector<1x8x128xf32> to vector<8x128xf32>
    %455 = vector.shape_cast %451 : vector<8x128xf32> to vector<1x8x128xf32>
    tpu.vector_store %arg4[%452, %c0_178, %c0_179], %455 {strides = array<i32>} : memref<16x8x128xf32, #tpu.memory_space<vmem>>, vector<1x8x128xf32>,
    %c11_i32 = arith.constant 11 : i32
    %456 = arith.index_cast %c11_i32 : i32 to index
    %c0_180 = arith.constant 0 : index
    %c0_181 = arith.constant 0 : index
    %457 = vector.load %arg2[%456, %c0_180, %c0_181] : memref<16x8x512xf32, #tpu.memory_space<vmem>>, vector<1x8x512xf32>
    %458 = vector.shape_cast %457 : vector<1x8x512xf32> to vector<8x512xf32>
    %c0_182 = arith.constant 0 : index
    %c0_183 = arith.constant 0 : index
    %459 = vector.load %arg5[%c0_182, %c0_183] : memref<128x512xf32, #tpu.memory_space<vmem>>, vector<128x512xf32>
    %cst_184 = arith.constant dense<0.000000e+00> : vector<8x512xf32>
    %460 = tpu.matmul %451, %459, %cst_184 {dimension_numbers = #tpu.dot_dimension_numbers<[1], [0], [0], [1], [0, 0, 1, 1], [], []>} : vector<8x128xf32>, vector<128x512xf32>, vector<8x512xf32> -> vector<8x512xf32>
    %461 = arith.addf %458, %460 : vector<8x512xf32>
    %462 = vector.extract_strided_slice %461 {offsets = [0, 0], sizes = [8, 128], strides = [1, 1]} : vector<8x512xf32> to vector<8x128xf32>
    %cst_185 = arith.constant 5.000000e-01 : f32
    %463 = vector.broadcast %cst_185 : f32 to vector<8x128xf32>
    %464 = arith.mulf %463, %462 : vector<8x128xf32>
    %465 = math.tanh %464 : vector<8x128xf32>
    %cst_186 = arith.constant 5.000000e-01 : f32
    %466 = vector.broadcast %cst_186 : f32 to vector<8x128xf32>
    %467 = arith.mulf %466, %465 : vector<8x128xf32>
    %cst_187 = arith.constant 5.000000e-01 : f32
    %468 = vector.broadcast %cst_187 : f32 to vector<8x128xf32>
    %469 = arith.addf %467, %468 : vector<8x128xf32>
    %470 = vector.extract_strided_slice %461 {offsets = [0, 128], sizes = [8, 128], strides = [1, 1]} : vector<8x512xf32> to vector<8x128xf32>
    %cst_188 = arith.constant 5.000000e-01 : f32
    %471 = vector.broadcast %cst_188 : f32 to vector<8x128xf32>
    %472 = arith.mulf %471, %470 : vector<8x128xf32>
    %473 = math.tanh %472 : vector<8x128xf32>
    %cst_189 = arith.constant 5.000000e-01 : f32
    %474 = vector.broadcast %cst_189 : f32 to vector<8x128xf32>
    %475 = arith.mulf %474, %473 : vector<8x128xf32>
    %cst_190 = arith.constant 5.000000e-01 : f32
    %476 = vector.broadcast %cst_190 : f32 to vector<8x128xf32>
    %477 = arith.addf %475, %476 : vector<8x128xf32>
    %478 = vector.extract_strided_slice %461 {offsets = [0, 256], sizes = [8, 128], strides = [1, 1]} : vector<8x512xf32> to vector<8x128xf32>
    %479 = math.tanh %478 : vector<8x128xf32>
    %480 = vector.extract_strided_slice %461 {offsets = [0, 384], sizes = [8, 128], strides = [1, 1]} : vector<8x512xf32> to vector<8x128xf32>
    %cst_191 = arith.constant 5.000000e-01 : f32
    %481 = vector.broadcast %cst_191 : f32 to vector<8x128xf32>
    %482 = arith.mulf %481, %480 : vector<8x128xf32>
    %483 = math.tanh %482 : vector<8x128xf32>
    %cst_192 = arith.constant 5.000000e-01 : f32
    %484 = vector.broadcast %cst_192 : f32 to vector<8x128xf32>
    %485 = arith.mulf %484, %483 : vector<8x128xf32>
    %cst_193 = arith.constant 5.000000e-01 : f32
    %486 = vector.broadcast %cst_193 : f32 to vector<8x128xf32>
    %487 = arith.addf %485, %486 : vector<8x128xf32>
    %488 = arith.mulf %477, %449 : vector<8x128xf32>
    %489 = arith.mulf %469, %479 : vector<8x128xf32>
    %490 = arith.addf %488, %489 : vector<8x128xf32>
    %491 = math.tanh %490 : vector<8x128xf32>
    %492 = arith.mulf %487, %491 : vector<8x128xf32>
    %493 = arith.index_cast %c11_i32 : i32 to index
    %c0_194 = arith.constant 0 : index
    %c0_195 = arith.constant 0 : index
    %494 = vector.load %arg4[%493, %c0_194, %c0_195] : memref<16x8x128xf32, #tpu.memory_space<vmem>>, vector<1x8x128xf32>
    %495 = vector.shape_cast %494 : vector<1x8x128xf32> to vector<8x128xf32>
    %496 = vector.shape_cast %492 : vector<8x128xf32> to vector<1x8x128xf32>
    tpu.vector_store %arg4[%493, %c0_194, %c0_195], %496 {strides = array<i32>} : memref<16x8x128xf32, #tpu.memory_space<vmem>>, vector<1x8x128xf32>,
    %c12_i32 = arith.constant 12 : i32
    %497 = arith.index_cast %c12_i32 : i32 to index
    %c0_196 = arith.constant 0 : index
    %c0_197 = arith.constant 0 : index
    %498 = vector.load %arg2[%497, %c0_196, %c0_197] : memref<16x8x512xf32, #tpu.memory_space<vmem>>, vector<1x8x512xf32>
    %499 = vector.shape_cast %498 : vector<1x8x512xf32> to vector<8x512xf32>
    %c0_198 = arith.constant 0 : index
    %c0_199 = arith.constant 0 : index
    %500 = vector.load %arg5[%c0_198, %c0_199] : memref<128x512xf32, #tpu.memory_space<vmem>>, vector<128x512xf32>
    %cst_200 = arith.constant dense<0.000000e+00> : vector<8x512xf32>
    %501 = tpu.matmul %492, %500, %cst_200 {dimension_numbers = #tpu.dot_dimension_numbers<[1], [0], [0], [1], [0, 0, 1, 1], [], []>} : vector<8x128xf32>, vector<128x512xf32>, vector<8x512xf32> -> vector<8x512xf32>
    %502 = arith.addf %499, %501 : vector<8x512xf32>
    %503 = vector.extract_strided_slice %502 {offsets = [0, 0], sizes = [8, 128], strides = [1, 1]} : vector<8x512xf32> to vector<8x128xf32>
    %cst_201 = arith.constant 5.000000e-01 : f32
    %504 = vector.broadcast %cst_201 : f32 to vector<8x128xf32>
    %505 = arith.mulf %504, %503 : vector<8x128xf32>
    %506 = math.tanh %505 : vector<8x128xf32>
    %cst_202 = arith.constant 5.000000e-01 : f32
    %507 = vector.broadcast %cst_202 : f32 to vector<8x128xf32>
    %508 = arith.mulf %507, %506 : vector<8x128xf32>
    %cst_203 = arith.constant 5.000000e-01 : f32
    %509 = vector.broadcast %cst_203 : f32 to vector<8x128xf32>
    %510 = arith.addf %508, %509 : vector<8x128xf32>
    %511 = vector.extract_strided_slice %502 {offsets = [0, 128], sizes = [8, 128], strides = [1, 1]} : vector<8x512xf32> to vector<8x128xf32>
    %cst_204 = arith.constant 5.000000e-01 : f32
    %512 = vector.broadcast %cst_204 : f32 to vector<8x128xf32>
    %513 = arith.mulf %512, %511 : vector<8x128xf32>
    %514 = math.tanh %513 : vector<8x128xf32>
    %cst_205 = arith.constant 5.000000e-01 : f32
    %515 = vector.broadcast %cst_205 : f32 to vector<8x128xf32>
    %516 = arith.mulf %515, %514 : vector<8x128xf32>
    %cst_206 = arith.constant 5.000000e-01 : f32
    %517 = vector.broadcast %cst_206 : f32 to vector<8x128xf32>
    %518 = arith.addf %516, %517 : vector<8x128xf32>
    %519 = vector.extract_strided_slice %502 {offsets = [0, 256], sizes = [8, 128], strides = [1, 1]} : vector<8x512xf32> to vector<8x128xf32>
    %520 = math.tanh %519 : vector<8x128xf32>
    %521 = vector.extract_strided_slice %502 {offsets = [0, 384], sizes = [8, 128], strides = [1, 1]} : vector<8x512xf32> to vector<8x128xf32>
    %cst_207 = arith.constant 5.000000e-01 : f32
    %522 = vector.broadcast %cst_207 : f32 to vector<8x128xf32>
    %523 = arith.mulf %522, %521 : vector<8x128xf32>
    %524 = math.tanh %523 : vector<8x128xf32>
    %cst_208 = arith.constant 5.000000e-01 : f32
    %525 = vector.broadcast %cst_208 : f32 to vector<8x128xf32>
    %526 = arith.mulf %525, %524 : vector<8x128xf32>
    %cst_209 = arith.constant 5.000000e-01 : f32
    %527 = vector.broadcast %cst_209 : f32 to vector<8x128xf32>
    %528 = arith.addf %526, %527 : vector<8x128xf32>
    %529 = arith.mulf %518, %490 : vector<8x128xf32>
    %530 = arith.mulf %510, %520 : vector<8x128xf32>
    %531 = arith.addf %529, %530 : vector<8x128xf32>
    %532 = math.tanh %531 : vector<8x128xf32>
    %533 = arith.mulf %528, %532 : vector<8x128xf32>
    %534 = arith.index_cast %c12_i32 : i32 to index
    %c0_210 = arith.constant 0 : index
    %c0_211 = arith.constant 0 : index
    %535 = vector.load %arg4[%534, %c0_210, %c0_211] : memref<16x8x128xf32, #tpu.memory_space<vmem>>, vector<1x8x128xf32>
    %536 = vector.shape_cast %535 : vector<1x8x128xf32> to vector<8x128xf32>
    %537 = vector.shape_cast %533 : vector<8x128xf32> to vector<1x8x128xf32>
    tpu.vector_store %arg4[%534, %c0_210, %c0_211], %537 {strides = array<i32>} : memref<16x8x128xf32, #tpu.memory_space<vmem>>, vector<1x8x128xf32>,
    %c13_i32 = arith.constant 13 : i32
    %538 = arith.index_cast %c13_i32 : i32 to index
    %c0_212 = arith.constant 0 : index
    %c0_213 = arith.constant 0 : index
    %539 = vector.load %arg2[%538, %c0_212, %c0_213] : memref<16x8x512xf32, #tpu.memory_space<vmem>>, vector<1x8x512xf32>
    %540 = vector.shape_cast %539 : vector<1x8x512xf32> to vector<8x512xf32>
    %c0_214 = arith.constant 0 : index
    %c0_215 = arith.constant 0 : index
    %541 = vector.load %arg5[%c0_214, %c0_215] : memref<128x512xf32, #tpu.memory_space<vmem>>, vector<128x512xf32>
    %cst_216 = arith.constant dense<0.000000e+00> : vector<8x512xf32>
    %542 = tpu.matmul %533, %541, %cst_216 {dimension_numbers = #tpu.dot_dimension_numbers<[1], [0], [0], [1], [0, 0, 1, 1], [], []>} : vector<8x128xf32>, vector<128x512xf32>, vector<8x512xf32> -> vector<8x512xf32>
    %543 = arith.addf %540, %542 : vector<8x512xf32>
    %544 = vector.extract_strided_slice %543 {offsets = [0, 0], sizes = [8, 128], strides = [1, 1]} : vector<8x512xf32> to vector<8x128xf32>
    %cst_217 = arith.constant 5.000000e-01 : f32
    %545 = vector.broadcast %cst_217 : f32 to vector<8x128xf32>
    %546 = arith.mulf %545, %544 : vector<8x128xf32>
    %547 = math.tanh %546 : vector<8x128xf32>
    %cst_218 = arith.constant 5.000000e-01 : f32
    %548 = vector.broadcast %cst_218 : f32 to vector<8x128xf32>
    %549 = arith.mulf %548, %547 : vector<8x128xf32>
    %cst_219 = arith.constant 5.000000e-01 : f32
    %550 = vector.broadcast %cst_219 : f32 to vector<8x128xf32>
    %551 = arith.addf %549, %550 : vector<8x128xf32>
    %552 = vector.extract_strided_slice %543 {offsets = [0, 128], sizes = [8, 128], strides = [1, 1]} : vector<8x512xf32> to vector<8x128xf32>
    %cst_220 = arith.constant 5.000000e-01 : f32
    %553 = vector.broadcast %cst_220 : f32 to vector<8x128xf32>
    %554 = arith.mulf %553, %552 : vector<8x128xf32>
    %555 = math.tanh %554 : vector<8x128xf32>
    %cst_221 = arith.constant 5.000000e-01 : f32
    %556 = vector.broadcast %cst_221 : f32 to vector<8x128xf32>
    %557 = arith.mulf %556, %555 : vector<8x128xf32>
    %cst_222 = arith.constant 5.000000e-01 : f32
    %558 = vector.broadcast %cst_222 : f32 to vector<8x128xf32>
    %559 = arith.addf %557, %558 : vector<8x128xf32>
    %560 = vector.extract_strided_slice %543 {offsets = [0, 256], sizes = [8, 128], strides = [1, 1]} : vector<8x512xf32> to vector<8x128xf32>
    %561 = math.tanh %560 : vector<8x128xf32>
    %562 = vector.extract_strided_slice %543 {offsets = [0, 384], sizes = [8, 128], strides = [1, 1]} : vector<8x512xf32> to vector<8x128xf32>
    %cst_223 = arith.constant 5.000000e-01 : f32
    %563 = vector.broadcast %cst_223 : f32 to vector<8x128xf32>
    %564 = arith.mulf %563, %562 : vector<8x128xf32>
    %565 = math.tanh %564 : vector<8x128xf32>
    %cst_224 = arith.constant 5.000000e-01 : f32
    %566 = vector.broadcast %cst_224 : f32 to vector<8x128xf32>
    %567 = arith.mulf %566, %565 : vector<8x128xf32>
    %cst_225 = arith.constant 5.000000e-01 : f32
    %568 = vector.broadcast %cst_225 : f32 to vector<8x128xf32>
    %569 = arith.addf %567, %568 : vector<8x128xf32>
    %570 = arith.mulf %559, %531 : vector<8x128xf32>
    %571 = arith.mulf %551, %561 : vector<8x128xf32>
    %572 = arith.addf %570, %571 : vector<8x128xf32>
    %573 = math.tanh %572 : vector<8x128xf32>
    %574 = arith.mulf %569, %573 : vector<8x128xf32>
    %575 = arith.index_cast %c13_i32 : i32 to index
    %c0_226 = arith.constant 0 : index
    %c0_227 = arith.constant 0 : index
    %576 = vector.load %arg4[%575, %c0_226, %c0_227] : memref<16x8x128xf32, #tpu.memory_space<vmem>>, vector<1x8x128xf32>
    %577 = vector.shape_cast %576 : vector<1x8x128xf32> to vector<8x128xf32>
    %578 = vector.shape_cast %574 : vector<8x128xf32> to vector<1x8x128xf32>
    tpu.vector_store %arg4[%575, %c0_226, %c0_227], %578 {strides = array<i32>} : memref<16x8x128xf32, #tpu.memory_space<vmem>>, vector<1x8x128xf32>,
    %c14_i32 = arith.constant 14 : i32
    %579 = arith.index_cast %c14_i32 : i32 to index
    %c0_228 = arith.constant 0 : index
    %c0_229 = arith.constant 0 : index
    %580 = vector.load %arg2[%579, %c0_228, %c0_229] : memref<16x8x512xf32, #tpu.memory_space<vmem>>, vector<1x8x512xf32>
    %581 = vector.shape_cast %580 : vector<1x8x512xf32> to vector<8x512xf32>
    %c0_230 = arith.constant 0 : index
    %c0_231 = arith.constant 0 : index
    %582 = vector.load %arg5[%c0_230, %c0_231] : memref<128x512xf32, #tpu.memory_space<vmem>>, vector<128x512xf32>
    %cst_232 = arith.constant dense<0.000000e+00> : vector<8x512xf32>
    %583 = tpu.matmul %574, %582, %cst_232 {dimension_numbers = #tpu.dot_dimension_numbers<[1], [0], [0], [1], [0, 0, 1, 1], [], []>} : vector<8x128xf32>, vector<128x512xf32>, vector<8x512xf32> -> vector<8x512xf32>
    %584 = arith.addf %581, %583 : vector<8x512xf32>
    %585 = vector.extract_strided_slice %584 {offsets = [0, 0], sizes = [8, 128], strides = [1, 1]} : vector<8x512xf32> to vector<8x128xf32>
    %cst_233 = arith.constant 5.000000e-01 : f32
    %586 = vector.broadcast %cst_233 : f32 to vector<8x128xf32>
    %587 = arith.mulf %586, %585 : vector<8x128xf32>
    %588 = math.tanh %587 : vector<8x128xf32>
    %cst_234 = arith.constant 5.000000e-01 : f32
    %589 = vector.broadcast %cst_234 : f32 to vector<8x128xf32>
    %590 = arith.mulf %589, %588 : vector<8x128xf32>
    %cst_235 = arith.constant 5.000000e-01 : f32
    %591 = vector.broadcast %cst_235 : f32 to vector<8x128xf32>
    %592 = arith.addf %590, %591 : vector<8x128xf32>
    %593 = vector.extract_strided_slice %584 {offsets = [0, 128], sizes = [8, 128], strides = [1, 1]} : vector<8x512xf32> to vector<8x128xf32>
    %cst_236 = arith.constant 5.000000e-01 : f32
    %594 = vector.broadcast %cst_236 : f32 to vector<8x128xf32>
    %595 = arith.mulf %594, %593 : vector<8x128xf32>
    %596 = math.tanh %595 : vector<8x128xf32>
    %cst_237 = arith.constant 5.000000e-01 : f32
    %597 = vector.broadcast %cst_237 : f32 to vector<8x128xf32>
    %598 = arith.mulf %597, %596 : vector<8x128xf32>
    %cst_238 = arith.constant 5.000000e-01 : f32
    %599 = vector.broadcast %cst_238 : f32 to vector<8x128xf32>
    %600 = arith.addf %598, %599 : vector<8x128xf32>
    %601 = vector.extract_strided_slice %584 {offsets = [0, 256], sizes = [8, 128], strides = [1, 1]} : vector<8x512xf32> to vector<8x128xf32>
    %602 = math.tanh %601 : vector<8x128xf32>
    %603 = vector.extract_strided_slice %584 {offsets = [0, 384], sizes = [8, 128], strides = [1, 1]} : vector<8x512xf32> to vector<8x128xf32>
    %cst_239 = arith.constant 5.000000e-01 : f32
    %604 = vector.broadcast %cst_239 : f32 to vector<8x128xf32>
    %605 = arith.mulf %604, %603 : vector<8x128xf32>
    %606 = math.tanh %605 : vector<8x128xf32>
    %cst_240 = arith.constant 5.000000e-01 : f32
    %607 = vector.broadcast %cst_240 : f32 to vector<8x128xf32>
    %608 = arith.mulf %607, %606 : vector<8x128xf32>
    %cst_241 = arith.constant 5.000000e-01 : f32
    %609 = vector.broadcast %cst_241 : f32 to vector<8x128xf32>
    %610 = arith.addf %608, %609 : vector<8x128xf32>
    %611 = arith.mulf %600, %572 : vector<8x128xf32>
    %612 = arith.mulf %592, %602 : vector<8x128xf32>
    %613 = arith.addf %611, %612 : vector<8x128xf32>
    %614 = math.tanh %613 : vector<8x128xf32>
    %615 = arith.mulf %610, %614 : vector<8x128xf32>
    %616 = arith.index_cast %c14_i32 : i32 to index
    %c0_242 = arith.constant 0 : index
    %c0_243 = arith.constant 0 : index
    %617 = vector.load %arg4[%616, %c0_242, %c0_243] : memref<16x8x128xf32, #tpu.memory_space<vmem>>, vector<1x8x128xf32>
    %618 = vector.shape_cast %617 : vector<1x8x128xf32> to vector<8x128xf32>
    %619 = vector.shape_cast %615 : vector<8x128xf32> to vector<1x8x128xf32>
    tpu.vector_store %arg4[%616, %c0_242, %c0_243], %619 {strides = array<i32>} : memref<16x8x128xf32, #tpu.memory_space<vmem>>, vector<1x8x128xf32>,
    %c15_i32 = arith.constant 15 : i32
    %620 = arith.index_cast %c15_i32 : i32 to index
    %c0_244 = arith.constant 0 : index
    %c0_245 = arith.constant 0 : index
    %621 = vector.load %arg2[%620, %c0_244, %c0_245] : memref<16x8x512xf32, #tpu.memory_space<vmem>>, vector<1x8x512xf32>
    %622 = vector.shape_cast %621 : vector<1x8x512xf32> to vector<8x512xf32>
    %c0_246 = arith.constant 0 : index
    %c0_247 = arith.constant 0 : index
    %623 = vector.load %arg5[%c0_246, %c0_247] : memref<128x512xf32, #tpu.memory_space<vmem>>, vector<128x512xf32>
    %cst_248 = arith.constant dense<0.000000e+00> : vector<8x512xf32>
    %624 = tpu.matmul %615, %623, %cst_248 {dimension_numbers = #tpu.dot_dimension_numbers<[1], [0], [0], [1], [0, 0, 1, 1], [], []>} : vector<8x128xf32>, vector<128x512xf32>, vector<8x512xf32> -> vector<8x512xf32>
    %625 = arith.addf %622, %624 : vector<8x512xf32>
    %626 = vector.extract_strided_slice %625 {offsets = [0, 0], sizes = [8, 128], strides = [1, 1]} : vector<8x512xf32> to vector<8x128xf32>
    %cst_249 = arith.constant 5.000000e-01 : f32
    %627 = vector.broadcast %cst_249 : f32 to vector<8x128xf32>
    %628 = arith.mulf %627, %626 : vector<8x128xf32>
    %629 = math.tanh %628 : vector<8x128xf32>
    %cst_250 = arith.constant 5.000000e-01 : f32
    %630 = vector.broadcast %cst_250 : f32 to vector<8x128xf32>
    %631 = arith.mulf %630, %629 : vector<8x128xf32>
    %cst_251 = arith.constant 5.000000e-01 : f32
    %632 = vector.broadcast %cst_251 : f32 to vector<8x128xf32>
    %633 = arith.addf %631, %632 : vector<8x128xf32>
    %634 = vector.extract_strided_slice %625 {offsets = [0, 128], sizes = [8, 128], strides = [1, 1]} : vector<8x512xf32> to vector<8x128xf32>
    %cst_252 = arith.constant 5.000000e-01 : f32
    %635 = vector.broadcast %cst_252 : f32 to vector<8x128xf32>
    %636 = arith.mulf %635, %634 : vector<8x128xf32>
    %637 = math.tanh %636 : vector<8x128xf32>
    %cst_253 = arith.constant 5.000000e-01 : f32
    %638 = vector.broadcast %cst_253 : f32 to vector<8x128xf32>
    %639 = arith.mulf %638, %637 : vector<8x128xf32>
    %cst_254 = arith.constant 5.000000e-01 : f32
    %640 = vector.broadcast %cst_254 : f32 to vector<8x128xf32>
    %641 = arith.addf %639, %640 : vector<8x128xf32>
    %642 = vector.extract_strided_slice %625 {offsets = [0, 256], sizes = [8, 128], strides = [1, 1]} : vector<8x512xf32> to vector<8x128xf32>
    %643 = math.tanh %642 : vector<8x128xf32>
    %644 = vector.extract_strided_slice %625 {offsets = [0, 384], sizes = [8, 128], strides = [1, 1]} : vector<8x512xf32> to vector<8x128xf32>
    %cst_255 = arith.constant 5.000000e-01 : f32
    %645 = vector.broadcast %cst_255 : f32 to vector<8x128xf32>
    %646 = arith.mulf %645, %644 : vector<8x128xf32>
    %647 = math.tanh %646 : vector<8x128xf32>
    %cst_256 = arith.constant 5.000000e-01 : f32
    %648 = vector.broadcast %cst_256 : f32 to vector<8x128xf32>
    %649 = arith.mulf %648, %647 : vector<8x128xf32>
    %cst_257 = arith.constant 5.000000e-01 : f32
    %650 = vector.broadcast %cst_257 : f32 to vector<8x128xf32>
    %651 = arith.addf %649, %650 : vector<8x128xf32>
    %652 = arith.mulf %641, %613 : vector<8x128xf32>
    %653 = arith.mulf %633, %643 : vector<8x128xf32>
    %654 = arith.addf %652, %653 : vector<8x128xf32>
    %655 = math.tanh %654 : vector<8x128xf32>
    %656 = arith.mulf %651, %655 : vector<8x128xf32>
    %657 = arith.index_cast %c15_i32 : i32 to index
    %c0_258 = arith.constant 0 : index
    %c0_259 = arith.constant 0 : index
    %658 = vector.load %arg4[%657, %c0_258, %c0_259] : memref<16x8x128xf32, #tpu.memory_space<vmem>>, vector<1x8x128xf32>
    %659 = vector.shape_cast %658 : vector<1x8x128xf32> to vector<8x128xf32>
    %660 = vector.shape_cast %656 : vector<8x128xf32> to vector<1x8x128xf32>
    tpu.vector_store %arg4[%657, %c0_258, %c0_259], %660 {strides = array<i32>} : memref<16x8x128xf32, #tpu.memory_space<vmem>>, vector<1x8x128xf32>,
    %c16_i32 = arith.constant 16 : i32
    %c0_260 = arith.constant 0 : index
    %c0_261 = arith.constant 0 : index
    %661 = vector.load %arg6[%c0_260, %c0_261] : memref<8x128xf32, #tpu.memory_space<vmem>>, vector<8x128xf32>
    tpu.vector_store %arg6[%c0_260, %c0_261], %656 {strides = array<i32>} : memref<8x128xf32, #tpu.memory_space<vmem>>, vector<8x128xf32>,
    %c0_262 = arith.constant 0 : index
    %c0_263 = arith.constant 0 : index
    %662 = vector.load %arg7[%c0_262, %c0_263] : memref<8x128xf32, #tpu.memory_space<vmem>>, vector<8x128xf32>
    tpu.vector_store %arg7[%c0_262, %c0_263], %654 {strides = array<i32>} : memref<8x128xf32, #tpu.memory_space<vmem>>, vector<8x128xf32>,
    return
  }
  func.func @transform_0(%arg0: i32, %arg1: i32) -> (i32, i32, i32) {
    %c0_i32 = arith.constant 0 : i32
    %c0_i32_0 = arith.constant 0 : i32
    return %arg1, %arg0, %c0_i32 : i32, i32, i32
  }
  func.func @transform_2(%arg0: i32, %arg1: i32) -> (i32, i32, i32) {
    %c0_i32 = arith.constant 0 : i32
    %c0_i32_0 = arith.constant 0 : i32
    return %arg1, %arg0, %c0_i32 : i32, i32, i32
  }
}

</mosaic_0001>

<bundles_post_ra>
// kernel: rlstm_forward.13
= control target key start
LH: loop header
LB: loop body
LE: loop exit
PB: predicated region body
PF: predicated region fallthrough
CT: control target
= control target key end

     0   :  { %s1199_s0 = inlined_call_operand.vmem [shape: f32[256,128], index: 0, kind: input, shape index: {}]   ;;  %s1200_s1 = inlined_call_operand.vmem [shape: f32[128,256], index: 1, kind: input, shape index: {}]   ;;  %s1201_s2 = inlined_call_operand.vmem [shape: f32[1,256], index: 2, kind: input, shape index: {}]   ;;  %s1202_s3 = inlined_call_operand.hbm [shape: f32[256,256], index: 3, kind: output, shape index: {}]  }
   0x1   :  { %v210_v0 = vld [vmem:[%s1200_s1 + $0xf8] sm:$0xff]  ;;  %v209_v1 = vld [vmem:[%s1200_s1 + $0xf0] sm:$0xff]  ;;  %v208_v2 = vld [vmem:[%s1200_s1 + $0xe8] sm:$0xff] }
   0x2   :  { %211 = vmatprep.subr.mxu0 %v210_v0  ;;  %819 = vmatprep.subr.mxu1 %v210_v0  ;;  %v207_v3 = vld [vmem:[%s1200_s1 + $0xe0] sm:$0xff]  ;;  %v206_v4 = vld [vmem:[%s1200_s1 + $0xd8] sm:$0xff]  ;;  %v205_v5 = vld [vmem:[%s1200_s1 + $0xd0] sm:$0xff] }
   0x3   :  { %212 = vmatpush1.msra.mxu0 %v209_v1  ;;  %835 = vmatpush1.msra.mxu1 %v209_v1  ;;  %v204_v6 = vld [vmem:[%s1200_s1 + $0xc8] sm:$0xff]  ;;  %v203_v7 = vld [vmem:[%s1200_s1 + $0xc0] sm:$0xff]  ;;  %v202_v8 = vld [vmem:[%s1200_s1 + $0xb8] sm:$0xff] }
   0x4   :  { %213 = vmatprep.subr.mxu0 %v208_v2  ;;  %820 = vmatprep.subr.mxu1 %v208_v2  ;;  %v201_v9 = vld [vmem:[%s1200_s1 + $0xb0] sm:$0xff]  ;;  %v200_v10 = vld [vmem:[%s1200_s1 + $0xa8] sm:$0xff]  ;;  %v199_v11 = vld [vmem:[%s1200_s1 + $0xa0] sm:$0xff] }
   0x5   :  { %214 = vmatpush1.msra.mxu0 %v207_v3  ;;  %836 = vmatpush1.msra.mxu1 %v207_v3  ;;  %v198_v12 = vld [vmem:[%s1200_s1 + $0x98] sm:$0xff]  ;;  %v197_v13 = vld [vmem:[%s1200_s1 + $0x90] sm:$0xff]  ;;  %v196_v14 = vld [vmem:[%s1200_s1 + $0x88] sm:$0xff] }
   0x6   :  { %215 = vmatprep.subr.mxu0 %v206_v4  ;;  %821 = vmatprep.subr.mxu1 %v206_v4  ;;  %v195_v15 = vld [vmem:[%s1200_s1 + $0x80] sm:$0xff]  ;;  %v194_v16 = vld [vmem:[%s1200_s1 + $0x78] sm:$0xff]  ;;  %v193_v17 = vld [vmem:[%s1200_s1 + $0x70] sm:$0xff] }
   0x7   :  { %216 = vmatpush1.msra.mxu0 %v205_v5  ;;  %837 = vmatpush1.msra.mxu1 %v205_v5  ;;  %v192_v18 = vld [vmem:[%s1200_s1 + $0x68] sm:$0xff]  ;;  %v191_v19 = vld [vmem:[%s1200_s1 + $0x60] sm:$0xff]  ;;  %v190_v20 = vld [vmem:[%s1200_s1 + $0x58] sm:$0xff] }
   0x8   :  { %217 = vmatprep.subr.mxu0 %v204_v6  ;;  %822 = vmatprep.subr.mxu1 %v204_v6  ;;  %v189_v21 = vld [vmem:[%s1200_s1 + $0x50] sm:$0xff]  ;;  %v188_v22 = vld [vmem:[%s1200_s1 + $0x48] sm:$0xff]  ;;  %v187_v23 = vld [vmem:[%s1200_s1 + $0x40] sm:$0xff] }
   0x9   :  { %218 = vmatpush1.msra.mxu0 %v203_v7  ;;  %838 = vmatpush1.msra.mxu1 %v203_v7 }
   0xa   :  { %219 = vmatprep.subr.mxu0 %v202_v8  ;;  %823 = vmatprep.subr.mxu1 %v202_v8 }
   0xb   :  { %220 = vmatpush1.msra.mxu0 %v201_v9  ;;  %839 = vmatpush1.msra.mxu1 %v201_v9 }
   0xc   :  { %221 = vmatprep.subr.mxu0 %v200_v10  ;;  %824 = vmatprep.subr.mxu1 %v200_v10 }
   0xd   :  { %222 = vmatpush1.msra.mxu0 %v199_v11  ;;  %840 = vmatpush1.msra.mxu1 %v199_v11 }
   0xe   :  { %223 = vmatprep.subr.mxu0 %v198_v12  ;;  %825 = vmatprep.subr.mxu1 %v198_v12 }
   0xf   :  { %224 = vmatpush1.msra.mxu0 %v197_v13  ;;  %841 = vmatpush1.msra.mxu1 %v197_v13 }
  0x10   :  { %225 = vmatprep.subr.mxu0 %v196_v14  ;;  %826 = vmatprep.subr.mxu1 %v196_v14 }
  0x11   :  { %226 = vmatpush1.msra.mxu0 %v195_v15  ;;  %842 = vmatpush1.msra.mxu1 %v195_v15 }
  0x12   :  { %227 = vmatprep.subr.mxu0 %v194_v16  ;;  %827 = vmatprep.subr.mxu1 %v194_v16 }
  0x13   :  { %228 = vmatpush1.msra.mxu0 %v193_v17  ;;  %843 = vmatpush1.msra.mxu1 %v193_v17 }
  0x14   :  { %229 = vmatprep.subr.mxu0 %v192_v18  ;;  %828 = vmatprep.subr.mxu1 %v192_v18 }
  0x15   :  { %230 = vmatpush1.msra.mxu0 %v191_v19  ;;  %844 = vmatpush1.msra.mxu1 %v191_v19 }
  0x16   :  { %231 = vmatprep.subr.mxu0 %v190_v20  ;;  %829 = vmatprep.subr.mxu1 %v190_v20 }
  0x17   :  { %8 = vsyncpa [#allocation4], 0  ;;  %232 = vmatpush1.msra.mxu0 %v189_v21  ;;  %845 = vmatpush1.msra.mxu1 %v189_v21  ;;  %v186_v24 = vld [vmem:[%s1200_s1 + $0x38] sm:$0xff]  ;;  %v185_v25 = vld [vmem:[%s1200_s1 + $0x30] sm:$0xff]  ;;  %v877_v34 = vmov 0.0   ;;  %v665_v1 = vlaneseq }
  0x18   :  { %233 = vmatprep.subr.mxu0 %v188_v22  ;;  %830 = vmatprep.subr.mxu1 %v188_v22  ;;  %v184_v26 = vld [vmem:[%s1200_s1 + $0x28] sm:$0xff]  ;;  %v183_v27 = vld [vmem:[%s1200_s1 + $0x20] sm:$0xff]  ;;  %v182_v28 = vld [vmem:[%s1200_s1 + $0x18] sm:$0xff] }
  0x19   :  { %234 = vmatpush1.msra.mxu0 %v187_v23  ;;  %846 = vmatpush1.msra.mxu1 %v187_v23  ;;  %v181_v29 = vld [vmem:[%s1200_s1 + $0x10] sm:$0xff]  ;;  %v180_v30 = vld [vmem:[%s1200_s1 + $0x8] sm:$0xff]  ;;  %v179_v31 = vld [vmem:[%s1200_s1] sm:$0xff]  ;;  %v666_v2 = vshrl.u32 %v665_v1, 7 }
  0x1a   :  { %235 = vmatprep.subr.mxu0 %v186_v24  ;;  %831 = vmatprep.subr.mxu1 %v186_v24  ;;  %v147_v32 = vld [vmem:[%s1199_s0] sm:$0xff]  ;;  %v148_v35 = vld [vmem:[%s1199_s0 + $0x8] sm:$0xff]  ;;  %v149_v37 = vld [vmem:[%s1199_s0 + $0x10] sm:$0xff] }
  0x1b   :  { %236 = vmatpush1.msra.mxu0 %v185_v25  ;;  %847 = vmatpush1.msra.mxu1 %v185_v25  ;;  %v163_v33 = vld [vmem:[%s1199_s0 + $0x80] sm:$0xff]  ;;  %v164_v36 = vld [vmem:[%s1199_s0 + $0x88] sm:$0xff]  ;;  %v165_v38 = vld [vmem:[%s1199_s0 + $0x90] sm:$0xff]  ;;  %v667_v3 = vsub.s32 0, %v666_v2  ;;  %v671_v5 = vsub.s32 1, %v666_v2 }
  0x1c   :  { %237 = vmatprep.subr.mxu0 %v184_v26  ;;  %832 = vmatprep.subr.mxu1 %v184_v26  ;;  %v150_v39 = vld [vmem:[%s1199_s0 + $0x18] sm:$0xff]  ;;  %v151_v41 = vld [vmem:[%s1199_s0 + $0x20] sm:$0xff]  ;;  %v152_v43 = vld [vmem:[%s1199_s0 + $0x28] sm:$0xff] }
  0x1d   :  { %238 = vmatpush1.msra.mxu0 %v183_v27  ;;  %848 = vmatpush1.msra.mxu1 %v183_v27  ;;  %v166_v40 = vld [vmem:[%s1199_s0 + $0x98] sm:$0xff]  ;;  %v167_v42 = vld [vmem:[%s1199_s0 + $0xa0] sm:$0xff]  ;;  %v168_v44 = vld [vmem:[%s1199_s0 + $0xa8] sm:$0xff] }
  0x1e   :  { %239 = vmatprep.subr.mxu0 %v182_v28  ;;  %833 = vmatprep.subr.mxu1 %v182_v28  ;;  %v153_v45 = vld [vmem:[%s1199_s0 + $0x30] sm:$0xff]  ;;  %v154_v47 = vld [vmem:[%s1199_s0 + $0x38] sm:$0xff]  ;;  %v155_v49 = vld [vmem:[%s1199_s0 + $0x40] sm:$0xff] }
  0x1f   :  { %240 = vmatpush1.msra.mxu0 %v181_v29  ;;  %849 = vmatpush1.msra.mxu1 %v181_v29  ;;  %v169_v46 = vld [vmem:[%s1199_s0 + $0xb0] sm:$0xff]  ;;  %v170_v48 = vld [vmem:[%s1199_s0 + $0xb8] sm:$0xff]  ;;  %v171_v50 = vld [vmem:[%s1199_s0 + $0xc0] sm:$0xff] }
  0x20   :  { %241 = vmatprep.subr.mxu0 %v180_v30  ;;  %834 = vmatprep.subr.mxu1 %v180_v30  ;;  %v156_v51 = vld [vmem:[%s1199_s0 + $0x48] sm:$0xff]  ;;  %v157_v53 = vld [vmem:[%s1199_s0 + $0x50] sm:$0xff]  ;;  %v158_v55 = vld [vmem:[%s1199_s0 + $0x58] sm:$0xff] }
  0x21   :  { %242 = vmatpush1.msra.mxu0 %v179_v31  ;;  %850 = vmatpush1.msra.mxu1 %v179_v31  ;;  %v172_v52 = vld [vmem:[%s1199_s0 + $0xc8] sm:$0xff]  ;;  %v173_v54 = vld [vmem:[%s1199_s0 + $0xd0] sm:$0xff]  ;;  %v174_v56 = vld [vmem:[%s1199_s0 + $0xd8] sm:$0xff] }
  0x22   :  { %275 = vmatprep.mubr.f32.mxu0 %v877_v34  ;;  %371 = vmatprep.mubr.f32.mxu1 %v877_v34  ;;  %v159_v57 = vld [vmem:[%s1199_s0 + $0x60] sm:$0xff]  ;;  %v160_v59 = vld [vmem:[%s1199_s0 + $0x68] sm:$0xff]  ;;  %v161_v61 = vld [vmem:[%s1199_s0 + $0x70] sm:$0xff] }
  0x23   :  { %276 = vmatmul.mubr.f32.vlgmr.msra.gmra.mxu0 %v147_v32  ;;  %372 = vmatmul.mubr.f32.vlgmr.msra.gmra.mxu1 %v163_v33  ;;  %v175_v58 = vld [vmem:[%s1199_s0 + $0xe0] sm:$0xff]  ;;  %v176_v60 = vld [vmem:[%s1199_s0 + $0xe8] sm:$0xff]  ;;  %v177_v62 = vld [vmem:[%s1199_s0 + $0xf0] sm:$0xff] }
  0x24   :  { %281 = vmatprep.mubr.f32.mxu0 %v877_v34  ;;  %377 = vmatprep.mubr.f32.mxu1 %v877_v34  ;;  %v162_v63 = vld [vmem:[%s1199_s0 + $0x78] sm:$0xff]  ;;  %v663_v4 = vld [vmem:[%s1201_s2] sm:$0x3] }
  0x25   :  { %v178_v0 = vld [vmem:[%s1199_s0 + $0xf8] sm:$0xff]  ;;  %v1128_v6 = vrot.slane %v663_v4, %v667_v3  ;;  %v1130_v7 = vrot.slane %v663_v4, %v671_v5  ;;  %s878_s0 = smov [#allocation3]  }
  0x26   :  { %s808_s2 = sshll.u32 %s878_s0, 4  ;;  %s809_s2 = int_to_ptr.vmem [resolvable:$true] %s808_s2 }
  0x27   :  { %282 = vmatmul.mubr.f32.gmra.mxu0 %v148_v35  ;;  %378 = vmatmul.mubr.f32.gmra.mxu1 %v164_v36  ;;  %s855_s4 = scalar_lea.vmem %s809_s2, 8192  ;;  %p860_p1 = scmp.lt.s32.totalorder %s809_s2, %s809_s2 }
  0x28   :  { %287 = vmatprep.mubr.f32.mxu0 %v877_v34  ;;  %383 = vmatprep.mubr.f32.mxu1 %v877_v34  ;;  %p856_p0 = scmp.ne.s32.totalorder %s809_s2, %s855_s4  ;;  %p861_p2 = scmp.lt.s32.totalorder %s855_s4, %s855_s4 }
  0x2a   :  { %p862_p3 = por %p861_p2, %p860_p1 }
  0x2b   :  { %288 = vmatmul.mubr.f32.gmra.mxu0 %v149_v37  ;;  %384 = vmatmul.mubr.f32.gmra.mxu1 %v165_v38 }
  0x2c   :  { %293 = vmatprep.mubr.f32.mxu0 %v877_v34  ;;  %389 = vmatprep.mubr.f32.mxu1 %v877_v34  ;;  %p863_p4 = pnand %p862_p3, %p856_p0 }
  0x2f   :  { %294 = vmatmul.mubr.f32.gmra.mxu0 %v150_v39  ;;  %390 = vmatmul.mubr.f32.gmra.mxu1 %v166_v40 }
  0x30   :  { %299 = vmatprep.mubr.f32.mxu0 %v877_v34  ;;  %395 = vmatprep.mubr.f32.mxu1 %v877_v34 }
  0x33   :  { %300 = vmatmul.mubr.f32.gmra.mxu0 %v151_v41  ;;  %396 = vmatmul.mubr.f32.gmra.mxu1 %v167_v42 }
  0x34   :  { %305 = vmatprep.mubr.f32.mxu0 %v877_v34  ;;  %401 = vmatprep.mubr.f32.mxu1 %v877_v34 }
  0x37   :  { %306 = vmatmul.mubr.f32.gmra.mxu0 %v152_v43  ;;  %402 = vmatmul.mubr.f32.gmra.mxu1 %v168_v44 }
  0x38   :  { %311 = vmatprep.mubr.f32.mxu0 %v877_v34  ;;  %407 = vmatprep.mubr.f32.mxu1 %v877_v34 }
  0x3b   :  { %312 = vmatmul.mubr.f32.gmra.mxu0 %v153_v45  ;;  %408 = vmatmul.mubr.f32.gmra.mxu1 %v169_v46 }
  0x3c   :  { %317 = vmatprep.mubr.f32.mxu0 %v877_v34  ;;  %413 = vmatprep.mubr.f32.mxu1 %v877_v34 }
  0x3f   :  { %318 = vmatmul.mubr.f32.gmra.mxu0 %v154_v47  ;;  %414 = vmatmul.mubr.f32.gmra.mxu1 %v170_v48 }
  0x40   :  { %323 = vmatprep.mubr.f32.mxu0 %v877_v34  ;;  %419 = vmatprep.mubr.f32.mxu1 %v877_v34 }
  0x43   :  { %324 = vmatmul.mubr.f32.gmra.mxu0 %v155_v49  ;;  %420 = vmatmul.mubr.f32.gmra.mxu1 %v171_v50 }
  0x44   :  { %329 = vmatprep.mubr.f32.mxu0 %v877_v34  ;;  %425 = vmatprep.mubr.f32.mxu1 %v877_v34 }
  0x47   :  { %330 = vmatmul.mubr.f32.gmra.mxu0 %v156_v51  ;;  %426 = vmatmul.mubr.f32.gmra.mxu1 %v172_v52 }
  0x48   :  { %335 = vmatprep.mubr.f32.mxu0 %v877_v34  ;;  %431 = vmatprep.mubr.f32.mxu1 %v877_v34 }
  0x4b   :  { %336 = vmatmul.mubr.f32.gmra.mxu0 %v157_v53  ;;  %432 = vmatmul.mubr.f32.gmra.mxu1 %v173_v54 }
  0x4c   :  { %341 = vmatprep.mubr.f32.mxu0 %v877_v34  ;;  %437 = vmatprep.mubr.f32.mxu1 %v877_v34 }
  0x4f   :  { %342 = vmatmul.mubr.f32.gmra.mxu0 %v158_v55  ;;  %438 = vmatmul.mubr.f32.gmra.mxu1 %v174_v56 }
  0x50   :  { %347 = vmatprep.mubr.f32.mxu0 %v877_v34  ;;  %443 = vmatprep.mubr.f32.mxu1 %v877_v34 }
  0x53   :  { %348 = vmatmul.mubr.f32.gmra.mxu0 %v159_v57  ;;  %444 = vmatmul.mubr.f32.gmra.mxu1 %v175_v58 }
  0x54   :  { %353 = vmatprep.mubr.f32.mxu0 %v877_v34  ;;  %449 = vmatprep.mubr.f32.mxu1 %v877_v34 }
  0x57   :  { %354 = vmatmul.mubr.f32.gmra.mxu0 %v160_v59  ;;  %450 = vmatmul.mubr.f32.gmra.mxu1 %v176_v60 }
  0x58   :  { %359 = vmatprep.mubr.f32.mxu0 %v877_v34  ;;  %455 = vmatprep.mubr.f32.mxu1 %v877_v34 }
  0x5b   :  { %360 = vmatmul.mubr.f32.gmra.mxu0 %v161_v61  ;;  %456 = vmatmul.mubr.f32.gmra.mxu1 %v177_v62 }
  0x5c   :  { %365 = vmatprep.mubr.f32.mxu0 %v877_v34  ;;  %461 = vmatprep.mubr.f32.mxu1 %v877_v34 }
  0x5f   :  { %366 = vmatmul.mubr.f32.gmra.mxu0 %v162_v63  ;;  %462 = vmatmul.mubr.f32.gmra.mxu1 %v178_v0 }
  0xe3   :  { %v277_v8 = vpop.f32.mrf.mxu0  ;;  %v373_v9 = vpop.f32.mrf.mxu1 }
  0xe4   :  { %v675_v10 = vadd.f32 %v1128_v6, %v277_v8  ;;  %v707_v11 = vadd.f32 %v1128_v6, %v373_v9 }
  0xe5   :  { %v279_v12 = vpop.f32.mrf.mxu0  ;;  %v375_v13 = vpop.f32.mrf.mxu1 }
  0xe6   :  { %739 = vst [vmem:[#allocation3] sm:$0xff] %v675_v10  ;;  %771 = vst [vmem:[#allocation3 + $0x100] sm:$0xff] %v707_v11  ;;  %v676_v14 = vadd.f32 %v1130_v7, %v279_v12  ;;  %v708_v15 = vadd.f32 %v1130_v7, %v375_v13 }
  0xe7   :  { %v283_v16 = vpop.f32.mrf.mxu0  ;;  %v379_v17 = vpop.f32.mrf.mxu1 }
  0xe8   :  { %740 = vst [vmem:[#allocation3 + $0x8] sm:$0xff] %v676_v14  ;;  %772 = vst [vmem:[#allocation3 + $0x108] sm:$0xff] %v708_v15  ;;  %v677_v18 = vadd.f32 %v1128_v6, %v283_v16  ;;  %v709_v19 = vadd.f32 %v1128_v6, %v379_v17 }
  0xe9   :  { %v285_v20 = vpop.f32.mrf.mxu0  ;;  %v381_v21 = vpop.f32.mrf.mxu1 }
  0xea   :  { %741 = vst [vmem:[#allocation3 + $0x10] sm:$0xff] %v677_v18  ;;  %773 = vst [vmem:[#allocation3 + $0x110] sm:$0xff] %v709_v19  ;;  %v678_v22 = vadd.f32 %v1130_v7, %v285_v20  ;;  %v710_v23 = vadd.f32 %v1130_v7, %v381_v21 }
  0xeb   :  { %v289_v24 = vpop.f32.mrf.mxu0  ;;  %v385_v25 = vpop.f32.mrf.mxu1 }
  0xec   :  { %742 = vst [vmem:[#allocation3 + $0x18] sm:$0xff] %v678_v22  ;;  %774 = vst [vmem:[#allocation3 + $0x118] sm:$0xff] %v710_v23  ;;  %v679_v26 = vadd.f32 %v1128_v6, %v289_v24  ;;  %v711_v27 = vadd.f32 %v1128_v6, %v385_v25 }
  0xed   :  { %v291_v28 = vpop.f32.mrf.mxu0  ;;  %v387_v29 = vpop.f32.mrf.mxu1 }
  0xee   :  { %743 = vst [vmem:[#allocation3 + $0x20] sm:$0xff] %v679_v26  ;;  %775 = vst [vmem:[#allocation3 + $0x120] sm:$0xff] %v711_v27  ;;  %v680_v30 = vadd.f32 %v1130_v7, %v291_v28  ;;  %v712_v31 = vadd.f32 %v1130_v7, %v387_v29 }
  0xef   :  { %v295_v32 = vpop.f32.mrf.mxu0  ;;  %v391_v33 = vpop.f32.mrf.mxu1 }
  0xf0   :  { %744 = vst [vmem:[#allocation3 + $0x28] sm:$0xff] %v680_v30  ;;  %776 = vst [vmem:[#allocation3 + $0x128] sm:$0xff] %v712_v31  ;;  %v681_v34 = vadd.f32 %v1128_v6, %v295_v32  ;;  %v713_v35 = vadd.f32 %v1128_v6, %v391_v33 }
  0xf1   :  { %v297_v36 = vpop.f32.mrf.mxu0  ;;  %v393_v37 = vpop.f32.mrf.mxu1 }
  0xf2   :  { %745 = vst [vmem:[#allocation3 + $0x30] sm:$0xff] %v681_v34  ;;  %777 = vst [vmem:[#allocation3 + $0x130] sm:$0xff] %v713_v35  ;;  %v682_v38 = vadd.f32 %v1130_v7, %v297_v36  ;;  %v714_v39 = vadd.f32 %v1130_v7, %v393_v37 }
  0xf3   :  { %v301_v40 = vpop.f32.mrf.mxu0  ;;  %v397_v41 = vpop.f32.mrf.mxu1 }
  0xf4   :  { %746 = vst [vmem:[#allocation3 + $0x38] sm:$0xff] %v682_v38  ;;  %778 = vst [vmem:[#allocation3 + $0x138] sm:$0xff] %v714_v39  ;;  %v683_v42 = vadd.f32 %v1128_v6, %v301_v40  ;;  %v715_v43 = vadd.f32 %v1128_v6, %v397_v41 }
  0xf5   :  { %v303_v44 = vpop.f32.mrf.mxu0  ;;  %v399_v45 = vpop.f32.mrf.mxu1 }
  0xf6   :  { %747 = vst [vmem:[#allocation3 + $0x40] sm:$0xff] %v683_v42  ;;  %779 = vst [vmem:[#allocation3 + $0x140] sm:$0xff] %v715_v43  ;;  %v684_v46 = vadd.f32 %v1130_v7, %v303_v44  ;;  %v716_v47 = vadd.f32 %v1130_v7, %v399_v45 }
  0xf7   :  { %v307_v48 = vpop.f32.mrf.mxu0  ;;  %v403_v49 = vpop.f32.mrf.mxu1 }
  0xf8   :  { %748 = vst [vmem:[#allocation3 + $0x48] sm:$0xff] %v684_v46  ;;  %780 = vst [vmem:[#allocation3 + $0x148] sm:$0xff] %v716_v47  ;;  %v685_v50 = vadd.f32 %v1128_v6, %v307_v48  ;;  %v717_v51 = vadd.f32 %v1128_v6, %v403_v49 }
  0xf9   :  { %v309_v52 = vpop.f32.mrf.mxu0  ;;  %v405_v53 = vpop.f32.mrf.mxu1 }
  0xfa   :  { %749 = vst [vmem:[#allocation3 + $0x50] sm:$0xff] %v685_v50  ;;  %781 = vst [vmem:[#allocation3 + $0x150] sm:$0xff] %v717_v51  ;;  %v686_v54 = vadd.f32 %v1130_v7, %v309_v52  ;;  %v718_v55 = vadd.f32 %v1130_v7, %v405_v53 }
  0xfb   :  { %v313_v56 = vpop.f32.mrf.mxu0  ;;  %v409_v57 = vpop.f32.mrf.mxu1 }
  0xfc   :  { %750 = vst [vmem:[#allocation3 + $0x58] sm:$0xff] %v686_v54  ;;  %782 = vst [vmem:[#allocation3 + $0x158] sm:$0xff] %v718_v55  ;;  %v687_v58 = vadd.f32 %v1128_v6, %v313_v56  ;;  %v719_v59 = vadd.f32 %v1128_v6, %v409_v57 }
  0xfd   :  { %v315_v60 = vpop.f32.mrf.mxu0  ;;  %v411_v61 = vpop.f32.mrf.mxu1 }
  0xfe   :  { %751 = vst [vmem:[#allocation3 + $0x60] sm:$0xff] %v687_v58  ;;  %783 = vst [vmem:[#allocation3 + $0x160] sm:$0xff] %v719_v59  ;;  %v688_v62 = vadd.f32 %v1130_v7, %v315_v60  ;;  %v720_v63 = vadd.f32 %v1130_v7, %v411_v61 }
  0xff   :  { %v319_v0 = vpop.f32.mrf.mxu0  ;;  %v415_v1 = vpop.f32.mrf.mxu1 }
 0x100   :  { %752 = vst [vmem:[#allocation3 + $0x68] sm:$0xff] %v688_v62  ;;  %784 = vst [vmem:[#allocation3 + $0x168] sm:$0xff] %v720_v63  ;;  %v689_v2 = vadd.f32 %v1128_v6, %v319_v0  ;;  %v721_v3 = vadd.f32 %v1128_v6, %v415_v1 }
 0x101   :  { %v321_v4 = vpop.f32.mrf.mxu0  ;;  %v417_v5 = vpop.f32.mrf.mxu1 }
 0x102   :  { %753 = vst [vmem:[#allocation3 + $0x70] sm:$0xff] %v689_v2  ;;  %785 = vst [vmem:[#allocation3 + $0x170] sm:$0xff] %v721_v3  ;;  %v690_v8 = vadd.f32 %v1130_v7, %v321_v4  ;;  %v722_v9 = vadd.f32 %v1130_v7, %v417_v5 }
 0x103   :  { %v325_v10 = vpop.f32.mrf.mxu0  ;;  %v421_v11 = vpop.f32.mrf.mxu1 }
 0x104   :  { %754 = vst [vmem:[#allocation3 + $0x78] sm:$0xff] %v690_v8  ;;  %786 = vst [vmem:[#allocation3 + $0x178] sm:$0xff] %v722_v9  ;;  %v691_v12 = vadd.f32 %v1128_v6, %v325_v10  ;;  %v723_v13 = vadd.f32 %v1128_v6, %v421_v11 }
 0x105   :  { %v327_v14 = vpop.f32.mrf.mxu0  ;;  %v423_v15 = vpop.f32.mrf.mxu1 }
 0x106   :  { %755 = vst [vmem:[#allocation3 + $0x80] sm:$0xff] %v691_v12  ;;  %787 = vst [vmem:[#allocation3 + $0x180] sm:$0xff] %v723_v13  ;;  %v692_v16 = vadd.f32 %v1130_v7, %v327_v14  ;;  %v724_v17 = vadd.f32 %v1130_v7, %v423_v15 }
 0x107   :  { %v331_v18 = vpop.f32.mrf.mxu0  ;;  %v427_v19 = vpop.f32.mrf.mxu1 }
 0x108   :  { %756 = vst [vmem:[#allocation3 + $0x88] sm:$0xff] %v692_v16  ;;  %788 = vst [vmem:[#allocation3 + $0x188] sm:$0xff] %v724_v17  ;;  %v693_v20 = vadd.f32 %v1128_v6, %v331_v18  ;;  %v725_v21 = vadd.f32 %v1128_v6, %v427_v19 }
 0x109   :  { %v333_v22 = vpop.f32.mrf.mxu0  ;;  %v429_v23 = vpop.f32.mrf.mxu1 }
 0x10a   :  { %757 = vst [vmem:[#allocation3 + $0x90] sm:$0xff] %v693_v20  ;;  %789 = vst [vmem:[#allocation3 + $0x190] sm:$0xff] %v725_v21  ;;  %v694_v24 = vadd.f32 %v1130_v7, %v333_v22  ;;  %v726_v25 = vadd.f32 %v1130_v7, %v429_v23 }
 0x10b   :  { %v337_v26 = vpop.f32.mrf.mxu0  ;;  %v433_v27 = vpop.f32.mrf.mxu1 }
 0x10c   :  { %758 = vst [vmem:[#allocation3 + $0x98] sm:$0xff] %v694_v24  ;;  %790 = vst [vmem:[#allocation3 + $0x198] sm:$0xff] %v726_v25  ;;  %v695_v28 = vadd.f32 %v1128_v6, %v337_v26  ;;  %v727_v29 = vadd.f32 %v1128_v6, %v433_v27 }
 0x10d   :  { %v339_v30 = vpop.f32.mrf.mxu0  ;;  %v435_v31 = vpop.f32.mrf.mxu1 }
 0x10e   :  { %759 = vst [vmem:[#allocation3 + $0xa0] sm:$0xff] %v695_v28  ;;  %791 = vst [vmem:[#allocation3 + $0x1a0] sm:$0xff] %v727_v29  ;;  %v696_v32 = vadd.f32 %v1130_v7, %v339_v30  ;;  %v728_v33 = vadd.f32 %v1130_v7, %v435_v31 }
 0x10f   :  { %v343_v34 = vpop.f32.mrf.mxu0  ;;  %v439_v35 = vpop.f32.mrf.mxu1 }
 0x110   :  { %760 = vst [vmem:[#allocation3 + $0xa8] sm:$0xff] %v696_v32  ;;  %792 = vst [vmem:[#allocation3 + $0x1a8] sm:$0xff] %v728_v33  ;;  %v697_v36 = vadd.f32 %v1128_v6, %v343_v34  ;;  %v729_v37 = vadd.f32 %v1128_v6, %v439_v35 }
 0x111   :  { %v345_v38 = vpop.f32.mrf.mxu0  ;;  %v441_v39 = vpop.f32.mrf.mxu1 }
 0x112   :  { %761 = vst [vmem:[#allocation3 + $0xb0] sm:$0xff] %v697_v36  ;;  %793 = vst [vmem:[#allocation3 + $0x1b0] sm:$0xff] %v729_v37  ;;  %v698_v40 = vadd.f32 %v1130_v7, %v345_v38  ;;  %v730_v41 = vadd.f32 %v1130_v7, %v441_v39 }
 0x113   :  { %v349_v42 = vpop.f32.mrf.mxu0  ;;  %v445_v43 = vpop.f32.mrf.mxu1 }
 0x114   :  { %762 = vst [vmem:[#allocation3 + $0xb8] sm:$0xff] %v698_v40  ;;  %794 = vst [vmem:[#allocation3 + $0x1b8] sm:$0xff] %v730_v41  ;;  %v699_v44 = vadd.f32 %v1128_v6, %v349_v42  ;;  %v731_v45 = vadd.f32 %v1128_v6, %v445_v43 }
 0x115   :  { %v351_v46 = vpop.f32.mrf.mxu0  ;;  %v447_v47 = vpop.f32.mrf.mxu1 }
 0x116   :  { %763 = vst [vmem:[#allocation3 + $0xc0] sm:$0xff] %v699_v44  ;;  %795 = vst [vmem:[#allocation3 + $0x1c0] sm:$0xff] %v731_v45  ;;  %v700_v48 = vadd.f32 %v1130_v7, %v351_v46  ;;  %v732_v49 = vadd.f32 %v1130_v7, %v447_v47 }
 0x117   :  { %v355_v50 = vpop.f32.mrf.mxu0  ;;  %v451_v51 = vpop.f32.mrf.mxu1 }
 0x118   :  { %764 = vst [vmem:[#allocation3 + $0xc8] sm:$0xff] %v700_v48  ;;  %796 = vst [vmem:[#allocation3 + $0x1c8] sm:$0xff] %v732_v49  ;;  %v701_v52 = vadd.f32 %v1128_v6, %v355_v50  ;;  %v733_v53 = vadd.f32 %v1128_v6, %v451_v51 }
 0x119   :  { %v357_v54 = vpop.f32.mrf.mxu0  ;;  %v453_v55 = vpop.f32.mrf.mxu1 }
 0x11a   :  { %765 = vst [vmem:[#allocation3 + $0xd0] sm:$0xff] %v701_v52  ;;  %797 = vst [vmem:[#allocation3 + $0x1d0] sm:$0xff] %v733_v53  ;;  %v702_v56 = vadd.f32 %v1130_v7, %v357_v54  ;;  %v734_v57 = vadd.f32 %v1130_v7, %v453_v55 }
 0x11b   :  { %v361_v58 = vpop.f32.mrf.mxu0  ;;  %v457_v59 = vpop.f32.mrf.mxu1 }
 0x11c   :  { %766 = vst [vmem:[#allocation3 + $0xd8] sm:$0xff] %v702_v56  ;;  %798 = vst [vmem:[#allocation3 + $0x1d8] sm:$0xff] %v734_v57  ;;  %v703_v60 = vadd.f32 %v1128_v6, %v361_v58  ;;  %v735_v61 = vadd.f32 %v1128_v6, %v457_v59 }
 0x11d   :  { %v363_v62 = vpop.f32.mrf.mxu0  ;;  %v459_v63 = vpop.f32.mrf.mxu1 }
 0x11e   :  { %767 = vst [vmem:[#allocation3 + $0xe0] sm:$0xff] %v703_v60  ;;  %799 = vst [vmem:[#allocation3 + $0x1e0] sm:$0xff] %v735_v61  ;;  %v704_v0 = vadd.f32 %v1130_v7, %v363_v62  ;;  %v736_v1 = vadd.f32 %v1130_v7, %v459_v63 }
 0x11f   :  { %v367_v2 = vpop.f32.mrf.mxu0  ;;  %v463_v3 = vpop.f32.mrf.mxu1 }
 0x120   :  { %768 = vst [vmem:[#allocation3 + $0xe8] sm:$0xff] %v704_v0  ;;  %800 = vst [vmem:[#allocation3 + $0x1e8] sm:$0xff] %v736_v1  ;;  %v705_v4 = vadd.f32 %v1128_v6, %v367_v2  ;;  %v737_v5 = vadd.f32 %v1128_v6, %v463_v3 }
 0x121   :  { %v369_v8 = vpop.f32.mrf.mxu0  ;;  %v465_v9 = vpop.f32.mrf.mxu1 }
 0x122   :  { %769 = vst [vmem:[#allocation3 + $0xf0] sm:$0xff] %v705_v4  ;;  %801 = vst [vmem:[#allocation3 + $0x1f0] sm:$0xff] %v737_v5  ;;  %v706_v10 = vadd.f32 %v1130_v7, %v369_v8  ;;  %v738_v11 = vadd.f32 %v1130_v7, %v465_v9 }
 0x124   :  { %770 = vst [vmem:[#allocation3 + $0xf8] sm:$0xff] %v706_v10  ;;  %802 = vst [vmem:[#allocation3 + $0x1f8] sm:$0xff] %v738_v11 }
 0x125   :  { %866 = shalt.err (!%p863_p4)
}
 0x126   :  { %s879_s5 = smov 256   ;;  %s880_s6 = smov 16  }
 0x127   :  { %814 = dma.vmem_to_hbm [thread:$0]  %s809_s2, 8192, %s1202_s3, [#allocation4], %s879_s5, %s879_s5, %s880_s6  }
 0x128   :  { %875 = dma.done.wait [#allocation4], 8192  }
 0x129   :  { %876 = vsyncadd [#allocation4], 4294959104 }
 0x12a   :  { %818 = vsyncpa [#allocation4], 1 }

// kernel: rlstm_forward.7
= control target key start
LH: loop header
LB: loop body
LE: loop exit
PB: predicated region body
PF: predicated region fallthrough
CT: control target
= control target key end

     0   :  { %v1554_v3 = vmov 0.0   ;;  %s2450_s1 = inlined_call_operand.vmem [shape: f32[128,512], index: 1, kind: input, shape index: {}]   ;;  %s2451_s0 = inlined_call_operand.vmem [shape: f32[256,128], index: 0, kind: input, shape index: {}]   ;;  %s2452_s2 = inlined_call_operand.vmem [shape: f32[1,512], index: 2, kind: input, shape index: {}]   ;;  %s2453_s3 = inlined_call_operand.vmem [shape: f32[256,512], index: 3, kind: output, shape index: {}]  }
   0x1   :  { %v367_v0 = vld [vmem:[%s2450_s1 + $0x1e8] sm:$0xff]  ;;  %v369_v1 = vld [vmem:[%s2450_s1 + $0x1f8] sm:$0xff]  ;;  %v366_v2 = vld [vmem:[%s2450_s1 + $0x1e0] sm:$0xff]  ;;  %434 = vmatprep.mubr.f32.mxu0 %v1554_v3  ;;  %691 = vmatprep.mubr.f32.mxu1 %v1554_v3 }
   0x2   :  { %370 = vmatprep.subr.mxu0 %v367_v0  ;;  %627 = vmatprep.subr.mxu1 %v369_v1  ;;  %v368_v4 = vld [vmem:[%s2450_s1 + $0x1f0] sm:$0xff]  ;;  %v363_v5 = vld [vmem:[%s2450_s1 + $0x1c8] sm:$0xff]  ;;  %v365_v6 = vld [vmem:[%s2450_s1 + $0x1d8] sm:$0xff] }
   0x3   :  { %371 = vmatpush1.msra.mxu0 %v366_v2  ;;  %628 = vmatpush1.msra.mxu1 %v368_v4  ;;  %v362_v7 = vld [vmem:[%s2450_s1 + $0x1c0] sm:$0xff]  ;;  %v364_v8 = vld [vmem:[%s2450_s1 + $0x1d0] sm:$0xff]  ;;  %v359_v9 = vld [vmem:[%s2450_s1 + $0x1a8] sm:$0xff] }
   0x4   :  { %372 = vmatprep.subr.mxu0 %v363_v5  ;;  %629 = vmatprep.subr.mxu1 %v365_v6  ;;  %v361_v10 = vld [vmem:[%s2450_s1 + $0x1b8] sm:$0xff]  ;;  %v358_v11 = vld [vmem:[%s2450_s1 + $0x1a0] sm:$0xff]  ;;  %v360_v12 = vld [vmem:[%s2450_s1 + $0x1b0] sm:$0xff] }
   0x5   :  { %373 = vmatpush1.msra.mxu0 %v362_v7  ;;  %630 = vmatpush1.msra.mxu1 %v364_v8  ;;  %v355_v13 = vld [vmem:[%s2450_s1 + $0x188] sm:$0xff]  ;;  %v357_v14 = vld [vmem:[%s2450_s1 + $0x198] sm:$0xff]  ;;  %v354_v15 = vld [vmem:[%s2450_s1 + $0x180] sm:$0xff] }
   0x6   :  { %374 = vmatprep.subr.mxu0 %v359_v9  ;;  %631 = vmatprep.subr.mxu1 %v361_v10  ;;  %v356_v16 = vld [vmem:[%s2450_s1 + $0x190] sm:$0xff]  ;;  %v351_v17 = vld [vmem:[%s2450_s1 + $0x168] sm:$0xff]  ;;  %v353_v18 = vld [vmem:[%s2450_s1 + $0x178] sm:$0xff] }
   0x7   :  { %375 = vmatpush1.msra.mxu0 %v358_v11  ;;  %632 = vmatpush1.msra.mxu1 %v360_v12  ;;  %v350_v19 = vld [vmem:[%s2450_s1 + $0x160] sm:$0xff]  ;;  %v352_v20 = vld [vmem:[%s2450_s1 + $0x170] sm:$0xff]  ;;  %v347_v21 = vld [vmem:[%s2450_s1 + $0x148] sm:$0xff] }
   0x8   :  { %376 = vmatprep.subr.mxu0 %v355_v13  ;;  %633 = vmatprep.subr.mxu1 %v357_v14  ;;  %v349_v22 = vld [vmem:[%s2450_s1 + $0x158] sm:$0xff]  ;;  %v346_v23 = vld [vmem:[%s2450_s1 + $0x140] sm:$0xff]  ;;  %v348_v24 = vld [vmem:[%s2450_s1 + $0x150] sm:$0xff] }
   0x9   :  { %377 = vmatpush1.msra.mxu0 %v354_v15  ;;  %634 = vmatpush1.msra.mxu1 %v356_v16  ;;  %v343_v25 = vld [vmem:[%s2450_s1 + $0x128] sm:$0xff]  ;;  %v345_v26 = vld [vmem:[%s2450_s1 + $0x138] sm:$0xff]  ;;  %v342_v27 = vld [vmem:[%s2450_s1 + $0x120] sm:$0xff] }
   0xa   :  { %378 = vmatprep.subr.mxu0 %v351_v17  ;;  %635 = vmatprep.subr.mxu1 %v353_v18  ;;  %v344_v28 = vld [vmem:[%s2450_s1 + $0x130] sm:$0xff]  ;;  %v339_v29 = vld [vmem:[%s2450_s1 + $0x108] sm:$0xff]  ;;  %v341_v30 = vld [vmem:[%s2450_s1 + $0x118] sm:$0xff] }
   0xb   :  { %379 = vmatpush1.msra.mxu0 %v350_v19  ;;  %636 = vmatpush1.msra.mxu1 %v352_v20  ;;  %v338_v31 = vld [vmem:[%s2450_s1 + $0x100] sm:$0xff]  ;;  %v340_v32 = vld [vmem:[%s2450_s1 + $0x110] sm:$0xff]  ;;  %v335_v33 = vld [vmem:[%s2450_s1 + $0xe8] sm:$0xff] }
   0xc   :  { %380 = vmatprep.subr.mxu0 %v347_v21  ;;  %637 = vmatprep.subr.mxu1 %v349_v22  ;;  %v337_v34 = vld [vmem:[%s2450_s1 + $0xf8] sm:$0xff]  ;;  %v334_v35 = vld [vmem:[%s2450_s1 + $0xe0] sm:$0xff]  ;;  %v336_v36 = vld [vmem:[%s2450_s1 + $0xf0] sm:$0xff] }
   0xd   :  { %381 = vmatpush1.msra.mxu0 %v346_v23  ;;  %638 = vmatpush1.msra.mxu1 %v348_v24  ;;  %v331_v37 = vld [vmem:[%s2450_s1 + $0xc8] sm:$0xff]  ;;  %v333_v38 = vld [vmem:[%s2450_s1 + $0xd8] sm:$0xff]  ;;  %v330_v39 = vld [vmem:[%s2450_s1 + $0xc0] sm:$0xff] }
   0xe   :  { %382 = vmatprep.subr.mxu0 %v343_v25  ;;  %639 = vmatprep.subr.mxu1 %v345_v26  ;;  %v332_v40 = vld [vmem:[%s2450_s1 + $0xd0] sm:$0xff]  ;;  %v327_v41 = vld [vmem:[%s2450_s1 + $0xa8] sm:$0xff]  ;;  %v329_v42 = vld [vmem:[%s2450_s1 + $0xb8] sm:$0xff] }
   0xf   :  { %383 = vmatpush1.msra.mxu0 %v342_v27  ;;  %640 = vmatpush1.msra.mxu1 %v344_v28  ;;  %v326_v43 = vld [vmem:[%s2450_s1 + $0xa0] sm:$0xff]  ;;  %v328_v44 = vld [vmem:[%s2450_s1 + $0xb0] sm:$0xff]  ;;  %v323_v45 = vld [vmem:[%s2450_s1 + $0x88] sm:$0xff] }
  0x10   :  { %384 = vmatprep.subr.mxu0 %v339_v29  ;;  %641 = vmatprep.subr.mxu1 %v341_v30  ;;  %v325_v46 = vld [vmem:[%s2450_s1 + $0x98] sm:$0xff]  ;;  %v322_v47 = vld [vmem:[%s2450_s1 + $0x80] sm:$0xff]  ;;  %v324_v48 = vld [vmem:[%s2450_s1 + $0x90] sm:$0xff] }
  0x11   :  { %385 = vmatpush1.msra.mxu0 %v338_v31  ;;  %642 = vmatpush1.msra.mxu1 %v340_v32  ;;  %v319_v49 = vld [vmem:[%s2450_s1 + $0x68] sm:$0xff]  ;;  %v321_v50 = vld [vmem:[%s2450_s1 + $0x78] sm:$0xff]  ;;  %v318_v51 = vld [vmem:[%s2450_s1 + $0x60] sm:$0xff] }
  0x12   :  { %386 = vmatprep.subr.mxu0 %v335_v33  ;;  %643 = vmatprep.subr.mxu1 %v337_v34  ;;  %v320_v52 = vld [vmem:[%s2450_s1 + $0x70] sm:$0xff]  ;;  %v315_v53 = vld [vmem:[%s2450_s1 + $0x48] sm:$0xff]  ;;  %v317_v54 = vld [vmem:[%s2450_s1 + $0x58] sm:$0xff]  ;;  %v1273_v34 = vlaneseq }
  0x13   :  { %387 = vmatpush1.msra.mxu0 %v334_v35  ;;  %644 = vmatpush1.msra.mxu1 %v336_v36  ;;  %v314_v55 = vld [vmem:[%s2450_s1 + $0x40] sm:$0xff]  ;;  %v316_v56 = vld [vmem:[%s2450_s1 + $0x50] sm:$0xff]  ;;  %v311_v57 = vld [vmem:[%s2450_s1 + $0x28] sm:$0xff] }
  0x14   :  { %388 = vmatprep.subr.mxu0 %v331_v37  ;;  %645 = vmatprep.subr.mxu1 %v333_v38  ;;  %v313_v58 = vld [vmem:[%s2450_s1 + $0x38] sm:$0xff]  ;;  %v310_v59 = vld [vmem:[%s2450_s1 + $0x20] sm:$0xff]  ;;  %v312_v60 = vld [vmem:[%s2450_s1 + $0x30] sm:$0xff]  ;;  %v1274_v35 = vshrl.u32 %v1273_v34, 7 }
  0x15   :  { %389 = vmatpush1.msra.mxu0 %v330_v39  ;;  %646 = vmatpush1.msra.mxu1 %v332_v40  ;;  %v307_v61 = vld [vmem:[%s2450_s1 + $0x8] sm:$0xff]  ;;  %v309_v62 = vld [vmem:[%s2450_s1 + $0x18] sm:$0xff]  ;;  %v306_v63 = vld [vmem:[%s2450_s1] sm:$0xff] }
  0x16   :  { %390 = vmatprep.subr.mxu0 %v327_v41  ;;  %647 = vmatprep.subr.mxu1 %v329_v42  ;;  %v308_v0 = vld [vmem:[%s2450_s1 + $0x10] sm:$0xff]  ;;  %v274_v1 = vld [vmem:[%s2451_s0] sm:$0xff]  ;;  %v275_v2 = vld [vmem:[%s2451_s0 + $0x8] sm:$0xff]  ;;  %v1275_v36 = vsub.s32 0, %v1274_v35  ;;  %v1283_v37 = vsub.s32 2, %v1274_v35  ;;  %v1279_v39 = vsub.s32 1, %v1274_v35 }
  0x17   :  { %391 = vmatpush1.msra.mxu0 %v326_v43  ;;  %648 = vmatpush1.msra.mxu1 %v328_v44  ;;  %v276_v4 = vld [vmem:[%s2451_s0 + $0x10] sm:$0xff]  ;;  %v277_v5 = vld [vmem:[%s2451_s0 + $0x18] sm:$0xff]  ;;  %v278_v6 = vld [vmem:[%s2451_s0 + $0x20] sm:$0xff]  ;;  %v1287_v40 = vsub.s32 3, %v1274_v35 }
  0x18   :  { %392 = vmatprep.subr.mxu0 %v323_v45  ;;  %649 = vmatprep.subr.mxu1 %v325_v46  ;;  %v279_v7 = vld [vmem:[%s2451_s0 + $0x28] sm:$0xff]  ;;  %v280_v8 = vld [vmem:[%s2451_s0 + $0x30] sm:$0xff]  ;;  %v281_v9 = vld [vmem:[%s2451_s0 + $0x38] sm:$0xff] }
  0x19   :  { %393 = vmatpush1.msra.mxu0 %v322_v47  ;;  %650 = vmatpush1.msra.mxu1 %v324_v48  ;;  %v282_v10 = vld [vmem:[%s2451_s0 + $0x40] sm:$0xff]  ;;  %v283_v11 = vld [vmem:[%s2451_s0 + $0x48] sm:$0xff]  ;;  %v284_v12 = vld [vmem:[%s2451_s0 + $0x50] sm:$0xff] }
  0x1a   :  { %394 = vmatprep.subr.mxu0 %v319_v49  ;;  %651 = vmatprep.subr.mxu1 %v321_v50  ;;  %v285_v13 = vld [vmem:[%s2451_s0 + $0x58] sm:$0xff]  ;;  %v286_v14 = vld [vmem:[%s2451_s0 + $0x60] sm:$0xff]  ;;  %v287_v15 = vld [vmem:[%s2451_s0 + $0x68] sm:$0xff] }
  0x1b   :  { %395 = vmatpush1.msra.mxu0 %v318_v51  ;;  %652 = vmatpush1.msra.mxu1 %v320_v52  ;;  %v288_v16 = vld [vmem:[%s2451_s0 + $0x70] sm:$0xff]  ;;  %v289_v17 = vld [vmem:[%s2451_s0 + $0x78] sm:$0xff]  ;;  %v290_v18 = vld [vmem:[%s2451_s0 + $0x80] sm:$0xff] }
  0x1c   :  { %396 = vmatprep.subr.mxu0 %v315_v53  ;;  %653 = vmatprep.subr.mxu1 %v317_v54  ;;  %v291_v19 = vld [vmem:[%s2451_s0 + $0x88] sm:$0xff]  ;;  %v292_v20 = vld [vmem:[%s2451_s0 + $0x90] sm:$0xff]  ;;  %v293_v21 = vld [vmem:[%s2451_s0 + $0x98] sm:$0xff] }
  0x1d   :  { %397 = vmatpush1.msra.mxu0 %v314_v55  ;;  %654 = vmatpush1.msra.mxu1 %v316_v56  ;;  %v294_v22 = vld [vmem:[%s2451_s0 + $0xa0] sm:$0xff]  ;;  %v295_v23 = vld [vmem:[%s2451_s0 + $0xa8] sm:$0xff]  ;;  %v296_v24 = vld [vmem:[%s2451_s0 + $0xb0] sm:$0xff] }
  0x1e   :  { %398 = vmatprep.subr.mxu0 %v311_v57  ;;  %655 = vmatprep.subr.mxu1 %v313_v58  ;;  %v297_v25 = vld [vmem:[%s2451_s0 + $0xb8] sm:$0xff]  ;;  %v298_v26 = vld [vmem:[%s2451_s0 + $0xc0] sm:$0xff]  ;;  %v299_v27 = vld [vmem:[%s2451_s0 + $0xc8] sm:$0xff] }
  0x1f   :  { %399 = vmatpush1.msra.mxu0 %v310_v59  ;;  %656 = vmatpush1.msra.mxu1 %v312_v60  ;;  %v300_v28 = vld [vmem:[%s2451_s0 + $0xd0] sm:$0xff]  ;;  %v301_v29 = vld [vmem:[%s2451_s0 + $0xd8] sm:$0xff]  ;;  %v302_v30 = vld [vmem:[%s2451_s0 + $0xe0] sm:$0xff] }
  0x20   :  { %400 = vmatprep.subr.mxu0 %v307_v61  ;;  %657 = vmatprep.subr.mxu1 %v309_v62  ;;  %v303_v31 = vld [vmem:[%s2451_s0 + $0xe8] sm:$0xff]  ;;  %v304_v32 = vld [vmem:[%s2451_s0 + $0xf0] sm:$0xff]  ;;  %v305_v33 = vld [vmem:[%s2451_s0 + $0xf8] sm:$0xff] }
  0x21   :  { %401 = vmatpush1.msra.mxu0 %v306_v63  ;;  %658 = vmatpush1.msra.mxu1 %v308_v0  ;;  %v1271_v38 = vld [vmem:[%s2452_s2] sm:$0xf] }
  0x22   :  { %435 = vmatmul.mubr.f32.vlgmr.msra.gmra.mxu0 %v274_v1  ;;  %692 = vmatmul.mubr.f32.vlgmr.msra.gmra.mxu1 %v274_v1  ;;  %v1930_v41 = vrot.slane %v1271_v38, %v1275_v36  ;;  %v1932_v42 = vrot.slane %v1271_v38, %v1283_v37  ;;  %v1936_v43 = vrot.slane %v1271_v38, %v1287_v40 }
  0x23   :  { %440 = vmatprep.mubr.f32.mxu0 %v1554_v3  ;;  %697 = vmatprep.mubr.f32.mxu1 %v1554_v3 }
  0x26   :  { %441 = vmatmul.mubr.f32.gmra.mxu0 %v275_v2  ;;  %698 = vmatmul.mubr.f32.gmra.mxu1 %v275_v2 }
  0x27   :  { %446 = vmatprep.mubr.f32.mxu0 %v1554_v3  ;;  %703 = vmatprep.mubr.f32.mxu1 %v1554_v3 }
  0x2a   :  { %447 = vmatmul.mubr.f32.gmra.mxu0 %v276_v4  ;;  %704 = vmatmul.mubr.f32.gmra.mxu1 %v276_v4 }
  0x2b   :  { %452 = vmatprep.mubr.f32.mxu0 %v1554_v3  ;;  %709 = vmatprep.mubr.f32.mxu1 %v1554_v3 }
  0x2e   :  { %453 = vmatmul.mubr.f32.gmra.mxu0 %v277_v5  ;;  %710 = vmatmul.mubr.f32.gmra.mxu1 %v277_v5 }
  0x2f   :  { %458 = vmatprep.mubr.f32.mxu0 %v1554_v3  ;;  %715 = vmatprep.mubr.f32.mxu1 %v1554_v3 }
  0x32   :  { %459 = vmatmul.mubr.f32.gmra.mxu0 %v278_v6  ;;  %716 = vmatmul.mubr.f32.gmra.mxu1 %v278_v6 }
  0x33   :  { %464 = vmatprep.mubr.f32.mxu0 %v1554_v3  ;;  %721 = vmatprep.mubr.f32.mxu1 %v1554_v3 }
  0x36   :  { %465 = vmatmul.mubr.f32.gmra.mxu0 %v279_v7  ;;  %722 = vmatmul.mubr.f32.gmra.mxu1 %v279_v7 }
  0x37   :  { %470 = vmatprep.mubr.f32.mxu0 %v1554_v3  ;;  %727 = vmatprep.mubr.f32.mxu1 %v1554_v3 }
  0x3a   :  { %471 = vmatmul.mubr.f32.gmra.mxu0 %v280_v8  ;;  %728 = vmatmul.mubr.f32.gmra.mxu1 %v280_v8 }
  0x3b   :  { %476 = vmatprep.mubr.f32.mxu0 %v1554_v3  ;;  %733 = vmatprep.mubr.f32.mxu1 %v1554_v3 }
  0x3e   :  { %477 = vmatmul.mubr.f32.gmra.mxu0 %v281_v9  ;;  %734 = vmatmul.mubr.f32.gmra.mxu1 %v281_v9 }
  0x3f   :  { %482 = vmatprep.mubr.f32.mxu0 %v1554_v3  ;;  %739 = vmatprep.mubr.f32.mxu1 %v1554_v3 }
  0x42   :  { %483 = vmatmul.mubr.f32.gmra.mxu0 %v282_v10  ;;  %740 = vmatmul.mubr.f32.gmra.mxu1 %v282_v10 }
  0x43   :  { %488 = vmatprep.mubr.f32.mxu0 %v1554_v3  ;;  %745 = vmatprep.mubr.f32.mxu1 %v1554_v3 }
  0x46   :  { %489 = vmatmul.mubr.f32.gmra.mxu0 %v283_v11  ;;  %746 = vmatmul.mubr.f32.gmra.mxu1 %v283_v11 }
  0x47   :  { %494 = vmatprep.mubr.f32.mxu0 %v1554_v3  ;;  %751 = vmatprep.mubr.f32.mxu1 %v1554_v3 }
  0x4a   :  { %495 = vmatmul.mubr.f32.gmra.mxu0 %v284_v12  ;;  %752 = vmatmul.mubr.f32.gmra.mxu1 %v284_v12 }
  0x4b   :  { %500 = vmatprep.mubr.f32.mxu0 %v1554_v3  ;;  %757 = vmatprep.mubr.f32.mxu1 %v1554_v3 }
  0x4e   :  { %501 = vmatmul.mubr.f32.gmra.mxu0 %v285_v13  ;;  %758 = vmatmul.mubr.f32.gmra.mxu1 %v285_v13 }
  0x4f   :  { %506 = vmatprep.mubr.f32.mxu0 %v1554_v3  ;;  %763 = vmatprep.mubr.f32.mxu1 %v1554_v3 }
  0x52   :  { %507 = vmatmul.mubr.f32.gmra.mxu0 %v286_v14  ;;  %764 = vmatmul.mubr.f32.gmra.mxu1 %v286_v14 }
  0x53   :  { %512 = vmatprep.mubr.f32.mxu0 %v1554_v3  ;;  %769 = vmatprep.mubr.f32.mxu1 %v1554_v3 }
  0x56   :  { %513 = vmatmul.mubr.f32.gmra.mxu0 %v287_v15  ;;  %770 = vmatmul.mubr.f32.gmra.mxu1 %v287_v15 }
  0x57   :  { %518 = vmatprep.mubr.f32.mxu0 %v1554_v3  ;;  %775 = vmatprep.mubr.f32.mxu1 %v1554_v3 }
  0x5a   :  { %519 = vmatmul.mubr.f32.gmra.mxu0 %v288_v16  ;;  %776 = vmatmul.mubr.f32.gmra.mxu1 %v288_v16 }
  0x5b   :  { %524 = vmatprep.mubr.f32.mxu0 %v1554_v3  ;;  %781 = vmatprep.mubr.f32.mxu1 %v1554_v3 }
  0x5e   :  { %525 = vmatmul.mubr.f32.gmra.mxu0 %v289_v17  ;;  %782 = vmatmul.mubr.f32.gmra.mxu1 %v289_v17 }
  0x5f   :  { %530 = vmatprep.mubr.f32.mxu0 %v1554_v3  ;;  %787 = vmatprep.mubr.f32.mxu1 %v1554_v3 }
  0x62   :  { %531 = vmatmul.mubr.f32.gmra.mxu0 %v290_v18  ;;  %788 = vmatmul.mubr.f32.gmra.mxu1 %v290_v18 }
  0x63   :  { %536 = vmatprep.mubr.f32.mxu0 %v1554_v3  ;;  %793 = vmatprep.mubr.f32.mxu1 %v1554_v3 }
  0x66   :  { %537 = vmatmul.mubr.f32.gmra.mxu0 %v291_v19  ;;  %794 = vmatmul.mubr.f32.gmra.mxu1 %v291_v19 }
  0x67   :  { %542 = vmatprep.mubr.f32.mxu0 %v1554_v3  ;;  %799 = vmatprep.mubr.f32.mxu1 %v1554_v3 }
  0x6a   :  { %543 = vmatmul.mubr.f32.gmra.mxu0 %v292_v20  ;;  %800 = vmatmul.mubr.f32.gmra.mxu1 %v292_v20 }
  0x6b   :  { %548 = vmatprep.mubr.f32.mxu0 %v1554_v3  ;;  %805 = vmatprep.mubr.f32.mxu1 %v1554_v3 }
  0x6e   :  { %549 = vmatmul.mubr.f32.gmra.mxu0 %v293_v21  ;;  %806 = vmatmul.mubr.f32.gmra.mxu1 %v293_v21 }
  0x6f   :  { %554 = vmatprep.mubr.f32.mxu0 %v1554_v3  ;;  %811 = vmatprep.mubr.f32.mxu1 %v1554_v3 }
  0x72   :  { %555 = vmatmul.mubr.f32.gmra.mxu0 %v294_v22  ;;  %812 = vmatmul.mubr.f32.gmra.mxu1 %v294_v22 }
  0x73   :  { %560 = vmatprep.mubr.f32.mxu0 %v1554_v3  ;;  %817 = vmatprep.mubr.f32.mxu1 %v1554_v3 }
  0x76   :  { %561 = vmatmul.mubr.f32.gmra.mxu0 %v295_v23  ;;  %818 = vmatmul.mubr.f32.gmra.mxu1 %v295_v23 }
  0x77   :  { %566 = vmatprep.mubr.f32.mxu0 %v1554_v3  ;;  %823 = vmatprep.mubr.f32.mxu1 %v1554_v3 }
  0x7a   :  { %567 = vmatmul.mubr.f32.gmra.mxu0 %v296_v24  ;;  %824 = vmatmul.mubr.f32.gmra.mxu1 %v296_v24 }
  0x7b   :  { %572 = vmatprep.mubr.f32.mxu0 %v1554_v3  ;;  %829 = vmatprep.mubr.f32.mxu1 %v1554_v3 }
  0x7e   :  { %573 = vmatmul.mubr.f32.gmra.mxu0 %v297_v25  ;;  %830 = vmatmul.mubr.f32.gmra.mxu1 %v297_v25 }
  0x7f   :  { %578 = vmatprep.mubr.f32.mxu0 %v1554_v3  ;;  %835 = vmatprep.mubr.f32.mxu1 %v1554_v3 }
  0x82   :  { %579 = vmatmul.mubr.f32.gmra.mxu0 %v298_v26  ;;  %836 = vmatmul.mubr.f32.gmra.mxu1 %v298_v26 }
  0x83   :  { %584 = vmatprep.mubr.f32.mxu0 %v1554_v3  ;;  %841 = vmatprep.mubr.f32.mxu1 %v1554_v3 }
  0x86   :  { %585 = vmatmul.mubr.f32.gmra.mxu0 %v299_v27  ;;  %842 = vmatmul.mubr.f32.gmra.mxu1 %v299_v27 }
  0x87   :  { %590 = vmatprep.mubr.f32.mxu0 %v1554_v3  ;;  %847 = vmatprep.mubr.f32.mxu1 %v1554_v3 }
  0x8a   :  { %591 = vmatmul.mubr.f32.gmra.mxu0 %v300_v28  ;;  %848 = vmatmul.mubr.f32.gmra.mxu1 %v300_v28 }
  0x8b   :  { %596 = vmatprep.mubr.f32.mxu0 %v1554_v3  ;;  %853 = vmatprep.mubr.f32.mxu1 %v1554_v3 }
  0x8e   :  { %597 = vmatmul.mubr.f32.gmra.mxu0 %v301_v29  ;;  %854 = vmatmul.mubr.f32.gmra.mxu1 %v301_v29 }
  0x8f   :  { %602 = vmatprep.mubr.f32.mxu0 %v1554_v3  ;;  %859 = vmatprep.mubr.f32.mxu1 %v1554_v3 }
  0x92   :  { %603 = vmatmul.mubr.f32.gmra.mxu0 %v302_v30  ;;  %860 = vmatmul.mubr.f32.gmra.mxu1 %v302_v30 }
  0x93   :  { %608 = vmatprep.mubr.f32.mxu0 %v1554_v3  ;;  %865 = vmatprep.mubr.f32.mxu1 %v1554_v3 }
  0x96   :  { %609 = vmatmul.mubr.f32.gmra.mxu0 %v303_v31  ;;  %866 = vmatmul.mubr.f32.gmra.mxu1 %v303_v31 }
  0x97   :  { %614 = vmatprep.mubr.f32.mxu0 %v1554_v3  ;;  %871 = vmatprep.mubr.f32.mxu1 %v1554_v3 }
  0x9a   :  { %615 = vmatmul.mubr.f32.gmra.mxu0 %v304_v32  ;;  %872 = vmatmul.mubr.f32.gmra.mxu1 %v304_v32 }
  0x9b   :  { %620 = vmatprep.mubr.f32.mxu0 %v1554_v3  ;;  %877 = vmatprep.mubr.f32.mxu1 %v1554_v3  ;;  %v1934_v3 = vrot.slane %v1271_v38, %v1279_v39 }
  0x9e   :  { %621 = vmatmul.mubr.f32.gmra.mxu0 %v305_v33  ;;  %878 = vmatmul.mubr.f32.gmra.mxu1 %v305_v33 }
  0xe2   :  { %v436_v44 = vpop.f32.mrf.mxu0  ;;  %v693_v45 = vpop.f32.mrf.mxu1 }
  0xe3   :  { %v1293_v46 = vadd.f32 %v1930_v41, %v436_v44  ;;  %v1295_v47 = vadd.f32 %v1932_v42, %v693_v45 }
  0xe4   :  { %v438_v48 = vpop.f32.mrf.mxu0  ;;  %v695_v49 = vpop.f32.mrf.mxu1 }
  0xe5   :  { %1421 = vst [vmem:[%s2453_s3] sm:$0xff] %v1293_v46  ;;  %1423 = vst [vmem:[%s2453_s3 + $0x10] sm:$0xff] %v1295_v47  ;;  %v1294_v50 = vadd.f32 %v1934_v3, %v438_v48  ;;  %v1296_v51 = vadd.f32 %v1936_v43, %v695_v49 }
  0xe6   :  { %v442_v52 = vpop.f32.mrf.mxu0  ;;  %v699_v53 = vpop.f32.mrf.mxu1 }
  0xe7   :  { %1422 = vst [vmem:[%s2453_s3 + $0x8] sm:$0xff] %v1294_v50  ;;  %1424 = vst [vmem:[%s2453_s3 + $0x18] sm:$0xff] %v1296_v51  ;;  %v1297_v54 = vadd.f32 %v1930_v41, %v442_v52  ;;  %v1299_v55 = vadd.f32 %v1932_v42, %v699_v53 }
  0xe8   :  { %v444_v56 = vpop.f32.mrf.mxu0  ;;  %v701_v57 = vpop.f32.mrf.mxu1 }
  0xe9   :  { %1425 = vst [vmem:[%s2453_s3 + $0x20] sm:$0xff] %v1297_v54  ;;  %1427 = vst [vmem:[%s2453_s3 + $0x30] sm:$0xff] %v1299_v55  ;;  %v1298_v58 = vadd.f32 %v1934_v3, %v444_v56  ;;  %v1300_v59 = vadd.f32 %v1936_v43, %v701_v57 }
  0xea   :  { %v448_v60 = vpop.f32.mrf.mxu0  ;;  %v705_v61 = vpop.f32.mrf.mxu1 }
  0xeb   :  { %1426 = vst [vmem:[%s2453_s3 + $0x28] sm:$0xff] %v1298_v58  ;;  %1428 = vst [vmem:[%s2453_s3 + $0x38] sm:$0xff] %v1300_v59  ;;  %v1301_v62 = vadd.f32 %v1930_v41, %v448_v60  ;;  %v1303_v63 = vadd.f32 %v1932_v42, %v705_v61 }
  0xec   :  { %v450_v0 = vpop.f32.mrf.mxu0  ;;  %v707_v1 = vpop.f32.mrf.mxu1 }
  0xed   :  { %1429 = vst [vmem:[%s2453_s3 + $0x40] sm:$0xff] %v1301_v62  ;;  %1431 = vst [vmem:[%s2453_s3 + $0x50] sm:$0xff] %v1303_v63  ;;  %v1302_v2 = vadd.f32 %v1934_v3, %v450_v0  ;;  %v1304_v4 = vadd.f32 %v1936_v43, %v707_v1 }
  0xee   :  { %v454_v5 = vpop.f32.mrf.mxu0  ;;  %v711_v6 = vpop.f32.mrf.mxu1 }
  0xef   :  { %1430 = vst [vmem:[%s2453_s3 + $0x48] sm:$0xff] %v1302_v2  ;;  %1432 = vst [vmem:[%s2453_s3 + $0x58] sm:$0xff] %v1304_v4  ;;  %v1305_v7 = vadd.f32 %v1930_v41, %v454_v5  ;;  %v1307_v8 = vadd.f32 %v1932_v42, %v711_v6 }
  0xf0   :  { %v456_v9 = vpop.f32.mrf.mxu0  ;;  %v713_v10 = vpop.f32.mrf.mxu1 }
  0xf1   :  { %1433 = vst [vmem:[%s2453_s3 + $0x60] sm:$0xff] %v1305_v7  ;;  %1435 = vst [vmem:[%s2453_s3 + $0x70] sm:$0xff] %v1307_v8  ;;  %v1306_v11 = vadd.f32 %v1934_v3, %v456_v9  ;;  %v1308_v12 = vadd.f32 %v1936_v43, %v713_v10 }
  0xf2   :  { %v460_v13 = vpop.f32.mrf.mxu0  ;;  %v717_v14 = vpop.f32.mrf.mxu1 }
  0xf3   :  { %1434 = vst [vmem:[%s2453_s3 + $0x68] sm:$0xff] %v1306_v11  ;;  %1436 = vst [vmem:[%s2453_s3 + $0x78] sm:$0xff] %v1308_v12  ;;  %v1309_v15 = vadd.f32 %v1930_v41, %v460_v13  ;;  %v1311_v16 = vadd.f32 %v1932_v42, %v717_v14 }
  0xf4   :  { %v462_v17 = vpop.f32.mrf.mxu0  ;;  %v719_v18 = vpop.f32.mrf.mxu1 }
  0xf5   :  { %1437 = vst [vmem:[%s2453_s3 + $0x80] sm:$0xff] %v1309_v15  ;;  %1439 = vst [vmem:[%s2453_s3 + $0x90] sm:$0xff] %v1311_v16  ;;  %v1310_v19 = vadd.f32 %v1934_v3, %v462_v17  ;;  %v1312_v20 = vadd.f32 %v1936_v43, %v719_v18 }
  0xf6   :  { %v466_v21 = vpop.f32.mrf.mxu0  ;;  %v723_v22 = vpop.f32.mrf.mxu1 }
  0xf7   :  { %1438 = vst [vmem:[%s2453_s3 + $0x88] sm:$0xff] %v1310_v19  ;;  %1440 = vst [vmem:[%s2453_s3 + $0x98] sm:$0xff] %v1312_v20  ;;  %v1313_v23 = vadd.f32 %v1930_v41, %v466_v21  ;;  %v1315_v24 = vadd.f32 %v1932_v42, %v723_v22 }
  0xf8   :  { %v468_v25 = vpop.f32.mrf.mxu0  ;;  %v725_v26 = vpop.f32.mrf.mxu1 }
  0xf9   :  { %1441 = vst [vmem:[%s2453_s3 + $0xa0] sm:$0xff] %v1313_v23  ;;  %1443 = vst [vmem:[%s2453_s3 + $0xb0] sm:$0xff] %v1315_v24  ;;  %v1314_v27 = vadd.f32 %v1934_v3, %v468_v25  ;;  %v1316_v28 = vadd.f32 %v1936_v43, %v725_v26 }
  0xfa   :  { %v472_v29 = vpop.f32.mrf.mxu0  ;;  %v729_v30 = vpop.f32.mrf.mxu1 }
  0xfb   :  { %1442 = vst [vmem:[%s2453_s3 + $0xa8] sm:$0xff] %v1314_v27  ;;  %1444 = vst [vmem:[%s2453_s3 + $0xb8] sm:$0xff] %v1316_v28  ;;  %v1317_v31 = vadd.f32 %v1930_v41, %v472_v29  ;;  %v1319_v32 = vadd.f32 %v1932_v42, %v729_v30 }
  0xfc   :  { %v474_v33 = vpop.f32.mrf.mxu0  ;;  %v731_v34 = vpop.f32.mrf.mxu1 }
  0xfd   :  { %1445 = vst [vmem:[%s2453_s3 + $0xc0] sm:$0xff] %v1317_v31  ;;  %1447 = vst [vmem:[%s2453_s3 + $0xd0] sm:$0xff] %v1319_v32  ;;  %v1318_v35 = vadd.f32 %v1934_v3, %v474_v33  ;;  %v1320_v36 = vadd.f32 %v1936_v43, %v731_v34 }
  0xfe   :  { %v478_v37 = vpop.f32.mrf.mxu0  ;;  %v735_v38 = vpop.f32.mrf.mxu1 }
  0xff   :  { %1446 = vst [vmem:[%s2453_s3 + $0xc8] sm:$0xff] %v1318_v35  ;;  %1448 = vst [vmem:[%s2453_s3 + $0xd8] sm:$0xff] %v1320_v36  ;;  %v1321_v39 = vadd.f32 %v1930_v41, %v478_v37  ;;  %v1323_v40 = vadd.f32 %v1932_v42, %v735_v38 }
 0x100   :  { %v480_v44 = vpop.f32.mrf.mxu0  ;;  %v737_v45 = vpop.f32.mrf.mxu1 }
 0x101   :  { %1449 = vst [vmem:[%s2453_s3 + $0xe0] sm:$0xff] %v1321_v39  ;;  %1451 = vst [vmem:[%s2453_s3 + $0xf0] sm:$0xff] %v1323_v40  ;;  %v1322_v46 = vadd.f32 %v1934_v3, %v480_v44  ;;  %v1324_v47 = vadd.f32 %v1936_v43, %v737_v45 }
 0x102   :  { %v484_v48 = vpop.f32.mrf.mxu0  ;;  %v741_v49 = vpop.f32.mrf.mxu1 }
 0x103   :  { %1450 = vst [vmem:[%s2453_s3 + $0xe8] sm:$0xff] %v1322_v46  ;;  %1452 = vst [vmem:[%s2453_s3 + $0xf8] sm:$0xff] %v1324_v47  ;;  %v1325_v50 = vadd.f32 %v1930_v41, %v484_v48  ;;  %v1327_v51 = vadd.f32 %v1932_v42, %v741_v49 }
 0x104   :  { %v486_v52 = vpop.f32.mrf.mxu0  ;;  %v743_v53 = vpop.f32.mrf.mxu1 }
 0x105   :  { %1453 = vst [vmem:[%s2453_s3 + $0x100] sm:$0xff] %v1325_v50  ;;  %1455 = vst [vmem:[%s2453_s3 + $0x110] sm:$0xff] %v1327_v51  ;;  %v1326_v54 = vadd.f32 %v1934_v3, %v486_v52  ;;  %v1328_v55 = vadd.f32 %v1936_v43, %v743_v53 }
 0x106   :  { %v490_v56 = vpop.f32.mrf.mxu0  ;;  %v747_v57 = vpop.f32.mrf.mxu1 }
 0x107   :  { %1454 = vst [vmem:[%s2453_s3 + $0x108] sm:$0xff] %v1326_v54  ;;  %1456 = vst [vmem:[%s2453_s3 + $0x118] sm:$0xff] %v1328_v55  ;;  %v1329_v58 = vadd.f32 %v1930_v41, %v490_v56  ;;  %v1331_v59 = vadd.f32 %v1932_v42, %v747_v57 }
 0x108   :  { %v492_v60 = vpop.f32.mrf.mxu0  ;;  %v749_v61 = vpop.f32.mrf.mxu1 }
 0x109   :  { %1457 = vst [vmem:[%s2453_s3 + $0x120] sm:$0xff] %v1329_v58  ;;  %1459 = vst [vmem:[%s2453_s3 + $0x130] sm:$0xff] %v1331_v59  ;;  %v1330_v62 = vadd.f32 %v1934_v3, %v492_v60  ;;  %v1332_v63 = vadd.f32 %v1936_v43, %v749_v61 }
 0x10a   :  { %v496_v0 = vpop.f32.mrf.mxu0  ;;  %v753_v1 = vpop.f32.mrf.mxu1 }
 0x10b   :  { %1458 = vst [vmem:[%s2453_s3 + $0x128] sm:$0xff] %v1330_v62  ;;  %1460 = vst [vmem:[%s2453_s3 + $0x138] sm:$0xff] %v1332_v63  ;;  %v1333_v2 = vadd.f32 %v1930_v41, %v496_v0  ;;  %v1335_v4 = vadd.f32 %v1932_v42, %v753_v1 }
 0x10c   :  { %v498_v5 = vpop.f32.mrf.mxu0  ;;  %v755_v6 = vpop.f32.mrf.mxu1 }
 0x10d   :  { %1461 = vst [vmem:[%s2453_s3 + $0x140] sm:$0xff] %v1333_v2  ;;  %1463 = vst [vmem:[%s2453_s3 + $0x150] sm:$0xff] %v1335_v4  ;;  %v1334_v7 = vadd.f32 %v1934_v3, %v498_v5  ;;  %v1336_v8 = vadd.f32 %v1936_v43, %v755_v6 }
 0x10e   :  { %v502_v9 = vpop.f32.mrf.mxu0  ;;  %v759_v10 = vpop.f32.mrf.mxu1 }
 0x10f   :  { %1462 = vst [vmem:[%s2453_s3 + $0x148] sm:$0xff] %v1334_v7  ;;  %1464 = vst [vmem:[%s2453_s3 + $0x158] sm:$0xff] %v1336_v8  ;;  %v1337_v11 = vadd.f32 %v1930_v41, %v502_v9  ;;  %v1339_v12 = vadd.f32 %v1932_v42, %v759_v10 }
 0x110   :  { %v504_v13 = vpop.f32.mrf.mxu0  ;;  %v761_v14 = vpop.f32.mrf.mxu1 }
 0x111   :  { %1465 = vst [vmem:[%s2453_s3 + $0x160] sm:$0xff] %v1337_v11  ;;  %1467 = vst [vmem:[%s2453_s3 + $0x170] sm:$0xff] %v1339_v12  ;;  %v1338_v15 = vadd.f32 %v1934_v3, %v504_v13  ;;  %v1340_v16 = vadd.f32 %v1936_v43, %v761_v14 }
 0x112   :  { %v508_v17 = vpop.f32.mrf.mxu0  ;;  %v765_v18 = vpop.f32.mrf.mxu1 }
 0x113   :  { %1466 = vst [vmem:[%s2453_s3 + $0x168] sm:$0xff] %v1338_v15  ;;  %1468 = vst [vmem:[%s2453_s3 + $0x178] sm:$0xff] %v1340_v16  ;;  %v1341_v19 = vadd.f32 %v1930_v41, %v508_v17  ;;  %v1343_v20 = vadd.f32 %v1932_v42, %v765_v18 }
 0x114   :  { %v510_v21 = vpop.f32.mrf.mxu0  ;;  %v767_v22 = vpop.f32.mrf.mxu1 }
 0x115   :  { %1469 = vst [vmem:[%s2453_s3 + $0x180] sm:$0xff] %v1341_v19  ;;  %1471 = vst [vmem:[%s2453_s3 + $0x190] sm:$0xff] %v1343_v20  ;;  %v1342_v23 = vadd.f32 %v1934_v3, %v510_v21  ;;  %v1344_v24 = vadd.f32 %v1936_v43, %v767_v22 }
 0x116   :  { %v514_v25 = vpop.f32.mrf.mxu0  ;;  %v771_v26 = vpop.f32.mrf.mxu1 }
 0x117   :  { %1470 = vst [vmem:[%s2453_s3 + $0x188] sm:$0xff] %v1342_v23  ;;  %1472 = vst [vmem:[%s2453_s3 + $0x198] sm:$0xff] %v1344_v24  ;;  %v1345_v27 = vadd.f32 %v1930_v41, %v514_v25  ;;  %v1347_v28 = vadd.f32 %v1932_v42, %v771_v26 }
 0x118   :  { %v516_v29 = vpop.f32.mrf.mxu0  ;;  %v773_v30 = vpop.f32.mrf.mxu1 }
 0x119   :  { %1473 = vst [vmem:[%s2453_s3 + $0x1a0] sm:$0xff] %v1345_v27  ;;  %1475 = vst [vmem:[%s2453_s3 + $0x1b0] sm:$0xff] %v1347_v28  ;;  %v1346_v31 = vadd.f32 %v1934_v3, %v516_v29  ;;  %v1348_v32 = vadd.f32 %v1936_v43, %v773_v30 }
 0x11a   :  { %v520_v33 = vpop.f32.mrf.mxu0  ;;  %v777_v34 = vpop.f32.mrf.mxu1 }
 0x11b   :  { %1474 = vst [vmem:[%s2453_s3 + $0x1a8] sm:$0xff] %v1346_v31  ;;  %1476 = vst [vmem:[%s2453_s3 + $0x1b8] sm:$0xff] %v1348_v32  ;;  %v1349_v35 = vadd.f32 %v1930_v41, %v520_v33  ;;  %v1351_v36 = vadd.f32 %v1932_v42, %v777_v34 }
 0x11c   :  { %v522_v37 = vpop.f32.mrf.mxu0  ;;  %v779_v38 = vpop.f32.mrf.mxu1 }
 0x11d   :  { %1477 = vst [vmem:[%s2453_s3 + $0x1c0] sm:$0xff] %v1349_v35  ;;  %1479 = vst [vmem:[%s2453_s3 + $0x1d0] sm:$0xff] %v1351_v36  ;;  %v1350_v39 = vadd.f32 %v1934_v3, %v522_v37  ;;  %v1352_v40 = vadd.f32 %v1936_v43, %v779_v38 }
 0x11e   :  { %v526_v44 = vpop.f32.mrf.mxu0  ;;  %v783_v45 = vpop.f32.mrf.mxu1 }
 0x11f   :  { %1478 = vst [vmem:[%s2453_s3 + $0x1c8] sm:$0xff] %v1350_v39  ;;  %1480 = vst [vmem:[%s2453_s3 + $0x1d8] sm:$0xff] %v1352_v40  ;;  %v1353_v46 = vadd.f32 %v1930_v41, %v526_v44  ;;  %v1355_v47 = vadd.f32 %v1932_v42, %v783_v45 }
 0x120   :  { %v528_v48 = vpop.f32.mrf.mxu0  ;;  %v785_v49 = vpop.f32.mrf.mxu1 }
 0x121   :  { %1481 = vst [vmem:[%s2453_s3 + $0x1e0] sm:$0xff] %v1353_v46  ;;  %1483 = vst [vmem:[%s2453_s3 + $0x1f0] sm:$0xff] %v1355_v47  ;;  %v1354_v50 = vadd.f32 %v1934_v3, %v528_v48  ;;  %v1356_v51 = vadd.f32 %v1936_v43, %v785_v49 }
 0x122   :  { %v532_v52 = vpop.f32.mrf.mxu0  ;;  %v789_v53 = vpop.f32.mrf.mxu1 }
 0x123   :  { %1482 = vst [vmem:[%s2453_s3 + $0x1e8] sm:$0xff] %v1354_v50  ;;  %1484 = vst [vmem:[%s2453_s3 + $0x1f8] sm:$0xff] %v1356_v51  ;;  %v1357_v54 = vadd.f32 %v1930_v41, %v532_v52  ;;  %v1359_v55 = vadd.f32 %v1932_v42, %v789_v53 }
 0x124   :  { %v534_v56 = vpop.f32.mrf.mxu0  ;;  %v791_v57 = vpop.f32.mrf.mxu1 }
 0x125   :  { %1485 = vst [vmem:[%s2453_s3 + $0x200] sm:$0xff] %v1357_v54  ;;  %1487 = vst [vmem:[%s2453_s3 + $0x210] sm:$0xff] %v1359_v55  ;;  %v1358_v58 = vadd.f32 %v1934_v3, %v534_v56  ;;  %v1360_v59 = vadd.f32 %v1936_v43, %v791_v57 }
 0x126   :  { %v538_v60 = vpop.f32.mrf.mxu0  ;;  %v795_v61 = vpop.f32.mrf.mxu1 }
 0x127   :  { %1486 = vst [vmem:[%s2453_s3 + $0x208] sm:$0xff] %v1358_v58  ;;  %1488 = vst [vmem:[%s2453_s3 + $0x218] sm:$0xff] %v1360_v59  ;;  %v1361_v62 = vadd.f32 %v1930_v41, %v538_v60  ;;  %v1363_v63 = vadd.f32 %v1932_v42, %v795_v61 }
 0x128   :  { %v540_v0 = vpop.f32.mrf.mxu0  ;;  %v797_v1 = vpop.f32.mrf.mxu1 }
 0x129   :  { %1489 = vst [vmem:[%s2453_s3 + $0x220] sm:$0xff] %v1361_v62  ;;  %1491 = vst [vmem:[%s2453_s3 + $0x230] sm:$0xff] %v1363_v63  ;;  %v1362_v2 = vadd.f32 %v1934_v3, %v540_v0  ;;  %v1364_v4 = vadd.f32 %v1936_v43, %v797_v1 }
 0x12a   :  { %v544_v5 = vpop.f32.mrf.mxu0  ;;  %v801_v6 = vpop.f32.mrf.mxu1 }
 0x12b   :  { %1490 = vst [vmem:[%s2453_s3 + $0x228] sm:$0xff] %v1362_v2  ;;  %1492 = vst [vmem:[%s2453_s3 + $0x238] sm:$0xff] %v1364_v4  ;;  %v1365_v7 = vadd.f32 %v1930_v41, %v544_v5  ;;  %v1367_v8 = vadd.f32 %v1932_v42, %v801_v6 }
 0x12c   :  { %v546_v9 = vpop.f32.mrf.mxu0  ;;  %v803_v10 = vpop.f32.mrf.mxu1 }
 0x12d   :  { %1493 = vst [vmem:[%s2453_s3 + $0x240] sm:$0xff] %v1365_v7  ;;  %1495 = vst [vmem:[%s2453_s3 + $0x250] sm:$0xff] %v1367_v8  ;;  %v1366_v11 = vadd.f32 %v1934_v3, %v546_v9  ;;  %v1368_v12 = vadd.f32 %v1936_v43, %v803_v10 }
 0x12e   :  { %v550_v13 = vpop.f32.mrf.mxu0  ;;  %v807_v14 = vpop.f32.mrf.mxu1 }
 0x12f   :  { %1494 = vst [vmem:[%s2453_s3 + $0x248] sm:$0xff] %v1366_v11  ;;  %1496 = vst [vmem:[%s2453_s3 + $0x258] sm:$0xff] %v1368_v12  ;;  %v1369_v15 = vadd.f32 %v1930_v41, %v550_v13  ;;  %v1371_v16 = vadd.f32 %v1932_v42, %v807_v14 }
 0x130   :  { %v552_v17 = vpop.f32.mrf.mxu0  ;;  %v809_v18 = vpop.f32.mrf.mxu1 }
 0x131   :  { %1497 = vst [vmem:[%s2453_s3 + $0x260] sm:$0xff] %v1369_v15  ;;  %1499 = vst [vmem:[%s2453_s3 + $0x270] sm:$0xff] %v1371_v16  ;;  %v1370_v19 = vadd.f32 %v1934_v3, %v552_v17  ;;  %v1372_v20 = vadd.f32 %v1936_v43, %v809_v18 }
 0x132   :  { %v556_v21 = vpop.f32.mrf.mxu0  ;;  %v813_v22 = vpop.f32.mrf.mxu1 }
 0x133   :  { %1498 = vst [vmem:[%s2453_s3 + $0x268] sm:$0xff] %v1370_v19  ;;  %1500 = vst [vmem:[%s2453_s3 + $0x278] sm:$0xff] %v1372_v20  ;;  %v1373_v23 = vadd.f32 %v1930_v41, %v556_v21  ;;  %v1375_v24 = vadd.f32 %v1932_v42, %v813_v22 }
 0x134   :  { %v558_v25 = vpop.f32.mrf.mxu0  ;;  %v815_v26 = vpop.f32.mrf.mxu1 }
 0x135   :  { %1501 = vst [vmem:[%s2453_s3 + $0x280] sm:$0xff] %v1373_v23  ;;  %1503 = vst [vmem:[%s2453_s3 + $0x290] sm:$0xff] %v1375_v24  ;;  %v1374_v27 = vadd.f32 %v1934_v3, %v558_v25  ;;  %v1376_v28 = vadd.f32 %v1936_v43, %v815_v26 }
 0x136   :  { %v562_v29 = vpop.f32.mrf.mxu0  ;;  %v819_v30 = vpop.f32.mrf.mxu1 }
 0x137   :  { %1502 = vst [vmem:[%s2453_s3 + $0x288] sm:$0xff] %v1374_v27  ;;  %1504 = vst [vmem:[%s2453_s3 + $0x298] sm:$0xff] %v1376_v28  ;;  %v1377_v31 = vadd.f32 %v1930_v41, %v562_v29  ;;  %v1379_v32 = vadd.f32 %v1932_v42, %v819_v30 }
 0x138   :  { %v564_v33 = vpop.f32.mrf.mxu0  ;;  %v821_v34 = vpop.f32.mrf.mxu1 }
 0x139   :  { %1505 = vst [vmem:[%s2453_s3 + $0x2a0] sm:$0xff] %v1377_v31  ;;  %1507 = vst [vmem:[%s2453_s3 + $0x2b0] sm:$0xff] %v1379_v32  ;;  %v1378_v35 = vadd.f32 %v1934_v3, %v564_v33  ;;  %v1380_v36 = vadd.f32 %v1936_v43, %v821_v34 }
 0x13a   :  { %v568_v37 = vpop.f32.mrf.mxu0  ;;  %v825_v38 = vpop.f32.mrf.mxu1 }
 0x13b   :  { %1506 = vst [vmem:[%s2453_s3 + $0x2a8] sm:$0xff] %v1378_v35  ;;  %1508 = vst [vmem:[%s2453_s3 + $0x2b8] sm:$0xff] %v1380_v36  ;;  %v1381_v39 = vadd.f32 %v1930_v41, %v568_v37  ;;  %v1383_v40 = vadd.f32 %v1932_v42, %v825_v38 }
 0x13c   :  { %v570_v44 = vpop.f32.mrf.mxu0  ;;  %v827_v45 = vpop.f32.mrf.mxu1 }
 0x13d   :  { %1509 = vst [vmem:[%s2453_s3 + $0x2c0] sm:$0xff] %v1381_v39  ;;  %1511 = vst [vmem:[%s2453_s3 + $0x2d0] sm:$0xff] %v1383_v40  ;;  %v1382_v46 = vadd.f32 %v1934_v3, %v570_v44  ;;  %v1384_v47 = vadd.f32 %v1936_v43, %v827_v45 }
 0x13e   :  { %v574_v48 = vpop.f32.mrf.mxu0  ;;  %v831_v49 = vpop.f32.mrf.mxu1 }
 0x13f   :  { %1510 = vst [vmem:[%s2453_s3 + $0x2c8] sm:$0xff] %v1382_v46  ;;  %1512 = vst [vmem:[%s2453_s3 + $0x2d8] sm:$0xff] %v1384_v47  ;;  %v1385_v50 = vadd.f32 %v1930_v41, %v574_v48  ;;  %v1387_v51 = vadd.f32 %v1932_v42, %v831_v49 }
 0x140   :  { %v576_v52 = vpop.f32.mrf.mxu0  ;;  %v833_v53 = vpop.f32.mrf.mxu1 }
 0x141   :  { %1513 = vst [vmem:[%s2453_s3 + $0x2e0] sm:$0xff] %v1385_v50  ;;  %1515 = vst [vmem:[%s2453_s3 + $0x2f0] sm:$0xff] %v1387_v51  ;;  %v1386_v54 = vadd.f32 %v1934_v3, %v576_v52  ;;  %v1388_v55 = vadd.f32 %v1936_v43, %v833_v53 }
 0x142   :  { %v580_v56 = vpop.f32.mrf.mxu0  ;;  %v837_v57 = vpop.f32.mrf.mxu1 }
 0x143   :  { %1514 = vst [vmem:[%s2453_s3 + $0x2e8] sm:$0xff] %v1386_v54  ;;  %1516 = vst [vmem:[%s2453_s3 + $0x2f8] sm:$0xff] %v1388_v55  ;;  %v1389_v58 = vadd.f32 %v1930_v41, %v580_v56  ;;  %v1391_v59 = vadd.f32 %v1932_v42, %v837_v57 }
 0x144   :  { %v582_v60 = vpop.f32.mrf.mxu0  ;;  %v839_v61 = vpop.f32.mrf.mxu1 }
 0x145   :  { %1517 = vst [vmem:[%s2453_s3 + $0x300] sm:$0xff] %v1389_v58  ;;  %1519 = vst [vmem:[%s2453_s3 + $0x310] sm:$0xff] %v1391_v59  ;;  %v1390_v62 = vadd.f32 %v1934_v3, %v582_v60  ;;  %v1392_v63 = vadd.f32 %v1936_v43, %v839_v61 }
 0x146   :  { %v586_v0 = vpop.f32.mrf.mxu0  ;;  %v843_v1 = vpop.f32.mrf.mxu1 }
 0x147   :  { %1518 = vst [vmem:[%s2453_s3 + $0x308] sm:$0xff] %v1390_v62  ;;  %1520 = vst [vmem:[%s2453_s3 + $0x318] sm:$0xff] %v1392_v63  ;;  %v1393_v2 = vadd.f32 %v1930_v41, %v586_v0  ;;  %v1395_v4 = vadd.f32 %v1932_v42, %v843_v1 }
 0x148   :  { %v588_v5 = vpop.f32.mrf.mxu0  ;;  %v845_v6 = vpop.f32.mrf.mxu1 }
 0x149   :  { %1521 = vst [vmem:[%s2453_s3 + $0x320] sm:$0xff] %v1393_v2  ;;  %1523 = vst [vmem:[%s2453_s3 + $0x330] sm:$0xff] %v1395_v4  ;;  %v1394_v7 = vadd.f32 %v1934_v3, %v588_v5  ;;  %v1396_v8 = vadd.f32 %v1936_v43, %v845_v6 }
 0x14a   :  { %v592_v9 = vpop.f32.mrf.mxu0  ;;  %v849_v10 = vpop.f32.mrf.mxu1 }
 0x14b   :  { %1522 = vst [vmem:[%s2453_s3 + $0x328] sm:$0xff] %v1394_v7  ;;  %1524 = vst [vmem:[%s2453_s3 + $0x338] sm:$0xff] %v1396_v8  ;;  %v1397_v11 = vadd.f32 %v1930_v41, %v592_v9  ;;  %v1399_v12 = vadd.f32 %v1932_v42, %v849_v10 }
 0x14c   :  { %v594_v13 = vpop.f32.mrf.mxu0  ;;  %v851_v14 = vpop.f32.mrf.mxu1 }
 0x14d   :  { %1525 = vst [vmem:[%s2453_s3 + $0x340] sm:$0xff] %v1397_v11  ;;  %1527 = vst [vmem:[%s2453_s3 + $0x350] sm:$0xff] %v1399_v12  ;;  %v1398_v15 = vadd.f32 %v1934_v3, %v594_v13  ;;  %v1400_v16 = vadd.f32 %v1936_v43, %v851_v14 }
 0x14e   :  { %v598_v17 = vpop.f32.mrf.mxu0  ;;  %v855_v18 = vpop.f32.mrf.mxu1 }
 0x14f   :  { %1526 = vst [vmem:[%s2453_s3 + $0x348] sm:$0xff] %v1398_v15  ;;  %1528 = vst [vmem:[%s2453_s3 + $0x358] sm:$0xff] %v1400_v16  ;;  %v1401_v19 = vadd.f32 %v1930_v41, %v598_v17  ;;  %v1403_v20 = vadd.f32 %v1932_v42, %v855_v18 }
 0x150   :  { %v600_v21 = vpop.f32.mrf.mxu0  ;;  %v857_v22 = vpop.f32.mrf.mxu1 }
 0x151   :  { %1529 = vst [vmem:[%s2453_s3 + $0x360] sm:$0xff] %v1401_v19  ;;  %1531 = vst [vmem:[%s2453_s3 + $0x370] sm:$0xff] %v1403_v20  ;;  %v1402_v23 = vadd.f32 %v1934_v3, %v600_v21  ;;  %v1404_v24 = vadd.f32 %v1936_v43, %v857_v22 }
 0x152   :  { %v604_v25 = vpop.f32.mrf.mxu0  ;;  %v861_v26 = vpop.f32.mrf.mxu1 }
 0x153   :  { %1530 = vst [vmem:[%s2453_s3 + $0x368] sm:$0xff] %v1402_v23  ;;  %1532 = vst [vmem:[%s2453_s3 + $0x378] sm:$0xff] %v1404_v24  ;;  %v1405_v27 = vadd.f32 %v1930_v41, %v604_v25  ;;  %v1407_v28 = vadd.f32 %v1932_v42, %v861_v26 }
 0x154   :  { %v606_v29 = vpop.f32.mrf.mxu0  ;;  %v863_v30 = vpop.f32.mrf.mxu1 }
 0x155   :  { %1533 = vst [vmem:[%s2453_s3 + $0x380] sm:$0xff] %v1405_v27  ;;  %1535 = vst [vmem:[%s2453_s3 + $0x390] sm:$0xff] %v1407_v28  ;;  %v1406_v31 = vadd.f32 %v1934_v3, %v606_v29  ;;  %v1408_v32 = vadd.f32 %v1936_v43, %v863_v30 }
 0x156   :  { %v610_v33 = vpop.f32.mrf.mxu0  ;;  %v867_v34 = vpop.f32.mrf.mxu1 }
 0x157   :  { %1534 = vst [vmem:[%s2453_s3 + $0x388] sm:$0xff] %v1406_v31  ;;  %1536 = vst [vmem:[%s2453_s3 + $0x398] sm:$0xff] %v1408_v32  ;;  %v1409_v35 = vadd.f32 %v1930_v41, %v610_v33  ;;  %v1411_v36 = vadd.f32 %v1932_v42, %v867_v34 }
 0x158   :  { %v612_v37 = vpop.f32.mrf.mxu0  ;;  %v869_v38 = vpop.f32.mrf.mxu1 }
 0x159   :  { %1537 = vst [vmem:[%s2453_s3 + $0x3a0] sm:$0xff] %v1409_v35  ;;  %1539 = vst [vmem:[%s2453_s3 + $0x3b0] sm:$0xff] %v1411_v36  ;;  %v1410_v39 = vadd.f32 %v1934_v3, %v612_v37  ;;  %v1412_v40 = vadd.f32 %v1936_v43, %v869_v38 }
 0x15a   :  { %v616_v44 = vpop.f32.mrf.mxu0  ;;  %v873_v45 = vpop.f32.mrf.mxu1 }
 0x15b   :  { %1538 = vst [vmem:[%s2453_s3 + $0x3a8] sm:$0xff] %v1410_v39  ;;  %1540 = vst [vmem:[%s2453_s3 + $0x3b8] sm:$0xff] %v1412_v40  ;;  %v1413_v46 = vadd.f32 %v1930_v41, %v616_v44  ;;  %v1415_v47 = vadd.f32 %v1932_v42, %v873_v45 }
 0x15c   :  { %v618_v48 = vpop.f32.mrf.mxu0  ;;  %v875_v49 = vpop.f32.mrf.mxu1 }
 0x15d   :  { %1541 = vst [vmem:[%s2453_s3 + $0x3c0] sm:$0xff] %v1413_v46  ;;  %1543 = vst [vmem:[%s2453_s3 + $0x3d0] sm:$0xff] %v1415_v47  ;;  %v1414_v50 = vadd.f32 %v1934_v3, %v618_v48  ;;  %v1416_v51 = vadd.f32 %v1936_v43, %v875_v49 }
 0x15e   :  { %v622_v52 = vpop.f32.mrf.mxu0  ;;  %v879_v53 = vpop.f32.mrf.mxu1 }
 0x15f   :  { %1542 = vst [vmem:[%s2453_s3 + $0x3c8] sm:$0xff] %v1414_v50  ;;  %1544 = vst [vmem:[%s2453_s3 + $0x3d8] sm:$0xff] %v1416_v51  ;;  %v1417_v54 = vadd.f32 %v1930_v41, %v622_v52  ;;  %v1419_v55 = vadd.f32 %v1932_v42, %v879_v53 }
 0x160   :  { %v624_v56 = vpop.f32.mrf.mxu0  ;;  %v881_v57 = vpop.f32.mrf.mxu1 }
 0x161   :  { %1545 = vst [vmem:[%s2453_s3 + $0x3e0] sm:$0xff] %v1417_v54  ;;  %1547 = vst [vmem:[%s2453_s3 + $0x3f0] sm:$0xff] %v1419_v55  ;;  %v1418_v58 = vadd.f32 %v1934_v3, %v624_v56  ;;  %v1420_v59 = vadd.f32 %v1936_v43, %v881_v57 }
 0x163   :  { %1546 = vst [vmem:[%s2453_s3 + $0x3e8] sm:$0xff] %v1418_v58  ;;  %1548 = vst [vmem:[%s2453_s3 + $0x3f8] sm:$0xff] %v1420_v59 }

// kernel: rlstm_forward.8
= control target key start
LH: loop header
LB: loop body
LE: loop exit
PB: predicated region body
PF: predicated region fallthrough
CT: control target
= control target key end

     0   :  { %s4752_s9 = smov 0   ;;  %s4754_s10 = smov 0   ;;  %s6490_s0 = inlined_call_operand.vmem [shape: f32[16,16,512], index: 0, kind: input, shape index: {}]   ;;  %s6491_s1 = inlined_call_operand.vmem [shape: f32[128,512], index: 1, kind: input, shape index: {}]   ;;  %s6492_s2 = inlined_call_operand.vmem [shape: f32[16,16,128], index: 2, kind: output, shape index: {}]  }
   0x1   :  { %s4756_s11 = smov 0   ;;  %s4758_s12 = smov 0  }
   0x2   :  { %s4760_s13 = smov 0  }
   0x3 LB: > { %s24_s14 = sadd.s32 1, %s4730_s12  ;;  %s4403_s15 = sadd.s32 4294967295, %s4734_s13   ;;  %s4734_s13 = sphi %s4760_s13, %s12_s13   ;;  %s4730_s12 = sphi %s4758_s12, %s6870_s12   ;;  %s4726_s11 = sphi %s4756_s11, %s6869_s11   ;;  %s4722_s10 = sphi %s4754_s10, %s6868_s10   ;;  %s4718_s9 = sphi %s4752_s9, %s6867_s9  }
   0x4   : > { %p26_p0 = scmp.ge.s32.totalorder %s24_s14, 2  ;;  %p40_p1 = scmp.ne.s32.totalorder %s4722_s10, %s4718_s9 }
   0x5   : > { %p41_p2 = scmp.eq.s32.totalorder %s4734_s13, 0  ;;  %p72_p4 = scmp.eq.s32.totalorder %s4403_s15, 1 }
   0x6   : > { %s6872_s14 = smov (%p26_p0, %s24_s14), 0  ;;  %s33_s17 = sadd.s32 1, %s4722_s10 }
   0x7   : > { %p42_p3 = por %p41_p2, %p40_p1  ;;  %s29_s16 = ssub.s32 %s4730_s12, %s6872_s14 }
   0x8   : > { %p31_p5 = scmp.eq.s32.totalorder %s29_s16, 0  ;;  %p4787_p6 = por %p72_p4, %p40_p1 }
   0x9   : > { %p4406_p7 = scmp.ge.s32.totalorder %s4734_s13, 2 }
   0xa   : > { %s4792_s19 = scalar_select %p31_p5, %s4722_s10, %s33_s17  }
   0xb   : > { %94 = sbr.rel (%p4406_p7) target bundleno = 52 (0x34), region = 16 }
  0x10   : > { %97 = sbr.rel (!%p42_p3) target bundleno = 52 (0x34), region = 20  ;;  %s99_s20 = sand.u32 (%p42_p3), 1, %s4722_s10  }
  0x11   : > { %s4492_s21 = sshll.u32 (%p42_p3), %s4730_s12, 5  ;;  %s4407_s22 = sshll.u32 (%p42_p3), %s99_s20, 9 }
  0x12   : > { %s4800_s25 = scalar_lea.vmem (%p42_p3), %s6490_s0, %s4492_s21  ;;  %s4805_s26 = scalar_lea.vmem (%p42_p3), [#allocation5], %s4407_s22 }
  0x13   : > { %v120_v0 = vld [vmem:[%s4800_s25] sm:$0xff] (%p42_p3)  ;;  %v122_v1 = vld [vmem:[%s4800_s25 + $0x8] sm:$0xff] (%p42_p3)  ;;  %v124_v2 = vld [vmem:[%s4800_s25 + $0x10] sm:$0xff] (%p42_p3) }
  0x14   : > { %121 = vst [vmem:[%s4805_s26] sm:$0xff] (%p42_p3), %v120_v0  ;;  %123 = vst [vmem:[%s4805_s26 + $0x8] sm:$0xff] (%p42_p3), %v122_v1  ;;  %v126_v3 = vld [vmem:[%s4800_s25 + $0x18] sm:$0xff] (%p42_p3)  ;;  %v128_v4 = vld [vmem:[%s4800_s25 + $0x40] sm:$0xff] (%p42_p3) }
  0x15   : > { %125 = vst [vmem:[%s4805_s26 + $0x10] sm:$0xff] %v124_v2  ;;  %v130_v5 = vld [vmem:[%s4800_s25 + $0x48] sm:$0xff]  ;;  %127 = vst [vmem:[%s4805_s26 + $0x18] sm:$0xff] %v126_v3  ;;  %v132_v6 = vld [vmem:[%s4800_s25 + $0x50] sm:$0xff] }
  0x16   : > { %129 = vst [vmem:[%s4805_s26 + $0x20] sm:$0xff] %v128_v4  ;;  %131 = vst [vmem:[%s4805_s26 + $0x28] sm:$0xff] %v130_v5  ;;  %v134_v7 = vld [vmem:[%s4800_s25 + $0x58] sm:$0xff]  ;;  %v136_v8 = vld [vmem:[%s4800_s25 + $0x80] sm:$0xff] }
  0x17   : > { %133 = vst [vmem:[%s4805_s26 + $0x30] sm:$0xff] %v132_v6  ;;  %135 = vst [vmem:[%s4805_s26 + $0x38] sm:$0xff] %v134_v7  ;;  %v138_v9 = vld [vmem:[%s4800_s25 + $0x88] sm:$0xff]  ;;  %v140_v10 = vld [vmem:[%s4800_s25 + $0x90] sm:$0xff] }
  0x18   : > { %137 = vst [vmem:[%s4805_s26 + $0x40] sm:$0xff] %v136_v8  ;;  %v142_v11 = vld [vmem:[%s4800_s25 + $0x98] sm:$0xff]  ;;  %139 = vst [vmem:[%s4805_s26 + $0x48] sm:$0xff] %v138_v9  ;;  %v144_v12 = vld [vmem:[%s4800_s25 + $0xc0] sm:$0xff] }
  0x19   : > { %141 = vst [vmem:[%s4805_s26 + $0x50] sm:$0xff] %v140_v10  ;;  %143 = vst [vmem:[%s4805_s26 + $0x58] sm:$0xff] %v142_v11  ;;  %v146_v13 = vld [vmem:[%s4800_s25 + $0xc8] sm:$0xff]  ;;  %v148_v14 = vld [vmem:[%s4800_s25 + $0xd0] sm:$0xff] }
  0x1a   : > { %145 = vst [vmem:[%s4805_s26 + $0x60] sm:$0xff] %v144_v12  ;;  %147 = vst [vmem:[%s4805_s26 + $0x68] sm:$0xff] %v146_v13  ;;  %v150_v15 = vld [vmem:[%s4800_s25 + $0xd8] sm:$0xff]  ;;  %v152_v16 = vld [vmem:[%s4800_s25 + $0x100] sm:$0xff] }
  0x1b   : > { %149 = vst [vmem:[%s4805_s26 + $0x70] sm:$0xff] %v148_v14  ;;  %v154_v17 = vld [vmem:[%s4800_s25 + $0x108] sm:$0xff]  ;;  %151 = vst [vmem:[%s4805_s26 + $0x78] sm:$0xff] %v150_v15  ;;  %v156_v18 = vld [vmem:[%s4800_s25 + $0x110] sm:$0xff] }
  0x1c   : > { %153 = vst [vmem:[%s4805_s26 + $0x80] sm:$0xff] %v152_v16  ;;  %155 = vst [vmem:[%s4805_s26 + $0x88] sm:$0xff] %v154_v17  ;;  %v158_v19 = vld [vmem:[%s4800_s25 + $0x118] sm:$0xff]  ;;  %v160_v20 = vld [vmem:[%s4800_s25 + $0x140] sm:$0xff] }
  0x1d   : > { %157 = vst [vmem:[%s4805_s26 + $0x90] sm:$0xff] %v156_v18  ;;  %159 = vst [vmem:[%s4805_s26 + $0x98] sm:$0xff] %v158_v19  ;;  %v162_v21 = vld [vmem:[%s4800_s25 + $0x148] sm:$0xff]  ;;  %v164_v22 = vld [vmem:[%s4800_s25 + $0x150] sm:$0xff] }
  0x1e   : > { %161 = vst [vmem:[%s4805_s26 + $0xa0] sm:$0xff] %v160_v20  ;;  %v166_v23 = vld [vmem:[%s4800_s25 + $0x158] sm:$0xff]  ;;  %163 = vst [vmem:[%s4805_s26 + $0xa8] sm:$0xff] %v162_v21  ;;  %v168_v24 = vld [vmem:[%s4800_s25 + $0x180] sm:$0xff] }
  0x1f   : > { %165 = vst [vmem:[%s4805_s26 + $0xb0] sm:$0xff] %v164_v22  ;;  %167 = vst [vmem:[%s4805_s26 + $0xb8] sm:$0xff] %v166_v23  ;;  %v170_v25 = vld [vmem:[%s4800_s25 + $0x188] sm:$0xff]  ;;  %v172_v26 = vld [vmem:[%s4800_s25 + $0x190] sm:$0xff] }
  0x20   : > { %169 = vst [vmem:[%s4805_s26 + $0xc0] sm:$0xff] %v168_v24  ;;  %171 = vst [vmem:[%s4805_s26 + $0xc8] sm:$0xff] %v170_v25  ;;  %v174_v27 = vld [vmem:[%s4800_s25 + $0x198] sm:$0xff]  ;;  %v176_v28 = vld [vmem:[%s4800_s25 + $0x1c0] sm:$0xff] }
  0x21   : > { %173 = vst [vmem:[%s4805_s26 + $0xd0] sm:$0xff] %v172_v26  ;;  %v178_v29 = vld [vmem:[%s4800_s25 + $0x1c8] sm:$0xff]  ;;  %175 = vst [vmem:[%s4805_s26 + $0xd8] sm:$0xff] %v174_v27  ;;  %v180_v30 = vld [vmem:[%s4800_s25 + $0x1d0] sm:$0xff] }
  0x22   : > { %177 = vst [vmem:[%s4805_s26 + $0xe0] sm:$0xff] %v176_v28  ;;  %179 = vst [vmem:[%s4805_s26 + $0xe8] sm:$0xff] %v178_v29  ;;  %v182_v31 = vld [vmem:[%s4800_s25 + $0x1d8] sm:$0xff]  ;;  %v184_v32 = vld [vmem:[%s4800_s25 + $0x200] sm:$0xff] }
  0x23   : > { %181 = vst [vmem:[%s4805_s26 + $0xf0] sm:$0xff] %v180_v30  ;;  %183 = vst [vmem:[%s4805_s26 + $0xf8] sm:$0xff] %v182_v31  ;;  %v186_v33 = vld [vmem:[%s4800_s25 + $0x208] sm:$0xff]  ;;  %v188_v34 = vld [vmem:[%s4800_s25 + $0x210] sm:$0xff] }
  0x24   : > { %185 = vst [vmem:[%s4805_s26 + $0x100] sm:$0xff] %v184_v32  ;;  %v190_v35 = vld [vmem:[%s4800_s25 + $0x218] sm:$0xff]  ;;  %187 = vst [vmem:[%s4805_s26 + $0x108] sm:$0xff] %v186_v33  ;;  %v192_v36 = vld [vmem:[%s4800_s25 + $0x240] sm:$0xff] }
  0x25   : > { %189 = vst [vmem:[%s4805_s26 + $0x110] sm:$0xff] %v188_v34  ;;  %191 = vst [vmem:[%s4805_s26 + $0x118] sm:$0xff] %v190_v35  ;;  %v194_v37 = vld [vmem:[%s4800_s25 + $0x248] sm:$0xff]  ;;  %v196_v38 = vld [vmem:[%s4800_s25 + $0x250] sm:$0xff] }
  0x26   : > { %193 = vst [vmem:[%s4805_s26 + $0x120] sm:$0xff] %v192_v36  ;;  %195 = vst [vmem:[%s4805_s26 + $0x128] sm:$0xff] %v194_v37  ;;  %v198_v39 = vld [vmem:[%s4800_s25 + $0x258] sm:$0xff]  ;;  %v200_v40 = vld [vmem:[%s4800_s25 + $0x280] sm:$0xff] }
  0x27   : > { %197 = vst [vmem:[%s4805_s26 + $0x130] sm:$0xff] %v196_v38  ;;  %v202_v41 = vld [vmem:[%s4800_s25 + $0x288] sm:$0xff]  ;;  %199 = vst [vmem:[%s4805_s26 + $0x138] sm:$0xff] %v198_v39  ;;  %v204_v42 = vld [vmem:[%s4800_s25 + $0x290] sm:$0xff] }
  0x28   : > { %201 = vst [vmem:[%s4805_s26 + $0x140] sm:$0xff] %v200_v40  ;;  %203 = vst [vmem:[%s4805_s26 + $0x148] sm:$0xff] %v202_v41  ;;  %v206_v43 = vld [vmem:[%s4800_s25 + $0x298] sm:$0xff]  ;;  %v208_v44 = vld [vmem:[%s4800_s25 + $0x2c0] sm:$0xff] }
  0x29   : > { %205 = vst [vmem:[%s4805_s26 + $0x150] sm:$0xff] %v204_v42  ;;  %207 = vst [vmem:[%s4805_s26 + $0x158] sm:$0xff] %v206_v43  ;;  %v210_v45 = vld [vmem:[%s4800_s25 + $0x2c8] sm:$0xff]  ;;  %v212_v46 = vld [vmem:[%s4800_s25 + $0x2d0] sm:$0xff] }
  0x2a   : > { %209 = vst [vmem:[%s4805_s26 + $0x160] sm:$0xff] %v208_v44  ;;  %v214_v47 = vld [vmem:[%s4800_s25 + $0x2d8] sm:$0xff]  ;;  %211 = vst [vmem:[%s4805_s26 + $0x168] sm:$0xff] %v210_v45  ;;  %v216_v48 = vld [vmem:[%s4800_s25 + $0x300] sm:$0xff] }
  0x2b   : > { %213 = vst [vmem:[%s4805_s26 + $0x170] sm:$0xff] %v212_v46  ;;  %215 = vst [vmem:[%s4805_s26 + $0x178] sm:$0xff] %v214_v47  ;;  %v218_v49 = vld [vmem:[%s4800_s25 + $0x308] sm:$0xff]  ;;  %v220_v50 = vld [vmem:[%s4800_s25 + $0x310] sm:$0xff] }
  0x2c   : > { %217 = vst [vmem:[%s4805_s26 + $0x180] sm:$0xff] %v216_v48  ;;  %219 = vst [vmem:[%s4805_s26 + $0x188] sm:$0xff] %v218_v49  ;;  %v222_v51 = vld [vmem:[%s4800_s25 + $0x318] sm:$0xff]  ;;  %v224_v52 = vld [vmem:[%s4800_s25 + $0x340] sm:$0xff] }
  0x2d   : > { %221 = vst [vmem:[%s4805_s26 + $0x190] sm:$0xff] %v220_v50  ;;  %v226_v53 = vld [vmem:[%s4800_s25 + $0x348] sm:$0xff]  ;;  %223 = vst [vmem:[%s4805_s26 + $0x198] sm:$0xff] %v222_v51  ;;  %v228_v54 = vld [vmem:[%s4800_s25 + $0x350] sm:$0xff] }
  0x2e   : > { %225 = vst [vmem:[%s4805_s26 + $0x1a0] sm:$0xff] %v224_v52  ;;  %227 = vst [vmem:[%s4805_s26 + $0x1a8] sm:$0xff] %v226_v53  ;;  %v230_v55 = vld [vmem:[%s4800_s25 + $0x358] sm:$0xff]  ;;  %v232_v56 = vld [vmem:[%s4800_s25 + $0x380] sm:$0xff] }
  0x2f   : > { %229 = vst [vmem:[%s4805_s26 + $0x1b0] sm:$0xff] %v228_v54  ;;  %231 = vst [vmem:[%s4805_s26 + $0x1b8] sm:$0xff] %v230_v55  ;;  %v234_v57 = vld [vmem:[%s4800_s25 + $0x388] sm:$0xff]  ;;  %v236_v58 = vld [vmem:[%s4800_s25 + $0x390] sm:$0xff] }
  0x30   : > { %233 = vst [vmem:[%s4805_s26 + $0x1c0] sm:$0xff] %v232_v56  ;;  %v238_v59 = vld [vmem:[%s4800_s25 + $0x398] sm:$0xff]  ;;  %235 = vst [vmem:[%s4805_s26 + $0x1c8] sm:$0xff] %v234_v57  ;;  %v240_v60 = vld [vmem:[%s4800_s25 + $0x3c0] sm:$0xff] }
  0x31   : > { %237 = vst [vmem:[%s4805_s26 + $0x1d0] sm:$0xff] %v236_v58  ;;  %239 = vst [vmem:[%s4805_s26 + $0x1d8] sm:$0xff] %v238_v59  ;;  %v242_v61 = vld [vmem:[%s4800_s25 + $0x3c8] sm:$0xff]  ;;  %v244_v62 = vld [vmem:[%s4800_s25 + $0x3d0] sm:$0xff] }
  0x32   : > { %241 = vst [vmem:[%s4805_s26 + $0x1e0] sm:$0xff] %v240_v60  ;;  %243 = vst [vmem:[%s4805_s26 + $0x1e8] sm:$0xff] %v242_v61  ;;  %v246_v63 = vld [vmem:[%s4800_s25 + $0x3d8] sm:$0xff] }
  0x33   : > { %245 = vst [vmem:[%s4805_s26 + $0x1f0] sm:$0xff] %v244_v62  ;;  %247 = vst [vmem:[%s4805_s26 + $0x1f8] sm:$0xff] %v246_v63 }
  0x34 PF: > { %p4410_p8 = scmp.ge.s32.totalorder %s4734_s13, 1  ;;  %p252_p9 = scmp.lt.s32.totalorder %s4734_s13, 3 }
  0x36   : > { %p253_p10 = pnand %p4410_p8, %p252_p9 }
  0x38   : > { %256 = sbr.rel (%p253_p10) target bundleno = 3925 (0xf55), region = 43 }
  0x3d   : > { %s259_s27 = sand.u32 1, %s4718_s9  }
  0x3e   : > { %s4411_s28 = sshll.u32 %s259_s27, 9  ;;  %s4412_s29 = sshll.u32 %s259_s27, 7 }
  0x3f   : > { %s4935_s30 = scalar_lea.vmem [#allocation5], %s4411_s28  ;;  %s4937_s3 = scalar_lea.vmem [#allocation6], %s4412_s29 }
  0x40   : > { %v4942_v0 = vld [vmem:[%s6491_s1] sm:$0xff]  ;;  %v4947_v1 = vld [vmem:[%s6491_s1 + $0x8] sm:$0xff]  ;;  %v4952_v2 = vld [vmem:[%s6491_s1 + $0x10] sm:$0xff] }
  0x41   : > { %6552 = vst [vmem:[#allocation10_spill] sm:$0xff] %v4942_v0  ;;  %6553 = vst [vmem:[#allocation11_spill] sm:$0xff] %v4947_v1  ;;  %v4957_v3 = vld [vmem:[%s6491_s1 + $0x18] sm:$0xff]  ;;  %v4962_v4 = vld [vmem:[%s6491_s1 + $0x20] sm:$0xff] }
  0x42   : > { %6554 = vst [vmem:[#allocation12_spill] sm:$0xff] %v4952_v2  ;;  %6555 = vst [vmem:[#allocation13_spill] sm:$0xff] %v4957_v3  ;;  %v4967_v5 = vld [vmem:[%s6491_s1 + $0x28] sm:$0xff]  ;;  %v4972_v6 = vld [vmem:[%s6491_s1 + $0x30] sm:$0xff] }
  0x43   : > { %6556 = vst [vmem:[#allocation14_spill] sm:$0xff] %v4962_v4  ;;  %6557 = vst [vmem:[#allocation15_spill] sm:$0xff] %v4967_v5  ;;  %v4977_v7 = vld [vmem:[%s6491_s1 + $0x38] sm:$0xff]  ;;  %v4982_v8 = vld [vmem:[%s6491_s1 + $0x40] sm:$0xff] }
  0x44   : > { %6558 = vst [vmem:[#allocation16_spill] sm:$0xff] %v4972_v6  ;;  %6559 = vst [vmem:[#allocation17_spill] sm:$0xff] %v4977_v7  ;;  %v4987_v9 = vld [vmem:[%s6491_s1 + $0x48] sm:$0xff]  ;;  %v4992_v10 = vld [vmem:[%s6491_s1 + $0x50] sm:$0xff] }
  0x45   : > { %6560 = vst [vmem:[#allocation18_spill] sm:$0xff] %v4982_v8  ;;  %6561 = vst [vmem:[#allocation19_spill] sm:$0xff] %v4987_v9  ;;  %v4997_v11 = vld [vmem:[%s6491_s1 + $0x58] sm:$0xff]  ;;  %v5002_v12 = vld [vmem:[%s6491_s1 + $0x60] sm:$0xff] }
  0x46   : > { %6562 = vst [vmem:[#allocation20_spill] sm:$0xff] %v4992_v10  ;;  %6563 = vst [vmem:[#allocation21_spill] sm:$0xff] %v4997_v11  ;;  %v5007_v13 = vld [vmem:[%s6491_s1 + $0x68] sm:$0xff]  ;;  %v5012_v14 = vld [vmem:[%s6491_s1 + $0x70] sm:$0xff] }
  0x47   : > { %6564 = vst [vmem:[#allocation22_spill] sm:$0xff] %v5002_v12  ;;  %6565 = vst [vmem:[#allocation23_spill] sm:$0xff] %v5007_v13  ;;  %v5017_v15 = vld [vmem:[%s6491_s1 + $0x78] sm:$0xff]  ;;  %v5022_v16 = vld [vmem:[%s6491_s1 + $0x80] sm:$0xff] }
  0x48   : > { %6566 = vst [vmem:[#allocation24_spill] sm:$0xff] %v5012_v14  ;;  %6567 = vst [vmem:[#allocation25_spill] sm:$0xff] %v5017_v15  ;;  %v5027_v17 = vld [vmem:[%s6491_s1 + $0x88] sm:$0xff]  ;;  %v5032_v18 = vld [vmem:[%s6491_s1 + $0x90] sm:$0xff] }
  0x49   : > { %6568 = vst [vmem:[#allocation26_spill] sm:$0xff] %v5022_v16  ;;  %6569 = vst [vmem:[#allocation27_spill] sm:$0xff] %v5032_v18  ;;  %v5037_v19 = vld [vmem:[%s6491_s1 + $0x98] sm:$0xff]  ;;  %v5042_v20 = vld [vmem:[%s6491_s1 + $0xa0] sm:$0xff] }
  0x4a   : > { %v5047_v21 = vld [vmem:[%s6491_s1 + $0xa8] sm:$0xff]  ;;  %v5052_v22 = vld [vmem:[%s6491_s1 + $0xb0] sm:$0xff]  ;;  %v5057_v23 = vld [vmem:[%s6491_s1 + $0xb8] sm:$0xff] }
  0x4b   : > { %6570 = vst [vmem:[#allocation28_spill] sm:$0xff] %v5047_v21  ;;  %v5062_v24 = vld [vmem:[%s6491_s1 + $0xc0] sm:$0xff]  ;;  %v5067_v25 = vld [vmem:[%s6491_s1 + $0xc8] sm:$0xff]  ;;  %v5072_v26 = vld [vmem:[%s6491_s1 + $0xd0] sm:$0xff] }
  0x4c   : > { %v5077_v27 = vld [vmem:[%s6491_s1 + $0xd8] sm:$0xff]  ;;  %v5082_v28 = vld [vmem:[%s6491_s1 + $0xe0] sm:$0xff]  ;;  %v5087_v29 = vld [vmem:[%s6491_s1 + $0xe8] sm:$0xff] }
  0x4d   : > { %v5092_v30 = vld [vmem:[%s6491_s1 + $0xf0] sm:$0xff]  ;;  %v5097_v31 = vld [vmem:[%s6491_s1 + $0xf8] sm:$0xff]  ;;  %v5102_v32 = vld [vmem:[%s6491_s1 + $0x100] sm:$0xff] }
  0x4e   : > { %v5107_v33 = vld [vmem:[%s6491_s1 + $0x108] sm:$0xff]  ;;  %v5112_v34 = vld [vmem:[%s6491_s1 + $0x110] sm:$0xff]  ;;  %v5117_v35 = vld [vmem:[%s6491_s1 + $0x118] sm:$0xff] }
  0x4f   : > { %v5122_v36 = vld [vmem:[%s6491_s1 + $0x120] sm:$0xff]  ;;  %v5127_v37 = vld [vmem:[%s6491_s1 + $0x128] sm:$0xff]  ;;  %v5132_v38 = vld [vmem:[%s6491_s1 + $0x130] sm:$0xff] }
  0x50   : > { %v5137_v39 = vld [vmem:[%s6491_s1 + $0x138] sm:$0xff]  ;;  %v5142_v40 = vld [vmem:[%s6491_s1 + $0x140] sm:$0xff]  ;;  %v5147_v41 = vld [vmem:[%s6491_s1 + $0x148] sm:$0xff] }
  0x51   : > { %v5152_v42 = vld [vmem:[%s6491_s1 + $0x150] sm:$0xff]  ;;  %v5157_v43 = vld [vmem:[%s6491_s1 + $0x158] sm:$0xff]  ;;  %v5162_v44 = vld [vmem:[%s6491_s1 + $0x160] sm:$0xff] }
  0x52   : > { %v5167_v45 = vld [vmem:[%s6491_s1 + $0x168] sm:$0xff]  ;;  %v5172_v46 = vld [vmem:[%s6491_s1 + $0x170] sm:$0xff]  ;;  %v5177_v47 = vld [vmem:[%s6491_s1 + $0x178] sm:$0xff] }
  0x53   : > { %v5182_v48 = vld [vmem:[%s6491_s1 + $0x180] sm:$0xff]  ;;  %v5187_v49 = vld [vmem:[%s6491_s1 + $0x188] sm:$0xff]  ;;  %v5192_v50 = vld [vmem:[%s6491_s1 + $0x190] sm:$0xff] }
  0x54   : > { %v5197_v51 = vld [vmem:[%s6491_s1 + $0x198] sm:$0xff]  ;;  %v5202_v52 = vld [vmem:[%s6491_s1 + $0x1a0] sm:$0xff]  ;;  %v5207_v53 = vld [vmem:[%s6491_s1 + $0x1a8] sm:$0xff] }
  0x55   : > { %v5212_v54 = vld [vmem:[%s6491_s1 + $0x1b0] sm:$0xff]  ;;  %v5217_v55 = vld [vmem:[%s6491_s1 + $0x1b8] sm:$0xff]  ;;  %v5222_v56 = vld [vmem:[%s6491_s1 + $0x1c0] sm:$0xff] }
  0x56   : > { %v5227_v57 = vld [vmem:[%s6491_s1 + $0x1c8] sm:$0xff]  ;;  %v5232_v58 = vld [vmem:[%s6491_s1 + $0x1d0] sm:$0xff]  ;;  %v5237_v59 = vld [vmem:[%s6491_s1 + $0x1d8] sm:$0xff] }
  0x57   : > { %v5242_v60 = vld [vmem:[%s6491_s1 + $0x1e0] sm:$0xff]  ;;  %v5247_v61 = vld [vmem:[%s6491_s1 + $0x1e8] sm:$0xff]  ;;  %v5252_v62 = vld [vmem:[%s6491_s1 + $0x1f0] sm:$0xff] }
  0x58   : > { %6571 = vst [vmem:[#allocation29_spill] sm:$0xff] %v5247_v61  ;;  %v5257_v63 = vld [vmem:[%s6491_s1 + $0x1f8] sm:$0xff] }
  0x59   : > { %6572 = vst [vmem:[#allocation30_spill] sm:$0xff] %v5257_v63 }
  0x5a   : > { %451 = vsyncadd [#allocation7], 8192 }
  0x5b   : > { %4714 = dma.done.wait [#allocation7], 8192 }
  0x5c   : > { %4715 = vsyncadd [#allocation7], 4294959104  ;;  %528 = vmatprep.subr.mxu0 %v5247_v61  ;;  %599 = vmatprep.subr.mxu1 %v5257_v63 }
  0x5d   : > { %529 = vmatpush1.msra.mxu0 %v5242_v60  ;;  %600 = vmatpush1.msra.mxu1 %v5252_v62 }
  0x5e   : > { %530 = vmatprep.subr.mxu0 %v5227_v57  ;;  %601 = vmatprep.subr.mxu1 %v5237_v59 }
  0x5f   : > { %531 = vmatpush1.msra.mxu0 %v5222_v56  ;;  %602 = vmatpush1.msra.mxu1 %v5232_v58 }
  0x60   : > { %532 = vmatprep.subr.mxu0 %v5207_v53  ;;  %603 = vmatprep.subr.mxu1 %v5217_v55 }
  0x61   : > { %533 = vmatpush1.msra.mxu0 %v5202_v52  ;;  %604 = vmatpush1.msra.mxu1 %v5212_v54 }
  0x62   : > { %534 = vmatprep.subr.mxu0 %v5187_v49  ;;  %605 = vmatprep.subr.mxu1 %v5197_v51 }
  0x63   : > { %535 = vmatpush1.msra.mxu0 %v5182_v48  ;;  %606 = vmatpush1.msra.mxu1 %v5192_v50 }
  0x64   : > { %536 = vmatprep.subr.mxu0 %v5167_v45  ;;  %607 = vmatprep.subr.mxu1 %v5177_v47 }
  0x65   : > { %537 = vmatpush1.msra.mxu0 %v5162_v44  ;;  %608 = vmatpush1.msra.mxu1 %v5172_v46 }
  0x66   : > { %538 = vmatprep.subr.mxu0 %v5147_v41  ;;  %609 = vmatprep.subr.mxu1 %v5157_v43 }
  0x67   : > { %539 = vmatpush1.msra.mxu0 %v5142_v40  ;;  %610 = vmatpush1.msra.mxu1 %v5152_v42 }
  0x68   : > { %540 = vmatprep.subr.mxu0 %v5127_v37  ;;  %611 = vmatprep.subr.mxu1 %v5137_v39 }
  0x69   : > { %541 = vmatpush1.msra.mxu0 %v5122_v36  ;;  %612 = vmatpush1.msra.mxu1 %v5132_v38 }
  0x6a   : > { %542 = vmatprep.subr.mxu0 %v5107_v33  ;;  %613 = vmatprep.subr.mxu1 %v5117_v35 }
  0x6b   : > { %543 = vmatpush1.msra.mxu0 %v5102_v32  ;;  %614 = vmatpush1.msra.mxu1 %v5112_v34 }
  0x6c   : > { %544 = vmatprep.subr.mxu0 %v5087_v29  ;;  %615 = vmatprep.subr.mxu1 %v5097_v31 }
  0x6d   : > { %545 = vmatpush1.msra.mxu0 %v5082_v28  ;;  %616 = vmatpush1.msra.mxu1 %v5092_v30 }
  0x6e   : > { %546 = vmatprep.subr.mxu0 %v5067_v25  ;;  %617 = vmatprep.subr.mxu1 %v5077_v27 }
  0x6f   : > { %547 = vmatpush1.msra.mxu0 %v5062_v24  ;;  %618 = vmatpush1.msra.mxu1 %v5072_v26 }
  0x70   : > { %548 = vmatprep.subr.mxu0 %v5047_v21  ;;  %619 = vmatprep.subr.mxu1 %v5057_v23  ;;  %v6495_v21 = vmov 0.0  }
  0x71   : > { %549 = vmatpush1.msra.mxu0 %v5042_v20  ;;  %620 = vmatpush1.msra.mxu1 %v5052_v22 }
  0x72   : > { %550 = vmatprep.subr.mxu0 %v5027_v17  ;;  %621 = vmatprep.subr.mxu1 %v5037_v19 }
  0x73   : > { %551 = vmatpush1.msra.mxu0 %v5022_v16  ;;  %622 = vmatpush1.msra.mxu1 %v5032_v18 }
  0x74   : > { %552 = vmatprep.subr.mxu0 %v5007_v13  ;;  %623 = vmatprep.subr.mxu1 %v5017_v15 }
  0x75   : > { %553 = vmatpush1.msra.mxu0 %v5002_v12  ;;  %592 = vmatprep.mubr.f32.mxu0 %v6495_v21 }
  0x76   : > { %554 = vmatprep.subr.mxu0 %v4987_v9  ;;  %624 = vmatpush1.msra.mxu1 %v5012_v14 }
  0x77   : > { %555 = vmatpush1.msra.mxu0 %v4982_v8  ;;  %625 = vmatprep.subr.mxu1 %v4997_v11 }
  0x78   : > { %556 = vmatprep.subr.mxu0 %v4967_v5  ;;  %626 = vmatpush1.msra.mxu1 %v4992_v10 }
  0x79   : > { %557 = vmatpush1.msra.mxu0 %v4962_v4  ;;  %627 = vmatprep.subr.mxu1 %v4977_v7 }
  0x7a   : > { %558 = vmatprep.subr.mxu0 %v4947_v1  ;;  %628 = vmatpush1.msra.mxu1 %v4972_v6 }
  0x7b   : > { %559 = vmatpush1.msra.mxu0 %v4942_v0  ;;  %629 = vmatprep.subr.mxu1 %v4957_v3 }
  0x7c   : > { %593 = vmatmul.mubr.f32.vlgmr.msra.gmra.mxu0 %v6495_v21  ;;  %630 = vmatpush1.msra.mxu1 %v4952_v2 }
  0x7d   : > { %663 = vmatprep.mubr.f32.mxu1 %v6495_v21  ;;  %762 = vmatprep.subr.mxu0 %v5247_v61 }
  0x7e   : > { %664 = vmatmul.mubr.f32.vlgmr.msra.gmra.mxu1 %v6495_v21  ;;  %833 = vmatprep.subr.mxu1 %v5257_v63  ;;  %v6573_v21 = vld [vmem:[#allocation28_spill] sm:$0xff] }
  0x7f   : > { %763 = vmatpush1.msra.mxu0 %v5242_v60  ;;  %834 = vmatpush1.msra.mxu1 %v5252_v62 }
  0x80   : > { %764 = vmatprep.subr.mxu0 %v5227_v57  ;;  %835 = vmatprep.subr.mxu1 %v5237_v59 }
  0x81   : > { %765 = vmatpush1.msra.mxu0 %v5222_v56  ;;  %836 = vmatpush1.msra.mxu1 %v5232_v58 }
  0x82   : > { %766 = vmatprep.subr.mxu0 %v5207_v53  ;;  %837 = vmatprep.subr.mxu1 %v5217_v55 }
  0x83   : > { %767 = vmatpush1.msra.mxu0 %v5202_v52  ;;  %838 = vmatpush1.msra.mxu1 %v5212_v54 }
  0x84   : > { %768 = vmatprep.subr.mxu0 %v5187_v49  ;;  %839 = vmatprep.subr.mxu1 %v5197_v51 }
  0x85   : > { %769 = vmatpush1.msra.mxu0 %v5182_v48  ;;  %840 = vmatpush1.msra.mxu1 %v5192_v50 }
  0x86   : > { %770 = vmatprep.subr.mxu0 %v5167_v45  ;;  %841 = vmatprep.subr.mxu1 %v5177_v47 }
  0x87   : > { %771 = vmatpush1.msra.mxu0 %v5162_v44  ;;  %842 = vmatpush1.msra.mxu1 %v5172_v46 }
  0x88   : > { %772 = vmatprep.subr.mxu0 %v5147_v41  ;;  %843 = vmatprep.subr.mxu1 %v5157_v43 }
  0x89   : > { %773 = vmatpush1.msra.mxu0 %v5142_v40  ;;  %844 = vmatpush1.msra.mxu1 %v5152_v42 }
  0x8a   : > { %774 = vmatprep.subr.mxu0 %v5127_v37  ;;  %845 = vmatprep.subr.mxu1 %v5137_v39 }
  0x8b   : > { %775 = vmatpush1.msra.mxu0 %v5122_v36  ;;  %846 = vmatpush1.msra.mxu1 %v5132_v38 }
  0x8c   : > { %776 = vmatprep.subr.mxu0 %v5107_v33  ;;  %847 = vmatprep.subr.mxu1 %v5117_v35 }
  0x8d   : > { %777 = vmatpush1.msra.mxu0 %v5102_v32  ;;  %848 = vmatpush1.msra.mxu1 %v5112_v34 }
  0x8e   : > { %778 = vmatprep.subr.mxu0 %v5087_v29  ;;  %849 = vmatprep.subr.mxu1 %v5097_v31 }
  0x8f   : > { %779 = vmatpush1.msra.mxu0 %v5082_v28  ;;  %850 = vmatpush1.msra.mxu1 %v5092_v30 }
  0x90   : > { %780 = vmatprep.subr.mxu0 %v5067_v25  ;;  %851 = vmatprep.subr.mxu1 %v5077_v27 }
  0x91   : > { %781 = vmatpush1.msra.mxu0 %v5062_v24  ;;  %852 = vmatpush1.msra.mxu1 %v5072_v26 }
  0x92   : > { %782 = vmatprep.subr.mxu0 %v6573_v21  ;;  %853 = vmatprep.subr.mxu1 %v5057_v23 }
  0x93   : > { %783 = vmatpush1.msra.mxu0 %v5042_v20  ;;  %854 = vmatpush1.msra.mxu1 %v5052_v22 }
  0x94   : > { %784 = vmatprep.subr.mxu0 %v5027_v17  ;;  %855 = vmatprep.subr.mxu1 %v5037_v19 }
  0x95   : > { %785 = vmatpush1.msra.mxu0 %v5022_v16  ;;  %856 = vmatpush1.msra.mxu1 %v5032_v18 }
  0x96   : > { %786 = vmatprep.subr.mxu0 %v5007_v13  ;;  %857 = vmatprep.subr.mxu1 %v5017_v15 }
  0x97   : > { %787 = vmatpush1.msra.mxu0 %v5002_v12  ;;  %858 = vmatpush1.msra.mxu1 %v5012_v14 }
  0x98   : > { %788 = vmatprep.subr.mxu0 %v4987_v9  ;;  %859 = vmatprep.subr.mxu1 %v4997_v11  ;;  %v6574_v11 = vmov 0.0  }
  0x99   : > { %789 = vmatpush1.msra.mxu0 %v4982_v8  ;;  %860 = vmatpush1.msra.mxu1 %v4992_v10  ;;  %v462_v10 = vld [vmem:[%s4935_s30 + $0x10] sm:$0xff] }
  0x9a   : > { %790 = vmatprep.subr.mxu0 %v4967_v5  ;;  %861 = vmatprep.subr.mxu1 %v4977_v7 }
  0x9b   : > { %791 = vmatpush1.msra.mxu0 %v4962_v4  ;;  %862 = vmatpush1.msra.mxu1 %v4972_v6  ;;  %v460_v4 = vld [vmem:[%s4935_s30] sm:$0xff]  ;;  %v461_v6 = vld [vmem:[%s4935_s30 + $0x8] sm:$0xff] }
  0x9c   : > { %792 = vmatprep.subr.mxu0 %v4947_v1  ;;  %863 = vmatprep.subr.mxu1 %v4957_v3 }
  0x9d   : > { %793 = vmatpush1.msra.mxu0 %v4942_v0  ;;  %826 = vmatprep.mubr.f32.mxu0 %v6574_v11 }
  0x9e   : > { %864 = vmatpush1.msra.mxu1 %v4952_v2  ;;  %897 = vmatprep.mubr.f32.mxu1 %v6574_v11  ;;  %v463_v2 = vld [vmem:[%s4935_s30 + $0x18] sm:$0xff] }
  0x9f   : > { %997 = vmatprep.subr.mxu0 %v5247_v61  ;;  %1068 = vmatprep.subr.mxu1 %v5257_v63 }
 0x13c   : > { %v594_v7 = vpop.f32.mrf.mxu0 }
 0x13d   : > { %v670_v5 = vadd.f32 %v594_v7, %v460_v4 }
 0x13e   : > { %v596_v1 = vpop.f32.mrf.mxu0  ;;  %v665_v3 = vpop.f32.mrf.mxu1 }
 0x13f   : > { %v674_v8 = vmul.f32 0.5, %v670_v5  ;;  %v671_v0 = vadd.f32 %v596_v1, %v461_v6  ;;  %v672_v14 = vadd.f32 %v665_v3, %v462_v10  ;;  %v6575_v10 = vld [vmem:[#allocation26_spill] sm:$0xff] }
 0x140   : > { %v667_v11 = vpop.f32.mrf.mxu1 }
 0x141   : > { %4534 = vtanh.f32 %v674_v8  ;;  %v678_v9 = vmul.f32 0.5, %v671_v0  ;;  %v673_v61 = vadd.f32 %v667_v11, %v463_v2  ;;  %v6576_v11 = vld [vmem:[#allocation27_spill] sm:$0xff] }
 0x143   : > { %4536 = vtanh.f32 %v678_v9  ;;  %v683_v12 = vmul.f32 0.5, %v673_v61  ;;  %v6583_v61 = vld [vmem:[#allocation18_spill] sm:$0xff] }
 0x144   : > { %4538 = vtanh.f32 %v672_v14  ;;  %v6579_v14 = vld [vmem:[#allocation22_spill] sm:$0xff] }
 0x145   : > { %4540 = vtanh.f32 %v683_v12  ;;  %v6577_v12 = vld [vmem:[#allocation23_spill] sm:$0xff] }
 0x14e   : > { %v4535_v15 = vpop.eup %4534 }
 0x14f   : > { %v676_v63 = vmul.f32 0.5, %v4535_v15  ;;  %v6580_v15 = vld [vmem:[#allocation24_spill] sm:$0xff] }
 0x150   : > { %v4537_v13 = vpop.eup %4536 }
 0x151   : > { %v677_v18 = vadd.f32 0.5, %v676_v63  ;;  %v680_v4 = vmul.f32 0.5, %v4537_v13  ;;  %v4539_v7 = vpop.eup %4538  ;;  %v6578_v13 = vld [vmem:[#allocation25_spill] sm:$0xff]  ;;  %v6584_v63 = vld [vmem:[#allocation20_spill] sm:$0xff] }
 0x152   : > { %v4541_v0 = vpop.eup %4540 }
 0x153   : > { %v681_v16 = vadd.f32 0.5, %v680_v4  ;;  %v688_v1 = vmul.f32 %v4539_v7, %v677_v18  ;;  %v685_v3 = vmul.f32 0.5, %v4541_v0  ;;  %v6582_v18 = vld [vmem:[#allocation21_spill] sm:$0xff]  ;;  %v6585_v4 = vld [vmem:[#allocation15_spill] sm:$0xff] }
 0x154   : > { %v6586_v7 = vld [vmem:[#allocation17_spill] sm:$0xff]  ;;  %v6589_v0 = vld [vmem:[#allocation11_spill] sm:$0xff] }
 0x155   : > { %v687_v5 = vmul.f32 0.0, %v681_v16  ;;  %v686_v8 = vadd.f32 0.5, %v685_v3  ;;  %v6581_v16 = vld [vmem:[#allocation19_spill] sm:$0xff]  ;;  %v6590_v3 = vld [vmem:[#allocation13_spill] sm:$0xff] }
 0x157   : > { %v5399_v6 = vadd.f32 %v688_v1, %v687_v5  ;;  %v6587_v5 = vld [vmem:[#allocation14_spill] sm:$0xff]  ;;  %v6588_v1 = vld [vmem:[#allocation16_spill] sm:$0xff] }
 0x159   : > { %4542 = vtanh.f32 %v5399_v6 }
 0x166   : > { %v4543_v2 = vpop.eup %4542 }
 0x167   : > { %v691_v9 = vmul.f32 %v4543_v2, %v686_v8  ;;  %v6591_v8 = vld [vmem:[#allocation10_spill] sm:$0xff]  ;;  %v6592_v2 = vmov 0.0  }
 0x169   : > { %692 = vst [vmem:[%s4937_s3] sm:$0xff] %v691_v9  ;;  %827 = vmatmul.mubr.f32.vlgmr.msra.gmra.mxu0 %v691_v9  ;;  %898 = vmatmul.mubr.f32.vlgmr.msra.gmra.mxu1 %v691_v9  ;;  %v6593_v9 = vld [vmem:[#allocation12_spill] sm:$0xff] }
 0x16a   : > { %998 = vmatpush1.msra.mxu0 %v5242_v60  ;;  %1069 = vmatpush1.msra.mxu1 %v5252_v62 }
 0x16b   : > { %999 = vmatprep.subr.mxu0 %v5227_v57  ;;  %1070 = vmatprep.subr.mxu1 %v5237_v59 }
 0x16c   : > { %1000 = vmatpush1.msra.mxu0 %v5222_v56  ;;  %1071 = vmatpush1.msra.mxu1 %v5232_v58 }
 0x16d   : > { %1001 = vmatprep.subr.mxu0 %v5207_v53  ;;  %1072 = vmatprep.subr.mxu1 %v5217_v55 }
 0x16e   : > { %1002 = vmatpush1.msra.mxu0 %v5202_v52  ;;  %1073 = vmatpush1.msra.mxu1 %v5212_v54 }
 0x16f   : > { %1003 = vmatprep.subr.mxu0 %v5187_v49  ;;  %1074 = vmatprep.subr.mxu1 %v5197_v51 }
 0x170   : > { %1004 = vmatpush1.msra.mxu0 %v5182_v48  ;;  %1075 = vmatpush1.msra.mxu1 %v5192_v50 }
 0x171   : > { %1005 = vmatprep.subr.mxu0 %v5167_v45  ;;  %1076 = vmatprep.subr.mxu1 %v5177_v47 }
 0x172   : > { %1006 = vmatpush1.msra.mxu0 %v5162_v44  ;;  %1077 = vmatpush1.msra.mxu1 %v5172_v46 }
 0x173   : > { %1007 = vmatprep.subr.mxu0 %v5147_v41  ;;  %1078 = vmatprep.subr.mxu1 %v5157_v43 }
 0x174   : > { %1008 = vmatpush1.msra.mxu0 %v5142_v40  ;;  %1079 = vmatpush1.msra.mxu1 %v5152_v42 }
 0x175   : > { %1009 = vmatprep.subr.mxu0 %v5127_v37  ;;  %1080 = vmatprep.subr.mxu1 %v5137_v39 }
 0x176   : > { %1010 = vmatpush1.msra.mxu0 %v5122_v36  ;;  %1081 = vmatpush1.msra.mxu1 %v5132_v38 }
 0x177   : > { %1011 = vmatprep.subr.mxu0 %v5107_v33  ;;  %1082 = vmatprep.subr.mxu1 %v5117_v35 }
 0x178   : > { %1012 = vmatpush1.msra.mxu0 %v5102_v32  ;;  %1083 = vmatpush1.msra.mxu1 %v5112_v34 }
 0x179   : > { %1013 = vmatprep.subr.mxu0 %v5087_v29  ;;  %1084 = vmatprep.subr.mxu1 %v5097_v31 }
 0x17a   : > { %1014 = vmatpush1.msra.mxu0 %v5082_v28  ;;  %1085 = vmatpush1.msra.mxu1 %v5092_v30 }
 0x17b   : > { %1015 = vmatprep.subr.mxu0 %v5067_v25  ;;  %1086 = vmatprep.subr.mxu1 %v5077_v27 }
 0x17c   : > { %1016 = vmatpush1.msra.mxu0 %v5062_v24  ;;  %1087 = vmatpush1.msra.mxu1 %v5072_v26 }
 0x17d   : > { %1017 = vmatprep.subr.mxu0 %v6573_v21  ;;  %1088 = vmatprep.subr.mxu1 %v5057_v23 }
 0x17e   : > { %1018 = vmatpush1.msra.mxu0 %v5042_v20  ;;  %1089 = vmatpush1.msra.mxu1 %v5052_v22 }
 0x17f   : > { %1019 = vmatprep.subr.mxu0 %v5027_v17  ;;  %1090 = vmatprep.subr.mxu1 %v5037_v19 }
 0x180   : > { %1020 = vmatpush1.msra.mxu0 %v6575_v10  ;;  %1091 = vmatpush1.msra.mxu1 %v6576_v11 }
 0x181   : > { %1021 = vmatprep.subr.mxu0 %v6577_v12  ;;  %1092 = vmatprep.subr.mxu1 %v6578_v13 }
 0x182   : > { %1022 = vmatpush1.msra.mxu0 %v6579_v14  ;;  %1093 = vmatpush1.msra.mxu1 %v6580_v15 }
 0x183   : > { %1023 = vmatprep.subr.mxu0 %v6581_v16  ;;  %1094 = vmatprep.subr.mxu1 %v6582_v18  ;;  %v4415_v16 = vld [vmem:[%s4935_s30 + $0x30] sm:$0xff] }
 0x184   : > { %1024 = vmatpush1.msra.mxu0 %v6583_v61  ;;  %1095 = vmatpush1.msra.mxu1 %v6584_v63  ;;  %v4414_v63 = vld [vmem:[%s4935_s30 + $0x28] sm:$0xff] }
 0x185   : > { %1025 = vmatprep.subr.mxu0 %v6585_v4  ;;  %1096 = vmatprep.subr.mxu1 %v6586_v7  ;;  %v6594_v4 = vld [vmem:[#allocation29_spill] sm:$0xff]  ;;  %v6595_v7 = vld [vmem:[#allocation30_spill] sm:$0xff] }
 0x186   : > { %1026 = vmatpush1.msra.mxu0 %v6587_v5  ;;  %1097 = vmatpush1.msra.mxu1 %v6588_v1  ;;  %v4413_v5 = vld [vmem:[%s4935_s30 + $0x20] sm:$0xff] }
 0x187   : > { %1027 = vmatprep.subr.mxu0 %v6589_v0  ;;  %1098 = vmatprep.subr.mxu1 %v6590_v3 }
 0x188   : > { %1028 = vmatpush1.msra.mxu0 %v6591_v8  ;;  %1061 = vmatprep.mubr.f32.mxu0 %v6592_v2 }
 0x189   : > { %1099 = vmatpush1.msra.mxu1 %v6593_v9  ;;  %1132 = vmatprep.mubr.f32.mxu1 %v6592_v2  ;;  %v4416_v9 = vld [vmem:[%s4935_s30 + $0x38] sm:$0xff] }
 0x18a   : > { %1232 = vmatprep.subr.mxu0 %v6594_v4  ;;  %1303 = vmatprep.subr.mxu1 %v6595_v7 }
 0x229   : > { %v828_v1 = vpop.f32.mrf.mxu0  ;;  %v899_v8 = vpop.f32.mrf.mxu1 }
 0x22a   : > { %v904_v61 = vadd.f32 %v4413_v5, %v828_v1  ;;  %v906_v14 = vadd.f32 %v4415_v16, %v899_v8  ;;  %v6602_v8 = vld [vmem:[#allocation19_spill] sm:$0xff] }
 0x22b   : > { %v830_v0 = vpop.f32.mrf.mxu0  ;;  %v901_v2 = vpop.f32.mrf.mxu1 }
 0x22c   : > { %v908_v18 = vmul.f32 0.5, %v904_v61  ;;  %v905_v3 = vadd.f32 %v4414_v63, %v830_v0  ;;  %v907_v13 = vadd.f32 %v4416_v9, %v901_v2  ;;  %v6603_v2 = vld [vmem:[#allocation21_spill] sm:$0xff]  ;;  %v6604_v9 = vld [vmem:[#allocation18_spill] sm:$0xff] }
 0x22e   : > { %4544 = vtanh.f32 %v908_v18  ;;  %v912_v15 = vmul.f32 0.5, %v905_v3  ;;  %v917_v4 = vmul.f32 0.5, %v907_v13 }
 0x230   : > { %4546 = vtanh.f32 %v912_v15 }
 0x231   : > { %4548 = vtanh.f32 %v906_v14 }
 0x232   : > { %4550 = vtanh.f32 %v917_v4  ;;  %v6600_v4 = vld [vmem:[#allocation22_spill] sm:$0xff] }
 0x23b   : > { %v4545_v12 = vpop.eup %4544 }
 0x23c   : > { %v910_v7 = vmul.f32 0.5, %v4545_v12  ;;  %v6599_v12 = vld [vmem:[#allocation25_spill] sm:$0xff] }
 0x23d   : > { %v4547_v11 = vpop.eup %4546 }
 0x23e   : > { %v911_v10 = vadd.f32 0.5, %v910_v7  ;;  %v914_v5 = vmul.f32 0.5, %v4547_v11  ;;  %v4549_v63 = vpop.eup %4548  ;;  %v6598_v11 = vld [vmem:[#allocation23_spill] sm:$0xff]  ;;  %v6601_v7 = vld [vmem:[#allocation24_spill] sm:$0xff] }
 0x23f   : > { %v4551_v15 = vpop.eup %4550 }
 0x240   : > { %v915_v61 = vadd.f32 0.5, %v914_v5  ;;  %v922_v18 = vmul.f32 %v4549_v63, %v911_v10  ;;  %v919_v14 = vmul.f32 0.5, %v4551_v15  ;;  %v6597_v10 = vld [vmem:[#allocation27_spill] sm:$0xff]  ;;  %v6605_v5 = vld [vmem:[#allocation20_spill] sm:$0xff]  ;;  %v6607_v63 = vld [vmem:[#allocation17_spill] sm:$0xff] }
 0x241   : > { %v6610_v15 = vld [vmem:[#allocation11_spill] sm:$0xff] }
 0x242   : > { %v921_v1 = vmul.f32 %v915_v61, %v5399_v6  ;;  %v920_v16 = vadd.f32 0.5, %v919_v14  ;;  %v6596_v6 = vld [vmem:[#allocation26_spill] sm:$0xff]  ;;  %v6606_v61 = vld [vmem:[#allocation15_spill] sm:$0xff]  ;;  %v6611_v14 = vld [vmem:[#allocation13_spill] sm:$0xff] }
 0x244   : > { %v5474_v0 = vadd.f32 %v922_v18, %v921_v1  ;;  %v6608_v1 = vld [vmem:[#allocation14_spill] sm:$0xff]  ;;  %v6609_v18 = vld [vmem:[#allocation16_spill] sm:$0xff] }
 0x246   : > { %4552 = vtanh.f32 %v5474_v0 }
 0x253   : > { %v4553_v13 = vpop.eup %4552 }
 0x254   : > { %v925_v3 = vmul.f32 %v4553_v13, %v920_v16  ;;  %v6612_v16 = vld [vmem:[#allocation10_spill] sm:$0xff]  ;;  %v6613_v13 = vmov 0.0  }
 0x256   : > { %4417 = vst [vmem:[%s4937_s3 + $0x8] sm:$0xff] %v925_v3  ;;  %1062 = vmatmul.mubr.f32.vlgmr.msra.gmra.mxu0 %v925_v3  ;;  %1133 = vmatmul.mubr.f32.vlgmr.msra.gmra.mxu1 %v925_v3  ;;  %v6614_v3 = vld [vmem:[#allocation12_spill] sm:$0xff] }
 0x257   : > { %1233 = vmatpush1.msra.mxu0 %v5242_v60  ;;  %1304 = vmatpush1.msra.mxu1 %v5252_v62 }
 0x258   : > { %1234 = vmatprep.subr.mxu0 %v5227_v57  ;;  %1305 = vmatprep.subr.mxu1 %v5237_v59 }
 0x259   : > { %1235 = vmatpush1.msra.mxu0 %v5222_v56  ;;  %1306 = vmatpush1.msra.mxu1 %v5232_v58 }
 0x25a   : > { %1236 = vmatprep.subr.mxu0 %v5207_v53  ;;  %1307 = vmatprep.subr.mxu1 %v5217_v55 }
 0x25b   : > { %1237 = vmatpush1.msra.mxu0 %v5202_v52  ;;  %1308 = vmatpush1.msra.mxu1 %v5212_v54 }
 0x25c   : > { %1238 = vmatprep.subr.mxu0 %v5187_v49  ;;  %1309 = vmatprep.subr.mxu1 %v5197_v51 }
 0x25d   : > { %1239 = vmatpush1.msra.mxu0 %v5182_v48  ;;  %1310 = vmatpush1.msra.mxu1 %v5192_v50 }
 0x25e   : > { %1240 = vmatprep.subr.mxu0 %v5167_v45  ;;  %1311 = vmatprep.subr.mxu1 %v5177_v47 }
 0x25f   : > { %1241 = vmatpush1.msra.mxu0 %v5162_v44  ;;  %1312 = vmatpush1.msra.mxu1 %v5172_v46 }
 0x260   : > { %1242 = vmatprep.subr.mxu0 %v5147_v41  ;;  %1313 = vmatprep.subr.mxu1 %v5157_v43 }
 0x261   : > { %1243 = vmatpush1.msra.mxu0 %v5142_v40  ;;  %1314 = vmatpush1.msra.mxu1 %v5152_v42 }
 0x262   : > { %1244 = vmatprep.subr.mxu0 %v5127_v37  ;;  %1315 = vmatprep.subr.mxu1 %v5137_v39 }
 0x263   : > { %1245 = vmatpush1.msra.mxu0 %v5122_v36  ;;  %1316 = vmatpush1.msra.mxu1 %v5132_v38 }
 0x264   : > { %1246 = vmatprep.subr.mxu0 %v5107_v33  ;;  %1317 = vmatprep.subr.mxu1 %v5117_v35 }
 0x265   : > { %1247 = vmatpush1.msra.mxu0 %v5102_v32  ;;  %1318 = vmatpush1.msra.mxu1 %v5112_v34 }
 0x266   : > { %1248 = vmatprep.subr.mxu0 %v5087_v29  ;;  %1319 = vmatprep.subr.mxu1 %v5097_v31 }
 0x267   : > { %1249 = vmatpush1.msra.mxu0 %v5082_v28  ;;  %1320 = vmatpush1.msra.mxu1 %v5092_v30 }
 0x268   : > { %1250 = vmatprep.subr.mxu0 %v5067_v25  ;;  %1321 = vmatprep.subr.mxu1 %v5077_v27 }
 0x269   : > { %1251 = vmatpush1.msra.mxu0 %v5062_v24  ;;  %1322 = vmatpush1.msra.mxu1 %v5072_v26 }
 0x26a   : > { %1252 = vmatprep.subr.mxu0 %v6573_v21  ;;  %1323 = vmatprep.subr.mxu1 %v5057_v23 }
 0x26b   : > { %1253 = vmatpush1.msra.mxu0 %v5042_v20  ;;  %1324 = vmatpush1.msra.mxu1 %v5052_v22 }
 0x26c   : > { %1254 = vmatprep.subr.mxu0 %v5027_v17  ;;  %1325 = vmatprep.subr.mxu1 %v5037_v19 }
 0x26d   : > { %1255 = vmatpush1.msra.mxu0 %v6596_v6  ;;  %1326 = vmatpush1.msra.mxu1 %v6597_v10 }
 0x26e   : > { %1256 = vmatprep.subr.mxu0 %v6598_v11  ;;  %1327 = vmatprep.subr.mxu1 %v6599_v12 }
 0x26f   : > { %1257 = vmatpush1.msra.mxu0 %v6600_v4  ;;  %1328 = vmatpush1.msra.mxu1 %v6601_v7 }
 0x270   : > { %1258 = vmatprep.subr.mxu0 %v6602_v8  ;;  %1329 = vmatprep.subr.mxu1 %v6603_v2  ;;  %v4420_v8 = vld [vmem:[%s4935_s30 + $0x50] sm:$0xff] }
 0x271   : > { %1259 = vmatpush1.msra.mxu0 %v6604_v9  ;;  %1330 = vmatpush1.msra.mxu1 %v6605_v5  ;;  %v4419_v5 = vld [vmem:[%s4935_s30 + $0x48] sm:$0xff] }
 0x272   : > { %1260 = vmatprep.subr.mxu0 %v6606_v61  ;;  %1331 = vmatprep.subr.mxu1 %v6607_v63  ;;  %v6615_v61 = vld [vmem:[#allocation29_spill] sm:$0xff]  ;;  %v6616_v63 = vld [vmem:[#allocation30_spill] sm:$0xff] }
 0x273   : > { %1261 = vmatpush1.msra.mxu0 %v6608_v1  ;;  %1332 = vmatpush1.msra.mxu1 %v6609_v18  ;;  %v4418_v1 = vld [vmem:[%s4935_s30 + $0x40] sm:$0xff] }
 0x274   : > { %1262 = vmatprep.subr.mxu0 %v6610_v15  ;;  %1333 = vmatprep.subr.mxu1 %v6611_v14 }
 0x275   : > { %1263 = vmatpush1.msra.mxu0 %v6612_v16  ;;  %1296 = vmatprep.mubr.f32.mxu0 %v6613_v13 }
 0x276   : > { %1334 = vmatpush1.msra.mxu1 %v6614_v3  ;;  %1367 = vmatprep.mubr.f32.mxu1 %v6613_v13  ;;  %v4421_v3 = vld [vmem:[%s4935_s30 + $0x58] sm:$0xff] }
 0x277   : > { %1467 = vmatprep.subr.mxu0 %v6615_v61  ;;  %1538 = vmatprep.subr.mxu1 %v6616_v63 }
 0x316   : > { %v1063_v18 = vpop.f32.mrf.mxu0  ;;  %v1134_v16 = vpop.f32.mrf.mxu1 }
 0x317   : > { %v1139_v9 = vadd.f32 %v4418_v1, %v1063_v18  ;;  %v1141_v4 = vadd.f32 %v4420_v8, %v1134_v16  ;;  %v6623_v16 = vld [vmem:[#allocation19_spill] sm:$0xff] }
 0x318   : > { %v1065_v15 = vpop.f32.mrf.mxu0  ;;  %v1136_v13 = vpop.f32.mrf.mxu1 }
 0x319   : > { %v1143_v2 = vmul.f32 0.5, %v1139_v9  ;;  %v1140_v14 = vadd.f32 %v4419_v5, %v1065_v15  ;;  %v1142_v12 = vadd.f32 %v4421_v3, %v1136_v13  ;;  %v6624_v13 = vld [vmem:[#allocation21_spill] sm:$0xff]  ;;  %v6625_v3 = vld [vmem:[#allocation18_spill] sm:$0xff] }
 0x31b   : > { %4554 = vtanh.f32 %v1143_v2  ;;  %v1147_v7 = vmul.f32 0.5, %v1140_v14  ;;  %v1152_v61 = vmul.f32 0.5, %v1142_v12 }
 0x31d   : > { %4556 = vtanh.f32 %v1147_v7 }
 0x31e   : > { %4558 = vtanh.f32 %v1141_v4 }
 0x31f   : > { %4560 = vtanh.f32 %v1152_v61  ;;  %v6621_v61 = vld [vmem:[#allocation22_spill] sm:$0xff] }
 0x328   : > { %v4555_v11 = vpop.eup %4554 }
 0x329   : > { %v1145_v63 = vmul.f32 0.5, %v4555_v11  ;;  %v6620_v11 = vld [vmem:[#allocation25_spill] sm:$0xff] }
 0x32a   : > { %v4557_v10 = vpop.eup %4556 }
 0x32b   : > { %v1146_v6 = vadd.f32 0.5, %v1145_v63  ;;  %v1149_v1 = vmul.f32 0.5, %v4557_v10  ;;  %v4559_v5 = vpop.eup %4558  ;;  %v6619_v10 = vld [vmem:[#allocation23_spill] sm:$0xff]  ;;  %v6622_v63 = vld [vmem:[#allocation24_spill] sm:$0xff] }
 0x32c   : > { %v4561_v7 = vpop.eup %4560 }
 0x32d   : > { %v1150_v9 = vadd.f32 0.5, %v1149_v1  ;;  %v1157_v2 = vmul.f32 %v4559_v5, %v1146_v6  ;;  %v1154_v4 = vmul.f32 0.5, %v4561_v7  ;;  %v6618_v6 = vld [vmem:[#allocation27_spill] sm:$0xff]  ;;  %v6626_v1 = vld [vmem:[#allocation20_spill] sm:$0xff]  ;;  %v6628_v5 = vld [vmem:[#allocation17_spill] sm:$0xff] }
 0x32e   : > { %v6631_v7 = vld [vmem:[#allocation11_spill] sm:$0xff] }
 0x32f   : > { %v1156_v18 = vmul.f32 %v1150_v9, %v5474_v0  ;;  %v1155_v8 = vadd.f32 0.5, %v1154_v4  ;;  %v6617_v0 = vld [vmem:[#allocation26_spill] sm:$0xff]  ;;  %v6627_v9 = vld [vmem:[#allocation15_spill] sm:$0xff]  ;;  %v6632_v4 = vld [vmem:[#allocation13_spill] sm:$0xff] }
 0x331   : > { %v5549_v15 = vadd.f32 %v1157_v2, %v1156_v18  ;;  %v6629_v18 = vld [vmem:[#allocation14_spill] sm:$0xff]  ;;  %v6630_v2 = vld [vmem:[#allocation16_spill] sm:$0xff] }
 0x333   : > { %4562 = vtanh.f32 %v5549_v15 }
 0x340   : > { %v4563_v12 = vpop.eup %4562 }
 0x341   : > { %v1160_v14 = vmul.f32 %v4563_v12, %v1155_v8  ;;  %v6633_v8 = vld [vmem:[#allocation10_spill] sm:$0xff]  ;;  %v6634_v12 = vmov 0.0  }
 0x343   : > { %4422 = vst [vmem:[%s4937_s3 + $0x10] sm:$0xff] %v1160_v14  ;;  %1297 = vmatmul.mubr.f32.vlgmr.msra.gmra.mxu0 %v1160_v14  ;;  %1368 = vmatmul.mubr.f32.vlgmr.msra.gmra.mxu1 %v1160_v14  ;;  %v6635_v14 = vld [vmem:[#allocation12_spill] sm:$0xff] }
 0x344   : > { %1468 = vmatpush1.msra.mxu0 %v5242_v60  ;;  %1539 = vmatpush1.msra.mxu1 %v5252_v62 }
 0x345   : > { %1469 = vmatprep.subr.mxu0 %v5227_v57  ;;  %1540 = vmatprep.subr.mxu1 %v5237_v59 }
 0x346   : > { %1470 = vmatpush1.msra.mxu0 %v5222_v56  ;;  %1541 = vmatpush1.msra.mxu1 %v5232_v58 }
 0x347   : > { %1471 = vmatprep.subr.mxu0 %v5207_v53  ;;  %1542 = vmatprep.subr.mxu1 %v5217_v55 }
 0x348   : > { %1472 = vmatpush1.msra.mxu0 %v5202_v52  ;;  %1543 = vmatpush1.msra.mxu1 %v5212_v54 }
 0x349   : > { %1473 = vmatprep.subr.mxu0 %v5187_v49  ;;  %1544 = vmatprep.subr.mxu1 %v5197_v51 }
 0x34a   : > { %1474 = vmatpush1.msra.mxu0 %v5182_v48  ;;  %1545 = vmatpush1.msra.mxu1 %v5192_v50 }
 0x34b   : > { %1475 = vmatprep.subr.mxu0 %v5167_v45  ;;  %1546 = vmatprep.subr.mxu1 %v5177_v47 }
 0x34c   : > { %1476 = vmatpush1.msra.mxu0 %v5162_v44  ;;  %1547 = vmatpush1.msra.mxu1 %v5172_v46 }
 0x34d   : > { %1477 = vmatprep.subr.mxu0 %v5147_v41  ;;  %1548 = vmatprep.subr.mxu1 %v5157_v43 }
 0x34e   : > { %1478 = vmatpush1.msra.mxu0 %v5142_v40  ;;  %1549 = vmatpush1.msra.mxu1 %v5152_v42 }
 0x34f   : > { %1479 = vmatprep.subr.mxu0 %v5127_v37  ;;  %1550 = vmatprep.subr.mxu1 %v5137_v39 }
 0x350   : > { %1480 = vmatpush1.msra.mxu0 %v5122_v36  ;;  %1551 = vmatpush1.msra.mxu1 %v5132_v38 }
 0x351   : > { %1481 = vmatprep.subr.mxu0 %v5107_v33  ;;  %1552 = vmatprep.subr.mxu1 %v5117_v35 }
 0x352   : > { %1482 = vmatpush1.msra.mxu0 %v5102_v32  ;;  %1553 = vmatpush1.msra.mxu1 %v5112_v34 }
 0x353   : > { %1483 = vmatprep.subr.mxu0 %v5087_v29  ;;  %1554 = vmatprep.subr.mxu1 %v5097_v31 }
 0x354   : > { %1484 = vmatpush1.msra.mxu0 %v5082_v28  ;;  %1555 = vmatpush1.msra.mxu1 %v5092_v30 }
 0x355   : > { %1485 = vmatprep.subr.mxu0 %v5067_v25  ;;  %1556 = vmatprep.subr.mxu1 %v5077_v27 }
 0x356   : > { %1486 = vmatpush1.msra.mxu0 %v5062_v24  ;;  %1557 = vmatpush1.msra.mxu1 %v5072_v26 }
 0x357   : > { %1487 = vmatprep.subr.mxu0 %v6573_v21  ;;  %1558 = vmatprep.subr.mxu1 %v5057_v23 }
 0x358   : > { %1488 = vmatpush1.msra.mxu0 %v5042_v20  ;;  %1559 = vmatpush1.msra.mxu1 %v5052_v22 }
 0x359   : > { %1489 = vmatprep.subr.mxu0 %v5027_v17  ;;  %1560 = vmatprep.subr.mxu1 %v5037_v19 }
 0x35a   : > { %1490 = vmatpush1.msra.mxu0 %v6617_v0  ;;  %1561 = vmatpush1.msra.mxu1 %v6618_v6 }
 0x35b   : > { %1491 = vmatprep.subr.mxu0 %v6619_v10  ;;  %1562 = vmatprep.subr.mxu1 %v6620_v11 }
 0x35c   : > { %1492 = vmatpush1.msra.mxu0 %v6621_v61  ;;  %1563 = vmatpush1.msra.mxu1 %v6622_v63 }
 0x35d   : > { %1493 = vmatprep.subr.mxu0 %v6623_v16  ;;  %1564 = vmatprep.subr.mxu1 %v6624_v13  ;;  %v4425_v16 = vld [vmem:[%s4935_s30 + $0x70] sm:$0xff] }
 0x35e   : > { %1494 = vmatpush1.msra.mxu0 %v6625_v3  ;;  %1565 = vmatpush1.msra.mxu1 %v6626_v1  ;;  %v4424_v1 = vld [vmem:[%s4935_s30 + $0x68] sm:$0xff] }
 0x35f   : > { %1495 = vmatprep.subr.mxu0 %v6627_v9  ;;  %1566 = vmatprep.subr.mxu1 %v6628_v5  ;;  %v6636_v9 = vld [vmem:[#allocation29_spill] sm:$0xff]  ;;  %v6637_v5 = vld [vmem:[#allocation30_spill] sm:$0xff] }
 0x360   : > { %1496 = vmatpush1.msra.mxu0 %v6629_v18  ;;  %1567 = vmatpush1.msra.mxu1 %v6630_v2  ;;  %v4423_v18 = vld [vmem:[%s4935_s30 + $0x60] sm:$0xff] }
 0x361   : > { %1497 = vmatprep.subr.mxu0 %v6631_v7  ;;  %1568 = vmatprep.subr.mxu1 %v6632_v4 }
 0x362   : > { %1498 = vmatpush1.msra.mxu0 %v6633_v8  ;;  %1531 = vmatprep.mubr.f32.mxu0 %v6634_v12 }
 0x363   : > { %1569 = vmatpush1.msra.mxu1 %v6635_v14  ;;  %1602 = vmatprep.mubr.f32.mxu1 %v6634_v12  ;;  %v4426_v14 = vld [vmem:[%s4935_s30 + $0x78] sm:$0xff] }
 0x364   : > { %1702 = vmatprep.subr.mxu0 %v6636_v9  ;;  %1773 = vmatprep.subr.mxu1 %v6637_v5 }
 0x403   : > { %v1298_v2 = vpop.f32.mrf.mxu0  ;;  %v1369_v8 = vpop.f32.mrf.mxu1 }
 0x404   : > { %v1374_v3 = vadd.f32 %v4423_v18, %v1298_v2  ;;  %v1376_v61 = vadd.f32 %v4425_v16, %v1369_v8  ;;  %v6644_v8 = vld [vmem:[#allocation19_spill] sm:$0xff] }
 0x405   : > { %v1300_v7 = vpop.f32.mrf.mxu0  ;;  %v1371_v12 = vpop.f32.mrf.mxu1 }
 0x406   : > { %v1378_v13 = vmul.f32 0.5, %v1374_v3  ;;  %v1375_v4 = vadd.f32 %v4424_v1, %v1300_v7  ;;  %v1377_v11 = vadd.f32 %v4426_v14, %v1371_v12  ;;  %v6645_v12 = vld [vmem:[#allocation21_spill] sm:$0xff]  ;;  %v6646_v14 = vld [vmem:[#allocation18_spill] sm:$0xff] }
 0x408   : > { %4564 = vtanh.f32 %v1378_v13  ;;  %v1382_v63 = vmul.f32 0.5, %v1375_v4  ;;  %v1387_v9 = vmul.f32 0.5, %v1377_v11 }
 0x40a   : > { %4566 = vtanh.f32 %v1382_v63 }
 0x40b   : > { %4568 = vtanh.f32 %v1376_v61 }
 0x40c   : > { %4570 = vtanh.f32 %v1387_v9  ;;  %v6642_v9 = vld [vmem:[#allocation22_spill] sm:$0xff] }
 0x415   : > { %v4565_v10 = vpop.eup %4564 }
 0x416   : > { %v1380_v5 = vmul.f32 0.5, %v4565_v10  ;;  %v6641_v10 = vld [vmem:[#allocation25_spill] sm:$0xff] }
 0x417   : > { %v4567_v6 = vpop.eup %4566 }
 0x418   : > { %v1381_v0 = vadd.f32 0.5, %v1380_v5  ;;  %v1384_v18 = vmul.f32 0.5, %v4567_v6  ;;  %v4569_v1 = vpop.eup %4568  ;;  %v6640_v6 = vld [vmem:[#allocation23_spill] sm:$0xff]  ;;  %v6643_v5 = vld [vmem:[#allocation24_spill] sm:$0xff] }
 0x419   : > { %v4571_v63 = vpop.eup %4570 }
 0x41a   : > { %v1385_v3 = vadd.f32 0.5, %v1384_v18  ;;  %v1392_v13 = vmul.f32 %v4569_v1, %v1381_v0  ;;  %v1389_v61 = vmul.f32 0.5, %v4571_v63  ;;  %v6639_v0 = vld [vmem:[#allocation27_spill] sm:$0xff]  ;;  %v6647_v18 = vld [vmem:[#allocation20_spill] sm:$0xff]  ;;  %v6649_v1 = vld [vmem:[#allocation17_spill] sm:$0xff] }
 0x41b   : > { %v6652_v63 = vld [vmem:[#allocation11_spill] sm:$0xff] }
 0x41c   : > { %v1391_v2 = vmul.f32 %v1385_v3, %v5549_v15  ;;  %v1390_v16 = vadd.f32 0.5, %v1389_v61  ;;  %v6638_v15 = vld [vmem:[#allocation26_spill] sm:$0xff]  ;;  %v6648_v3 = vld [vmem:[#allocation15_spill] sm:$0xff]  ;;  %v6653_v61 = vld [vmem:[#allocation13_spill] sm:$0xff] }
 0x41e   : > { %v5624_v7 = vadd.f32 %v1392_v13, %v1391_v2  ;;  %v6650_v2 = vld [vmem:[#allocation14_spill] sm:$0xff]  ;;  %v6651_v13 = vld [vmem:[#allocation16_spill] sm:$0xff] }
 0x420   : > { %4572 = vtanh.f32 %v5624_v7 }
 0x42d   : > { %v4573_v11 = vpop.eup %4572 }
 0x42e   : > { %v1395_v4 = vmul.f32 %v4573_v11, %v1390_v16  ;;  %v6654_v16 = vld [vmem:[#allocation10_spill] sm:$0xff]  ;;  %v6655_v11 = vmov 0.0  }
 0x430   : > { %4427 = vst [vmem:[%s4937_s3 + $0x18] sm:$0xff] %v1395_v4  ;;  %1532 = vmatmul.mubr.f32.vlgmr.msra.gmra.mxu0 %v1395_v4  ;;  %1603 = vmatmul.mubr.f32.vlgmr.msra.gmra.mxu1 %v1395_v4  ;;  %v6656_v4 = vld [vmem:[#allocation12_spill] sm:$0xff] }
 0x431   : > { %1703 = vmatpush1.msra.mxu0 %v5242_v60  ;;  %1774 = vmatpush1.msra.mxu1 %v5252_v62 }
 0x432   : > { %1704 = vmatprep.subr.mxu0 %v5227_v57  ;;  %1775 = vmatprep.subr.mxu1 %v5237_v59 }
 0x433   : > { %1705 = vmatpush1.msra.mxu0 %v5222_v56  ;;  %1776 = vmatpush1.msra.mxu1 %v5232_v58 }
 0x434   : > { %1706 = vmatprep.subr.mxu0 %v5207_v53  ;;  %1777 = vmatprep.subr.mxu1 %v5217_v55 }
 0x435   : > { %1707 = vmatpush1.msra.mxu0 %v5202_v52  ;;  %1778 = vmatpush1.msra.mxu1 %v5212_v54 }
 0x436   : > { %1708 = vmatprep.subr.mxu0 %v5187_v49  ;;  %1779 = vmatprep.subr.mxu1 %v5197_v51 }
 0x437   : > { %1709 = vmatpush1.msra.mxu0 %v5182_v48  ;;  %1780 = vmatpush1.msra.mxu1 %v5192_v50 }
 0x438   : > { %1710 = vmatprep.subr.mxu0 %v5167_v45  ;;  %1781 = vmatprep.subr.mxu1 %v5177_v47 }
 0x439   : > { %1711 = vmatpush1.msra.mxu0 %v5162_v44  ;;  %1782 = vmatpush1.msra.mxu1 %v5172_v46 }
 0x43a   : > { %1712 = vmatprep.subr.mxu0 %v5147_v41  ;;  %1783 = vmatprep.subr.mxu1 %v5157_v43 }
 0x43b   : > { %1713 = vmatpush1.msra.mxu0 %v5142_v40  ;;  %1784 = vmatpush1.msra.mxu1 %v5152_v42 }
 0x43c   : > { %1714 = vmatprep.subr.mxu0 %v5127_v37  ;;  %1785 = vmatprep.subr.mxu1 %v5137_v39 }
 0x43d   : > { %1715 = vmatpush1.msra.mxu0 %v5122_v36  ;;  %1786 = vmatpush1.msra.mxu1 %v5132_v38 }
 0x43e   : > { %1716 = vmatprep.subr.mxu0 %v5107_v33  ;;  %1787 = vmatprep.subr.mxu1 %v5117_v35 }
 0x43f   : > { %1717 = vmatpush1.msra.mxu0 %v5102_v32  ;;  %1788 = vmatpush1.msra.mxu1 %v5112_v34 }
 0x440   : > { %1718 = vmatprep.subr.mxu0 %v5087_v29  ;;  %1789 = vmatprep.subr.mxu1 %v5097_v31 }
 0x441   : > { %1719 = vmatpush1.msra.mxu0 %v5082_v28  ;;  %1790 = vmatpush1.msra.mxu1 %v5092_v30 }
 0x442   : > { %1720 = vmatprep.subr.mxu0 %v5067_v25  ;;  %1791 = vmatprep.subr.mxu1 %v5077_v27 }
 0x443   : > { %1721 = vmatpush1.msra.mxu0 %v5062_v24  ;;  %1792 = vmatpush1.msra.mxu1 %v5072_v26 }
 0x444   : > { %1722 = vmatprep.subr.mxu0 %v6573_v21  ;;  %1793 = vmatprep.subr.mxu1 %v5057_v23 }
 0x445   : > { %1723 = vmatpush1.msra.mxu0 %v5042_v20  ;;  %1794 = vmatpush1.msra.mxu1 %v5052_v22 }
 0x446   : > { %1724 = vmatprep.subr.mxu0 %v5027_v17  ;;  %1795 = vmatprep.subr.mxu1 %v5037_v19 }
 0x447   : > { %1725 = vmatpush1.msra.mxu0 %v6638_v15  ;;  %1796 = vmatpush1.msra.mxu1 %v6639_v0 }
 0x448   : > { %1726 = vmatprep.subr.mxu0 %v6640_v6  ;;  %1797 = vmatprep.subr.mxu1 %v6641_v10 }
 0x449   : > { %1727 = vmatpush1.msra.mxu0 %v6642_v9  ;;  %1798 = vmatpush1.msra.mxu1 %v6643_v5 }
 0x44a   : > { %1728 = vmatprep.subr.mxu0 %v6644_v8  ;;  %1799 = vmatprep.subr.mxu1 %v6645_v12  ;;  %v4430_v8 = vld [vmem:[%s4935_s30 + $0x90] sm:$0xff] }
 0x44b   : > { %1729 = vmatpush1.msra.mxu0 %v6646_v14  ;;  %1800 = vmatpush1.msra.mxu1 %v6647_v18  ;;  %v4429_v18 = vld [vmem:[%s4935_s30 + $0x88] sm:$0xff] }
 0x44c   : > { %1730 = vmatprep.subr.mxu0 %v6648_v3  ;;  %1801 = vmatprep.subr.mxu1 %v6649_v1  ;;  %v6657_v3 = vld [vmem:[#allocation29_spill] sm:$0xff]  ;;  %v6658_v1 = vld [vmem:[#allocation30_spill] sm:$0xff] }
 0x44d   : > { %1731 = vmatpush1.msra.mxu0 %v6650_v2  ;;  %1802 = vmatpush1.msra.mxu1 %v6651_v13  ;;  %v4428_v2 = vld [vmem:[%s4935_s30 + $0x80] sm:$0xff] }
 0x44e   : > { %1732 = vmatprep.subr.mxu0 %v6652_v63  ;;  %1803 = vmatprep.subr.mxu1 %v6653_v61 }
 0x44f   : > { %1733 = vmatpush1.msra.mxu0 %v6654_v16  ;;  %1766 = vmatprep.mubr.f32.mxu0 %v6655_v11 }
 0x450   : > { %1804 = vmatpush1.msra.mxu1 %v6656_v4  ;;  %1837 = vmatprep.mubr.f32.mxu1 %v6655_v11  ;;  %v4431_v4 = vld [vmem:[%s4935_s30 + $0x98] sm:$0xff] }
 0x451   : > { %1937 = vmatprep.subr.mxu0 %v6657_v3  ;;  %2008 = vmatprep.subr.mxu1 %v6658_v1 }
 0x4f0   : > { %v1533_v13 = vpop.f32.mrf.mxu0  ;;  %v1604_v16 = vpop.f32.mrf.mxu1 }
 0x4f1   : > { %v1609_v14 = vadd.f32 %v4428_v2, %v1533_v13  ;;  %v1611_v9 = vadd.f32 %v4430_v8, %v1604_v16  ;;  %v6665_v16 = vld [vmem:[#allocation19_spill] sm:$0xff] }
 0x4f2   : > { %v1535_v63 = vpop.f32.mrf.mxu0  ;;  %v1606_v11 = vpop.f32.mrf.mxu1 }
 0x4f3   : > { %v1613_v12 = vmul.f32 0.5, %v1609_v14  ;;  %v1610_v61 = vadd.f32 %v4429_v18, %v1535_v63  ;;  %v1612_v10 = vadd.f32 %v4431_v4, %v1606_v11  ;;  %v6666_v11 = vld [vmem:[#allocation21_spill] sm:$0xff]  ;;  %v6667_v4 = vld [vmem:[#allocation18_spill] sm:$0xff] }
 0x4f5   : > { %4574 = vtanh.f32 %v1613_v12  ;;  %v1617_v5 = vmul.f32 0.5, %v1610_v61  ;;  %v1622_v3 = vmul.f32 0.5, %v1612_v10 }
 0x4f7   : > { %4576 = vtanh.f32 %v1617_v5 }
 0x4f8   : > { %4578 = vtanh.f32 %v1611_v9 }
 0x4f9   : > { %4580 = vtanh.f32 %v1622_v3  ;;  %v6663_v3 = vld [vmem:[#allocation22_spill] sm:$0xff] }
 0x502   : > { %v4575_v6 = vpop.eup %4574 }
 0x503   : > { %v1615_v1 = vmul.f32 0.5, %v4575_v6  ;;  %v6662_v6 = vld [vmem:[#allocation25_spill] sm:$0xff] }
 0x504   : > { %v4577_v0 = vpop.eup %4576 }
 0x505   : > { %v1616_v15 = vadd.f32 0.5, %v1615_v1  ;;  %v1619_v2 = vmul.f32 0.5, %v4577_v0  ;;  %v4579_v18 = vpop.eup %4578  ;;  %v6661_v0 = vld [vmem:[#allocation23_spill] sm:$0xff]  ;;  %v6664_v1 = vld [vmem:[#allocation24_spill] sm:$0xff] }
 0x506   : > { %v4581_v5 = vpop.eup %4580 }
 0x507   : > { %v1620_v14 = vadd.f32 0.5, %v1619_v2  ;;  %v1627_v12 = vmul.f32 %v4579_v18, %v1616_v15  ;;  %v1624_v9 = vmul.f32 0.5, %v4581_v5  ;;  %v6660_v15 = vld [vmem:[#allocation27_spill] sm:$0xff]  ;;  %v6668_v2 = vld [vmem:[#allocation20_spill] sm:$0xff]  ;;  %v6670_v18 = vld [vmem:[#allocation17_spill] sm:$0xff] }
 0x508   : > { %v6673_v5 = vld [vmem:[#allocation11_spill] sm:$0xff] }
 0x509   : > { %v1626_v13 = vmul.f32 %v1620_v14, %v5624_v7  ;;  %v1625_v8 = vadd.f32 0.5, %v1624_v9  ;;  %v6659_v7 = vld [vmem:[#allocation26_spill] sm:$0xff]  ;;  %v6669_v14 = vld [vmem:[#allocation15_spill] sm:$0xff]  ;;  %v6674_v9 = vld [vmem:[#allocation13_spill] sm:$0xff] }
 0x50b   : > { %v5699_v63 = vadd.f32 %v1627_v12, %v1626_v13  ;;  %v6671_v13 = vld [vmem:[#allocation14_spill] sm:$0xff]  ;;  %v6672_v12 = vld [vmem:[#allocation16_spill] sm:$0xff] }
 0x50d   : > { %4582 = vtanh.f32 %v5699_v63 }
 0x51a   : > { %v4583_v10 = vpop.eup %4582 }
 0x51b   : > { %v1630_v61 = vmul.f32 %v4583_v10, %v1625_v8  ;;  %v6675_v8 = vld [vmem:[#allocation10_spill] sm:$0xff]  ;;  %v6676_v10 = vmov 0.0  }
 0x51d   : > { %4432 = vst [vmem:[%s4937_s3 + $0x20] sm:$0xff] %v1630_v61  ;;  %1767 = vmatmul.mubr.f32.vlgmr.msra.gmra.mxu0 %v1630_v61  ;;  %1838 = vmatmul.mubr.f32.vlgmr.msra.gmra.mxu1 %v1630_v61  ;;  %v6677_v61 = vld [vmem:[#allocation12_spill] sm:$0xff] }
 0x51e   : > { %1938 = vmatpush1.msra.mxu0 %v5242_v60  ;;  %2009 = vmatpush1.msra.mxu1 %v5252_v62 }
 0x51f   : > { %1939 = vmatprep.subr.mxu0 %v5227_v57  ;;  %2010 = vmatprep.subr.mxu1 %v5237_v59 }
 0x520   : > { %1940 = vmatpush1.msra.mxu0 %v5222_v56  ;;  %2011 = vmatpush1.msra.mxu1 %v5232_v58 }
 0x521   : > { %1941 = vmatprep.subr.mxu0 %v5207_v53  ;;  %2012 = vmatprep.subr.mxu1 %v5217_v55 }
 0x522   : > { %1942 = vmatpush1.msra.mxu0 %v5202_v52  ;;  %2013 = vmatpush1.msra.mxu1 %v5212_v54 }
 0x523   : > { %1943 = vmatprep.subr.mxu0 %v5187_v49  ;;  %2014 = vmatprep.subr.mxu1 %v5197_v51 }
 0x524   : > { %1944 = vmatpush1.msra.mxu0 %v5182_v48  ;;  %2015 = vmatpush1.msra.mxu1 %v5192_v50 }
 0x525   : > { %1945 = vmatprep.subr.mxu0 %v5167_v45  ;;  %2016 = vmatprep.subr.mxu1 %v5177_v47 }
 0x526   : > { %1946 = vmatpush1.msra.mxu0 %v5162_v44  ;;  %2017 = vmatpush1.msra.mxu1 %v5172_v46 }
 0x527   : > { %1947 = vmatprep.subr.mxu0 %v5147_v41  ;;  %2018 = vmatprep.subr.mxu1 %v5157_v43 }
 0x528   : > { %1948 = vmatpush1.msra.mxu0 %v5142_v40  ;;  %2019 = vmatpush1.msra.mxu1 %v5152_v42 }
 0x529   : > { %1949 = vmatprep.subr.mxu0 %v5127_v37  ;;  %2020 = vmatprep.subr.mxu1 %v5137_v39 }
 0x52a   : > { %1950 = vmatpush1.msra.mxu0 %v5122_v36  ;;  %2021 = vmatpush1.msra.mxu1 %v5132_v38 }
 0x52b   : > { %1951 = vmatprep.subr.mxu0 %v5107_v33  ;;  %2022 = vmatprep.subr.mxu1 %v5117_v35 }
 0x52c   : > { %1952 = vmatpush1.msra.mxu0 %v5102_v32  ;;  %2023 = vmatpush1.msra.mxu1 %v5112_v34 }
 0x52d   : > { %1953 = vmatprep.subr.mxu0 %v5087_v29  ;;  %2024 = vmatprep.subr.mxu1 %v5097_v31 }
 0x52e   : > { %1954 = vmatpush1.msra.mxu0 %v5082_v28  ;;  %2025 = vmatpush1.msra.mxu1 %v5092_v30 }
 0x52f   : > { %1955 = vmatprep.subr.mxu0 %v5067_v25  ;;  %2026 = vmatprep.subr.mxu1 %v5077_v27 }
 0x530   : > { %1956 = vmatpush1.msra.mxu0 %v5062_v24  ;;  %2027 = vmatpush1.msra.mxu1 %v5072_v26 }
 0x531   : > { %1957 = vmatprep.subr.mxu0 %v6573_v21  ;;  %2028 = vmatprep.subr.mxu1 %v5057_v23 }
 0x532   : > { %1958 = vmatpush1.msra.mxu0 %v5042_v20  ;;  %2029 = vmatpush1.msra.mxu1 %v5052_v22 }
 0x533   : > { %1959 = vmatprep.subr.mxu0 %v5027_v17  ;;  %2030 = vmatprep.subr.mxu1 %v5037_v19 }
 0x534   : > { %1960 = vmatpush1.msra.mxu0 %v6659_v7  ;;  %2031 = vmatpush1.msra.mxu1 %v6660_v15 }
 0x535   : > { %1961 = vmatprep.subr.mxu0 %v6661_v0  ;;  %2032 = vmatprep.subr.mxu1 %v6662_v6 }
 0x536   : > { %1962 = vmatpush1.msra.mxu0 %v6663_v3  ;;  %2033 = vmatpush1.msra.mxu1 %v6664_v1 }
 0x537   : > { %1963 = vmatprep.subr.mxu0 %v6665_v16  ;;  %2034 = vmatprep.subr.mxu1 %v6666_v11  ;;  %v4435_v16 = vld [vmem:[%s4935_s30 + $0xb0] sm:$0xff] }
 0x538   : > { %1964 = vmatpush1.msra.mxu0 %v6667_v4  ;;  %2035 = vmatpush1.msra.mxu1 %v6668_v2  ;;  %v4434_v2 = vld [vmem:[%s4935_s30 + $0xa8] sm:$0xff] }
 0x539   : > { %1965 = vmatprep.subr.mxu0 %v6669_v14  ;;  %2036 = vmatprep.subr.mxu1 %v6670_v18  ;;  %v6678_v14 = vld [vmem:[#allocation29_spill] sm:$0xff]  ;;  %v6679_v18 = vld [vmem:[#allocation30_spill] sm:$0xff] }
 0x53a   : > { %1966 = vmatpush1.msra.mxu0 %v6671_v13  ;;  %2037 = vmatpush1.msra.mxu1 %v6672_v12  ;;  %v4433_v13 = vld [vmem:[%s4935_s30 + $0xa0] sm:$0xff] }
 0x53b   : > { %1967 = vmatprep.subr.mxu0 %v6673_v5  ;;  %2038 = vmatprep.subr.mxu1 %v6674_v9 }
 0x53c   : > { %1968 = vmatpush1.msra.mxu0 %v6675_v8  ;;  %2001 = vmatprep.mubr.f32.mxu0 %v6676_v10 }
 0x53d   : > { %2039 = vmatpush1.msra.mxu1 %v6677_v61  ;;  %2072 = vmatprep.mubr.f32.mxu1 %v6676_v10  ;;  %v4436_v61 = vld [vmem:[%s4935_s30 + $0xb8] sm:$0xff] }
 0x53e   : > { %2172 = vmatprep.subr.mxu0 %v6678_v14  ;;  %2243 = vmatprep.subr.mxu1 %v6679_v18 }
 0x5dd   : > { %v1768_v12 = vpop.f32.mrf.mxu0  ;;  %v1839_v8 = vpop.f32.mrf.mxu1 }
 0x5de   : > { %v1844_v4 = vadd.f32 %v4433_v13, %v1768_v12  ;;  %v1846_v3 = vadd.f32 %v4435_v16, %v1839_v8  ;;  %v6686_v8 = vld [vmem:[#allocation19_spill] sm:$0xff] }
 0x5df   : > { %v1770_v5 = vpop.f32.mrf.mxu0  ;;  %v1841_v10 = vpop.f32.mrf.mxu1 }
 0x5e0   : > { %v1848_v11 = vmul.f32 0.5, %v1844_v4  ;;  %v1845_v9 = vadd.f32 %v4434_v2, %v1770_v5  ;;  %v1847_v6 = vadd.f32 %v4436_v61, %v1841_v10  ;;  %v6687_v10 = vld [vmem:[#allocation21_spill] sm:$0xff]  ;;  %v6688_v61 = vld [vmem:[#allocation18_spill] sm:$0xff] }
 0x5e2   : > { %4584 = vtanh.f32 %v1848_v11  ;;  %v1852_v1 = vmul.f32 0.5, %v1845_v9  ;;  %v1857_v14 = vmul.f32 0.5, %v1847_v6 }
 0x5e4   : > { %4586 = vtanh.f32 %v1852_v1 }
 0x5e5   : > { %4588 = vtanh.f32 %v1846_v3 }
 0x5e6   : > { %4590 = vtanh.f32 %v1857_v14  ;;  %v6684_v14 = vld [vmem:[#allocation22_spill] sm:$0xff] }
 0x5ef   : > { %v4585_v0 = vpop.eup %4584 }
 0x5f0   : > { %v1850_v18 = vmul.f32 0.5, %v4585_v0  ;;  %v6683_v0 = vld [vmem:[#allocation25_spill] sm:$0xff] }
 0x5f1   : > { %v4587_v15 = vpop.eup %4586 }
 0x5f2   : > { %v1851_v7 = vadd.f32 0.5, %v1850_v18  ;;  %v1854_v13 = vmul.f32 0.5, %v4587_v15  ;;  %v4589_v2 = vpop.eup %4588  ;;  %v6682_v15 = vld [vmem:[#allocation23_spill] sm:$0xff]  ;;  %v6685_v18 = vld [vmem:[#allocation24_spill] sm:$0xff] }
 0x5f3   : > { %v4591_v1 = vpop.eup %4590 }
 0x5f4   : > { %v1855_v4 = vadd.f32 0.5, %v1854_v13  ;;  %v1862_v11 = vmul.f32 %v4589_v2, %v1851_v7  ;;  %v1859_v3 = vmul.f32 0.5, %v4591_v1  ;;  %v6681_v7 = vld [vmem:[#allocation27_spill] sm:$0xff]  ;;  %v6689_v13 = vld [vmem:[#allocation20_spill] sm:$0xff]  ;;  %v6691_v2 = vld [vmem:[#allocation17_spill] sm:$0xff] }
 0x5f5   : > { %v6694_v1 = vld [vmem:[#allocation11_spill] sm:$0xff] }
 0x5f6   : > { %v1861_v12 = vmul.f32 %v1855_v4, %v5699_v63  ;;  %v1860_v16 = vadd.f32 0.5, %v1859_v3  ;;  %v6680_v63 = vld [vmem:[#allocation26_spill] sm:$0xff]  ;;  %v6690_v4 = vld [vmem:[#allocation15_spill] sm:$0xff]  ;;  %v6695_v3 = vld [vmem:[#allocation13_spill] sm:$0xff] }
 0x5f8   : > { %v5774_v5 = vadd.f32 %v1862_v11, %v1861_v12  ;;  %v6692_v12 = vld [vmem:[#allocation14_spill] sm:$0xff]  ;;  %v6693_v11 = vld [vmem:[#allocation16_spill] sm:$0xff] }
 0x5fa   : > { %4592 = vtanh.f32 %v5774_v5 }
 0x607   : > { %v4593_v6 = vpop.eup %4592 }
 0x608   : > { %v1865_v9 = vmul.f32 %v4593_v6, %v1860_v16  ;;  %v6696_v16 = vld [vmem:[#allocation10_spill] sm:$0xff]  ;;  %v6697_v6 = vmov 0.0  }
 0x60a   : > { %4437 = vst [vmem:[%s4937_s3 + $0x28] sm:$0xff] %v1865_v9  ;;  %2002 = vmatmul.mubr.f32.vlgmr.msra.gmra.mxu0 %v1865_v9  ;;  %2073 = vmatmul.mubr.f32.vlgmr.msra.gmra.mxu1 %v1865_v9  ;;  %v6698_v9 = vld [vmem:[#allocation12_spill] sm:$0xff] }
 0x60b   : > { %2173 = vmatpush1.msra.mxu0 %v5242_v60  ;;  %2244 = vmatpush1.msra.mxu1 %v5252_v62 }
 0x60c   : > { %2174 = vmatprep.subr.mxu0 %v5227_v57  ;;  %2245 = vmatprep.subr.mxu1 %v5237_v59 }
 0x60d   : > { %2175 = vmatpush1.msra.mxu0 %v5222_v56  ;;  %2246 = vmatpush1.msra.mxu1 %v5232_v58 }
 0x60e   : > { %2176 = vmatprep.subr.mxu0 %v5207_v53  ;;  %2247 = vmatprep.subr.mxu1 %v5217_v55 }
 0x60f   : > { %2177 = vmatpush1.msra.mxu0 %v5202_v52  ;;  %2248 = vmatpush1.msra.mxu1 %v5212_v54 }
 0x610   : > { %2178 = vmatprep.subr.mxu0 %v5187_v49  ;;  %2249 = vmatprep.subr.mxu1 %v5197_v51 }
 0x611   : > { %2179 = vmatpush1.msra.mxu0 %v5182_v48  ;;  %2250 = vmatpush1.msra.mxu1 %v5192_v50 }
 0x612   : > { %2180 = vmatprep.subr.mxu0 %v5167_v45  ;;  %2251 = vmatprep.subr.mxu1 %v5177_v47 }
 0x613   : > { %2181 = vmatpush1.msra.mxu0 %v5162_v44  ;;  %2252 = vmatpush1.msra.mxu1 %v5172_v46 }
 0x614   : > { %2182 = vmatprep.subr.mxu0 %v5147_v41  ;;  %2253 = vmatprep.subr.mxu1 %v5157_v43 }
 0x615   : > { %2183 = vmatpush1.msra.mxu0 %v5142_v40  ;;  %2254 = vmatpush1.msra.mxu1 %v5152_v42 }
 0x616   : > { %2184 = vmatprep.subr.mxu0 %v5127_v37  ;;  %2255 = vmatprep.subr.mxu1 %v5137_v39 }
 0x617   : > { %2185 = vmatpush1.msra.mxu0 %v5122_v36  ;;  %2256 = vmatpush1.msra.mxu1 %v5132_v38 }
 0x618   : > { %2186 = vmatprep.subr.mxu0 %v5107_v33  ;;  %2257 = vmatprep.subr.mxu1 %v5117_v35 }
 0x619   : > { %2187 = vmatpush1.msra.mxu0 %v5102_v32  ;;  %2258 = vmatpush1.msra.mxu1 %v5112_v34 }
 0x61a   : > { %2188 = vmatprep.subr.mxu0 %v5087_v29  ;;  %2259 = vmatprep.subr.mxu1 %v5097_v31 }
 0x61b   : > { %2189 = vmatpush1.msra.mxu0 %v5082_v28  ;;  %2260 = vmatpush1.msra.mxu1 %v5092_v30 }
 0x61c   : > { %2190 = vmatprep.subr.mxu0 %v5067_v25  ;;  %2261 = vmatprep.subr.mxu1 %v5077_v27 }
 0x61d   : > { %2191 = vmatpush1.msra.mxu0 %v5062_v24  ;;  %2262 = vmatpush1.msra.mxu1 %v5072_v26 }
 0x61e   : > { %2192 = vmatprep.subr.mxu0 %v6573_v21  ;;  %2263 = vmatprep.subr.mxu1 %v5057_v23 }
 0x61f   : > { %2193 = vmatpush1.msra.mxu0 %v5042_v20  ;;  %2264 = vmatpush1.msra.mxu1 %v5052_v22 }
 0x620   : > { %2194 = vmatprep.subr.mxu0 %v5027_v17  ;;  %2265 = vmatprep.subr.mxu1 %v5037_v19 }
 0x621   : > { %2195 = vmatpush1.msra.mxu0 %v6680_v63  ;;  %2266 = vmatpush1.msra.mxu1 %v6681_v7 }
 0x622   : > { %2196 = vmatprep.subr.mxu0 %v6682_v15  ;;  %2267 = vmatprep.subr.mxu1 %v6683_v0 }
 0x623   : > { %2197 = vmatpush1.msra.mxu0 %v6684_v14  ;;  %2268 = vmatpush1.msra.mxu1 %v6685_v18 }
 0x624   : > { %2198 = vmatprep.subr.mxu0 %v6686_v8  ;;  %2269 = vmatprep.subr.mxu1 %v6687_v10  ;;  %v4440_v8 = vld [vmem:[%s4935_s30 + $0xd0] sm:$0xff] }
 0x625   : > { %2199 = vmatpush1.msra.mxu0 %v6688_v61  ;;  %2270 = vmatpush1.msra.mxu1 %v6689_v13  ;;  %v4439_v13 = vld [vmem:[%s4935_s30 + $0xc8] sm:$0xff] }
 0x626   : > { %2200 = vmatprep.subr.mxu0 %v6690_v4  ;;  %2271 = vmatprep.subr.mxu1 %v6691_v2  ;;  %v6699_v4 = vld [vmem:[#allocation29_spill] sm:$0xff]  ;;  %v6700_v2 = vld [vmem:[#allocation30_spill] sm:$0xff] }
 0x627   : > { %2201 = vmatpush1.msra.mxu0 %v6692_v12  ;;  %2272 = vmatpush1.msra.mxu1 %v6693_v11  ;;  %v4438_v12 = vld [vmem:[%s4935_s30 + $0xc0] sm:$0xff] }
 0x628   : > { %2202 = vmatprep.subr.mxu0 %v6694_v1  ;;  %2273 = vmatprep.subr.mxu1 %v6695_v3 }
 0x629   : > { %2203 = vmatpush1.msra.mxu0 %v6696_v16  ;;  %2236 = vmatprep.mubr.f32.mxu0 %v6697_v6 }
 0x62a   : > { %2274 = vmatpush1.msra.mxu1 %v6698_v9  ;;  %2307 = vmatprep.mubr.f32.mxu1 %v6697_v6  ;;  %v4441_v9 = vld [vmem:[%s4935_s30 + $0xd8] sm:$0xff] }
 0x62b   : > { %2407 = vmatprep.subr.mxu0 %v6699_v4  ;;  %2478 = vmatprep.subr.mxu1 %v6700_v2 }
 0x6ca   : > { %v2003_v11 = vpop.f32.mrf.mxu0  ;;  %v2074_v16 = vpop.f32.mrf.mxu1 }
 0x6cb   : > { %v2079_v61 = vadd.f32 %v4438_v12, %v2003_v11  ;;  %v2081_v14 = vadd.f32 %v4440_v8, %v2074_v16  ;;  %v6707_v16 = vld [vmem:[#allocation19_spill] sm:$0xff] }
 0x6cc   : > { %v2005_v1 = vpop.f32.mrf.mxu0  ;;  %v2076_v6 = vpop.f32.mrf.mxu1 }
 0x6cd   : > { %v2083_v10 = vmul.f32 0.5, %v2079_v61  ;;  %v2080_v3 = vadd.f32 %v4439_v13, %v2005_v1  ;;  %v2082_v0 = vadd.f32 %v4441_v9, %v2076_v6  ;;  %v6708_v6 = vld [vmem:[#allocation21_spill] sm:$0xff]  ;;  %v6709_v9 = vld [vmem:[#allocation18_spill] sm:$0xff] }
 0x6cf   : > { %4594 = vtanh.f32 %v2083_v10  ;;  %v2087_v18 = vmul.f32 0.5, %v2080_v3  ;;  %v2092_v4 = vmul.f32 0.5, %v2082_v0 }
 0x6d1   : > { %4596 = vtanh.f32 %v2087_v18 }
 0x6d2   : > { %4598 = vtanh.f32 %v2081_v14 }
 0x6d3   : > { %4600 = vtanh.f32 %v2092_v4  ;;  %v6705_v4 = vld [vmem:[#allocation22_spill] sm:$0xff] }
 0x6dc   : > { %v4595_v15 = vpop.eup %4594 }
 0x6dd   : > { %v2085_v2 = vmul.f32 0.5, %v4595_v15  ;;  %v6704_v15 = vld [vmem:[#allocation25_spill] sm:$0xff] }
 0x6de   : > { %v4597_v7 = vpop.eup %4596 }
 0x6df   : > { %v2086_v63 = vadd.f32 0.5, %v2085_v2  ;;  %v2089_v12 = vmul.f32 0.5, %v4597_v7  ;;  %v4599_v13 = vpop.eup %4598  ;;  %v6703_v7 = vld [vmem:[#allocation23_spill] sm:$0xff]  ;;  %v6706_v2 = vld [vmem:[#allocation24_spill] sm:$0xff] }
 0x6e0   : > { %v4601_v18 = vpop.eup %4600 }
 0x6e1   : > { %v2090_v61 = vadd.f32 0.5, %v2089_v12  ;;  %v2097_v10 = vmul.f32 %v4599_v13, %v2086_v63  ;;  %v2094_v14 = vmul.f32 0.5, %v4601_v18  ;;  %v6702_v63 = vld [vmem:[#allocation27_spill] sm:$0xff]  ;;  %v6710_v12 = vld [vmem:[#allocation20_spill] sm:$0xff]  ;;  %v6712_v13 = vld [vmem:[#allocation17_spill] sm:$0xff] }
 0x6e2   : > { %v6715_v18 = vld [vmem:[#allocation11_spill] sm:$0xff] }
 0x6e3   : > { %v2096_v11 = vmul.f32 %v2090_v61, %v5774_v5  ;;  %v2095_v8 = vadd.f32 0.5, %v2094_v14  ;;  %v6701_v5 = vld [vmem:[#allocation26_spill] sm:$0xff]  ;;  %v6711_v61 = vld [vmem:[#allocation15_spill] sm:$0xff]  ;;  %v6716_v14 = vld [vmem:[#allocation13_spill] sm:$0xff] }
 0x6e5   : > { %v5849_v1 = vadd.f32 %v2097_v10, %v2096_v11  ;;  %v6713_v11 = vld [vmem:[#allocation14_spill] sm:$0xff]  ;;  %v6714_v10 = vld [vmem:[#allocation16_spill] sm:$0xff] }
 0x6e7   : > { %4602 = vtanh.f32 %v5849_v1 }
 0x6f4   : > { %v4603_v0 = vpop.eup %4602 }
 0x6f5   : > { %v2100_v3 = vmul.f32 %v4603_v0, %v2095_v8  ;;  %v6717_v8 = vld [vmem:[#allocation10_spill] sm:$0xff]  ;;  %v6718_v0 = vmov 0.0  }
 0x6f7   : > { %4442 = vst [vmem:[%s4937_s3 + $0x30] sm:$0xff] %v2100_v3  ;;  %2237 = vmatmul.mubr.f32.vlgmr.msra.gmra.mxu0 %v2100_v3  ;;  %2308 = vmatmul.mubr.f32.vlgmr.msra.gmra.mxu1 %v2100_v3  ;;  %v6719_v3 = vld [vmem:[#allocation12_spill] sm:$0xff] }
 0x6f8   : > { %2408 = vmatpush1.msra.mxu0 %v5242_v60  ;;  %2479 = vmatpush1.msra.mxu1 %v5252_v62 }
 0x6f9   : > { %2409 = vmatprep.subr.mxu0 %v5227_v57  ;;  %2480 = vmatprep.subr.mxu1 %v5237_v59 }
 0x6fa   : > { %2410 = vmatpush1.msra.mxu0 %v5222_v56  ;;  %2481 = vmatpush1.msra.mxu1 %v5232_v58 }
 0x6fb   : > { %2411 = vmatprep.subr.mxu0 %v5207_v53  ;;  %2482 = vmatprep.subr.mxu1 %v5217_v55 }
 0x6fc   : > { %2412 = vmatpush1.msra.mxu0 %v5202_v52  ;;  %2483 = vmatpush1.msra.mxu1 %v5212_v54 }
 0x6fd   : > { %2413 = vmatprep.subr.mxu0 %v5187_v49  ;;  %2484 = vmatprep.subr.mxu1 %v5197_v51 }
 0x6fe   : > { %2414 = vmatpush1.msra.mxu0 %v5182_v48  ;;  %2485 = vmatpush1.msra.mxu1 %v5192_v50 }
 0x6ff   : > { %2415 = vmatprep.subr.mxu0 %v5167_v45  ;;  %2486 = vmatprep.subr.mxu1 %v5177_v47 }
 0x700   : > { %2416 = vmatpush1.msra.mxu0 %v5162_v44  ;;  %2487 = vmatpush1.msra.mxu1 %v5172_v46 }
 0x701   : > { %2417 = vmatprep.subr.mxu0 %v5147_v41  ;;  %2488 = vmatprep.subr.mxu1 %v5157_v43 }
 0x702   : > { %2418 = vmatpush1.msra.mxu0 %v5142_v40  ;;  %2489 = vmatpush1.msra.mxu1 %v5152_v42 }
 0x703   : > { %2419 = vmatprep.subr.mxu0 %v5127_v37  ;;  %2490 = vmatprep.subr.mxu1 %v5137_v39 }
 0x704   : > { %2420 = vmatpush1.msra.mxu0 %v5122_v36  ;;  %2491 = vmatpush1.msra.mxu1 %v5132_v38 }
 0x705   : > { %2421 = vmatprep.subr.mxu0 %v5107_v33  ;;  %2492 = vmatprep.subr.mxu1 %v5117_v35 }
 0x706   : > { %2422 = vmatpush1.msra.mxu0 %v5102_v32  ;;  %2493 = vmatpush1.msra.mxu1 %v5112_v34 }
 0x707   : > { %2423 = vmatprep.subr.mxu0 %v5087_v29  ;;  %2494 = vmatprep.subr.mxu1 %v5097_v31 }
 0x708   : > { %2424 = vmatpush1.msra.mxu0 %v5082_v28  ;;  %2495 = vmatpush1.msra.mxu1 %v5092_v30 }
 0x709   : > { %2425 = vmatprep.subr.mxu0 %v5067_v25  ;;  %2496 = vmatprep.subr.mxu1 %v5077_v27 }
 0x70a   : > { %2426 = vmatpush1.msra.mxu0 %v5062_v24  ;;  %2497 = vmatpush1.msra.mxu1 %v5072_v26 }
 0x70b   : > { %2427 = vmatprep.subr.mxu0 %v6573_v21  ;;  %2498 = vmatprep.subr.mxu1 %v5057_v23 }
 0x70c   : > { %2428 = vmatpush1.msra.mxu0 %v5042_v20  ;;  %2499 = vmatpush1.msra.mxu1 %v5052_v22 }
 0x70d   : > { %2429 = vmatprep.subr.mxu0 %v5027_v17  ;;  %2500 = vmatprep.subr.mxu1 %v5037_v19 }
 0x70e   : > { %2430 = vmatpush1.msra.mxu0 %v6701_v5  ;;  %2501 = vmatpush1.msra.mxu1 %v6702_v63 }
 0x70f   : > { %2431 = vmatprep.subr.mxu0 %v6703_v7  ;;  %2502 = vmatprep.subr.mxu1 %v6704_v15 }
 0x710   : > { %2432 = vmatpush1.msra.mxu0 %v6705_v4  ;;  %2503 = vmatpush1.msra.mxu1 %v6706_v2 }
 0x711   : > { %2433 = vmatprep.subr.mxu0 %v6707_v16  ;;  %2504 = vmatprep.subr.mxu1 %v6708_v6  ;;  %v4445_v16 = vld [vmem:[%s4935_s30 + $0xf0] sm:$0xff] }
 0x712   : > { %2434 = vmatpush1.msra.mxu0 %v6709_v9  ;;  %2505 = vmatpush1.msra.mxu1 %v6710_v12  ;;  %v4444_v12 = vld [vmem:[%s4935_s30 + $0xe8] sm:$0xff] }
 0x713   : > { %2435 = vmatprep.subr.mxu0 %v6711_v61  ;;  %2506 = vmatprep.subr.mxu1 %v6712_v13  ;;  %v6720_v61 = vld [vmem:[#allocation29_spill] sm:$0xff]  ;;  %v6721_v13 = vld [vmem:[#allocation30_spill] sm:$0xff] }
 0x714   : > { %2436 = vmatpush1.msra.mxu0 %v6713_v11  ;;  %2507 = vmatpush1.msra.mxu1 %v6714_v10  ;;  %v4443_v11 = vld [vmem:[%s4935_s30 + $0xe0] sm:$0xff] }
 0x715   : > { %2437 = vmatprep.subr.mxu0 %v6715_v18  ;;  %2508 = vmatprep.subr.mxu1 %v6716_v14 }
 0x716   : > { %2438 = vmatpush1.msra.mxu0 %v6717_v8  ;;  %2471 = vmatprep.mubr.f32.mxu0 %v6718_v0 }
 0x717   : > { %2509 = vmatpush1.msra.mxu1 %v6719_v3  ;;  %2542 = vmatprep.mubr.f32.mxu1 %v6718_v0  ;;  %v4446_v3 = vld [vmem:[%s4935_s30 + $0xf8] sm:$0xff] }
 0x718   : > { %2642 = vmatprep.subr.mxu0 %v6720_v61  ;;  %2713 = vmatprep.subr.mxu1 %v6721_v13 }
 0x7b7   : > { %v2238_v10 = vpop.f32.mrf.mxu0  ;;  %v2309_v8 = vpop.f32.mrf.mxu1 }
 0x7b8   : > { %v2314_v9 = vadd.f32 %v4443_v11, %v2238_v10  ;;  %v2316_v4 = vadd.f32 %v4445_v16, %v2309_v8  ;;  %v6728_v8 = vld [vmem:[#allocation19_spill] sm:$0xff] }
 0x7b9   : > { %v2240_v18 = vpop.f32.mrf.mxu0  ;;  %v2311_v0 = vpop.f32.mrf.mxu1 }
 0x7ba   : > { %v2318_v6 = vmul.f32 0.5, %v2314_v9  ;;  %v2315_v14 = vadd.f32 %v4444_v12, %v2240_v18  ;;  %v2317_v15 = vadd.f32 %v4446_v3, %v2311_v0  ;;  %v6729_v0 = vld [vmem:[#allocation21_spill] sm:$0xff]  ;;  %v6730_v3 = vld [vmem:[#allocation18_spill] sm:$0xff] }
 0x7bc   : > { %4604 = vtanh.f32 %v2318_v6  ;;  %v2322_v2 = vmul.f32 0.5, %v2315_v14  ;;  %v2327_v61 = vmul.f32 0.5, %v2317_v15 }
 0x7be   : > { %4606 = vtanh.f32 %v2322_v2 }
 0x7bf   : > { %4608 = vtanh.f32 %v2316_v4 }
 0x7c0   : > { %4610 = vtanh.f32 %v2327_v61  ;;  %v6726_v61 = vld [vmem:[#allocation22_spill] sm:$0xff] }
 0x7c9   : > { %v4605_v7 = vpop.eup %4604 }
 0x7ca   : > { %v2320_v13 = vmul.f32 0.5, %v4605_v7  ;;  %v6725_v7 = vld [vmem:[#allocation25_spill] sm:$0xff] }
 0x7cb   : > { %v4607_v63 = vpop.eup %4606 }
 0x7cc   : > { %v2321_v5 = vadd.f32 0.5, %v2320_v13  ;;  %v2324_v11 = vmul.f32 0.5, %v4607_v63  ;;  %v4609_v12 = vpop.eup %4608  ;;  %v6724_v63 = vld [vmem:[#allocation23_spill] sm:$0xff]  ;;  %v6727_v13 = vld [vmem:[#allocation24_spill] sm:$0xff] }
 0x7cd   : > { %v4611_v2 = vpop.eup %4610 }
 0x7ce   : > { %v2325_v9 = vadd.f32 0.5, %v2324_v11  ;;  %v2332_v6 = vmul.f32 %v4609_v12, %v2321_v5  ;;  %v2329_v4 = vmul.f32 0.5, %v4611_v2  ;;  %v6723_v5 = vld [vmem:[#allocation27_spill] sm:$0xff]  ;;  %v6731_v11 = vld [vmem:[#allocation20_spill] sm:$0xff]  ;;  %v6733_v12 = vld [vmem:[#allocation17_spill] sm:$0xff] }
 0x7cf   : > { %v6736_v2 = vld [vmem:[#allocation11_spill] sm:$0xff] }
 0x7d0   : > { %v2331_v10 = vmul.f32 %v2325_v9, %v5849_v1  ;;  %v2330_v16 = vadd.f32 0.5, %v2329_v4  ;;  %v6722_v1 = vld [vmem:[#allocation26_spill] sm:$0xff]  ;;  %v6732_v9 = vld [vmem:[#allocation15_spill] sm:$0xff]  ;;  %v6737_v4 = vld [vmem:[#allocation13_spill] sm:$0xff] }
 0x7d2   : > { %v5924_v18 = vadd.f32 %v2332_v6, %v2331_v10  ;;  %v6734_v10 = vld [vmem:[#allocation14_spill] sm:$0xff]  ;;  %v6735_v6 = vld [vmem:[#allocation16_spill] sm:$0xff] }
 0x7d4   : > { %4612 = vtanh.f32 %v5924_v18 }
 0x7e1   : > { %v4613_v15 = vpop.eup %4612 }
 0x7e2   : > { %v2335_v14 = vmul.f32 %v4613_v15, %v2330_v16  ;;  %v6738_v16 = vld [vmem:[#allocation10_spill] sm:$0xff]  ;;  %v6739_v15 = vmov 0.0  }
 0x7e4   : > { %4447 = vst [vmem:[%s4937_s3 + $0x38] sm:$0xff] %v2335_v14  ;;  %2472 = vmatmul.mubr.f32.vlgmr.msra.gmra.mxu0 %v2335_v14  ;;  %2543 = vmatmul.mubr.f32.vlgmr.msra.gmra.mxu1 %v2335_v14  ;;  %v6740_v14 = vld [vmem:[#allocation12_spill] sm:$0xff] }
 0x7e5   : > { %2643 = vmatpush1.msra.mxu0 %v5242_v60  ;;  %2714 = vmatpush1.msra.mxu1 %v5252_v62 }
 0x7e6   : > { %2644 = vmatprep.subr.mxu0 %v5227_v57  ;;  %2715 = vmatprep.subr.mxu1 %v5237_v59 }
 0x7e7   : > { %2645 = vmatpush1.msra.mxu0 %v5222_v56  ;;  %2716 = vmatpush1.msra.mxu1 %v5232_v58 }
 0x7e8   : > { %2646 = vmatprep.subr.mxu0 %v5207_v53  ;;  %2717 = vmatprep.subr.mxu1 %v5217_v55 }
 0x7e9   : > { %2647 = vmatpush1.msra.mxu0 %v5202_v52  ;;  %2718 = vmatpush1.msra.mxu1 %v5212_v54 }
 0x7ea   : > { %2648 = vmatprep.subr.mxu0 %v5187_v49  ;;  %2719 = vmatprep.subr.mxu1 %v5197_v51 }
 0x7eb   : > { %2649 = vmatpush1.msra.mxu0 %v5182_v48  ;;  %2720 = vmatpush1.msra.mxu1 %v5192_v50 }
 0x7ec   : > { %2650 = vmatprep.subr.mxu0 %v5167_v45  ;;  %2721 = vmatprep.subr.mxu1 %v5177_v47 }
 0x7ed   : > { %2651 = vmatpush1.msra.mxu0 %v5162_v44  ;;  %2722 = vmatpush1.msra.mxu1 %v5172_v46 }
 0x7ee   : > { %2652 = vmatprep.subr.mxu0 %v5147_v41  ;;  %2723 = vmatprep.subr.mxu1 %v5157_v43 }
 0x7ef   : > { %2653 = vmatpush1.msra.mxu0 %v5142_v40  ;;  %2724 = vmatpush1.msra.mxu1 %v5152_v42 }
 0x7f0   : > { %2654 = vmatprep.subr.mxu0 %v5127_v37  ;;  %2725 = vmatprep.subr.mxu1 %v5137_v39 }
 0x7f1   : > { %2655 = vmatpush1.msra.mxu0 %v5122_v36  ;;  %2726 = vmatpush1.msra.mxu1 %v5132_v38 }
 0x7f2   : > { %2656 = vmatprep.subr.mxu0 %v5107_v33  ;;  %2727 = vmatprep.subr.mxu1 %v5117_v35 }
 0x7f3   : > { %2657 = vmatpush1.msra.mxu0 %v5102_v32  ;;  %2728 = vmatpush1.msra.mxu1 %v5112_v34 }
 0x7f4   : > { %2658 = vmatprep.subr.mxu0 %v5087_v29  ;;  %2729 = vmatprep.subr.mxu1 %v5097_v31 }
 0x7f5   : > { %2659 = vmatpush1.msra.mxu0 %v5082_v28  ;;  %2730 = vmatpush1.msra.mxu1 %v5092_v30 }
 0x7f6   : > { %2660 = vmatprep.subr.mxu0 %v5067_v25  ;;  %2731 = vmatprep.subr.mxu1 %v5077_v27 }
 0x7f7   : > { %2661 = vmatpush1.msra.mxu0 %v5062_v24  ;;  %2732 = vmatpush1.msra.mxu1 %v5072_v26 }
 0x7f8   : > { %2662 = vmatprep.subr.mxu0 %v6573_v21  ;;  %2733 = vmatprep.subr.mxu1 %v5057_v23 }
 0x7f9   : > { %2663 = vmatpush1.msra.mxu0 %v5042_v20  ;;  %2734 = vmatpush1.msra.mxu1 %v5052_v22 }
 0x7fa   : > { %2664 = vmatprep.subr.mxu0 %v5027_v17  ;;  %2735 = vmatprep.subr.mxu1 %v5037_v19 }
 0x7fb   : > { %2665 = vmatpush1.msra.mxu0 %v6722_v1  ;;  %2736 = vmatpush1.msra.mxu1 %v6723_v5 }
 0x7fc   : > { %2666 = vmatprep.subr.mxu0 %v6724_v63  ;;  %2737 = vmatprep.subr.mxu1 %v6725_v7 }
 0x7fd   : > { %2667 = vmatpush1.msra.mxu0 %v6726_v61  ;;  %2738 = vmatpush1.msra.mxu1 %v6727_v13 }
 0x7fe   : > { %2668 = vmatprep.subr.mxu0 %v6728_v8  ;;  %2739 = vmatprep.subr.mxu1 %v6729_v0  ;;  %v4450_v8 = vld [vmem:[%s4935_s30 + $0x110] sm:$0xff] }
 0x7ff   : > { %2669 = vmatpush1.msra.mxu0 %v6730_v3  ;;  %2740 = vmatpush1.msra.mxu1 %v6731_v11  ;;  %v4449_v11 = vld [vmem:[%s4935_s30 + $0x108] sm:$0xff] }
 0x800   : > { %2670 = vmatprep.subr.mxu0 %v6732_v9  ;;  %2741 = vmatprep.subr.mxu1 %v6733_v12  ;;  %v6741_v9 = vld [vmem:[#allocation29_spill] sm:$0xff]  ;;  %v6742_v12 = vld [vmem:[#allocation30_spill] sm:$0xff] }
 0x801   : > { %2671 = vmatpush1.msra.mxu0 %v6734_v10  ;;  %2742 = vmatpush1.msra.mxu1 %v6735_v6  ;;  %v4448_v10 = vld [vmem:[%s4935_s30 + $0x100] sm:$0xff] }
 0x802   : > { %2672 = vmatprep.subr.mxu0 %v6736_v2  ;;  %2743 = vmatprep.subr.mxu1 %v6737_v4 }
 0x803   : > { %2673 = vmatpush1.msra.mxu0 %v6738_v16  ;;  %2706 = vmatprep.mubr.f32.mxu0 %v6739_v15 }
 0x804   : > { %2744 = vmatpush1.msra.mxu1 %v6740_v14  ;;  %2777 = vmatprep.mubr.f32.mxu1 %v6739_v15  ;;  %v4451_v14 = vld [vmem:[%s4935_s30 + $0x118] sm:$0xff] }
 0x805   : > { %2877 = vmatprep.subr.mxu0 %v6741_v9  ;;  %2948 = vmatprep.subr.mxu1 %v6742_v12 }
 0x8a4   : > { %v2473_v6 = vpop.f32.mrf.mxu0  ;;  %v2544_v16 = vpop.f32.mrf.mxu1 }
 0x8a5   : > { %v2549_v3 = vadd.f32 %v4448_v10, %v2473_v6  ;;  %v2551_v61 = vadd.f32 %v4450_v8, %v2544_v16  ;;  %v6749_v16 = vld [vmem:[#allocation19_spill] sm:$0xff] }
 0x8a6   : > { %v2475_v2 = vpop.f32.mrf.mxu0  ;;  %v2546_v15 = vpop.f32.mrf.mxu1 }
 0x8a7   : > { %v2553_v0 = vmul.f32 0.5, %v2549_v3  ;;  %v2550_v4 = vadd.f32 %v4449_v11, %v2475_v2  ;;  %v2552_v7 = vadd.f32 %v4451_v14, %v2546_v15  ;;  %v6750_v15 = vld [vmem:[#allocation21_spill] sm:$0xff]  ;;  %v6751_v14 = vld [vmem:[#allocation18_spill] sm:$0xff] }
 0x8a9   : > { %4614 = vtanh.f32 %v2553_v0  ;;  %v2557_v13 = vmul.f32 0.5, %v2550_v4  ;;  %v2562_v9 = vmul.f32 0.5, %v2552_v7 }
 0x8ab   : > { %4616 = vtanh.f32 %v2557_v13 }
 0x8ac   : > { %4618 = vtanh.f32 %v2551_v61 }
 0x8ad   : > { %4620 = vtanh.f32 %v2562_v9  ;;  %v6747_v9 = vld [vmem:[#allocation22_spill] sm:$0xff] }
 0x8b6   : > { %v4615_v63 = vpop.eup %4614 }
 0x8b7   : > { %v2555_v12 = vmul.f32 0.5, %v4615_v63  ;;  %v6746_v63 = vld [vmem:[#allocation25_spill] sm:$0xff] }
 0x8b8   : > { %v4617_v5 = vpop.eup %4616 }
 0x8b9   : > { %v2556_v1 = vadd.f32 0.5, %v2555_v12  ;;  %v2559_v10 = vmul.f32 0.5, %v4617_v5  ;;  %v4619_v11 = vpop.eup %4618  ;;  %v6745_v5 = vld [vmem:[#allocation23_spill] sm:$0xff]  ;;  %v6748_v12 = vld [vmem:[#allocation24_spill] sm:$0xff] }
 0x8ba   : > { %v4621_v13 = vpop.eup %4620 }
 0x8bb   : > { %v2560_v3 = vadd.f32 0.5, %v2559_v10  ;;  %v2567_v0 = vmul.f32 %v4619_v11, %v2556_v1  ;;  %v2564_v61 = vmul.f32 0.5, %v4621_v13  ;;  %v6744_v1 = vld [vmem:[#allocation27_spill] sm:$0xff]  ;;  %v6752_v10 = vld [vmem:[#allocation20_spill] sm:$0xff]  ;;  %v6754_v11 = vld [vmem:[#allocation17_spill] sm:$0xff] }
 0x8bc   : > { %v6757_v13 = vld [vmem:[#allocation11_spill] sm:$0xff] }
 0x8bd   : > { %v2566_v6 = vmul.f32 %v2560_v3, %v5924_v18  ;;  %v2565_v8 = vadd.f32 0.5, %v2564_v61  ;;  %v6743_v18 = vld [vmem:[#allocation26_spill] sm:$0xff]  ;;  %v6753_v3 = vld [vmem:[#allocation15_spill] sm:$0xff]  ;;  %v6758_v61 = vld [vmem:[#allocation13_spill] sm:$0xff] }
 0x8bf   : > { %v5999_v2 = vadd.f32 %v2567_v0, %v2566_v6  ;;  %v6755_v6 = vld [vmem:[#allocation14_spill] sm:$0xff]  ;;  %v6756_v0 = vld [vmem:[#allocation16_spill] sm:$0xff] }
 0x8c1   : > { %4622 = vtanh.f32 %v5999_v2 }
 0x8ce   : > { %v4623_v7 = vpop.eup %4622 }
 0x8cf   : > { %v2570_v4 = vmul.f32 %v4623_v7, %v2565_v8  ;;  %v6759_v8 = vld [vmem:[#allocation10_spill] sm:$0xff]  ;;  %v6760_v7 = vmov 0.0  }
 0x8d1   : > { %4452 = vst [vmem:[%s4937_s3 + $0x40] sm:$0xff] %v2570_v4  ;;  %2707 = vmatmul.mubr.f32.vlgmr.msra.gmra.mxu0 %v2570_v4  ;;  %2778 = vmatmul.mubr.f32.vlgmr.msra.gmra.mxu1 %v2570_v4  ;;  %v6761_v4 = vld [vmem:[#allocation12_spill] sm:$0xff] }
 0x8d2   : > { %2878 = vmatpush1.msra.mxu0 %v5242_v60  ;;  %2949 = vmatpush1.msra.mxu1 %v5252_v62 }
 0x8d3   : > { %2879 = vmatprep.subr.mxu0 %v5227_v57  ;;  %2950 = vmatprep.subr.mxu1 %v5237_v59 }
 0x8d4   : > { %2880 = vmatpush1.msra.mxu0 %v5222_v56  ;;  %2951 = vmatpush1.msra.mxu1 %v5232_v58 }
 0x8d5   : > { %2881 = vmatprep.subr.mxu0 %v5207_v53  ;;  %2952 = vmatprep.subr.mxu1 %v5217_v55 }
 0x8d6   : > { %2882 = vmatpush1.msra.mxu0 %v5202_v52  ;;  %2953 = vmatpush1.msra.mxu1 %v5212_v54 }
 0x8d7   : > { %2883 = vmatprep.subr.mxu0 %v5187_v49  ;;  %2954 = vmatprep.subr.mxu1 %v5197_v51 }
 0x8d8   : > { %2884 = vmatpush1.msra.mxu0 %v5182_v48  ;;  %2955 = vmatpush1.msra.mxu1 %v5192_v50 }
 0x8d9   : > { %2885 = vmatprep.subr.mxu0 %v5167_v45  ;;  %2956 = vmatprep.subr.mxu1 %v5177_v47 }
 0x8da   : > { %2886 = vmatpush1.msra.mxu0 %v5162_v44  ;;  %2957 = vmatpush1.msra.mxu1 %v5172_v46 }
 0x8db   : > { %2887 = vmatprep.subr.mxu0 %v5147_v41  ;;  %2958 = vmatprep.subr.mxu1 %v5157_v43 }
 0x8dc   : > { %2888 = vmatpush1.msra.mxu0 %v5142_v40  ;;  %2959 = vmatpush1.msra.mxu1 %v5152_v42 }
 0x8dd   : > { %2889 = vmatprep.subr.mxu0 %v5127_v37  ;;  %2960 = vmatprep.subr.mxu1 %v5137_v39 }
 0x8de   : > { %2890 = vmatpush1.msra.mxu0 %v5122_v36  ;;  %2961 = vmatpush1.msra.mxu1 %v5132_v38 }
 0x8df   : > { %2891 = vmatprep.subr.mxu0 %v5107_v33  ;;  %2962 = vmatprep.subr.mxu1 %v5117_v35 }
 0x8e0   : > { %2892 = vmatpush1.msra.mxu0 %v5102_v32  ;;  %2963 = vmatpush1.msra.mxu1 %v5112_v34 }
 0x8e1   : > { %2893 = vmatprep.subr.mxu0 %v5087_v29  ;;  %2964 = vmatprep.subr.mxu1 %v5097_v31 }
 0x8e2   : > { %2894 = vmatpush1.msra.mxu0 %v5082_v28  ;;  %2965 = vmatpush1.msra.mxu1 %v5092_v30 }
 0x8e3   : > { %2895 = vmatprep.subr.mxu0 %v5067_v25  ;;  %2966 = vmatprep.subr.mxu1 %v5077_v27 }
 0x8e4   : > { %2896 = vmatpush1.msra.mxu0 %v5062_v24  ;;  %2967 = vmatpush1.msra.mxu1 %v5072_v26 }
 0x8e5   : > { %2897 = vmatprep.subr.mxu0 %v6573_v21  ;;  %2968 = vmatprep.subr.mxu1 %v5057_v23 }
 0x8e6   : > { %2898 = vmatpush1.msra.mxu0 %v5042_v20  ;;  %2969 = vmatpush1.msra.mxu1 %v5052_v22 }
 0x8e7   : > { %2899 = vmatprep.subr.mxu0 %v5027_v17  ;;  %2970 = vmatprep.subr.mxu1 %v5037_v19 }
 0x8e8   : > { %2900 = vmatpush1.msra.mxu0 %v6743_v18  ;;  %2971 = vmatpush1.msra.mxu1 %v6744_v1 }
 0x8e9   : > { %2901 = vmatprep.subr.mxu0 %v6745_v5  ;;  %2972 = vmatprep.subr.mxu1 %v6746_v63 }
 0x8ea   : > { %2902 = vmatpush1.msra.mxu0 %v6747_v9  ;;  %2973 = vmatpush1.msra.mxu1 %v6748_v12 }
 0x8eb   : > { %2903 = vmatprep.subr.mxu0 %v6749_v16  ;;  %2974 = vmatprep.subr.mxu1 %v6750_v15  ;;  %v4455_v16 = vld [vmem:[%s4935_s30 + $0x130] sm:$0xff] }
 0x8ec   : > { %2904 = vmatpush1.msra.mxu0 %v6751_v14  ;;  %2975 = vmatpush1.msra.mxu1 %v6752_v10  ;;  %v4454_v10 = vld [vmem:[%s4935_s30 + $0x128] sm:$0xff] }
 0x8ed   : > { %2905 = vmatprep.subr.mxu0 %v6753_v3  ;;  %2976 = vmatprep.subr.mxu1 %v6754_v11  ;;  %v6762_v3 = vld [vmem:[#allocation29_spill] sm:$0xff]  ;;  %v6763_v11 = vld [vmem:[#allocation30_spill] sm:$0xff] }
 0x8ee   : > { %2906 = vmatpush1.msra.mxu0 %v6755_v6  ;;  %2977 = vmatpush1.msra.mxu1 %v6756_v0  ;;  %v4453_v6 = vld [vmem:[%s4935_s30 + $0x120] sm:$0xff] }
 0x8ef   : > { %2907 = vmatprep.subr.mxu0 %v6757_v13  ;;  %2978 = vmatprep.subr.mxu1 %v6758_v61 }
 0x8f0   : > { %2908 = vmatpush1.msra.mxu0 %v6759_v8  ;;  %2941 = vmatprep.mubr.f32.mxu0 %v6760_v7 }
 0x8f1   : > { %2979 = vmatpush1.msra.mxu1 %v6761_v4  ;;  %3012 = vmatprep.mubr.f32.mxu1 %v6760_v7  ;;  %v4456_v4 = vld [vmem:[%s4935_s30 + $0x138] sm:$0xff] }
 0x8f2   : > { %3112 = vmatprep.subr.mxu0 %v6762_v3  ;;  %3183 = vmatprep.subr.mxu1 %v6763_v11 }
 0x991   : > { %v2708_v0 = vpop.f32.mrf.mxu0  ;;  %v2779_v8 = vpop.f32.mrf.mxu1 }
 0x992   : > { %v2784_v14 = vadd.f32 %v4453_v6, %v2708_v0  ;;  %v2786_v9 = vadd.f32 %v4455_v16, %v2779_v8  ;;  %v6770_v8 = vld [vmem:[#allocation19_spill] sm:$0xff] }
 0x993   : > { %v2710_v13 = vpop.f32.mrf.mxu0  ;;  %v2781_v7 = vpop.f32.mrf.mxu1 }
 0x994   : > { %v2788_v15 = vmul.f32 0.5, %v2784_v14  ;;  %v2785_v61 = vadd.f32 %v4454_v10, %v2710_v13  ;;  %v2787_v63 = vadd.f32 %v4456_v4, %v2781_v7  ;;  %v6771_v7 = vld [vmem:[#allocation21_spill] sm:$0xff]  ;;  %v6772_v4 = vld [vmem:[#allocation18_spill] sm:$0xff] }
 0x996   : > { %4624 = vtanh.f32 %v2788_v15  ;;  %v2792_v12 = vmul.f32 0.5, %v2785_v61  ;;  %v2797_v3 = vmul.f32 0.5, %v2787_v63 }
 0x998   : > { %4626 = vtanh.f32 %v2792_v12 }
 0x999   : > { %4628 = vtanh.f32 %v2786_v9 }
 0x99a   : > { %4630 = vtanh.f32 %v2797_v3  ;;  %v6768_v3 = vld [vmem:[#allocation22_spill] sm:$0xff] }
 0x9a3   : > { %v4625_v5 = vpop.eup %4624 }
 0x9a4   : > { %v2790_v11 = vmul.f32 0.5, %v4625_v5  ;;  %v6767_v5 = vld [vmem:[#allocation25_spill] sm:$0xff] }
 0x9a5   : > { %v4627_v1 = vpop.eup %4626 }
 0x9a6   : > { %v2791_v18 = vadd.f32 0.5, %v2790_v11  ;;  %v2794_v6 = vmul.f32 0.5, %v4627_v1  ;;  %v4629_v10 = vpop.eup %4628  ;;  %v6766_v1 = vld [vmem:[#allocation23_spill] sm:$0xff]  ;;  %v6769_v11 = vld [vmem:[#allocation24_spill] sm:$0xff] }
 0x9a7   : > { %v4631_v12 = vpop.eup %4630 }
 0x9a8   : > { %v2795_v14 = vadd.f32 0.5, %v2794_v6  ;;  %v2802_v15 = vmul.f32 %v4629_v10, %v2791_v18  ;;  %v2799_v9 = vmul.f32 0.5, %v4631_v12  ;;  %v6765_v18 = vld [vmem:[#allocation27_spill] sm:$0xff]  ;;  %v6773_v6 = vld [vmem:[#allocation20_spill] sm:$0xff]  ;;  %v6775_v10 = vld [vmem:[#allocation17_spill] sm:$0xff] }
 0x9a9   : > { %v6778_v12 = vld [vmem:[#allocation11_spill] sm:$0xff] }
 0x9aa   : > { %v2801_v0 = vmul.f32 %v2795_v14, %v5999_v2  ;;  %v2800_v16 = vadd.f32 0.5, %v2799_v9  ;;  %v6764_v2 = vld [vmem:[#allocation26_spill] sm:$0xff]  ;;  %v6774_v14 = vld [vmem:[#allocation15_spill] sm:$0xff]  ;;  %v6779_v9 = vld [vmem:[#allocation13_spill] sm:$0xff] }
 0x9ac   : > { %v6074_v13 = vadd.f32 %v2802_v15, %v2801_v0  ;;  %v6776_v0 = vld [vmem:[#allocation14_spill] sm:$0xff]  ;;  %v6777_v15 = vld [vmem:[#allocation16_spill] sm:$0xff] }
 0x9ae   : > { %4632 = vtanh.f32 %v6074_v13 }
 0x9bb   : > { %v4633_v63 = vpop.eup %4632 }
 0x9bc   : > { %v2805_v61 = vmul.f32 %v4633_v63, %v2800_v16  ;;  %v6780_v16 = vld [vmem:[#allocation10_spill] sm:$0xff]  ;;  %v6781_v63 = vmov 0.0  }
 0x9be   : > { %4457 = vst [vmem:[%s4937_s3 + $0x48] sm:$0xff] %v2805_v61  ;;  %2942 = vmatmul.mubr.f32.vlgmr.msra.gmra.mxu0 %v2805_v61  ;;  %3013 = vmatmul.mubr.f32.vlgmr.msra.gmra.mxu1 %v2805_v61  ;;  %v6782_v61 = vld [vmem:[#allocation12_spill] sm:$0xff] }
 0x9bf   : > { %3113 = vmatpush1.msra.mxu0 %v5242_v60  ;;  %3184 = vmatpush1.msra.mxu1 %v5252_v62 }
 0x9c0   : > { %3114 = vmatprep.subr.mxu0 %v5227_v57  ;;  %3185 = vmatprep.subr.mxu1 %v5237_v59 }
 0x9c1   : > { %3115 = vmatpush1.msra.mxu0 %v5222_v56  ;;  %3186 = vmatpush1.msra.mxu1 %v5232_v58 }
 0x9c2   : > { %3116 = vmatprep.subr.mxu0 %v5207_v53  ;;  %3187 = vmatprep.subr.mxu1 %v5217_v55 }
 0x9c3   : > { %3117 = vmatpush1.msra.mxu0 %v5202_v52  ;;  %3188 = vmatpush1.msra.mxu1 %v5212_v54 }
 0x9c4   : > { %3118 = vmatprep.subr.mxu0 %v5187_v49  ;;  %3189 = vmatprep.subr.mxu1 %v5197_v51 }
 0x9c5   : > { %3119 = vmatpush1.msra.mxu0 %v5182_v48  ;;  %3190 = vmatpush1.msra.mxu1 %v5192_v50 }
 0x9c6   : > { %3120 = vmatprep.subr.mxu0 %v5167_v45  ;;  %3191 = vmatprep.subr.mxu1 %v5177_v47 }
 0x9c7   : > { %3121 = vmatpush1.msra.mxu0 %v5162_v44  ;;  %3192 = vmatpush1.msra.mxu1 %v5172_v46 }
 0x9c8   : > { %3122 = vmatprep.subr.mxu0 %v5147_v41  ;;  %3193 = vmatprep.subr.mxu1 %v5157_v43 }
 0x9c9   : > { %3123 = vmatpush1.msra.mxu0 %v5142_v40  ;;  %3194 = vmatpush1.msra.mxu1 %v5152_v42 }
 0x9ca   : > { %3124 = vmatprep.subr.mxu0 %v5127_v37  ;;  %3195 = vmatprep.subr.mxu1 %v5137_v39 }
 0x9cb   : > { %3125 = vmatpush1.msra.mxu0 %v5122_v36  ;;  %3196 = vmatpush1.msra.mxu1 %v5132_v38 }
 0x9cc   : > { %3126 = vmatprep.subr.mxu0 %v5107_v33  ;;  %3197 = vmatprep.subr.mxu1 %v5117_v35 }
 0x9cd   : > { %3127 = vmatpush1.msra.mxu0 %v5102_v32  ;;  %3198 = vmatpush1.msra.mxu1 %v5112_v34 }
 0x9ce   : > { %3128 = vmatprep.subr.mxu0 %v5087_v29  ;;  %3199 = vmatprep.subr.mxu1 %v5097_v31 }
 0x9cf   : > { %3129 = vmatpush1.msra.mxu0 %v5082_v28  ;;  %3200 = vmatpush1.msra.mxu1 %v5092_v30 }
 0x9d0   : > { %3130 = vmatprep.subr.mxu0 %v5067_v25  ;;  %3201 = vmatprep.subr.mxu1 %v5077_v27 }
 0x9d1   : > { %3131 = vmatpush1.msra.mxu0 %v5062_v24  ;;  %3202 = vmatpush1.msra.mxu1 %v5072_v26 }
 0x9d2   : > { %3132 = vmatprep.subr.mxu0 %v6573_v21  ;;  %3203 = vmatprep.subr.mxu1 %v5057_v23 }
 0x9d3   : > { %3133 = vmatpush1.msra.mxu0 %v5042_v20  ;;  %3204 = vmatpush1.msra.mxu1 %v5052_v22 }
 0x9d4   : > { %3134 = vmatprep.subr.mxu0 %v5027_v17  ;;  %3205 = vmatprep.subr.mxu1 %v5037_v19 }
 0x9d5   : > { %3135 = vmatpush1.msra.mxu0 %v6764_v2  ;;  %3206 = vmatpush1.msra.mxu1 %v6765_v18 }
 0x9d6   : > { %3136 = vmatprep.subr.mxu0 %v6766_v1  ;;  %3207 = vmatprep.subr.mxu1 %v6767_v5 }
 0x9d7   : > { %3137 = vmatpush1.msra.mxu0 %v6768_v3  ;;  %3208 = vmatpush1.msra.mxu1 %v6769_v11 }
 0x9d8   : > { %3138 = vmatprep.subr.mxu0 %v6770_v8  ;;  %3209 = vmatprep.subr.mxu1 %v6771_v7  ;;  %v4460_v8 = vld [vmem:[%s4935_s30 + $0x150] sm:$0xff] }
 0x9d9   : > { %3139 = vmatpush1.msra.mxu0 %v6772_v4  ;;  %3210 = vmatpush1.msra.mxu1 %v6773_v6  ;;  %v4459_v6 = vld [vmem:[%s4935_s30 + $0x148] sm:$0xff] }
 0x9da   : > { %3140 = vmatprep.subr.mxu0 %v6774_v14  ;;  %3211 = vmatprep.subr.mxu1 %v6775_v10  ;;  %v6783_v14 = vld [vmem:[#allocation29_spill] sm:$0xff]  ;;  %v6784_v10 = vld [vmem:[#allocation30_spill] sm:$0xff] }
 0x9db   : > { %3141 = vmatpush1.msra.mxu0 %v6776_v0  ;;  %3212 = vmatpush1.msra.mxu1 %v6777_v15  ;;  %v4458_v0 = vld [vmem:[%s4935_s30 + $0x140] sm:$0xff] }
 0x9dc   : > { %3142 = vmatprep.subr.mxu0 %v6778_v12  ;;  %3213 = vmatprep.subr.mxu1 %v6779_v9 }
 0x9dd   : > { %3143 = vmatpush1.msra.mxu0 %v6780_v16  ;;  %3176 = vmatprep.mubr.f32.mxu0 %v6781_v63 }
 0x9de   : > { %3214 = vmatpush1.msra.mxu1 %v6782_v61  ;;  %3247 = vmatprep.mubr.f32.mxu1 %v6781_v63  ;;  %v4461_v61 = vld [vmem:[%s4935_s30 + $0x158] sm:$0xff] }
 0x9df   : > { %3347 = vmatprep.subr.mxu0 %v6783_v14  ;;  %3418 = vmatprep.subr.mxu1 %v6784_v10 }
 0xa7e   : > { %v2943_v15 = vpop.f32.mrf.mxu0  ;;  %v3014_v16 = vpop.f32.mrf.mxu1 }
 0xa7f   : > { %v3019_v4 = vadd.f32 %v4458_v0, %v2943_v15  ;;  %v3021_v3 = vadd.f32 %v4460_v8, %v3014_v16  ;;  %v6791_v16 = vld [vmem:[#allocation19_spill] sm:$0xff] }
 0xa80   : > { %v2945_v12 = vpop.f32.mrf.mxu0  ;;  %v3016_v63 = vpop.f32.mrf.mxu1 }
 0xa81   : > { %v3023_v7 = vmul.f32 0.5, %v3019_v4  ;;  %v3020_v9 = vadd.f32 %v4459_v6, %v2945_v12  ;;  %v3022_v5 = vadd.f32 %v4461_v61, %v3016_v63  ;;  %v6792_v63 = vld [vmem:[#allocation21_spill] sm:$0xff]  ;;  %v6793_v61 = vld [vmem:[#allocation18_spill] sm:$0xff] }
 0xa83   : > { %4634 = vtanh.f32 %v3023_v7  ;;  %v3027_v11 = vmul.f32 0.5, %v3020_v9  ;;  %v3032_v14 = vmul.f32 0.5, %v3022_v5 }
 0xa85   : > { %4636 = vtanh.f32 %v3027_v11 }
 0xa86   : > { %4638 = vtanh.f32 %v3021_v3 }
 0xa87   : > { %4640 = vtanh.f32 %v3032_v14  ;;  %v6789_v14 = vld [vmem:[#allocation22_spill] sm:$0xff] }
 0xa90   : > { %v4635_v1 = vpop.eup %4634 }
 0xa91   : > { %v3025_v10 = vmul.f32 0.5, %v4635_v1  ;;  %v6788_v1 = vld [vmem:[#allocation25_spill] sm:$0xff] }
 0xa92   : > { %v4637_v18 = vpop.eup %4636 }
 0xa93   : > { %v3026_v2 = vadd.f32 0.5, %v3025_v10  ;;  %v3029_v0 = vmul.f32 0.5, %v4637_v18  ;;  %v4639_v6 = vpop.eup %4638  ;;  %v6787_v18 = vld [vmem:[#allocation23_spill] sm:$0xff]  ;;  %v6790_v10 = vld [vmem:[#allocation24_spill] sm:$0xff] }
 0xa94   : > { %v4641_v11 = vpop.eup %4640 }
 0xa95   : > { %v3030_v4 = vadd.f32 0.5, %v3029_v0  ;;  %v3037_v7 = vmul.f32 %v4639_v6, %v3026_v2  ;;  %v3034_v3 = vmul.f32 0.5, %v4641_v11  ;;  %v6786_v2 = vld [vmem:[#allocation27_spill] sm:$0xff]  ;;  %v6794_v0 = vld [vmem:[#allocation20_spill] sm:$0xff]  ;;  %v6796_v6 = vld [vmem:[#allocation17_spill] sm:$0xff] }
 0xa96   : > { %v6799_v11 = vld [vmem:[#allocation11_spill] sm:$0xff] }
 0xa97   : > { %v3036_v15 = vmul.f32 %v3030_v4, %v6074_v13  ;;  %v3035_v8 = vadd.f32 0.5, %v3034_v3  ;;  %v6785_v13 = vld [vmem:[#allocation26_spill] sm:$0xff]  ;;  %v6795_v4 = vld [vmem:[#allocation15_spill] sm:$0xff]  ;;  %v6800_v3 = vld [vmem:[#allocation13_spill] sm:$0xff] }
 0xa99   : > { %v6149_v12 = vadd.f32 %v3037_v7, %v3036_v15  ;;  %v6797_v15 = vld [vmem:[#allocation14_spill] sm:$0xff]  ;;  %v6798_v7 = vld [vmem:[#allocation16_spill] sm:$0xff] }
 0xa9b   : > { %4642 = vtanh.f32 %v6149_v12 }
 0xaa8   : > { %v4643_v5 = vpop.eup %4642 }
 0xaa9   : > { %v3040_v9 = vmul.f32 %v4643_v5, %v3035_v8  ;;  %v6801_v8 = vld [vmem:[#allocation10_spill] sm:$0xff]  ;;  %v6802_v5 = vmov 0.0  }
 0xaab   : > { %4462 = vst [vmem:[%s4937_s3 + $0x50] sm:$0xff] %v3040_v9  ;;  %3177 = vmatmul.mubr.f32.vlgmr.msra.gmra.mxu0 %v3040_v9  ;;  %3248 = vmatmul.mubr.f32.vlgmr.msra.gmra.mxu1 %v3040_v9  ;;  %v6803_v9 = vld [vmem:[#allocation12_spill] sm:$0xff] }
 0xaac   : > { %3348 = vmatpush1.msra.mxu0 %v5242_v60  ;;  %3419 = vmatpush1.msra.mxu1 %v5252_v62 }
 0xaad   : > { %3349 = vmatprep.subr.mxu0 %v5227_v57  ;;  %3420 = vmatprep.subr.mxu1 %v5237_v59 }
 0xaae   : > { %3350 = vmatpush1.msra.mxu0 %v5222_v56  ;;  %3421 = vmatpush1.msra.mxu1 %v5232_v58 }
 0xaaf   : > { %3351 = vmatprep.subr.mxu0 %v5207_v53  ;;  %3422 = vmatprep.subr.mxu1 %v5217_v55 }
 0xab0   : > { %3352 = vmatpush1.msra.mxu0 %v5202_v52  ;;  %3423 = vmatpush1.msra.mxu1 %v5212_v54 }
 0xab1   : > { %3353 = vmatprep.subr.mxu0 %v5187_v49  ;;  %3424 = vmatprep.subr.mxu1 %v5197_v51 }
 0xab2   : > { %3354 = vmatpush1.msra.mxu0 %v5182_v48  ;;  %3425 = vmatpush1.msra.mxu1 %v5192_v50 }
 0xab3   : > { %3355 = vmatprep.subr.mxu0 %v5167_v45  ;;  %3426 = vmatprep.subr.mxu1 %v5177_v47 }
 0xab4   : > { %3356 = vmatpush1.msra.mxu0 %v5162_v44  ;;  %3427 = vmatpush1.msra.mxu1 %v5172_v46 }
 0xab5   : > { %3357 = vmatprep.subr.mxu0 %v5147_v41  ;;  %3428 = vmatprep.subr.mxu1 %v5157_v43 }
 0xab6   : > { %3358 = vmatpush1.msra.mxu0 %v5142_v40  ;;  %3429 = vmatpush1.msra.mxu1 %v5152_v42 }
 0xab7   : > { %3359 = vmatprep.subr.mxu0 %v5127_v37  ;;  %3430 = vmatprep.subr.mxu1 %v5137_v39 }
 0xab8   : > { %3360 = vmatpush1.msra.mxu0 %v5122_v36  ;;  %3431 = vmatpush1.msra.mxu1 %v5132_v38 }
 0xab9   : > { %3361 = vmatprep.subr.mxu0 %v5107_v33  ;;  %3432 = vmatprep.subr.mxu1 %v5117_v35 }
 0xaba   : > { %3362 = vmatpush1.msra.mxu0 %v5102_v32  ;;  %3433 = vmatpush1.msra.mxu1 %v5112_v34 }
 0xabb   : > { %3363 = vmatprep.subr.mxu0 %v5087_v29  ;;  %3434 = vmatprep.subr.mxu1 %v5097_v31 }
 0xabc   : > { %3364 = vmatpush1.msra.mxu0 %v5082_v28  ;;  %3435 = vmatpush1.msra.mxu1 %v5092_v30 }
 0xabd   : > { %3365 = vmatprep.subr.mxu0 %v5067_v25  ;;  %3436 = vmatprep.subr.mxu1 %v5077_v27 }
 0xabe   : > { %3366 = vmatpush1.msra.mxu0 %v5062_v24  ;;  %3437 = vmatpush1.msra.mxu1 %v5072_v26 }
 0xabf   : > { %3367 = vmatprep.subr.mxu0 %v6573_v21  ;;  %3438 = vmatprep.subr.mxu1 %v5057_v23 }
 0xac0   : > { %3368 = vmatpush1.msra.mxu0 %v5042_v20  ;;  %3439 = vmatpush1.msra.mxu1 %v5052_v22 }
 0xac1   : > { %3369 = vmatprep.subr.mxu0 %v5027_v17  ;;  %3440 = vmatprep.subr.mxu1 %v5037_v19 }
 0xac2   : > { %3370 = vmatpush1.msra.mxu0 %v6785_v13  ;;  %3441 = vmatpush1.msra.mxu1 %v6786_v2 }
 0xac3   : > { %3371 = vmatprep.subr.mxu0 %v6787_v18  ;;  %3442 = vmatprep.subr.mxu1 %v6788_v1 }
 0xac4   : > { %3372 = vmatpush1.msra.mxu0 %v6789_v14  ;;  %3443 = vmatpush1.msra.mxu1 %v6790_v10 }
 0xac5   : > { %3373 = vmatprep.subr.mxu0 %v6791_v16  ;;  %3444 = vmatprep.subr.mxu1 %v6792_v63  ;;  %v4465_v16 = vld [vmem:[%s4935_s30 + $0x170] sm:$0xff] }
 0xac6   : > { %3374 = vmatpush1.msra.mxu0 %v6793_v61  ;;  %3445 = vmatpush1.msra.mxu1 %v6794_v0  ;;  %v4464_v0 = vld [vmem:[%s4935_s30 + $0x168] sm:$0xff] }
 0xac7   : > { %3375 = vmatprep.subr.mxu0 %v6795_v4  ;;  %3446 = vmatprep.subr.mxu1 %v6796_v6  ;;  %v6804_v4 = vld [vmem:[#allocation29_spill] sm:$0xff]  ;;  %v6805_v6 = vld [vmem:[#allocation30_spill] sm:$0xff] }
 0xac8   : > { %3376 = vmatpush1.msra.mxu0 %v6797_v15  ;;  %3447 = vmatpush1.msra.mxu1 %v6798_v7  ;;  %v4463_v15 = vld [vmem:[%s4935_s30 + $0x160] sm:$0xff] }
 0xac9   : > { %3377 = vmatprep.subr.mxu0 %v6799_v11  ;;  %3448 = vmatprep.subr.mxu1 %v6800_v3 }
 0xaca   : > { %3378 = vmatpush1.msra.mxu0 %v6801_v8  ;;  %3411 = vmatprep.mubr.f32.mxu0 %v6802_v5 }
 0xacb   : > { %3449 = vmatpush1.msra.mxu1 %v6803_v9  ;;  %3482 = vmatprep.mubr.f32.mxu1 %v6802_v5  ;;  %v4466_v9 = vld [vmem:[%s4935_s30 + $0x178] sm:$0xff] }
 0xacc   : > { %3582 = vmatprep.subr.mxu0 %v6804_v4  ;;  %3653 = vmatprep.subr.mxu1 %v6805_v6 }
 0xb6b   : > { %v3178_v7 = vpop.f32.mrf.mxu0  ;;  %v3249_v8 = vpop.f32.mrf.mxu1 }
 0xb6c   : > { %v3254_v61 = vadd.f32 %v4463_v15, %v3178_v7  ;;  %v3256_v14 = vadd.f32 %v4465_v16, %v3249_v8  ;;  %v6812_v8 = vld [vmem:[#allocation19_spill] sm:$0xff] }
 0xb6d   : > { %v3180_v11 = vpop.f32.mrf.mxu0  ;;  %v3251_v5 = vpop.f32.mrf.mxu1 }
 0xb6e   : > { %v3258_v63 = vmul.f32 0.5, %v3254_v61  ;;  %v3255_v3 = vadd.f32 %v4464_v0, %v3180_v11  ;;  %v3257_v1 = vadd.f32 %v4466_v9, %v3251_v5  ;;  %v6813_v5 = vld [vmem:[#allocation21_spill] sm:$0xff]  ;;  %v6814_v9 = vld [vmem:[#allocation18_spill] sm:$0xff] }
 0xb70   : > { %4644 = vtanh.f32 %v3258_v63  ;;  %v3262_v10 = vmul.f32 0.5, %v3255_v3  ;;  %v3267_v4 = vmul.f32 0.5, %v3257_v1 }
 0xb72   : > { %4646 = vtanh.f32 %v3262_v10 }
 0xb73   : > { %4648 = vtanh.f32 %v3256_v14 }
 0xb74   : > { %4650 = vtanh.f32 %v3267_v4  ;;  %v6810_v4 = vld [vmem:[#allocation22_spill] sm:$0xff] }
 0xb7d   : > { %v4645_v18 = vpop.eup %4644 }
 0xb7e   : > { %v3260_v6 = vmul.f32 0.5, %v4645_v18  ;;  %v6809_v18 = vld [vmem:[#allocation25_spill] sm:$0xff] }
 0xb7f   : > { %v4647_v2 = vpop.eup %4646 }
 0xb80   : > { %v3261_v13 = vadd.f32 0.5, %v3260_v6  ;;  %v3264_v15 = vmul.f32 0.5, %v4647_v2  ;;  %v4649_v0 = vpop.eup %4648  ;;  %v6808_v2 = vld [vmem:[#allocation23_spill] sm:$0xff]  ;;  %v6811_v6 = vld [vmem:[#allocation24_spill] sm:$0xff] }
 0xb81   : > { %v4651_v10 = vpop.eup %4650 }
 0xb82   : > { %v3265_v61 = vadd.f32 0.5, %v3264_v15  ;;  %v3272_v63 = vmul.f32 %v4649_v0, %v3261_v13  ;;  %v3269_v14 = vmul.f32 0.5, %v4651_v10  ;;  %v6807_v13 = vld [vmem:[#allocation27_spill] sm:$0xff]  ;;  %v6815_v15 = vld [vmem:[#allocation20_spill] sm:$0xff]  ;;  %v6817_v0 = vld [vmem:[#allocation17_spill] sm:$0xff] }
 0xb83   : > { %v6820_v10 = vld [vmem:[#allocation11_spill] sm:$0xff] }
 0xb84   : > { %v3271_v7 = vmul.f32 %v3265_v61, %v6149_v12  ;;  %v3270_v16 = vadd.f32 0.5, %v3269_v14  ;;  %v6806_v12 = vld [vmem:[#allocation26_spill] sm:$0xff]  ;;  %v6816_v61 = vld [vmem:[#allocation15_spill] sm:$0xff]  ;;  %v6821_v14 = vld [vmem:[#allocation13_spill] sm:$0xff] }
 0xb86   : > { %v6224_v11 = vadd.f32 %v3272_v63, %v3271_v7  ;;  %v6818_v7 = vld [vmem:[#allocation14_spill] sm:$0xff]  ;;  %v6819_v63 = vld [vmem:[#allocation16_spill] sm:$0xff] }
 0xb88   : > { %4652 = vtanh.f32 %v6224_v11 }
 0xb95   : > { %v4653_v1 = vpop.eup %4652 }
 0xb96   : > { %v3275_v3 = vmul.f32 %v4653_v1, %v3270_v16  ;;  %v6822_v16 = vld [vmem:[#allocation10_spill] sm:$0xff]  ;;  %v6823_v1 = vmov 0.0  }
 0xb98   : > { %4467 = vst [vmem:[%s4937_s3 + $0x58] sm:$0xff] %v3275_v3  ;;  %3412 = vmatmul.mubr.f32.vlgmr.msra.gmra.mxu0 %v3275_v3  ;;  %3483 = vmatmul.mubr.f32.vlgmr.msra.gmra.mxu1 %v3275_v3  ;;  %v6824_v3 = vld [vmem:[#allocation12_spill] sm:$0xff] }
 0xb99   : > { %3583 = vmatpush1.msra.mxu0 %v5242_v60  ;;  %3654 = vmatpush1.msra.mxu1 %v5252_v62 }
 0xb9a   : > { %3584 = vmatprep.subr.mxu0 %v5227_v57  ;;  %3655 = vmatprep.subr.mxu1 %v5237_v59 }
 0xb9b   : > { %3585 = vmatpush1.msra.mxu0 %v5222_v56  ;;  %3656 = vmatpush1.msra.mxu1 %v5232_v58 }
 0xb9c   : > { %3586 = vmatprep.subr.mxu0 %v5207_v53  ;;  %3657 = vmatprep.subr.mxu1 %v5217_v55 }
 0xb9d   : > { %3587 = vmatpush1.msra.mxu0 %v5202_v52  ;;  %3658 = vmatpush1.msra.mxu1 %v5212_v54 }
 0xb9e   : > { %3588 = vmatprep.subr.mxu0 %v5187_v49  ;;  %3659 = vmatprep.subr.mxu1 %v5197_v51 }
 0xb9f   : > { %3589 = vmatpush1.msra.mxu0 %v5182_v48  ;;  %3660 = vmatpush1.msra.mxu1 %v5192_v50 }
 0xba0   : > { %3590 = vmatprep.subr.mxu0 %v5167_v45  ;;  %3661 = vmatprep.subr.mxu1 %v5177_v47 }
 0xba1   : > { %3591 = vmatpush1.msra.mxu0 %v5162_v44  ;;  %3662 = vmatpush1.msra.mxu1 %v5172_v46 }
 0xba2   : > { %3592 = vmatprep.subr.mxu0 %v5147_v41  ;;  %3663 = vmatprep.subr.mxu1 %v5157_v43 }
 0xba3   : > { %3593 = vmatpush1.msra.mxu0 %v5142_v40  ;;  %3664 = vmatpush1.msra.mxu1 %v5152_v42 }
 0xba4   : > { %3594 = vmatprep.subr.mxu0 %v5127_v37  ;;  %3665 = vmatprep.subr.mxu1 %v5137_v39 }
 0xba5   : > { %3595 = vmatpush1.msra.mxu0 %v5122_v36  ;;  %3666 = vmatpush1.msra.mxu1 %v5132_v38 }
 0xba6   : > { %3596 = vmatprep.subr.mxu0 %v5107_v33  ;;  %3667 = vmatprep.subr.mxu1 %v5117_v35 }
 0xba7   : > { %3597 = vmatpush1.msra.mxu0 %v5102_v32  ;;  %3668 = vmatpush1.msra.mxu1 %v5112_v34 }
 0xba8   : > { %3598 = vmatprep.subr.mxu0 %v5087_v29  ;;  %3669 = vmatprep.subr.mxu1 %v5097_v31 }
 0xba9   : > { %3599 = vmatpush1.msra.mxu0 %v5082_v28  ;;  %3670 = vmatpush1.msra.mxu1 %v5092_v30 }
 0xbaa   : > { %3600 = vmatprep.subr.mxu0 %v5067_v25  ;;  %3671 = vmatprep.subr.mxu1 %v5077_v27 }
 0xbab   : > { %3601 = vmatpush1.msra.mxu0 %v5062_v24  ;;  %3672 = vmatpush1.msra.mxu1 %v5072_v26 }
 0xbac   : > { %3602 = vmatprep.subr.mxu0 %v6573_v21  ;;  %3673 = vmatprep.subr.mxu1 %v5057_v23 }
 0xbad   : > { %3603 = vmatpush1.msra.mxu0 %v5042_v20  ;;  %3674 = vmatpush1.msra.mxu1 %v5052_v22 }
 0xbae   : > { %3604 = vmatprep.subr.mxu0 %v5027_v17  ;;  %3675 = vmatprep.subr.mxu1 %v5037_v19 }
 0xbaf   : > { %3605 = vmatpush1.msra.mxu0 %v6806_v12  ;;  %3676 = vmatpush1.msra.mxu1 %v6807_v13 }
 0xbb0   : > { %3606 = vmatprep.subr.mxu0 %v6808_v2  ;;  %3677 = vmatprep.subr.mxu1 %v6809_v18 }
 0xbb1   : > { %3607 = vmatpush1.msra.mxu0 %v6810_v4  ;;  %3678 = vmatpush1.msra.mxu1 %v6811_v6 }
 0xbb2   : > { %3608 = vmatprep.subr.mxu0 %v6812_v8  ;;  %3679 = vmatprep.subr.mxu1 %v6813_v5  ;;  %v4470_v8 = vld [vmem:[%s4935_s30 + $0x190] sm:$0xff] }
 0xbb3   : > { %3609 = vmatpush1.msra.mxu0 %v6814_v9  ;;  %3680 = vmatpush1.msra.mxu1 %v6815_v15  ;;  %v4469_v15 = vld [vmem:[%s4935_s30 + $0x188] sm:$0xff] }
 0xbb4   : > { %3610 = vmatprep.subr.mxu0 %v6816_v61  ;;  %3681 = vmatprep.subr.mxu1 %v6817_v0  ;;  %v6825_v61 = vld [vmem:[#allocation29_spill] sm:$0xff]  ;;  %v6826_v0 = vld [vmem:[#allocation30_spill] sm:$0xff] }
 0xbb5   : > { %3611 = vmatpush1.msra.mxu0 %v6818_v7  ;;  %3682 = vmatpush1.msra.mxu1 %v6819_v63  ;;  %v4468_v7 = vld [vmem:[%s4935_s30 + $0x180] sm:$0xff] }
 0xbb6   : > { %3612 = vmatprep.subr.mxu0 %v6820_v10  ;;  %3683 = vmatprep.subr.mxu1 %v6821_v14 }
 0xbb7   : > { %3613 = vmatpush1.msra.mxu0 %v6822_v16  ;;  %3646 = vmatprep.mubr.f32.mxu0 %v6823_v1 }
 0xbb8   : > { %3684 = vmatpush1.msra.mxu1 %v6824_v3  ;;  %3717 = vmatprep.mubr.f32.mxu1 %v6823_v1  ;;  %v4471_v3 = vld [vmem:[%s4935_s30 + $0x198] sm:$0xff] }
 0xbb9   : > { %3817 = vmatprep.subr.mxu0 %v6825_v61  ;;  %3888 = vmatprep.subr.mxu1 %v6826_v0 }
 0xc58   : > { %v3413_v63 = vpop.f32.mrf.mxu0  ;;  %v3484_v16 = vpop.f32.mrf.mxu1 }
 0xc59   : > { %v3489_v9 = vadd.f32 %v4468_v7, %v3413_v63  ;;  %v3491_v4 = vadd.f32 %v4470_v8, %v3484_v16  ;;  %v6833_v16 = vld [vmem:[#allocation19_spill] sm:$0xff] }
 0xc5a   : > { %v3415_v10 = vpop.f32.mrf.mxu0  ;;  %v3486_v1 = vpop.f32.mrf.mxu1 }
 0xc5b   : > { %v3493_v5 = vmul.f32 0.5, %v3489_v9  ;;  %v3490_v14 = vadd.f32 %v4469_v15, %v3415_v10  ;;  %v3492_v18 = vadd.f32 %v4471_v3, %v3486_v1  ;;  %v6834_v1 = vld [vmem:[#allocation21_spill] sm:$0xff]  ;;  %v6835_v3 = vld [vmem:[#allocation18_spill] sm:$0xff] }
 0xc5d   : > { %4654 = vtanh.f32 %v3493_v5  ;;  %v3497_v6 = vmul.f32 0.5, %v3490_v14  ;;  %v3502_v61 = vmul.f32 0.5, %v3492_v18 }
 0xc5f   : > { %4656 = vtanh.f32 %v3497_v6 }
 0xc60   : > { %4658 = vtanh.f32 %v3491_v4 }
 0xc61   : > { %4660 = vtanh.f32 %v3502_v61  ;;  %v6831_v61 = vld [vmem:[#allocation22_spill] sm:$0xff] }
 0xc6a   : > { %v4655_v2 = vpop.eup %4654 }
 0xc6b   : > { %v3495_v0 = vmul.f32 0.5, %v4655_v2  ;;  %v6830_v2 = vld [vmem:[#allocation25_spill] sm:$0xff] }
 0xc6c   : > { %v4657_v13 = vpop.eup %4656 }
 0xc6d   : > { %v3496_v12 = vadd.f32 0.5, %v3495_v0  ;;  %v3499_v7 = vmul.f32 0.5, %v4657_v13  ;;  %v4659_v15 = vpop.eup %4658  ;;  %v6829_v13 = vld [vmem:[#allocation23_spill] sm:$0xff]  ;;  %v6832_v0 = vld [vmem:[#allocation24_spill] sm:$0xff] }
 0xc6e   : > { %v4661_v6 = vpop.eup %4660 }
 0xc6f   : > { %v3500_v9 = vadd.f32 0.5, %v3499_v7  ;;  %v3507_v5 = vmul.f32 %v4659_v15, %v3496_v12  ;;  %v3504_v4 = vmul.f32 0.5, %v4661_v6  ;;  %v6828_v12 = vld [vmem:[#allocation27_spill] sm:$0xff]  ;;  %v6836_v7 = vld [vmem:[#allocation20_spill] sm:$0xff]  ;;  %v6838_v15 = vld [vmem:[#allocation17_spill] sm:$0xff] }
 0xc70   : > { %v6841_v6 = vld [vmem:[#allocation11_spill] sm:$0xff] }
 0xc71   : > { %v3506_v63 = vmul.f32 %v3500_v9, %v6224_v11  ;;  %v3505_v8 = vadd.f32 0.5, %v3504_v4  ;;  %v6827_v11 = vld [vmem:[#allocation26_spill] sm:$0xff]  ;;  %v6837_v9 = vld [vmem:[#allocation15_spill] sm:$0xff]  ;;  %v6842_v4 = vld [vmem:[#allocation13_spill] sm:$0xff] }
 0xc73   : > { %v6299_v10 = vadd.f32 %v3507_v5, %v3506_v63  ;;  %v6839_v63 = vld [vmem:[#allocation14_spill] sm:$0xff]  ;;  %v6840_v5 = vld [vmem:[#allocation16_spill] sm:$0xff] }
 0xc75   : > { %4662 = vtanh.f32 %v6299_v10 }
 0xc82   : > { %v4663_v18 = vpop.eup %4662 }
 0xc83   : > { %v3510_v14 = vmul.f32 %v4663_v18, %v3505_v8  ;;  %v6843_v8 = vld [vmem:[#allocation10_spill] sm:$0xff]  ;;  %v6844_v18 = vmov 0.0  }
 0xc85   : > { %4472 = vst [vmem:[%s4937_s3 + $0x60] sm:$0xff] %v3510_v14  ;;  %3647 = vmatmul.mubr.f32.vlgmr.msra.gmra.mxu0 %v3510_v14  ;;  %3718 = vmatmul.mubr.f32.vlgmr.msra.gmra.mxu1 %v3510_v14  ;;  %v6845_v14 = vld [vmem:[#allocation12_spill] sm:$0xff] }
 0xc86   : > { %3818 = vmatpush1.msra.mxu0 %v5242_v60  ;;  %3889 = vmatpush1.msra.mxu1 %v5252_v62 }
 0xc87   : > { %3819 = vmatprep.subr.mxu0 %v5227_v57  ;;  %3890 = vmatprep.subr.mxu1 %v5237_v59 }
 0xc88   : > { %3820 = vmatpush1.msra.mxu0 %v5222_v56  ;;  %3891 = vmatpush1.msra.mxu1 %v5232_v58 }
 0xc89   : > { %3821 = vmatprep.subr.mxu0 %v5207_v53  ;;  %3892 = vmatprep.subr.mxu1 %v5217_v55 }
 0xc8a   : > { %3822 = vmatpush1.msra.mxu0 %v5202_v52  ;;  %3893 = vmatpush1.msra.mxu1 %v5212_v54 }
 0xc8b   : > { %3823 = vmatprep.subr.mxu0 %v5187_v49  ;;  %3894 = vmatprep.subr.mxu1 %v5197_v51 }
 0xc8c   : > { %3824 = vmatpush1.msra.mxu0 %v5182_v48  ;;  %3895 = vmatpush1.msra.mxu1 %v5192_v50 }
 0xc8d   : > { %3825 = vmatprep.subr.mxu0 %v5167_v45  ;;  %3896 = vmatprep.subr.mxu1 %v5177_v47 }
 0xc8e   : > { %3826 = vmatpush1.msra.mxu0 %v5162_v44  ;;  %3897 = vmatpush1.msra.mxu1 %v5172_v46 }
 0xc8f   : > { %3827 = vmatprep.subr.mxu0 %v5147_v41  ;;  %3898 = vmatprep.subr.mxu1 %v5157_v43 }
 0xc90   : > { %3828 = vmatpush1.msra.mxu0 %v5142_v40  ;;  %3899 = vmatpush1.msra.mxu1 %v5152_v42 }
 0xc91   : > { %3829 = vmatprep.subr.mxu0 %v5127_v37  ;;  %3900 = vmatprep.subr.mxu1 %v5137_v39 }
 0xc92   : > { %3830 = vmatpush1.msra.mxu0 %v5122_v36  ;;  %3901 = vmatpush1.msra.mxu1 %v5132_v38 }
 0xc93   : > { %3831 = vmatprep.subr.mxu0 %v5107_v33  ;;  %3902 = vmatprep.subr.mxu1 %v5117_v35 }
 0xc94   : > { %3832 = vmatpush1.msra.mxu0 %v5102_v32  ;;  %3903 = vmatpush1.msra.mxu1 %v5112_v34 }
 0xc95   : > { %3833 = vmatprep.subr.mxu0 %v5087_v29  ;;  %3904 = vmatprep.subr.mxu1 %v5097_v31 }
 0xc96   : > { %3834 = vmatpush1.msra.mxu0 %v5082_v28  ;;  %3905 = vmatpush1.msra.mxu1 %v5092_v30 }
 0xc97   : > { %3835 = vmatprep.subr.mxu0 %v5067_v25  ;;  %3906 = vmatprep.subr.mxu1 %v5077_v27 }
 0xc98   : > { %3836 = vmatpush1.msra.mxu0 %v5062_v24  ;;  %3907 = vmatpush1.msra.mxu1 %v5072_v26 }
 0xc99   : > { %3837 = vmatprep.subr.mxu0 %v6573_v21  ;;  %3908 = vmatprep.subr.mxu1 %v5057_v23 }
 0xc9a   : > { %3838 = vmatpush1.msra.mxu0 %v5042_v20  ;;  %3909 = vmatpush1.msra.mxu1 %v5052_v22 }
 0xc9b   : > { %3839 = vmatprep.subr.mxu0 %v5027_v17  ;;  %3910 = vmatprep.subr.mxu1 %v5037_v19 }
 0xc9c   : > { %3840 = vmatpush1.msra.mxu0 %v6827_v11  ;;  %3911 = vmatpush1.msra.mxu1 %v6828_v12 }
 0xc9d   : > { %3841 = vmatprep.subr.mxu0 %v6829_v13  ;;  %3912 = vmatprep.subr.mxu1 %v6830_v2 }
 0xc9e   : > { %3842 = vmatpush1.msra.mxu0 %v6831_v61  ;;  %3913 = vmatpush1.msra.mxu1 %v6832_v0 }
 0xc9f   : > { %3843 = vmatprep.subr.mxu0 %v6833_v16  ;;  %3914 = vmatprep.subr.mxu1 %v6834_v1  ;;  %v4475_v16 = vld [vmem:[%s4935_s30 + $0x1b0] sm:$0xff] }
 0xca0   : > { %3844 = vmatpush1.msra.mxu0 %v6835_v3  ;;  %3915 = vmatpush1.msra.mxu1 %v6836_v7  ;;  %v4474_v7 = vld [vmem:[%s4935_s30 + $0x1a8] sm:$0xff] }
 0xca1   : > { %3845 = vmatprep.subr.mxu0 %v6837_v9  ;;  %3916 = vmatprep.subr.mxu1 %v6838_v15  ;;  %v6846_v9 = vld [vmem:[#allocation29_spill] sm:$0xff]  ;;  %v6847_v15 = vld [vmem:[#allocation30_spill] sm:$0xff] }
 0xca2   : > { %3846 = vmatpush1.msra.mxu0 %v6839_v63  ;;  %3917 = vmatpush1.msra.mxu1 %v6840_v5  ;;  %v4473_v63 = vld [vmem:[%s4935_s30 + $0x1a0] sm:$0xff] }
 0xca3   : > { %3847 = vmatprep.subr.mxu0 %v6841_v6  ;;  %3918 = vmatprep.subr.mxu1 %v6842_v4 }
 0xca4   : > { %3848 = vmatpush1.msra.mxu0 %v6843_v8  ;;  %3881 = vmatprep.mubr.f32.mxu0 %v6844_v18 }
 0xca5   : > { %3919 = vmatpush1.msra.mxu1 %v6845_v14  ;;  %3952 = vmatprep.mubr.f32.mxu1 %v6844_v18  ;;  %v4476_v14 = vld [vmem:[%s4935_s30 + $0x1b8] sm:$0xff] }
 0xca6   : > { %4052 = vmatprep.subr.mxu0 %v6846_v9  ;;  %4123 = vmatprep.subr.mxu1 %v6847_v15 }
 0xd45   : > { %v3648_v5 = vpop.f32.mrf.mxu0  ;;  %v3719_v8 = vpop.f32.mrf.mxu1 }
 0xd46   : > { %v3724_v3 = vadd.f32 %v4473_v63, %v3648_v5  ;;  %v3726_v61 = vadd.f32 %v4475_v16, %v3719_v8 }
 0xd47   : > { %v3650_v6 = vpop.f32.mrf.mxu0  ;;  %v3721_v18 = vpop.f32.mrf.mxu1 }
 0xd48   : > { %v3728_v1 = vmul.f32 0.5, %v3724_v3  ;;  %v3725_v4 = vadd.f32 %v4474_v7, %v3650_v6  ;;  %v3727_v2 = vadd.f32 %v4476_v14, %v3721_v18  ;;  %v4483_v18 = vld [vmem:[%s4935_s30 + $0x1e0] sm:$0xff] }
 0xd4a   : > { %4664 = vtanh.f32 %v3728_v1  ;;  %v3732_v0 = vmul.f32 0.5, %v3725_v4  ;;  %v3737_v9 = vmul.f32 0.5, %v3727_v2 }
 0xd4c   : > { %4666 = vtanh.f32 %v3732_v0 }
 0xd4d   : > { %4668 = vtanh.f32 %v3726_v61 }
 0xd4e   : > { %4670 = vtanh.f32 %v3737_v9  ;;  %v4484_v9 = vld [vmem:[%s4935_s30 + $0x1e8] sm:$0xff] }
 0xd57   : > { %v4665_v13 = vpop.eup %4664 }
 0xd58   : > { %v3730_v15 = vmul.f32 0.5, %v4665_v13 }
 0xd59   : > { %v4667_v12 = vpop.eup %4666 }
 0xd5a   : > { %v3731_v11 = vadd.f32 0.5, %v3730_v15  ;;  %v3734_v63 = vmul.f32 0.5, %v4667_v12  ;;  %v4669_v7 = vpop.eup %4668 }
 0xd5b   : > { %v4671_v0 = vpop.eup %4670 }
 0xd5c   : > { %v3735_v3 = vadd.f32 0.5, %v3734_v63  ;;  %v3742_v1 = vmul.f32 %v4669_v7, %v3731_v11  ;;  %v3739_v61 = vmul.f32 0.5, %v4671_v0 }
 0xd5e   : > { %v3741_v5 = vmul.f32 %v3735_v3, %v6299_v10  ;;  %v3740_v16 = vadd.f32 0.5, %v3739_v61  ;;  %v4486_v61 = vld [vmem:[%s4935_s30 + $0x1f8] sm:$0xff] }
 0xd60   : > { %v6374_v6 = vadd.f32 %v3742_v1, %v3741_v5  ;;  %v4485_v5 = vld [vmem:[%s4935_s30 + $0x1f0] sm:$0xff] }
 0xd62   : > { %4672 = vtanh.f32 %v6374_v6 }
 0xd6f   : > { %v4673_v2 = vpop.eup %4672 }
 0xd70   : > { %v3745_v4 = vmul.f32 %v4673_v2, %v3740_v16 }
 0xd72   : > { %4477 = vst [vmem:[%s4937_s3 + $0x68] sm:$0xff] %v3745_v4  ;;  %3882 = vmatmul.mubr.f32.vlgmr.msra.gmra.mxu0 %v3745_v4  ;;  %3953 = vmatmul.mubr.f32.vlgmr.msra.gmra.mxu1 %v3745_v4 }
 0xd73   : > { %4053 = vmatpush1.msra.mxu0 %v5242_v60  ;;  %4124 = vmatpush1.msra.mxu1 %v5252_v62 }
 0xd74   : > { %4054 = vmatprep.subr.mxu0 %v5227_v57  ;;  %4125 = vmatprep.subr.mxu1 %v5237_v59 }
 0xd75   : > { %4055 = vmatpush1.msra.mxu0 %v5222_v56  ;;  %4126 = vmatpush1.msra.mxu1 %v5232_v58 }
 0xd76   : > { %4056 = vmatprep.subr.mxu0 %v5207_v53  ;;  %4127 = vmatprep.subr.mxu1 %v5217_v55 }
 0xd77   : > { %4057 = vmatpush1.msra.mxu0 %v5202_v52  ;;  %4128 = vmatpush1.msra.mxu1 %v5212_v54 }
 0xd78   : > { %4058 = vmatprep.subr.mxu0 %v5187_v49  ;;  %4129 = vmatprep.subr.mxu1 %v5197_v51 }
 0xd79   : > { %4059 = vmatpush1.msra.mxu0 %v5182_v48  ;;  %4130 = vmatpush1.msra.mxu1 %v5192_v50  ;;  %v4481_v48 = vld [vmem:[%s4935_s30 + $0x1d8] sm:$0xff] }
 0xd7a   : > { %4060 = vmatprep.subr.mxu0 %v5167_v45  ;;  %4131 = vmatprep.subr.mxu1 %v5177_v47 }
 0xd7b   : > { %4061 = vmatpush1.msra.mxu0 %v5162_v44  ;;  %4132 = vmatpush1.msra.mxu1 %v5172_v46  ;;  %v4480_v44 = vld [vmem:[%s4935_s30 + $0x1d0] sm:$0xff] }
 0xd7c   : > { %4062 = vmatprep.subr.mxu0 %v5147_v41  ;;  %4133 = vmatprep.subr.mxu1 %v5157_v43 }
 0xd7d   : > { %4063 = vmatpush1.msra.mxu0 %v5142_v40  ;;  %4134 = vmatpush1.msra.mxu1 %v5152_v42 }
 0xd7e   : > { %4064 = vmatprep.subr.mxu0 %v5127_v37  ;;  %4135 = vmatprep.subr.mxu1 %v5137_v39  ;;  %v4478_v37 = vld [vmem:[%s4935_s30 + $0x1c0] sm:$0xff]  ;;  %v4479_v39 = vld [vmem:[%s4935_s30 + $0x1c8] sm:$0xff]  ;;  %s4489_s30 = sshll.u32 (%p4787_p6), %s4726_s11, 3 }
 0xd7f   : > { %4065 = vmatpush1.msra.mxu0 %v5122_v36  ;;  %4136 = vmatpush1.msra.mxu1 %v5132_v38  ;;  %v6866_v36 = vld [vmem:[#allocation12_spill] sm:$0xff]  ;;  %s4231_s27 = scalar_lea.vmem (%p4787_p6), %s6492_s2, %s4489_s30 }
 0xd80   : > { %4066 = vmatprep.subr.mxu0 %v5107_v33  ;;  %4137 = vmatprep.subr.mxu1 %v5117_v35  ;;  %v6863_v33 = vld [vmem:[#allocation13_spill] sm:$0xff]  ;;  %v6865_v35 = vmov 0.0  }
 0xd81   : > { %4067 = vmatpush1.msra.mxu0 %v5102_v32  ;;  %4138 = vmatpush1.msra.mxu1 %v5112_v34  ;;  %v6862_v32 = vld [vmem:[#allocation11_spill] sm:$0xff]  ;;  %v6864_v34 = vld [vmem:[#allocation10_spill] sm:$0xff] }
 0xd82   : > { %4068 = vmatprep.subr.mxu0 %v5087_v29  ;;  %4139 = vmatprep.subr.mxu1 %v5097_v31  ;;  %v6859_v29 = vld [vmem:[#allocation17_spill] sm:$0xff]  ;;  %v6861_v31 = vld [vmem:[#allocation16_spill] sm:$0xff] }
 0xd83   : > { %4069 = vmatpush1.msra.mxu0 %v5082_v28  ;;  %4140 = vmatpush1.msra.mxu1 %v5092_v30  ;;  %v6848_v28 = vld [vmem:[#allocation26_spill] sm:$0xff] }
 0xd84   : > { %4070 = vmatprep.subr.mxu0 %v5067_v25  ;;  %4141 = vmatprep.subr.mxu1 %v5077_v27  ;;  %v6849_v25 = vld [vmem:[#allocation27_spill] sm:$0xff]  ;;  %v6860_v30 = vld [vmem:[#allocation14_spill] sm:$0xff] }
 0xd85   : > { %4071 = vmatpush1.msra.mxu0 %v5062_v24  ;;  %4142 = vmatpush1.msra.mxu1 %v5072_v26  ;;  %v6850_v27 = vld [vmem:[#allocation23_spill] sm:$0xff]  ;;  %v6851_v24 = vld [vmem:[#allocation25_spill] sm:$0xff]  ;;  %v6852_v26 = vld [vmem:[#allocation22_spill] sm:$0xff] }
 0xd86   : > { %4072 = vmatprep.subr.mxu0 %v6573_v21  ;;  %4143 = vmatprep.subr.mxu1 %v5057_v23  ;;  %v6853_v21 = vld [vmem:[#allocation24_spill] sm:$0xff]  ;;  %v6858_v23 = vld [vmem:[#allocation15_spill] sm:$0xff] }
 0xd87   : > { %4073 = vmatpush1.msra.mxu0 %v5042_v20  ;;  %4144 = vmatpush1.msra.mxu1 %v5052_v22  ;;  %v6854_v20 = vld [vmem:[#allocation19_spill] sm:$0xff]  ;;  %v6855_v22 = vld [vmem:[#allocation21_spill] sm:$0xff] }
 0xd88   : > { %4074 = vmatprep.subr.mxu0 %v5027_v17  ;;  %4145 = vmatprep.subr.mxu1 %v5037_v19  ;;  %v6856_v17 = vld [vmem:[#allocation18_spill] sm:$0xff]  ;;  %v6857_v19 = vld [vmem:[#allocation20_spill] sm:$0xff] }
 0xd89   : > { %4075 = vmatpush1.msra.mxu0 %v6848_v28  ;;  %4146 = vmatpush1.msra.mxu1 %v6849_v25 }
 0xd8a   : > { %4076 = vmatprep.subr.mxu0 %v6850_v27  ;;  %4147 = vmatprep.subr.mxu1 %v6851_v24 }
 0xd8b   : > { %4077 = vmatpush1.msra.mxu0 %v6852_v26  ;;  %4148 = vmatpush1.msra.mxu1 %v6853_v21 }
 0xd8c   : > { %4078 = vmatprep.subr.mxu0 %v6854_v20  ;;  %4149 = vmatprep.subr.mxu1 %v6855_v22 }
 0xd8d   : > { %4079 = vmatpush1.msra.mxu0 %v6856_v17  ;;  %4150 = vmatpush1.msra.mxu1 %v6857_v19 }
 0xd8e   : > { %4080 = vmatprep.subr.mxu0 %v6858_v23  ;;  %4151 = vmatprep.subr.mxu1 %v6859_v29 }
 0xd8f   : > { %4081 = vmatpush1.msra.mxu0 %v6860_v30  ;;  %4152 = vmatpush1.msra.mxu1 %v6861_v31 }
 0xd90   : > { %4082 = vmatprep.subr.mxu0 %v6862_v32  ;;  %4153 = vmatprep.subr.mxu1 %v6863_v33  ;;  %v4290_v33 = vld [vmem:[%s4937_s3] sm:$0xff] (%p4787_p6) }
 0xd91   : > { %4083 = vmatpush1.msra.mxu0 %v6864_v34  ;;  %4116 = vmatprep.mubr.f32.mxu0 %v6865_v35  ;;  %v4292_v34 = vld [vmem:[%s4937_s3 + $0x8] sm:$0xff] (%p4787_p6)  ;;  %4291 = vst [vmem:[%s4231_s27] sm:$0xff] (%p4787_p6), %v4290_v33 }
 0xd92   : > { %4154 = vmatpush1.msra.mxu1 %v6866_v36  ;;  %4187 = vmatprep.mubr.f32.mxu1 %v6865_v35  ;;  %v4294_v35 = vld [vmem:[%s4937_s3 + $0x10] sm:$0xff] (%p4787_p6)  ;;  %v4296_v36 = vld [vmem:[%s4937_s3 + $0x18] sm:$0xff] (%p4787_p6)  ;;  %4293 = vst [vmem:[%s4231_s27 + $0x10] sm:$0xff] (%p4787_p6), %v4292_v34 }
 0xd93   : > { %4295 = vst [vmem:[%s4231_s27 + $0x20] sm:$0xff] (%p4787_p6), %v4294_v35  ;;  %4297 = vst [vmem:[%s4231_s27 + $0x30] sm:$0xff] (%p4787_p6), %v4296_v36 }
 0xe32   : > { %v3883_v38 = vpop.f32.mrf.mxu0  ;;  %v3954_v45 = vpop.f32.mrf.mxu1 }
 0xe33   : > { %v3959_v40 = vadd.f32 %v4478_v37, %v3883_v38  ;;  %v3961_v47 = vadd.f32 %v4480_v44, %v3954_v45  ;;  %v4298_v37 = vld [vmem:[%s4937_s3 + $0x20] sm:$0xff] (%p4787_p6)  ;;  %v4300_v38 = vld [vmem:[%s4937_s3 + $0x28] sm:$0xff] (%p4787_p6)  ;;  %v4312_v44 = vld [vmem:[%s4937_s3 + $0x58] sm:$0xff] (%p4787_p6) }
 0xe34   : > { %v3885_v41 = vpop.f32.mrf.mxu0  ;;  %v3956_v49 = vpop.f32.mrf.mxu1  ;;  %4299 = vst [vmem:[%s4231_s27 + $0x40] sm:$0xff] (%p4787_p6), %v4298_v37  ;;  %4301 = vst [vmem:[%s4231_s27 + $0x50] sm:$0xff] (%p4787_p6), %v4300_v38  ;;  %v4314_v45 = vld [vmem:[%s4937_s3 + $0x60] sm:$0xff] (%p4787_p6) }
 0xe35   : > { %v3963_v42 = vmul.f32 0.5, %v3959_v40  ;;  %v3960_v43 = vadd.f32 %v4479_v39, %v3885_v41  ;;  %v3962_v50 = vadd.f32 %v4481_v48, %v3956_v49  ;;  %v4302_v39 = vld [vmem:[%s4937_s3 + $0x30] sm:$0xff] (%p4787_p6)  ;;  %v4304_v40 = vld [vmem:[%s4937_s3 + $0x38] sm:$0xff] (%p4787_p6)  ;;  %v4306_v41 = vld [vmem:[%s4937_s3 + $0x40] sm:$0xff] (%p4787_p6)  ;;  %4313 = vst [vmem:[%s4231_s27 + $0xb0] sm:$0xff] (%p4787_p6), %v4312_v44 }
 0xe36   : > { %4303 = vst [vmem:[%s4231_s27 + $0x60] sm:$0xff] (%p4787_p6), %v4302_v39  ;;  %4305 = vst [vmem:[%s4231_s27 + $0x70] sm:$0xff] (%p4787_p6), %v4304_v40 }
 0xe37   : > { %4674 = vtanh.f32 %v3963_v42  ;;  %v3967_v46 = vmul.f32 0.5, %v3960_v43  ;;  %v3972_v51 = vmul.f32 0.5, %v3962_v50  ;;  %4307 = vst [vmem:[%s4231_s27 + $0x80] sm:$0xff] (%p4787_p6), %v4306_v41  ;;  %v4308_v42 = vld [vmem:[%s4937_s3 + $0x48] sm:$0xff] (%p4787_p6)  ;;  %v4310_v43 = vld [vmem:[%s4937_s3 + $0x50] sm:$0xff] (%p4787_p6)  ;;  %4315 = vst [vmem:[%s4231_s27 + $0xc0] sm:$0xff] (%p4787_p6), %v4314_v45 }
 0xe38   : > { %4309 = vst [vmem:[%s4231_s27 + $0x90] sm:$0xff] (%p4787_p6), %v4308_v42  ;;  %4311 = vst [vmem:[%s4231_s27 + $0xa0] sm:$0xff] (%p4787_p6), %v4310_v43 }
 0xe39   : > { %4676 = vtanh.f32 %v3967_v46  ;;  %v4316_v46 = vld [vmem:[%s4937_s3 + $0x68] sm:$0xff] (%p4787_p6) }
 0xe3a   : > { %4678 = vtanh.f32 %v3961_v47  ;;  %4317 = vst [vmem:[%s4231_s27 + $0xd0] sm:$0xff] (%p4787_p6), %v4316_v46 }
 0xe3b   : > { %4680 = vtanh.f32 %v3972_v51 }
 0xe44   : > { %v4675_v52 = vpop.eup %4674 }
 0xe45   : > { %v3965_v53 = vmul.f32 0.5, %v4675_v52 }
 0xe46   : > { %v4677_v54 = vpop.eup %4676 }
 0xe47   : > { %v3966_v55 = vadd.f32 0.5, %v3965_v53  ;;  %v3969_v56 = vmul.f32 0.5, %v4677_v54  ;;  %v4679_v58 = vpop.eup %4678 }
 0xe48   : > { %v4681_v10 = vpop.eup %4680 }
 0xe49   : > { %v3970_v57 = vadd.f32 0.5, %v3969_v56  ;;  %v3977_v60 = vmul.f32 %v4679_v58, %v3966_v55  ;;  %v3974_v11 = vmul.f32 0.5, %v4681_v10 }
 0xe4b   : > { %v3976_v59 = vmul.f32 %v3970_v57, %v6374_v6  ;;  %v3975_v12 = vadd.f32 0.5, %v3974_v11 }
 0xe4d   : > { %v3978_v62 = vadd.f32 %v3977_v60, %v3976_v59 }
 0xe4f   : > { %4682 = vtanh.f32 %v3978_v62 }
 0xe5c   : > { %v4683_v13 = vpop.eup %4682 }
 0xe5d   : > { %v3980_v8 = vmul.f32 %v4683_v13, %v3975_v12 }
 0xe5f   : > { %4482 = vst [vmem:[%s4937_s3 + $0x70] sm:$0xff] %v3980_v8  ;;  %4117 = vmatmul.mubr.f32.vlgmr.msra.gmra.mxu0 %v3980_v8  ;;  %4188 = vmatmul.mubr.f32.vlgmr.msra.gmra.mxu1 %v3980_v8 }
 0xe66   : > { %v4318_v47 = vld [vmem:[%s4937_s3 + $0x70] sm:$0xff] (%p4787_p6) }
 0xe67   : > { %4319 = vst [vmem:[%s4231_s27 + $0xe0] sm:$0xff] (%p4787_p6), %v4318_v47 }
 0xf1f   : > { %v4118_v14 = vpop.f32.mrf.mxu0  ;;  %v4189_v1 = vpop.f32.mrf.mxu1 }
 0xf20   : > { %v4194_v15 = vadd.f32 %v4483_v18, %v4118_v14  ;;  %v4196_v0 = vadd.f32 %v4485_v5, %v4189_v1 }
 0xf21   : > { %v4120_v63 = vpop.f32.mrf.mxu0  ;;  %v4191_v16 = vpop.f32.mrf.mxu1 }
 0xf22   : > { %v4198_v3 = vmul.f32 0.5, %v4194_v15  ;;  %v4195_v7 = vadd.f32 %v4484_v9, %v4120_v63  ;;  %v4197_v2 = vadd.f32 %v4486_v61, %v4191_v16 }
 0xf24   : > { %4684 = vtanh.f32 %v4198_v3  ;;  %v4202_v6 = vmul.f32 0.5, %v4195_v7  ;;  %v4207_v4 = vmul.f32 0.5, %v4197_v2 }
 0xf26   : > { %4686 = vtanh.f32 %v4202_v6 }
 0xf27   : > { %4688 = vtanh.f32 %v4196_v0 }
 0xf28   : > { %4690 = vtanh.f32 %v4207_v4 }
 0xf31   : > { %v4685_v28 = vpop.eup %4684 }
 0xf32   : > { %v4200_v25 = vmul.f32 0.5, %v4685_v28 }
 0xf33   : > { %v4687_v27 = vpop.eup %4686 }
 0xf34   : > { %v4201_v24 = vadd.f32 0.5, %v4200_v25  ;;  %v4204_v26 = vmul.f32 0.5, %v4687_v27  ;;  %v4689_v20 = vpop.eup %4688 }
 0xf35   : > { %v4691_v23 = vpop.eup %4690 }
 0xf36   : > { %v4205_v21 = vadd.f32 0.5, %v4204_v26  ;;  %v4212_v17 = vmul.f32 %v4689_v20, %v4201_v24  ;;  %v4209_v29 = vmul.f32 0.5, %v4691_v23 }
 0xf38   : > { %v4211_v22 = vmul.f32 %v4205_v21, %v3978_v62  ;;  %v4210_v30 = vadd.f32 0.5, %v4209_v29 }
 0xf3a   : > { %v4213_v19 = vadd.f32 %v4212_v17, %v4211_v22 }
 0xf3c   : > { %4692 = vtanh.f32 %v4213_v19 }
 0xf48   : > { %4226 = sbr.rel (!%p4787_p6) target bundleno = 3925 (0xf55), region = 90 }
 0xf49   : > { %v4693_v31 = vpop.eup %4692 }
 0xf4a   : > { %v4215_v32 = vmul.f32 %v4693_v31, %v4210_v30 }
 0xf4c   : > { %4487 = vst [vmem:[%s4937_s3 + $0x78] sm:$0xff] %v4215_v32 }
 0xf53   : > { %v4320_v48 = vld [vmem:[%s4937_s3 + $0x78] sm:$0xff] }
 0xf54   : > { %4321 = vst [vmem:[%s4231_s27 + $0xf0] sm:$0xff] %v4320_v48 }
 0xf55 PF: > { %s12_s13 = sadd.s32 1, %s4734_s13   ;;  %s6867_s9 = smov %s4722_s10 }
 0xf56   : > { %p9_p11 = scmp.ge.s32.totalorder %s12_s13, 4   ;;  %s6868_s10 = smov %s4792_s19 }
 0xf57   : > { %s6869_s11 = smov %s4730_s12  ;;  %s6870_s12 = smov %s6872_s14 }
 0xf58   :  { %11 = sbr.rel (!%p9_p11) target bundleno = 3 (0x3), region = 197 }

</bundles_post_ra>
